<compile_context>
chip_gen: v7x
topology: tpu7x:2x2x1
jax: 0.10.0
libtpu: 0.0.40
codegen_flags: <defaults>
</compile_context>

<pallas_src>
import functools
import math

import numpy as np
import jax
import jax.numpy as jnp
from jax import lax
from jax.experimental import pallas as pl
from jax.experimental.pallas import tpu as pltpu

BN_EPS = 1e-5
LN_EPS = 1e-5

_TBLOCK_KEYS = ("ln1_g", "ln1_b", "wq", "wk", "wv", "bq", "bk", "bv",
                "wo", "bo", "wg", "bg", "ln2_g", "ln2_b", "w1", "b1",
                "w2", "b2")


# ----------------------------- in-kernel math ------------------------------ #
def _erf(x):
    # Abramowitz & Stegun 7.1.26 (|err| < 1.5e-7); uses only exp -> Mosaic-safe.
    a1, a2, a3, a4, a5 = (0.254829592, -0.284496736, 1.421413741,
                          -1.453152027, 1.061405429)
    ax = jnp.abs(x)
    t = 1.0 / (1.0 + 0.3275911 * ax)
    poly = ((((a5 * t + a4) * t + a3) * t + a2) * t + a1) * t
    y = 1.0 - poly * jnp.exp(-ax * ax)
    return jnp.where(x >= 0, y, -y)


def _gelu(x):
    # PyTorch nn.GELU() default (exact, erf-based), f32.
    return 0.5 * x * (1.0 + _erf(x * 0.7071067811865476))


def _layernorm(x, g, b):
    # Two-pass variance (exact feature dim, no lane padding).
    m = jnp.mean(x, axis=-1, keepdims=True)
    c = x - m
    var = jnp.mean(c * c, axis=-1, keepdims=True)
    return c * lax.rsqrt(var + LN_EPS) * g + b


# ------------------------------ fused kernel ------------------------------- #
def _fused_kernel(*args, num_heads, num_enc, num_dec):
    o_ref = args[-2]
    attn_buf = args[-1]                       # VMEM (L_enc, d) f32 scratch
    it = iter(args[:-2])
    x_ref = next(it)

    x = x_ref[0].astype(jnp.float32)          # (L0, Cin) channels-last

    # -------- encoder: HybridConvBlock x num_enc (stride-2 conv, folded BN,
    # GELU, mixed 0.7/0.3 with 1x1 stride-2 residual conv) --------
    for _ in range(num_enc):
        A_ref = next(it)       # (K, Lout, Lin) bf16 0/1 tap selectors
        Ares_ref = next(it)    # (Lout, Lin)    bf16 residual selector
        W_ref = next(it)       # (K, Cin, Cout) bf16 folded conv taps
        bm_ref = next(it)      # (1, Cout)      f32 folded bias
        Wr_ref = next(it)      # (Cin, Cout)    bf16 residual 1x1 weight
        br_ref = next(it)      # (1, Cout)      f32 residual bias

        K = A_ref.shape[0]
        Lout = A_ref.shape[1]
        cout = W_ref.shape[2]
        xb = x.astype(jnp.bfloat16)           # cast once per stage
        acc = jnp.zeros((Lout, cout), jnp.float32)
        for k in range(K):                    # static, small (K taps)
            sel = jnp.dot(A_ref[k], xb,       # exact 0/1 row selection
                          preferred_element_type=jnp.float32
                          ).astype(jnp.bfloat16)
            acc = acc + jnp.dot(sel, W_ref[k],
                                preferred_element_type=jnp.float32)
        main = _gelu(acc + bm_ref[...])
        selr = jnp.dot(Ares_ref[...], xb,
                       preferred_element_type=jnp.float32).astype(jnp.bfloat16)
        res = jnp.dot(selr, Wr_ref[...],
                      preferred_element_type=jnp.float32) + br_ref[...]
        x = 0.7 * main + 0.3 * res            # (Lout, Cout) f32

    # -------- channel-aware pos-encoding + gated transformer blocks --------
    pe_ref = next(it)                         # (L_enc, d) f32, precomputed
    tb = {name: next(it) for name in _TBLOCK_KEYS}

    x = x + pe_ref[...]
    enc = x                                   # enc_out residual
    num_blocks = tb["wq"].shape[0]
    d = tb["wq"].shape[1]
    hd = d // num_heads
    scale = 1.0 / math.sqrt(hd)

    for blk in range(num_blocks):             # static unroll (tiny model)
        xn = _layernorm(x, tb["ln1_g"][blk], tb["ln1_b"][blk])
        xnb = xn.astype(jnp.bfloat16)
        q = jnp.dot(xnb, tb["wq"][blk],
                    preferred_element_type=jnp.float32) + tb["bq"][blk]
        kk = jnp.dot(xnb, tb["wk"][blk],
                     preferred_element_type=jnp.float32) + tb["bk"][blk]
        v = jnp.dot(xnb, tb["wv"][blk],
                    preferred_element_type=jnp.float32) + tb["bv"][blk]
        # Cast q/k/v to bf16 ONCE; heads are lane slices of the bf16 arrays.
        qb = q.astype(jnp.bfloat16)
        kb = kk.astype(jnp.bfloat16)
        vb = v.astype(jnp.bfloat16)

        for h in range(num_heads):            # static unroll
            sl = slice(h * hd, (h + 1) * hd)
            s = lax.dot_general(qb[:, sl], kb[:, sl],
                                (((1,), (1,)), ((), ())),
                                preferred_element_type=jnp.float32) * scale
            s = s - jnp.max(s, axis=-1, keepdims=True)
            p = jnp.exp(s)
            p = p / jnp.sum(p, axis=-1, keepdims=True)
            # Head output goes into its lane slot of the scratch buffer.
            attn_buf[:, sl] = jnp.dot(p.astype(jnp.bfloat16), vb[:, sl],
                                      preferred_element_type=jnp.float32)
        # Single full-K output projection.
        attn = jnp.dot(attn_buf[...].astype(jnp.bfloat16), tb["wo"][blk],
                       preferred_element_type=jnp.float32) + tb["bo"][blk]

        gate = jax.nn.sigmoid(
            jnp.dot(x.astype(jnp.bfloat16), tb["wg"][blk],
                    preferred_element_type=jnp.float32) + tb["bg"][blk])
        # TODO(synk): reference applies F.dropout(p=0.1, training=True) here
        # even in eval; omitted for deterministic inference.
        x = x + attn * gate

        yn = _layernorm(x, tb["ln2_g"][blk], tb["ln2_b"][blk])
        h1 = _gelu(jnp.dot(yn.astype(jnp.bfloat16), tb["w1"][blk],
                           preferred_element_type=jnp.float32) + tb["b1"][blk])
        x = x + jnp.dot(h1.astype(jnp.bfloat16), tb["w2"][blk],
                        preferred_element_type=jnp.float32) + tb["b2"][blk]

    x = x + enc                               # trans_out + enc_out

    # -------- decoder: ConvTranspose1d x num_dec (folded BN, GELU/Tanh) ----
    for si in range(num_dec):
        T_ref = next(it)       # (K, Lout, Lin) bf16 0/1 transpose-selectors
        W_ref = next(it)       # (K, Cin, Cout) bf16 folded taps
        b_ref = next(it)       # (1, Cout)      f32 folded bias

        K = T_ref.shape[0]
        Lout = T_ref.shape[1]
        cout = W_ref.shape[2]
        xb = x.astype(jnp.bfloat16)
        acc = jnp.zeros((Lout, cout), jnp.float32)
        for k in range(K):                    # static, small
            sel = jnp.dot(T_ref[k], xb,
                          preferred_element_type=jnp.float32
                          ).astype(jnp.bfloat16)
            acc = acc + jnp.dot(sel, W_ref[k],
                                preferred_element_type=jnp.float32)
        y = acc + b_ref[...]
        x = _gelu(y) if si < num_dec - 1 else jnp.tanh(y)

    o_ref[0] = x.astype(o_ref.dtype)          # (L0, Cin)


# ------------------------------ forward wrapper ----------------------------- #
def _flatten_prep(prep):
    flat = []
    for st in prep["encoder"]:
        flat += [st["A"], st["Ares"], st["W"], st["bm"], st["Wr"], st["br"]]
    flat.append(prep["pe_bias"])
    flat += [prep["tblocks"][k] for k in _TBLOCK_KEYS]
    for st in prep["decoder"]:
        flat += [st["T"], st["W"], st["b"]]
    return flat


def enhanced_dae_forward(x_ncl, prep, *, num_heads):
    B, C, L0 = x_ncl.shape
    x = jnp.transpose(x_ncl, (0, 2, 1)).astype(jnp.float32)    # (B, L0, C)
    flat = _flatten_prep(prep)
    L_enc, d = prep["pe_bias"].shape

    in_specs = [pl.BlockSpec((1, L0, C), lambda b: (b, 0, 0))]
    in_specs += [pl.BlockSpec(a.shape, lambda b, _n=a.ndim: (0,) * _n)
                 for a in flat]

    kern = functools.partial(_fused_kernel, num_heads=num_heads,
                             num_enc=len(prep["encoder"]),
                             num_dec=len(prep["decoder"]))
    y = pl.pallas_call(
        kern,
        grid=(B,),
        in_specs=in_specs,
        out_specs=pl.BlockSpec((1, L0, C), lambda b: (b, 0, 0)),
        out_shape=jax.ShapeDtypeStruct((B, L0, C), jnp.float32),
        scratch_shapes=[pltpu.VMEM((L_enc, d), jnp.float32)],
        compiler_params=pltpu.CompilerParams(
            dimension_semantics=("parallel",),
            vmem_limit_bytes=32 * 1024 * 1024),
    )(x, *flat)
    return jnp.transpose(y, (0, 2, 1))                          # (B, C, L0)


# --------------------------- parameter preparation -------------------------- #
def _prep_encoder_stage(p, K, Lin):
    """Fold BN, build per-tap selection matrices (stride 2, pad K//2)."""
    pad = K // 2
    Lout = (Lin + 2 * pad - K) // 2 + 1
    cout, cin, _ = p["w"].shape
    s = p["bn_g"] / jnp.sqrt(p["bn_var"] + BN_EPS)
    w_f = p["w"] * s[:, None, None]                  # (cout, cin, K)
    b_f = (p["b"] - p["bn_mean"]) * s + p["bn_b"]

    A = np.zeros((K, Lout, Lin), np.float32)
    for k in range(K):
        for i in range(Lout):
            l = 2 * i + k - pad
            if 0 <= l < Lin:
                A[k, i, l] = 1.0
    Ares = np.zeros((Lout, Lin), np.float32)
    for i in range(Lout):
        Ares[i, 2 * i] = 1.0

    W = jnp.transpose(w_f, (2, 1, 0))                # (K, cin, cout)
    Wr = p["res_w"][:, :, 0].T                       # (cin, cout)
    st = dict(A=jnp.asarray(A, jnp.bfloat16),
              Ares=jnp.asarray(Ares, jnp.bfloat16),
              W=W.astype(jnp.bfloat16),
              bm=b_f.reshape(1, -1).astype(jnp.float32),
              Wr=Wr.astype(jnp.bfloat16),
              br=p["res_b"].reshape(1, -1).astype(jnp.float32))
    return st, Lout


def _prep_decoder_stage(dp, K, Lin):
    """Fold BN, build ConvTranspose1d tap selectors (stride 2, pad K//2,
    output_padding 1 -> Lout = 2*Lin)."""
    pad = K // 2
    Lout = 2 * Lin
    w = dp["w"]                                      # (cin, cout, K)
    b = dp["b"]
    if dp["bn"] is not None:
        s = dp["bn"]["g"] / jnp.sqrt(dp["bn"]["var"] + BN_EPS)
        w_f = w * s[None, :, None]
        b_f = (b - dp["bn"]["mean"]) * s + dp["bn"]["b"]
    else:
        w_f, b_f = w, b

    T = np.zeros((K, Lout, Lin), np.float32)
    for k in range(K):
        for o in range(Lout):
            num = o + pad - k
            if num % 2 == 0:
                t = num // 2
                if 0 <= t < Lin:
                    T[k, o, t] = 1.0

    W = jnp.transpose(w_f, (2, 0, 1))                # (K, cin, cout)
    st = dict(T=jnp.asarray(T, jnp.bfloat16),
              W=W.astype(jnp.bfloat16),
              b=b_f.reshape(1, -1).astype(jnp.float32))
    return st, Lout


def _prep_transformer(blocks):
    def stackw(name):
        return jnp.stack([bp[name] for bp in blocks]).astype(jnp.bfloat16)

    def stackb(name):
        return jnp.stack([bp[name] for bp in blocks]).astype(jnp.float32)

    weights = {"wq", "wk", "wv", "wo", "wg", "w1", "w2"}
    return {name: (stackw(name) if name in weights else stackb(name))
            for name in _TBLOCK_KEYS}


def prepare_params(raw, *, kernel_size, input_len):
    K = kernel_size
    enc, L = [], input_len
    for p in raw["encoder"]:
        st, L = _prep_encoder_stage(p, K, L)
        enc.append(st)
    # Precompute pos-encoding bias for the encoded length (no per-call pads).
    pe_bias = (raw["pe"][:L, :] + raw["channel_embed"]).astype(jnp.float32)
    tb = _prep_transformer(raw["blocks"])
    dec = []
    for dp in raw["decoder"]:
        st, L = _prep_decoder_stage(dp, K, L)
        dec.append(st)
    return dict(encoder=enc, pe_bias=pe_bias, tblocks=tb, decoder=dec)


# ------------------------------ parameter init ------------------------------ #
def init_params(key, in_channels, base_dim, num_heads, num_blocks, kernel_size,
                max_len=256):
    d = base_dim * 4
    keys = iter(jax.random.split(key, 512))

    def nrm(shape, scale=0.05):
        return (jax.random.normal(next(keys), shape) * scale).astype(jnp.float32)

    def conv_block(cin, cout):
        return dict(
            w=nrm((cout, cin, kernel_size)), b=nrm((cout,)),
            bn_g=1.0 + nrm((cout,)), bn_b=nrm((cout,)),
            bn_mean=jnp.zeros((cout,), jnp.float32),
            bn_var=jnp.ones((cout,), jnp.float32),
            res_w=nrm((cout, cin, 1)), res_b=nrm((cout,)),
        )

    def tblock():
        hidden = 4 * d
        return dict(
            ln1_g=1.0 + nrm((1, d)), ln1_b=nrm((1, d)),
            wq=nrm((d, d)), wk=nrm((d, d)), wv=nrm((d, d)),
            bq=nrm((1, d)), bk=nrm((1, d)), bv=nrm((1, d)),
            wo=nrm((d, d)), bo=nrm((1, d)),
            wg=nrm((d, d)), bg=nrm((1, d)),
            ln2_g=1.0 + nrm((1, d)), ln2_b=nrm((1, d)),
            w1=nrm((d, hidden)), b1=nrm((1, hidden)),
            w2=nrm((hidden, d)), b2=nrm((1, d)),
        )

    position = jnp.arange(max_len, dtype=jnp.float32)[:, None]
    div_term = jnp.exp(jnp.arange(0, d, 2, dtype=jnp.float32)
                       * (-math.log(10000.0) / d))
    pe = jnp.zeros((max_len, d), jnp.float32)
    pe = pe.at[:, 0::2].set(jnp.sin(position * div_term))
    pe = pe.at[:, 1::2].set(jnp.cos(position * div_term))

    def bn(c):
        return dict(g=1.0 + nrm((c,)), b=nrm((c,)),
                    mean=jnp.zeros((c,), jnp.float32),
                    var=jnp.ones((c,), jnp.float32))

    return dict(
        encoder=[conv_block(in_channels, base_dim),
                 conv_block(base_dim, base_dim * 2),
                 conv_block(base_dim * 2, base_dim * 4)],
        pe=pe,
        channel_embed=nrm((1, d), scale=1.0),     # torch.randn(1, d, 1) -> (1, d)
        blocks=[tblock() for _ in range(num_blocks)],
        decoder=[
            dict(w=nrm((d, base_dim * 2, kernel_size)), b=nrm((base_dim * 2,)),
                 bn=bn(base_dim * 2)),
            dict(w=nrm((base_dim * 2, base_dim, kernel_size)),
                 b=nrm((base_dim,)), bn=bn(base_dim)),
            dict(w=nrm((base_dim, in_channels, kernel_size)),
                 b=nrm((in_channels,)), bn=None),
        ],
    )


# --------------------------------- main ------------------------------------ #
if __name__ == "__main__":
    B, C, L = 2, 4, 32                     # (batch, channels, length)
    base_dim, num_heads, num_blocks, kernel_size = 16, 4, 2, 5

    key = jax.random.PRNGKey(0)
    pkey, xkey = jax.random.split(key)
    raw = init_params(pkey, C, base_dim, num_heads, num_blocks, kernel_size)
    prep = prepare_params(raw, kernel_size=kernel_size, input_len=L)
    x = jax.random.normal(xkey, (B, C, L), dtype=jnp.float32)

    fwd = jax.jit(functools.partial(enhanced_dae_forward, num_heads=num_heads))
    y = jax.block_until_ready(fwd(x, prep))
    assert y.shape == (B, C, L), y.shape
    assert bool(jnp.all(jnp.isfinite(y)))
    print("KERNEL_OK")
</pallas_src>

<mosaic_0001>
module attributes {stable_mosaic.version = 11 : i64} {
  func.func @_fused_kernel(%arg0: i32, %arg1: memref<1x32x4xf32, #tpu.memory_space<vmem>>, %arg2: memref<5x16x32xbf16, #tpu.memory_space<vmem>>, %arg3: memref<16x32xbf16, #tpu.memory_space<vmem>>, %arg4: memref<5x4x16xbf16, #tpu.memory_space<vmem>>, %arg5: memref<1x16xf32, #tpu.memory_space<vmem>>, %arg6: memref<4x16xbf16, #tpu.memory_space<vmem>>, %arg7: memref<1x16xf32, #tpu.memory_space<vmem>>, %arg8: memref<5x8x16xbf16, #tpu.memory_space<vmem>>, %arg9: memref<8x16xbf16, #tpu.memory_space<vmem>>, %arg10: memref<5x16x32xbf16, #tpu.memory_space<vmem>>, %arg11: memref<1x32xf32, #tpu.memory_space<vmem>>, %arg12: memref<16x32xbf16, #tpu.memory_space<vmem>>, %arg13: memref<1x32xf32, #tpu.memory_space<vmem>>, %arg14: memref<5x4x8xbf16, #tpu.memory_space<vmem>>, %arg15: memref<4x8xbf16, #tpu.memory_space<vmem>>, %arg16: memref<5x32x64xbf16, #tpu.memory_space<vmem>>, %arg17: memref<1x64xf32, #tpu.memory_space<vmem>>, %arg18: memref<32x64xbf16, #tpu.memory_space<vmem>>, %arg19: memref<1x64xf32, #tpu.memory_space<vmem>>, %arg20: memref<4x64xf32, #tpu.memory_space<vmem>>, %arg21: memref<2x1x64xf32, #tpu.memory_space<vmem>>, %arg22: memref<2x1x64xf32, #tpu.memory_space<vmem>>, %arg23: memref<2x64x64xbf16, #tpu.memory_space<vmem>>, %arg24: memref<2x64x64xbf16, #tpu.memory_space<vmem>>, %arg25: memref<2x64x64xbf16, #tpu.memory_space<vmem>>, %arg26: memref<2x1x64xf32, #tpu.memory_space<vmem>>, %arg27: memref<2x1x64xf32, #tpu.memory_space<vmem>>, %arg28: memref<2x1x64xf32, #tpu.memory_space<vmem>>, %arg29: memref<2x64x64xbf16, #tpu.memory_space<vmem>>, %arg30: memref<2x1x64xf32, #tpu.memory_space<vmem>>, %arg31: memref<2x64x64xbf16, #tpu.memory_space<vmem>>, %arg32: memref<2x1x64xf32, #tpu.memory_space<vmem>>, %arg33: memref<2x1x64xf32, #tpu.memory_space<vmem>>, %arg34: memref<2x1x64xf32, #tpu.memory_space<vmem>>, %arg35: memref<2x64x256xbf16, #tpu.memory_space<vmem>>, %arg36: memref<2x1x256xf32, #tpu.memory_space<vmem>>, %arg37: memref<2x256x64xbf16, #tpu.memory_space<vmem>>, %arg38: memref<2x1x64xf32, #tpu.memory_space<vmem>>, %arg39: memref<5x8x4xbf16, #tpu.memory_space<vmem>>, %arg40: memref<5x64x32xbf16, #tpu.memory_space<vmem>>, %arg41: memref<1x32xf32, #tpu.memory_space<vmem>>, %arg42: memref<5x16x8xbf16, #tpu.memory_space<vmem>>, %arg43: memref<5x32x16xbf16, #tpu.memory_space<vmem>>, %arg44: memref<1x16xf32, #tpu.memory_space<vmem>>, %arg45: memref<5x32x16xbf16, #tpu.memory_space<vmem>>, %arg46: memref<5x16x4xbf16, #tpu.memory_space<vmem>>, %arg47: memref<1x4xf32, #tpu.memory_space<vmem>>, %arg48: memref<1x32x4xf32, #tpu.memory_space<vmem>>, %arg49: memref<4x64xf32, #tpu.memory_space<vmem>>) attributes {dimension_semantics = [#tpu.dimension_semantics<parallel>], iteration_bounds = array<i64: 2>, scalar_prefetch = 0 : i64, scratch_operands = 1 : i64, tpu.core_type = #tpu.core_type<tc>, window_params = [{transform_indices = @transform_0, window_bounds = array<i64: 1, 32, 4>}, {pipeline_mode = #tpu.pipeline_mode<synchronous>, transform_indices = @transform_1, window_bounds = array<i64: 5, 16, 32>}, {pipeline_mode = #tpu.pipeline_mode<synchronous>, transform_indices = @transform_2, window_bounds = array<i64: 16, 32>}, {pipeline_mode = #tpu.pipeline_mode<synchronous>, transform_indices = @transform_3, window_bounds = array<i64: 5, 4, 16>}, {pipeline_mode = #tpu.pipeline_mode<synchronous>, transform_indices = @transform_4, window_bounds = array<i64: 1, 16>}, {pipeline_mode = #tpu.pipeline_mode<synchronous>, transform_indices = @transform_5, window_bounds = array<i64: 4, 16>}, {pipeline_mode = #tpu.pipeline_mode<synchronous>, transform_indices = @transform_6, window_bounds = array<i64: 1, 16>}, {pipeline_mode = #tpu.pipeline_mode<synchronous>, transform_indices = @transform_7, window_bounds = array<i64: 5, 8, 16>}, {pipeline_mode = #tpu.pipeline_mode<synchronous>, transform_indices = @transform_8, window_bounds = array<i64: 8, 16>}, {pipeline_mode = #tpu.pipeline_mode<synchronous>, transform_indices = @transform_9, window_bounds = array<i64: 5, 16, 32>}, {pipeline_mode = #tpu.pipeline_mode<synchronous>, transform_indices = @transform_10, window_bounds = array<i64: 1, 32>}, {pipeline_mode = #tpu.pipeline_mode<synchronous>, transform_indices = @transform_11, window_bounds = array<i64: 16, 32>}, {pipeline_mode = #tpu.pipeline_mode<synchronous>, transform_indices = @transform_12, window_bounds = array<i64: 1, 32>}, {pipeline_mode = #tpu.pipeline_mode<synchronous>, transform_indices = @transform_13, window_bounds = array<i64: 5, 4, 8>}, {pipeline_mode = #tpu.pipeline_mode<synchronous>, transform_indices = @transform_14, window_bounds = array<i64: 4, 8>}, {pipeline_mode = #tpu.pipeline_mode<synchronous>, transform_indices = @transform_15, window_bounds = array<i64: 5, 32, 64>}, {pipeline_mode = #tpu.pipeline_mode<synchronous>, transform_indices = @transform_16, window_bounds = array<i64: 1, 64>}, {pipeline_mode = #tpu.pipeline_mode<synchronous>, transform_indices = @transform_17, window_bounds = array<i64: 32, 64>}, {pipeline_mode = #tpu.pipeline_mode<synchronous>, transform_indices = @transform_18, window_bounds = array<i64: 1, 64>}, {pipeline_mode = #tpu.pipeline_mode<synchronous>, transform_indices = @transform_19, window_bounds = array<i64: 4, 64>}, {pipeline_mode = #tpu.pipeline_mode<synchronous>, transform_indices = @transform_20, window_bounds = array<i64: 2, 1, 64>}, {pipeline_mode = #tpu.pipeline_mode<synchronous>, transform_indices = @transform_21, window_bounds = array<i64: 2, 1, 64>}, {pipeline_mode = #tpu.pipeline_mode<synchronous>, transform_indices = @transform_22, window_bounds = array<i64: 2, 64, 64>}, {pipeline_mode = #tpu.pipeline_mode<synchronous>, transform_indices = @transform_23, window_bounds = array<i64: 2, 64, 64>}, {pipeline_mode = #tpu.pipeline_mode<synchronous>, transform_indices = @transform_24, window_bounds = array<i64: 2, 64, 64>}, {pipeline_mode = #tpu.pipeline_mode<synchronous>, transform_indices = @transform_25, window_bounds = array<i64: 2, 1, 64>}, {pipeline_mode = #tpu.pipeline_mode<synchronous>, transform_indices = @transform_26, window_bounds = array<i64: 2, 1, 64>}, {pipeline_mode = #tpu.pipeline_mode<synchronous>, transform_indices = @transform_27, window_bounds = array<i64: 2, 1, 64>}, {pipeline_mode = #tpu.pipeline_mode<synchronous>, transform_indices = @transform_28, window_bounds = array<i64: 2, 64, 64>}, {pipeline_mode = #tpu.pipeline_mode<synchronous>, transform_indices = @transform_29, window_bounds = array<i64: 2, 1, 64>}, {pipeline_mode = #tpu.pipeline_mode<synchronous>, transform_indices = @transform_30, window_bounds = array<i64: 2, 64, 64>}, {pipeline_mode = #tpu.pipeline_mode<synchronous>, transform_indices = @transform_31, window_bounds = array<i64: 2, 1, 64>}, {pipeline_mode = #tpu.pipeline_mode<synchronous>, transform_indices = @transform_32, window_bounds = array<i64: 2, 1, 64>}, {pipeline_mode = #tpu.pipeline_mode<synchronous>, transform_indices = @transform_33, window_bounds = array<i64: 2, 1, 64>}, {pipeline_mode = #tpu.pipeline_mode<synchronous>, transform_indices = @transform_34, window_bounds = array<i64: 2, 64, 256>}, {pipeline_mode = #tpu.pipeline_mode<synchronous>, transform_indices = @transform_35, window_bounds = array<i64: 2, 1, 256>}, {pipeline_mode = #tpu.pipeline_mode<synchronous>, transform_indices = @transform_36, window_bounds = array<i64: 2, 256, 64>}, {pipeline_mode = #tpu.pipeline_mode<synchronous>, transform_indices = @transform_37, window_bounds = array<i64: 2, 1, 64>}, {pipeline_mode = #tpu.pipeline_mode<synchronous>, transform_indices = @transform_38, window_bounds = array<i64: 5, 8, 4>}, {pipeline_mode = #tpu.pipeline_mode<synchronous>, transform_indices = @transform_39, window_bounds = array<i64: 5, 64, 32>}, {pipeline_mode = #tpu.pipeline_mode<synchronous>, transform_indices = @transform_40, window_bounds = array<i64: 1, 32>}, {pipeline_mode = #tpu.pipeline_mode<synchronous>, transform_indices = @transform_41, window_bounds = array<i64: 5, 16, 8>}, {pipeline_mode = #tpu.pipeline_mode<synchronous>, transform_indices = @transform_42, window_bounds = array<i64: 5, 32, 16>}, {pipeline_mode = #tpu.pipeline_mode<synchronous>, transform_indices = @transform_43, window_bounds = array<i64: 1, 16>}, {pipeline_mode = #tpu.pipeline_mode<synchronous>, transform_indices = @transform_44, window_bounds = array<i64: 5, 32, 16>}, {pipeline_mode = #tpu.pipeline_mode<synchronous>, transform_indices = @transform_45, window_bounds = array<i64: 5, 16, 4>}, {pipeline_mode = #tpu.pipeline_mode<synchronous>, transform_indices = @transform_46, window_bounds = array<i64: 1, 4>}, {transform_indices = @transform_47, window_bounds = array<i64: 1, 32, 4>}]} {
    %c0 = arith.constant 0 : index
    %c0_0 = arith.constant 0 : index
    %c0_1 = arith.constant 0 : index
    %0 = vector.load %arg1[%c0, %c0_0, %c0_1] : memref<1x32x4xf32, #tpu.memory_space<vmem>>, vector<1x32x4xf32>
    %1 = vector.shape_cast %0 : vector<1x32x4xf32> to vector<32x4xf32>
    %2 = arith.truncf %1 : vector<32x4xf32> to vector<32x4xbf16>
    %cst = arith.constant 0.000000e+00 : f32
    %3 = vector.broadcast %cst : f32 to vector<16x16xf32>
    %c0_2 = arith.constant 0 : index
    %c0_3 = arith.constant 0 : index
    %c0_4 = arith.constant 0 : index
    %4 = vector.load %arg2[%c0_2, %c0_3, %c0_4] : memref<5x16x32xbf16, #tpu.memory_space<vmem>>, vector<1x16x32xbf16>
    %5 = vector.shape_cast %4 : vector<1x16x32xbf16> to vector<16x32xbf16>
    %cst_5 = arith.constant dense<0.000000e+00> : vector<16x4xf32>
    %6 = tpu.matmul %5, %2, %cst_5 {dimension_numbers = #tpu.dot_dimension_numbers<[1], [0], [0], [1], [0, 0, 1, 1], [], []>} : vector<16x32xbf16>, vector<32x4xbf16>, vector<16x4xf32> -> vector<16x4xf32>
    %7 = arith.truncf %6 : vector<16x4xf32> to vector<16x4xbf16>
    %c0_6 = arith.constant 0 : index
    %c0_7 = arith.constant 0 : index
    %c0_8 = arith.constant 0 : index
    %8 = vector.load %arg4[%c0_6, %c0_7, %c0_8] : memref<5x4x16xbf16, #tpu.memory_space<vmem>>, vector<1x4x16xbf16>
    %9 = vector.shape_cast %8 : vector<1x4x16xbf16> to vector<4x16xbf16>
    %cst_9 = arith.constant dense<0.000000e+00> : vector<16x16xf32>
    %10 = tpu.matmul %7, %9, %cst_9 {dimension_numbers = #tpu.dot_dimension_numbers<[1], [0], [0], [1], [0, 0, 1, 1], [], []>} : vector<16x4xbf16>, vector<4x16xbf16>, vector<16x16xf32> -> vector<16x16xf32>
    %11 = arith.addf %3, %10 : vector<16x16xf32>
    %c1 = arith.constant 1 : index
    %c0_10 = arith.constant 0 : index
    %c0_11 = arith.constant 0 : index
    %12 = vector.load %arg2[%c1, %c0_10, %c0_11] : memref<5x16x32xbf16, #tpu.memory_space<vmem>>, vector<1x16x32xbf16>
    %13 = vector.shape_cast %12 : vector<1x16x32xbf16> to vector<16x32xbf16>
    %cst_12 = arith.constant dense<0.000000e+00> : vector<16x4xf32>
    %14 = tpu.matmul %13, %2, %cst_12 {dimension_numbers = #tpu.dot_dimension_numbers<[1], [0], [0], [1], [0, 0, 1, 1], [], []>} : vector<16x32xbf16>, vector<32x4xbf16>, vector<16x4xf32> -> vector<16x4xf32>
    %15 = arith.truncf %14 : vector<16x4xf32> to vector<16x4xbf16>
    %c1_13 = arith.constant 1 : index
    %c0_14 = arith.constant 0 : index
    %c0_15 = arith.constant 0 : index
    %16 = vector.load %arg4[%c1_13, %c0_14, %c0_15] : memref<5x4x16xbf16, #tpu.memory_space<vmem>>, vector<1x4x16xbf16>
    %17 = vector.shape_cast %16 : vector<1x4x16xbf16> to vector<4x16xbf16>
    %cst_16 = arith.constant dense<0.000000e+00> : vector<16x16xf32>
    %18 = tpu.matmul %15, %17, %cst_16 {dimension_numbers = #tpu.dot_dimension_numbers<[1], [0], [0], [1], [0, 0, 1, 1], [], []>} : vector<16x4xbf16>, vector<4x16xbf16>, vector<16x16xf32> -> vector<16x16xf32>
    %19 = arith.addf %11, %18 : vector<16x16xf32>
    %c2 = arith.constant 2 : index
    %c0_17 = arith.constant 0 : index
    %c0_18 = arith.constant 0 : index
    %20 = vector.load %arg2[%c2, %c0_17, %c0_18] : memref<5x16x32xbf16, #tpu.memory_space<vmem>>, vector<1x16x32xbf16>
    %21 = vector.shape_cast %20 : vector<1x16x32xbf16> to vector<16x32xbf16>
    %cst_19 = arith.constant dense<0.000000e+00> : vector<16x4xf32>
    %22 = tpu.matmul %21, %2, %cst_19 {dimension_numbers = #tpu.dot_dimension_numbers<[1], [0], [0], [1], [0, 0, 1, 1], [], []>} : vector<16x32xbf16>, vector<32x4xbf16>, vector<16x4xf32> -> vector<16x4xf32>
    %23 = arith.truncf %22 : vector<16x4xf32> to vector<16x4xbf16>
    %c2_20 = arith.constant 2 : index
    %c0_21 = arith.constant 0 : index
    %c0_22 = arith.constant 0 : index
    %24 = vector.load %arg4[%c2_20, %c0_21, %c0_22] : memref<5x4x16xbf16, #tpu.memory_space<vmem>>, vector<1x4x16xbf16>
    %25 = vector.shape_cast %24 : vector<1x4x16xbf16> to vector<4x16xbf16>
    %cst_23 = arith.constant dense<0.000000e+00> : vector<16x16xf32>
    %26 = tpu.matmul %23, %25, %cst_23 {dimension_numbers = #tpu.dot_dimension_numbers<[1], [0], [0], [1], [0, 0, 1, 1], [], []>} : vector<16x4xbf16>, vector<4x16xbf16>, vector<16x16xf32> -> vector<16x16xf32>
    %27 = arith.addf %19, %26 : vector<16x16xf32>
    %c3 = arith.constant 3 : index
    %c0_24 = arith.constant 0 : index
    %c0_25 = arith.constant 0 : index
    %28 = vector.load %arg2[%c3, %c0_24, %c0_25] : memref<5x16x32xbf16, #tpu.memory_space<vmem>>, vector<1x16x32xbf16>
    %29 = vector.shape_cast %28 : vector<1x16x32xbf16> to vector<16x32xbf16>
    %cst_26 = arith.constant dense<0.000000e+00> : vector<16x4xf32>
    %30 = tpu.matmul %29, %2, %cst_26 {dimension_numbers = #tpu.dot_dimension_numbers<[1], [0], [0], [1], [0, 0, 1, 1], [], []>} : vector<16x32xbf16>, vector<32x4xbf16>, vector<16x4xf32> -> vector<16x4xf32>
    %31 = arith.truncf %30 : vector<16x4xf32> to vector<16x4xbf16>
    %c3_27 = arith.constant 3 : index
    %c0_28 = arith.constant 0 : index
    %c0_29 = arith.constant 0 : index
    %32 = vector.load %arg4[%c3_27, %c0_28, %c0_29] : memref<5x4x16xbf16, #tpu.memory_space<vmem>>, vector<1x4x16xbf16>
    %33 = vector.shape_cast %32 : vector<1x4x16xbf16> to vector<4x16xbf16>
    %cst_30 = arith.constant dense<0.000000e+00> : vector<16x16xf32>
    %34 = tpu.matmul %31, %33, %cst_30 {dimension_numbers = #tpu.dot_dimension_numbers<[1], [0], [0], [1], [0, 0, 1, 1], [], []>} : vector<16x4xbf16>, vector<4x16xbf16>, vector<16x16xf32> -> vector<16x16xf32>
    %35 = arith.addf %27, %34 : vector<16x16xf32>
    %c4 = arith.constant 4 : index
    %c0_31 = arith.constant 0 : index
    %c0_32 = arith.constant 0 : index
    %36 = vector.load %arg2[%c4, %c0_31, %c0_32] : memref<5x16x32xbf16, #tpu.memory_space<vmem>>, vector<1x16x32xbf16>
    %37 = vector.shape_cast %36 : vector<1x16x32xbf16> to vector<16x32xbf16>
    %cst_33 = arith.constant dense<0.000000e+00> : vector<16x4xf32>
    %38 = tpu.matmul %37, %2, %cst_33 {dimension_numbers = #tpu.dot_dimension_numbers<[1], [0], [0], [1], [0, 0, 1, 1], [], []>} : vector<16x32xbf16>, vector<32x4xbf16>, vector<16x4xf32> -> vector<16x4xf32>
    %39 = arith.truncf %38 : vector<16x4xf32> to vector<16x4xbf16>
    %c4_34 = arith.constant 4 : index
    %c0_35 = arith.constant 0 : index
    %c0_36 = arith.constant 0 : index
    %40 = vector.load %arg4[%c4_34, %c0_35, %c0_36] : memref<5x4x16xbf16, #tpu.memory_space<vmem>>, vector<1x4x16xbf16>
    %41 = vector.shape_cast %40 : vector<1x4x16xbf16> to vector<4x16xbf16>
    %cst_37 = arith.constant dense<0.000000e+00> : vector<16x16xf32>
    %42 = tpu.matmul %39, %41, %cst_37 {dimension_numbers = #tpu.dot_dimension_numbers<[1], [0], [0], [1], [0, 0, 1, 1], [], []>} : vector<16x4xbf16>, vector<4x16xbf16>, vector<16x16xf32> -> vector<16x16xf32>
    %43 = arith.addf %35, %42 : vector<16x16xf32>
    %c0_38 = arith.constant 0 : index
    %c0_39 = arith.constant 0 : index
    %44 = vector.load %arg5[%c0_38, %c0_39] : memref<1x16xf32, #tpu.memory_space<vmem>>, vector<1x16xf32>
    %45 = vector.broadcast %44 : vector<1x16xf32> to vector<16x16xf32>
    %46 = arith.addf %43, %45 : vector<16x16xf32>
    %cst_40 = arith.constant 5.000000e-01 : f32
    %47 = vector.broadcast %cst_40 : f32 to vector<16x16xf32>
    %48 = arith.mulf %47, %46 : vector<16x16xf32>
    %cst_41 = arith.constant 0.707106769 : f32
    %49 = vector.broadcast %cst_41 : f32 to vector<16x16xf32>
    %50 = arith.mulf %46, %49 : vector<16x16xf32>
    %51 = math.absf %50 : vector<16x16xf32>
    %cst_42 = arith.constant 0.327591091 : f32
    %52 = vector.broadcast %cst_42 : f32 to vector<16x16xf32>
    %53 = arith.mulf %52, %51 : vector<16x16xf32>
    %cst_43 = arith.constant 1.000000e+00 : f32
    %54 = vector.broadcast %cst_43 : f32 to vector<16x16xf32>
    %55 = arith.addf %54, %53 : vector<16x16xf32>
    %cst_44 = arith.constant 1.000000e+00 : f32
    %56 = vector.broadcast %cst_44 : f32 to vector<16x16xf32>
    %57 = arith.divf %56, %55 : vector<16x16xf32>
    %cst_45 = arith.constant 1.06140542 : f32
    %58 = vector.broadcast %cst_45 : f32 to vector<16x16xf32>
    %59 = arith.mulf %58, %57 : vector<16x16xf32>
    %cst_46 = arith.constant -1.45315206 : f32
    %60 = vector.broadcast %cst_46 : f32 to vector<16x16xf32>
    %61 = arith.addf %59, %60 : vector<16x16xf32>
    %62 = arith.mulf %61, %57 : vector<16x16xf32>
    %cst_47 = arith.constant 1.42141378 : f32
    %63 = vector.broadcast %cst_47 : f32 to vector<16x16xf32>
    %64 = arith.addf %62, %63 : vector<16x16xf32>
    %65 = arith.mulf %64, %57 : vector<16x16xf32>
    %cst_48 = arith.constant -0.284496725 : f32
    %66 = vector.broadcast %cst_48 : f32 to vector<16x16xf32>
    %67 = arith.addf %65, %66 : vector<16x16xf32>
    %68 = arith.mulf %67, %57 : vector<16x16xf32>
    %cst_49 = arith.constant 0.254829586 : f32
    %69 = vector.broadcast %cst_49 : f32 to vector<16x16xf32>
    %70 = arith.addf %68, %69 : vector<16x16xf32>
    %71 = arith.mulf %70, %57 : vector<16x16xf32>
    %cst_50 = arith.constant 0.000000e+00 : f32
    %72 = vector.broadcast %cst_50 : f32 to vector<16x16xf32>
    %73 = arith.subf %72, %51 : vector<16x16xf32>
    %74 = arith.mulf %73, %51 : vector<16x16xf32>
    %75 = math.exp %74 : vector<16x16xf32>
    %76 = arith.mulf %71, %75 : vector<16x16xf32>
    %cst_51 = arith.constant 1.000000e+00 : f32
    %77 = vector.broadcast %cst_51 : f32 to vector<16x16xf32>
    %78 = arith.subf %77, %76 : vector<16x16xf32>
    %cst_52 = arith.constant 0.000000e+00 : f32
    %79 = vector.broadcast %cst_52 : f32 to vector<16x16xf32>
    %80 = arith.cmpf oge, %50, %79 : vector<16x16xf32>
    %cst_53 = arith.constant 0.000000e+00 : f32
    %81 = vector.broadcast %cst_53 : f32 to vector<16x16xf32>
    %82 = arith.subf %81, %78 : vector<16x16xf32>
    %83 = arith.select %80, %78, %82 : vector<16x16xi1>, vector<16x16xf32>
    %cst_54 = arith.constant 1.000000e+00 : f32
    %84 = vector.broadcast %cst_54 : f32 to vector<16x16xf32>
    %85 = arith.addf %84, %83 : vector<16x16xf32>
    %86 = arith.mulf %48, %85 : vector<16x16xf32>
    %c0_55 = arith.constant 0 : index
    %c0_56 = arith.constant 0 : index
    %87 = vector.load %arg3[%c0_55, %c0_56] : memref<16x32xbf16, #tpu.memory_space<vmem>>, vector<16x32xbf16>
    %cst_57 = arith.constant dense<0.000000e+00> : vector<16x4xf32>
    %88 = tpu.matmul %87, %2, %cst_57 {dimension_numbers = #tpu.dot_dimension_numbers<[1], [0], [0], [1], [0, 0, 1, 1], [], []>} : vector<16x32xbf16>, vector<32x4xbf16>, vector<16x4xf32> -> vector<16x4xf32>
    %89 = arith.truncf %88 : vector<16x4xf32> to vector<16x4xbf16>
    %c0_58 = arith.constant 0 : index
    %c0_59 = arith.constant 0 : index
    %90 = vector.load %arg6[%c0_58, %c0_59] : memref<4x16xbf16, #tpu.memory_space<vmem>>, vector<4x16xbf16>
    %cst_60 = arith.constant dense<0.000000e+00> : vector<16x16xf32>
    %91 = tpu.matmul %89, %90, %cst_60 {dimension_numbers = #tpu.dot_dimension_numbers<[1], [0], [0], [1], [0, 0, 1, 1], [], []>} : vector<16x4xbf16>, vector<4x16xbf16>, vector<16x16xf32> -> vector<16x16xf32>
    %c0_61 = arith.constant 0 : index
    %c0_62 = arith.constant 0 : index
    %92 = vector.load %arg7[%c0_61, %c0_62] : memref<1x16xf32, #tpu.memory_space<vmem>>, vector<1x16xf32>
    %93 = vector.broadcast %92 : vector<1x16xf32> to vector<16x16xf32>
    %94 = arith.addf %91, %93 : vector<16x16xf32>
    %cst_63 = arith.constant 0.699999988 : f32
    %95 = vector.broadcast %cst_63 : f32 to vector<16x16xf32>
    %96 = arith.mulf %95, %86 : vector<16x16xf32>
    %cst_64 = arith.constant 3.000000e-01 : f32
    %97 = vector.broadcast %cst_64 : f32 to vector<16x16xf32>
    %98 = arith.mulf %97, %94 : vector<16x16xf32>
    %99 = arith.addf %96, %98 : vector<16x16xf32>
    %100 = arith.truncf %99 : vector<16x16xf32> to vector<16x16xbf16>
    %cst_65 = arith.constant 0.000000e+00 : f32
    %101 = vector.broadcast %cst_65 : f32 to vector<8x32xf32>
    %c0_66 = arith.constant 0 : index
    %c0_67 = arith.constant 0 : index
    %c0_68 = arith.constant 0 : index
    %102 = vector.load %arg8[%c0_66, %c0_67, %c0_68] : memref<5x8x16xbf16, #tpu.memory_space<vmem>>, vector<1x8x16xbf16>
    %103 = vector.shape_cast %102 : vector<1x8x16xbf16> to vector<8x16xbf16>
    %cst_69 = arith.constant dense<0.000000e+00> : vector<8x16xf32>
    %104 = tpu.matmul %103, %100, %cst_69 {dimension_numbers = #tpu.dot_dimension_numbers<[1], [0], [0], [1], [0, 0, 1, 1], [], []>} : vector<8x16xbf16>, vector<16x16xbf16>, vector<8x16xf32> -> vector<8x16xf32>
    %105 = arith.truncf %104 : vector<8x16xf32> to vector<8x16xbf16>
    %c0_70 = arith.constant 0 : index
    %c0_71 = arith.constant 0 : index
    %c0_72 = arith.constant 0 : index
    %106 = vector.load %arg10[%c0_70, %c0_71, %c0_72] : memref<5x16x32xbf16, #tpu.memory_space<vmem>>, vector<1x16x32xbf16>
    %107 = vector.shape_cast %106 : vector<1x16x32xbf16> to vector<16x32xbf16>
    %cst_73 = arith.constant dense<0.000000e+00> : vector<8x32xf32>
    %108 = tpu.matmul %105, %107, %cst_73 {dimension_numbers = #tpu.dot_dimension_numbers<[1], [0], [0], [1], [0, 0, 1, 1], [], []>} : vector<8x16xbf16>, vector<16x32xbf16>, vector<8x32xf32> -> vector<8x32xf32>
    %109 = arith.addf %101, %108 : vector<8x32xf32>
    %c1_74 = arith.constant 1 : index
    %c0_75 = arith.constant 0 : index
    %c0_76 = arith.constant 0 : index
    %110 = vector.load %arg8[%c1_74, %c0_75, %c0_76] : memref<5x8x16xbf16, #tpu.memory_space<vmem>>, vector<1x8x16xbf16>
    %111 = vector.shape_cast %110 : vector<1x8x16xbf16> to vector<8x16xbf16>
    %cst_77 = arith.constant dense<0.000000e+00> : vector<8x16xf32>
    %112 = tpu.matmul %111, %100, %cst_77 {dimension_numbers = #tpu.dot_dimension_numbers<[1], [0], [0], [1], [0, 0, 1, 1], [], []>} : vector<8x16xbf16>, vector<16x16xbf16>, vector<8x16xf32> -> vector<8x16xf32>
    %113 = arith.truncf %112 : vector<8x16xf32> to vector<8x16xbf16>
    %c1_78 = arith.constant 1 : index
    %c0_79 = arith.constant 0 : index
    %c0_80 = arith.constant 0 : index
    %114 = vector.load %arg10[%c1_78, %c0_79, %c0_80] : memref<5x16x32xbf16, #tpu.memory_space<vmem>>, vector<1x16x32xbf16>
    %115 = vector.shape_cast %114 : vector<1x16x32xbf16> to vector<16x32xbf16>
    %cst_81 = arith.constant dense<0.000000e+00> : vector<8x32xf32>
    %116 = tpu.matmul %113, %115, %cst_81 {dimension_numbers = #tpu.dot_dimension_numbers<[1], [0], [0], [1], [0, 0, 1, 1], [], []>} : vector<8x16xbf16>, vector<16x32xbf16>, vector<8x32xf32> -> vector<8x32xf32>
    %117 = arith.addf %109, %116 : vector<8x32xf32>
    %c2_82 = arith.constant 2 : index
    %c0_83 = arith.constant 0 : index
    %c0_84 = arith.constant 0 : index
    %118 = vector.load %arg8[%c2_82, %c0_83, %c0_84] : memref<5x8x16xbf16, #tpu.memory_space<vmem>>, vector<1x8x16xbf16>
    %119 = vector.shape_cast %118 : vector<1x8x16xbf16> to vector<8x16xbf16>
    %cst_85 = arith.constant dense<0.000000e+00> : vector<8x16xf32>
    %120 = tpu.matmul %119, %100, %cst_85 {dimension_numbers = #tpu.dot_dimension_numbers<[1], [0], [0], [1], [0, 0, 1, 1], [], []>} : vector<8x16xbf16>, vector<16x16xbf16>, vector<8x16xf32> -> vector<8x16xf32>
    %121 = arith.truncf %120 : vector<8x16xf32> to vector<8x16xbf16>
    %c2_86 = arith.constant 2 : index
    %c0_87 = arith.constant 0 : index
    %c0_88 = arith.constant 0 : index
    %122 = vector.load %arg10[%c2_86, %c0_87, %c0_88] : memref<5x16x32xbf16, #tpu.memory_space<vmem>>, vector<1x16x32xbf16>
    %123 = vector.shape_cast %122 : vector<1x16x32xbf16> to vector<16x32xbf16>
    %cst_89 = arith.constant dense<0.000000e+00> : vector<8x32xf32>
    %124 = tpu.matmul %121, %123, %cst_89 {dimension_numbers = #tpu.dot_dimension_numbers<[1], [0], [0], [1], [0, 0, 1, 1], [], []>} : vector<8x16xbf16>, vector<16x32xbf16>, vector<8x32xf32> -> vector<8x32xf32>
    %125 = arith.addf %117, %124 : vector<8x32xf32>
    %c3_90 = arith.constant 3 : index
    %c0_91 = arith.constant 0 : index
    %c0_92 = arith.constant 0 : index
    %126 = vector.load %arg8[%c3_90, %c0_91, %c0_92] : memref<5x8x16xbf16, #tpu.memory_space<vmem>>, vector<1x8x16xbf16>
    %127 = vector.shape_cast %126 : vector<1x8x16xbf16> to vector<8x16xbf16>
    %cst_93 = arith.constant dense<0.000000e+00> : vector<8x16xf32>
    %128 = tpu.matmul %127, %100, %cst_93 {dimension_numbers = #tpu.dot_dimension_numbers<[1], [0], [0], [1], [0, 0, 1, 1], [], []>} : vector<8x16xbf16>, vector<16x16xbf16>, vector<8x16xf32> -> vector<8x16xf32>
    %129 = arith.truncf %128 : vector<8x16xf32> to vector<8x16xbf16>
    %c3_94 = arith.constant 3 : index
    %c0_95 = arith.constant 0 : index
    %c0_96 = arith.constant 0 : index
    %130 = vector.load %arg10[%c3_94, %c0_95, %c0_96] : memref<5x16x32xbf16, #tpu.memory_space<vmem>>, vector<1x16x32xbf16>
    %131 = vector.shape_cast %130 : vector<1x16x32xbf16> to vector<16x32xbf16>
    %cst_97 = arith.constant dense<0.000000e+00> : vector<8x32xf32>
    %132 = tpu.matmul %129, %131, %cst_97 {dimension_numbers = #tpu.dot_dimension_numbers<[1], [0], [0], [1], [0, 0, 1, 1], [], []>} : vector<8x16xbf16>, vector<16x32xbf16>, vector<8x32xf32> -> vector<8x32xf32>
    %133 = arith.addf %125, %132 : vector<8x32xf32>
    %c4_98 = arith.constant 4 : index
    %c0_99 = arith.constant 0 : index
    %c0_100 = arith.constant 0 : index
    %134 = vector.load %arg8[%c4_98, %c0_99, %c0_100] : memref<5x8x16xbf16, #tpu.memory_space<vmem>>, vector<1x8x16xbf16>
    %135 = vector.shape_cast %134 : vector<1x8x16xbf16> to vector<8x16xbf16>
    %cst_101 = arith.constant dense<0.000000e+00> : vector<8x16xf32>
    %136 = tpu.matmul %135, %100, %cst_101 {dimension_numbers = #tpu.dot_dimension_numbers<[1], [0], [0], [1], [0, 0, 1, 1], [], []>} : vector<8x16xbf16>, vector<16x16xbf16>, vector<8x16xf32> -> vector<8x16xf32>
    %137 = arith.truncf %136 : vector<8x16xf32> to vector<8x16xbf16>
    %c4_102 = arith.constant 4 : index
    %c0_103 = arith.constant 0 : index
    %c0_104 = arith.constant 0 : index
    %138 = vector.load %arg10[%c4_102, %c0_103, %c0_104] : memref<5x16x32xbf16, #tpu.memory_space<vmem>>, vector<1x16x32xbf16>
    %139 = vector.shape_cast %138 : vector<1x16x32xbf16> to vector<16x32xbf16>
    %cst_105 = arith.constant dense<0.000000e+00> : vector<8x32xf32>
    %140 = tpu.matmul %137, %139, %cst_105 {dimension_numbers = #tpu.dot_dimension_numbers<[1], [0], [0], [1], [0, 0, 1, 1], [], []>} : vector<8x16xbf16>, vector<16x32xbf16>, vector<8x32xf32> -> vector<8x32xf32>
    %141 = arith.addf %133, %140 : vector<8x32xf32>
    %c0_106 = arith.constant 0 : index
    %c0_107 = arith.constant 0 : index
    %142 = vector.load %arg11[%c0_106, %c0_107] : memref<1x32xf32, #tpu.memory_space<vmem>>, vector<1x32xf32>
    %143 = vector.broadcast %142 : vector<1x32xf32> to vector<8x32xf32>
    %144 = arith.addf %141, %143 : vector<8x32xf32>
    %cst_108 = arith.constant 5.000000e-01 : f32
    %145 = vector.broadcast %cst_108 : f32 to vector<8x32xf32>
    %146 = arith.mulf %145, %144 : vector<8x32xf32>
    %cst_109 = arith.constant 0.707106769 : f32
    %147 = vector.broadcast %cst_109 : f32 to vector<8x32xf32>
    %148 = arith.mulf %144, %147 : vector<8x32xf32>
    %149 = math.absf %148 : vector<8x32xf32>
    %cst_110 = arith.constant 0.327591091 : f32
    %150 = vector.broadcast %cst_110 : f32 to vector<8x32xf32>
    %151 = arith.mulf %150, %149 : vector<8x32xf32>
    %cst_111 = arith.constant 1.000000e+00 : f32
    %152 = vector.broadcast %cst_111 : f32 to vector<8x32xf32>
    %153 = arith.addf %152, %151 : vector<8x32xf32>
    %cst_112 = arith.constant 1.000000e+00 : f32
    %154 = vector.broadcast %cst_112 : f32 to vector<8x32xf32>
    %155 = arith.divf %154, %153 : vector<8x32xf32>
    %cst_113 = arith.constant 1.06140542 : f32
    %156 = vector.broadcast %cst_113 : f32 to vector<8x32xf32>
    %157 = arith.mulf %156, %155 : vector<8x32xf32>
    %cst_114 = arith.constant -1.45315206 : f32
    %158 = vector.broadcast %cst_114 : f32 to vector<8x32xf32>
    %159 = arith.addf %157, %158 : vector<8x32xf32>
    %160 = arith.mulf %159, %155 : vector<8x32xf32>
    %cst_115 = arith.constant 1.42141378 : f32
    %161 = vector.broadcast %cst_115 : f32 to vector<8x32xf32>
    %162 = arith.addf %160, %161 : vector<8x32xf32>
    %163 = arith.mulf %162, %155 : vector<8x32xf32>
    %cst_116 = arith.constant -0.284496725 : f32
    %164 = vector.broadcast %cst_116 : f32 to vector<8x32xf32>
    %165 = arith.addf %163, %164 : vector<8x32xf32>
    %166 = arith.mulf %165, %155 : vector<8x32xf32>
    %cst_117 = arith.constant 0.254829586 : f32
    %167 = vector.broadcast %cst_117 : f32 to vector<8x32xf32>
    %168 = arith.addf %166, %167 : vector<8x32xf32>
    %169 = arith.mulf %168, %155 : vector<8x32xf32>
    %cst_118 = arith.constant 0.000000e+00 : f32
    %170 = vector.broadcast %cst_118 : f32 to vector<8x32xf32>
    %171 = arith.subf %170, %149 : vector<8x32xf32>
    %172 = arith.mulf %171, %149 : vector<8x32xf32>
    %173 = math.exp %172 : vector<8x32xf32>
    %174 = arith.mulf %169, %173 : vector<8x32xf32>
    %cst_119 = arith.constant 1.000000e+00 : f32
    %175 = vector.broadcast %cst_119 : f32 to vector<8x32xf32>
    %176 = arith.subf %175, %174 : vector<8x32xf32>
    %cst_120 = arith.constant 0.000000e+00 : f32
    %177 = vector.broadcast %cst_120 : f32 to vector<8x32xf32>
    %178 = arith.cmpf oge, %148, %177 : vector<8x32xf32>
    %cst_121 = arith.constant 0.000000e+00 : f32
    %179 = vector.broadcast %cst_121 : f32 to vector<8x32xf32>
    %180 = arith.subf %179, %176 : vector<8x32xf32>
    %181 = arith.select %178, %176, %180 : vector<8x32xi1>, vector<8x32xf32>
    %cst_122 = arith.constant 1.000000e+00 : f32
    %182 = vector.broadcast %cst_122 : f32 to vector<8x32xf32>
    %183 = arith.addf %182, %181 : vector<8x32xf32>
    %184 = arith.mulf %146, %183 : vector<8x32xf32>
    %c0_123 = arith.constant 0 : index
    %c0_124 = arith.constant 0 : index
    %185 = vector.load %arg9[%c0_123, %c0_124] : memref<8x16xbf16, #tpu.memory_space<vmem>>, vector<8x16xbf16>
    %cst_125 = arith.constant dense<0.000000e+00> : vector<8x16xf32>
    %186 = tpu.matmul %185, %100, %cst_125 {dimension_numbers = #tpu.dot_dimension_numbers<[1], [0], [0], [1], [0, 0, 1, 1], [], []>} : vector<8x16xbf16>, vector<16x16xbf16>, vector<8x16xf32> -> vector<8x16xf32>
    %187 = arith.truncf %186 : vector<8x16xf32> to vector<8x16xbf16>
    %c0_126 = arith.constant 0 : index
    %c0_127 = arith.constant 0 : index
    %188 = vector.load %arg12[%c0_126, %c0_127] : memref<16x32xbf16, #tpu.memory_space<vmem>>, vector<16x32xbf16>
    %cst_128 = arith.constant dense<0.000000e+00> : vector<8x32xf32>
    %189 = tpu.matmul %187, %188, %cst_128 {dimension_numbers = #tpu.dot_dimension_numbers<[1], [0], [0], [1], [0, 0, 1, 1], [], []>} : vector<8x16xbf16>, vector<16x32xbf16>, vector<8x32xf32> -> vector<8x32xf32>
    %c0_129 = arith.constant 0 : index
    %c0_130 = arith.constant 0 : index
    %190 = vector.load %arg13[%c0_129, %c0_130] : memref<1x32xf32, #tpu.memory_space<vmem>>, vector<1x32xf32>
    %191 = vector.broadcast %190 : vector<1x32xf32> to vector<8x32xf32>
    %192 = arith.addf %189, %191 : vector<8x32xf32>
    %cst_131 = arith.constant 0.699999988 : f32
    %193 = vector.broadcast %cst_131 : f32 to vector<8x32xf32>
    %194 = arith.mulf %193, %184 : vector<8x32xf32>
    %cst_132 = arith.constant 3.000000e-01 : f32
    %195 = vector.broadcast %cst_132 : f32 to vector<8x32xf32>
    %196 = arith.mulf %195, %192 : vector<8x32xf32>
    %197 = arith.addf %194, %196 : vector<8x32xf32>
    %198 = arith.truncf %197 : vector<8x32xf32> to vector<8x32xbf16>
    %cst_133 = arith.constant 0.000000e+00 : f32
    %199 = vector.broadcast %cst_133 : f32 to vector<4x64xf32>
    %c0_134 = arith.constant 0 : index
    %c0_135 = arith.constant 0 : index
    %c0_136 = arith.constant 0 : index
    %200 = vector.load %arg14[%c0_134, %c0_135, %c0_136] : memref<5x4x8xbf16, #tpu.memory_space<vmem>>, vector<1x4x8xbf16>
    %201 = vector.shape_cast %200 : vector<1x4x8xbf16> to vector<4x8xbf16>
    %cst_137 = arith.constant dense<0.000000e+00> : vector<4x32xf32>
    %202 = tpu.matmul %201, %198, %cst_137 {dimension_numbers = #tpu.dot_dimension_numbers<[1], [0], [0], [1], [0, 0, 1, 1], [], []>} : vector<4x8xbf16>, vector<8x32xbf16>, vector<4x32xf32> -> vector<4x32xf32>
    %203 = arith.truncf %202 : vector<4x32xf32> to vector<4x32xbf16>
    %c0_138 = arith.constant 0 : index
    %c0_139 = arith.constant 0 : index
    %c0_140 = arith.constant 0 : index
    %204 = vector.load %arg16[%c0_138, %c0_139, %c0_140] : memref<5x32x64xbf16, #tpu.memory_space<vmem>>, vector<1x32x64xbf16>
    %205 = vector.shape_cast %204 : vector<1x32x64xbf16> to vector<32x64xbf16>
    %cst_141 = arith.constant dense<0.000000e+00> : vector<4x64xf32>
    %206 = tpu.matmul %203, %205, %cst_141 {dimension_numbers = #tpu.dot_dimension_numbers<[1], [0], [0], [1], [0, 0, 1, 1], [], []>} : vector<4x32xbf16>, vector<32x64xbf16>, vector<4x64xf32> -> vector<4x64xf32>
    %207 = arith.addf %199, %206 : vector<4x64xf32>
    %c1_142 = arith.constant 1 : index
    %c0_143 = arith.constant 0 : index
    %c0_144 = arith.constant 0 : index
    %208 = vector.load %arg14[%c1_142, %c0_143, %c0_144] : memref<5x4x8xbf16, #tpu.memory_space<vmem>>, vector<1x4x8xbf16>
    %209 = vector.shape_cast %208 : vector<1x4x8xbf16> to vector<4x8xbf16>
    %cst_145 = arith.constant dense<0.000000e+00> : vector<4x32xf32>
    %210 = tpu.matmul %209, %198, %cst_145 {dimension_numbers = #tpu.dot_dimension_numbers<[1], [0], [0], [1], [0, 0, 1, 1], [], []>} : vector<4x8xbf16>, vector<8x32xbf16>, vector<4x32xf32> -> vector<4x32xf32>
    %211 = arith.truncf %210 : vector<4x32xf32> to vector<4x32xbf16>
    %c1_146 = arith.constant 1 : index
    %c0_147 = arith.constant 0 : index
    %c0_148 = arith.constant 0 : index
    %212 = vector.load %arg16[%c1_146, %c0_147, %c0_148] : memref<5x32x64xbf16, #tpu.memory_space<vmem>>, vector<1x32x64xbf16>
    %213 = vector.shape_cast %212 : vector<1x32x64xbf16> to vector<32x64xbf16>
    %cst_149 = arith.constant dense<0.000000e+00> : vector<4x64xf32>
    %214 = tpu.matmul %211, %213, %cst_149 {dimension_numbers = #tpu.dot_dimension_numbers<[1], [0], [0], [1], [0, 0, 1, 1], [], []>} : vector<4x32xbf16>, vector<32x64xbf16>, vector<4x64xf32> -> vector<4x64xf32>
    %215 = arith.addf %207, %214 : vector<4x64xf32>
    %c2_150 = arith.constant 2 : index
    %c0_151 = arith.constant 0 : index
    %c0_152 = arith.constant 0 : index
    %216 = vector.load %arg14[%c2_150, %c0_151, %c0_152] : memref<5x4x8xbf16, #tpu.memory_space<vmem>>, vector<1x4x8xbf16>
    %217 = vector.shape_cast %216 : vector<1x4x8xbf16> to vector<4x8xbf16>
    %cst_153 = arith.constant dense<0.000000e+00> : vector<4x32xf32>
    %218 = tpu.matmul %217, %198, %cst_153 {dimension_numbers = #tpu.dot_dimension_numbers<[1], [0], [0], [1], [0, 0, 1, 1], [], []>} : vector<4x8xbf16>, vector<8x32xbf16>, vector<4x32xf32> -> vector<4x32xf32>
    %219 = arith.truncf %218 : vector<4x32xf32> to vector<4x32xbf16>
    %c2_154 = arith.constant 2 : index
    %c0_155 = arith.constant 0 : index
    %c0_156 = arith.constant 0 : index
    %220 = vector.load %arg16[%c2_154, %c0_155, %c0_156] : memref<5x32x64xbf16, #tpu.memory_space<vmem>>, vector<1x32x64xbf16>
    %221 = vector.shape_cast %220 : vector<1x32x64xbf16> to vector<32x64xbf16>
    %cst_157 = arith.constant dense<0.000000e+00> : vector<4x64xf32>
    %222 = tpu.matmul %219, %221, %cst_157 {dimension_numbers = #tpu.dot_dimension_numbers<[1], [0], [0], [1], [0, 0, 1, 1], [], []>} : vector<4x32xbf16>, vector<32x64xbf16>, vector<4x64xf32> -> vector<4x64xf32>
    %223 = arith.addf %215, %222 : vector<4x64xf32>
    %c3_158 = arith.constant 3 : index
    %c0_159 = arith.constant 0 : index
    %c0_160 = arith.constant 0 : index
    %224 = vector.load %arg14[%c3_158, %c0_159, %c0_160] : memref<5x4x8xbf16, #tpu.memory_space<vmem>>, vector<1x4x8xbf16>
    %225 = vector.shape_cast %224 : vector<1x4x8xbf16> to vector<4x8xbf16>
    %cst_161 = arith.constant dense<0.000000e+00> : vector<4x32xf32>
    %226 = tpu.matmul %225, %198, %cst_161 {dimension_numbers = #tpu.dot_dimension_numbers<[1], [0], [0], [1], [0, 0, 1, 1], [], []>} : vector<4x8xbf16>, vector<8x32xbf16>, vector<4x32xf32> -> vector<4x32xf32>
    %227 = arith.truncf %226 : vector<4x32xf32> to vector<4x32xbf16>
    %c3_162 = arith.constant 3 : index
    %c0_163 = arith.constant 0 : index
    %c0_164 = arith.constant 0 : index
    %228 = vector.load %arg16[%c3_162, %c0_163, %c0_164] : memref<5x32x64xbf16, #tpu.memory_space<vmem>>, vector<1x32x64xbf16>
    %229 = vector.shape_cast %228 : vector<1x32x64xbf16> to vector<32x64xbf16>
    %cst_165 = arith.constant dense<0.000000e+00> : vector<4x64xf32>
    %230 = tpu.matmul %227, %229, %cst_165 {dimension_numbers = #tpu.dot_dimension_numbers<[1], [0], [0], [1], [0, 0, 1, 1], [], []>} : vector<4x32xbf16>, vector<32x64xbf16>, vector<4x64xf32> -> vector<4x64xf32>
    %231 = arith.addf %223, %230 : vector<4x64xf32>
    %c4_166 = arith.constant 4 : index
    %c0_167 = arith.constant 0 : index
    %c0_168 = arith.constant 0 : index
    %232 = vector.load %arg14[%c4_166, %c0_167, %c0_168] : memref<5x4x8xbf16, #tpu.memory_space<vmem>>, vector<1x4x8xbf16>
    %233 = vector.shape_cast %232 : vector<1x4x8xbf16> to vector<4x8xbf16>
    %cst_169 = arith.constant dense<0.000000e+00> : vector<4x32xf32>
    %234 = tpu.matmul %233, %198, %cst_169 {dimension_numbers = #tpu.dot_dimension_numbers<[1], [0], [0], [1], [0, 0, 1, 1], [], []>} : vector<4x8xbf16>, vector<8x32xbf16>, vector<4x32xf32> -> vector<4x32xf32>
    %235 = arith.truncf %234 : vector<4x32xf32> to vector<4x32xbf16>
    %c4_170 = arith.constant 4 : index
    %c0_171 = arith.constant 0 : index
    %c0_172 = arith.constant 0 : index
    %236 = vector.load %arg16[%c4_170, %c0_171, %c0_172] : memref<5x32x64xbf16, #tpu.memory_space<vmem>>, vector<1x32x64xbf16>
    %237 = vector.shape_cast %236 : vector<1x32x64xbf16> to vector<32x64xbf16>
    %cst_173 = arith.constant dense<0.000000e+00> : vector<4x64xf32>
    %238 = tpu.matmul %235, %237, %cst_173 {dimension_numbers = #tpu.dot_dimension_numbers<[1], [0], [0], [1], [0, 0, 1, 1], [], []>} : vector<4x32xbf16>, vector<32x64xbf16>, vector<4x64xf32> -> vector<4x64xf32>
    %239 = arith.addf %231, %238 : vector<4x64xf32>
    %c0_174 = arith.constant 0 : index
    %c0_175 = arith.constant 0 : index
    %240 = vector.load %arg17[%c0_174, %c0_175] : memref<1x64xf32, #tpu.memory_space<vmem>>, vector<1x64xf32>
    %241 = vector.broadcast %240 : vector<1x64xf32> to vector<4x64xf32>
    %242 = arith.addf %239, %241 : vector<4x64xf32>
    %cst_176 = arith.constant 5.000000e-01 : f32
    %243 = vector.broadcast %cst_176 : f32 to vector<4x64xf32>
    %244 = arith.mulf %243, %242 : vector<4x64xf32>
    %cst_177 = arith.constant 0.707106769 : f32
    %245 = vector.broadcast %cst_177 : f32 to vector<4x64xf32>
    %246 = arith.mulf %242, %245 : vector<4x64xf32>
    %247 = math.absf %246 : vector<4x64xf32>
    %cst_178 = arith.constant 0.327591091 : f32
    %248 = vector.broadcast %cst_178 : f32 to vector<4x64xf32>
    %249 = arith.mulf %248, %247 : vector<4x64xf32>
    %cst_179 = arith.constant 1.000000e+00 : f32
    %250 = vector.broadcast %cst_179 : f32 to vector<4x64xf32>
    %251 = arith.addf %250, %249 : vector<4x64xf32>
    %cst_180 = arith.constant 1.000000e+00 : f32
    %252 = vector.broadcast %cst_180 : f32 to vector<4x64xf32>
    %253 = arith.divf %252, %251 : vector<4x64xf32>
    %cst_181 = arith.constant 1.06140542 : f32
    %254 = vector.broadcast %cst_181 : f32 to vector<4x64xf32>
    %255 = arith.mulf %254, %253 : vector<4x64xf32>
    %cst_182 = arith.constant -1.45315206 : f32
    %256 = vector.broadcast %cst_182 : f32 to vector<4x64xf32>
    %257 = arith.addf %255, %256 : vector<4x64xf32>
    %258 = arith.mulf %257, %253 : vector<4x64xf32>
    %cst_183 = arith.constant 1.42141378 : f32
    %259 = vector.broadcast %cst_183 : f32 to vector<4x64xf32>
    %260 = arith.addf %258, %259 : vector<4x64xf32>
    %261 = arith.mulf %260, %253 : vector<4x64xf32>
    %cst_184 = arith.constant -0.284496725 : f32
    %262 = vector.broadcast %cst_184 : f32 to vector<4x64xf32>
    %263 = arith.addf %261, %262 : vector<4x64xf32>
    %264 = arith.mulf %263, %253 : vector<4x64xf32>
    %cst_185 = arith.constant 0.254829586 : f32
    %265 = vector.broadcast %cst_185 : f32 to vector<4x64xf32>
    %266 = arith.addf %264, %265 : vector<4x64xf32>
    %267 = arith.mulf %266, %253 : vector<4x64xf32>
    %cst_186 = arith.constant 0.000000e+00 : f32
    %268 = vector.broadcast %cst_186 : f32 to vector<4x64xf32>
    %269 = arith.subf %268, %247 : vector<4x64xf32>
    %270 = arith.mulf %269, %247 : vector<4x64xf32>
    %271 = math.exp %270 : vector<4x64xf32>
    %272 = arith.mulf %267, %271 : vector<4x64xf32>
    %cst_187 = arith.constant 1.000000e+00 : f32
    %273 = vector.broadcast %cst_187 : f32 to vector<4x64xf32>
    %274 = arith.subf %273, %272 : vector<4x64xf32>
    %cst_188 = arith.constant 0.000000e+00 : f32
    %275 = vector.broadcast %cst_188 : f32 to vector<4x64xf32>
    %276 = arith.cmpf oge, %246, %275 : vector<4x64xf32>
    %cst_189 = arith.constant 0.000000e+00 : f32
    %277 = vector.broadcast %cst_189 : f32 to vector<4x64xf32>
    %278 = arith.subf %277, %274 : vector<4x64xf32>
    %279 = arith.select %276, %274, %278 : vector<4x64xi1>, vector<4x64xf32>
    %cst_190 = arith.constant 1.000000e+00 : f32
    %280 = vector.broadcast %cst_190 : f32 to vector<4x64xf32>
    %281 = arith.addf %280, %279 : vector<4x64xf32>
    %282 = arith.mulf %244, %281 : vector<4x64xf32>
    %c0_191 = arith.constant 0 : index
    %c0_192 = arith.constant 0 : index
    %283 = vector.load %arg15[%c0_191, %c0_192] : memref<4x8xbf16, #tpu.memory_space<vmem>>, vector<4x8xbf16>
    %cst_193 = arith.constant dense<0.000000e+00> : vector<4x32xf32>
    %284 = tpu.matmul %283, %198, %cst_193 {dimension_numbers = #tpu.dot_dimension_numbers<[1], [0], [0], [1], [0, 0, 1, 1], [], []>} : vector<4x8xbf16>, vector<8x32xbf16>, vector<4x32xf32> -> vector<4x32xf32>
    %285 = arith.truncf %284 : vector<4x32xf32> to vector<4x32xbf16>
    %c0_194 = arith.constant 0 : index
    %c0_195 = arith.constant 0 : index
    %286 = vector.load %arg18[%c0_194, %c0_195] : memref<32x64xbf16, #tpu.memory_space<vmem>>, vector<32x64xbf16>
    %cst_196 = arith.constant dense<0.000000e+00> : vector<4x64xf32>
    %287 = tpu.matmul %285, %286, %cst_196 {dimension_numbers = #tpu.dot_dimension_numbers<[1], [0], [0], [1], [0, 0, 1, 1], [], []>} : vector<4x32xbf16>, vector<32x64xbf16>, vector<4x64xf32> -> vector<4x64xf32>
    %c0_197 = arith.constant 0 : index
    %c0_198 = arith.constant 0 : index
    %288 = vector.load %arg19[%c0_197, %c0_198] : memref<1x64xf32, #tpu.memory_space<vmem>>, vector<1x64xf32>
    %289 = vector.broadcast %288 : vector<1x64xf32> to vector<4x64xf32>
    %290 = arith.addf %287, %289 : vector<4x64xf32>
    %cst_199 = arith.constant 0.699999988 : f32
    %291 = vector.broadcast %cst_199 : f32 to vector<4x64xf32>
    %292 = arith.mulf %291, %282 : vector<4x64xf32>
    %cst_200 = arith.constant 3.000000e-01 : f32
    %293 = vector.broadcast %cst_200 : f32 to vector<4x64xf32>
    %294 = arith.mulf %293, %290 : vector<4x64xf32>
    %295 = arith.addf %292, %294 : vector<4x64xf32>
    %c0_201 = arith.constant 0 : index
    %c0_202 = arith.constant 0 : index
    %296 = vector.load %arg20[%c0_201, %c0_202] : memref<4x64xf32, #tpu.memory_space<vmem>>, vector<4x64xf32>
    %297 = arith.addf %295, %296 : vector<4x64xf32>
    %c0_203 = arith.constant 0 : index
    %c0_204 = arith.constant 0 : index
    %c0_205 = arith.constant 0 : index
    %298 = vector.load %arg21[%c0_203, %c0_204, %c0_205] : memref<2x1x64xf32, #tpu.memory_space<vmem>>, vector<1x1x64xf32>
    %299 = vector.shape_cast %298 : vector<1x1x64xf32> to vector<1x64xf32>
    %c0_206 = arith.constant 0 : index
    %c0_207 = arith.constant 0 : index
    %c0_208 = arith.constant 0 : index
    %300 = vector.load %arg22[%c0_206, %c0_207, %c0_208] : memref<2x1x64xf32, #tpu.memory_space<vmem>>, vector<1x1x64xf32>
    %301 = vector.shape_cast %300 : vector<1x1x64xf32> to vector<1x64xf32>
    %cst_209 = arith.constant dense<0.000000e+00> : vector<4xf32>
    %302 = vector.multi_reduction <add>, %297, %cst_209 [1] : vector<4x64xf32> to vector<4xf32>
    %303 = vector.shape_cast %302 : vector<4xf32> to vector<4x1xf32>
    %cst_210 = arith.constant 6.400000e+01 : f32
    %304 = vector.broadcast %cst_210 : f32 to vector<4x1xf32>
    %305 = arith.divf %303, %304 : vector<4x1xf32>
    %306 = vector.broadcast %305 : vector<4x1xf32> to vector<4x64xf32>
    %307 = arith.subf %297, %306 : vector<4x64xf32>
    %308 = arith.mulf %307, %307 : vector<4x64xf32>
    %cst_211 = arith.constant dense<0.000000e+00> : vector<4xf32>
    %309 = vector.multi_reduction <add>, %308, %cst_211 [1] : vector<4x64xf32> to vector<4xf32>
    %310 = vector.shape_cast %309 : vector<4xf32> to vector<4x1xf32>
    %cst_212 = arith.constant 6.400000e+01 : f32
    %311 = vector.broadcast %cst_212 : f32 to vector<4x1xf32>
    %312 = arith.divf %310, %311 : vector<4x1xf32>
    %cst_213 = arith.constant 9.99999974E-6 : f32
    %313 = vector.broadcast %cst_213 : f32 to vector<4x1xf32>
    %314 = arith.addf %312, %313 : vector<4x1xf32>
    %315 = math.rsqrt %314 : vector<4x1xf32>
    %316 = vector.broadcast %315 : vector<4x1xf32> to vector<4x64xf32>
    %317 = arith.mulf %307, %316 : vector<4x64xf32>
    %318 = vector.broadcast %299 : vector<1x64xf32> to vector<4x64xf32>
    %319 = arith.mulf %317, %318 : vector<4x64xf32>
    %320 = vector.broadcast %301 : vector<1x64xf32> to vector<4x64xf32>
    %321 = arith.addf %319, %320 : vector<4x64xf32>
    %322 = arith.truncf %321 : vector<4x64xf32> to vector<4x64xbf16>
    %c0_214 = arith.constant 0 : index
    %c0_215 = arith.constant 0 : index
    %c0_216 = arith.constant 0 : index
    %323 = vector.load %arg23[%c0_214, %c0_215, %c0_216] : memref<2x64x64xbf16, #tpu.memory_space<vmem>>, vector<1x64x64xbf16>
    %324 = vector.shape_cast %323 : vector<1x64x64xbf16> to vector<64x64xbf16>
    %cst_217 = arith.constant dense<0.000000e+00> : vector<4x64xf32>
    %325 = tpu.matmul %322, %324, %cst_217 {dimension_numbers = #tpu.dot_dimension_numbers<[1], [0], [0], [1], [0, 0, 1, 1], [], []>} : vector<4x64xbf16>, vector<64x64xbf16>, vector<4x64xf32> -> vector<4x64xf32>
    %c0_218 = arith.constant 0 : index
    %c0_219 = arith.constant 0 : index
    %c0_220 = arith.constant 0 : index
    %326 = vector.load %arg26[%c0_218, %c0_219, %c0_220] : memref<2x1x64xf32, #tpu.memory_space<vmem>>, vector<1x1x64xf32>
    %327 = vector.shape_cast %326 : vector<1x1x64xf32> to vector<1x64xf32>
    %328 = vector.broadcast %327 : vector<1x64xf32> to vector<4x64xf32>
    %329 = arith.addf %325, %328 : vector<4x64xf32>
    %c0_221 = arith.constant 0 : index
    %c0_222 = arith.constant 0 : index
    %c0_223 = arith.constant 0 : index
    %330 = vector.load %arg24[%c0_221, %c0_222, %c0_223] : memref<2x64x64xbf16, #tpu.memory_space<vmem>>, vector<1x64x64xbf16>
    %331 = vector.shape_cast %330 : vector<1x64x64xbf16> to vector<64x64xbf16>
    %cst_224 = arith.constant dense<0.000000e+00> : vector<4x64xf32>
    %332 = tpu.matmul %322, %331, %cst_224 {dimension_numbers = #tpu.dot_dimension_numbers<[1], [0], [0], [1], [0, 0, 1, 1], [], []>} : vector<4x64xbf16>, vector<64x64xbf16>, vector<4x64xf32> -> vector<4x64xf32>
    %c0_225 = arith.constant 0 : index
    %c0_226 = arith.constant 0 : index
    %c0_227 = arith.constant 0 : index
    %333 = vector.load %arg27[%c0_225, %c0_226, %c0_227] : memref<2x1x64xf32, #tpu.memory_space<vmem>>, vector<1x1x64xf32>
    %334 = vector.shape_cast %333 : vector<1x1x64xf32> to vector<1x64xf32>
    %335 = vector.broadcast %334 : vector<1x64xf32> to vector<4x64xf32>
    %336 = arith.addf %332, %335 : vector<4x64xf32>
    %c0_228 = arith.constant 0 : index
    %c0_229 = arith.constant 0 : index
    %c0_230 = arith.constant 0 : index
    %337 = vector.load %arg25[%c0_228, %c0_229, %c0_230] : memref<2x64x64xbf16, #tpu.memory_space<vmem>>, vector<1x64x64xbf16>
    %338 = vector.shape_cast %337 : vector<1x64x64xbf16> to vector<64x64xbf16>
    %cst_231 = arith.constant dense<0.000000e+00> : vector<4x64xf32>
    %339 = tpu.matmul %322, %338, %cst_231 {dimension_numbers = #tpu.dot_dimension_numbers<[1], [0], [0], [1], [0, 0, 1, 1], [], []>} : vector<4x64xbf16>, vector<64x64xbf16>, vector<4x64xf32> -> vector<4x64xf32>
    %c0_232 = arith.constant 0 : index
    %c0_233 = arith.constant 0 : index
    %c0_234 = arith.constant 0 : index
    %340 = vector.load %arg28[%c0_232, %c0_233, %c0_234] : memref<2x1x64xf32, #tpu.memory_space<vmem>>, vector<1x1x64xf32>
    %341 = vector.shape_cast %340 : vector<1x1x64xf32> to vector<1x64xf32>
    %342 = vector.broadcast %341 : vector<1x64xf32> to vector<4x64xf32>
    %343 = arith.addf %339, %342 : vector<4x64xf32>
    %344 = arith.truncf %329 : vector<4x64xf32> to vector<4x64xbf16>
    %345 = arith.truncf %336 : vector<4x64xf32> to vector<4x64xbf16>
    %346 = arith.truncf %343 : vector<4x64xf32> to vector<4x64xbf16>
    %347 = vector.extract_strided_slice %344 {offsets = [0, 0], sizes = [4, 16], strides = [1, 1]} : vector<4x64xbf16> to vector<4x16xbf16>
    %348 = vector.extract_strided_slice %345 {offsets = [0, 0], sizes = [4, 16], strides = [1, 1]} : vector<4x64xbf16> to vector<4x16xbf16>
    %cst_235 = arith.constant dense<0.000000e+00> : vector<4x4xf32>
    %349 = tpu.matmul %347, %348, %cst_235 {dimension_numbers = #tpu.dot_dimension_numbers<[1], [1], [0], [0], [0, 0, 1, 0], [], []>} : vector<4x16xbf16>, vector<4x16xbf16>, vector<4x4xf32> -> vector<4x4xf32>
    %cst_236 = arith.constant 2.500000e-01 : f32
    %350 = vector.broadcast %cst_236 : f32 to vector<4x4xf32>
    %351 = arith.mulf %349, %350 : vector<4x4xf32>
    %cst_237 = arith.constant dense<0xFF800000> : vector<4xf32>
    %352 = vector.multi_reduction <maximumf>, %351, %cst_237 [1] : vector<4x4xf32> to vector<4xf32>
    %353 = vector.shape_cast %352 : vector<4xf32> to vector<4x1xf32>
    %354 = vector.broadcast %353 : vector<4x1xf32> to vector<4x4xf32>
    %355 = arith.subf %351, %354 : vector<4x4xf32>
    %356 = math.exp %355 : vector<4x4xf32>
    %cst_238 = arith.constant dense<0.000000e+00> : vector<4xf32>
    %357 = vector.multi_reduction <add>, %356, %cst_238 [1] : vector<4x4xf32> to vector<4xf32>
    %358 = vector.shape_cast %357 : vector<4xf32> to vector<4x1xf32>
    %359 = vector.broadcast %358 : vector<4x1xf32> to vector<4x4xf32>
    %360 = arith.divf %356, %359 : vector<4x4xf32>
    %361 = arith.truncf %360 : vector<4x4xf32> to vector<4x4xbf16>
    %362 = vector.extract_strided_slice %346 {offsets = [0, 0], sizes = [4, 16], strides = [1, 1]} : vector<4x64xbf16> to vector<4x16xbf16>
    %cst_239 = arith.constant dense<0.000000e+00> : vector<4x16xf32>
    %363 = tpu.matmul %361, %362, %cst_239 {dimension_numbers = #tpu.dot_dimension_numbers<[1], [0], [0], [1], [0, 0, 1, 1], [], []>} : vector<4x4xbf16>, vector<4x16xbf16>, vector<4x16xf32> -> vector<4x16xf32>
    %c0_240 = arith.constant 0 : index
    %c0_241 = arith.constant 0 : index
    %364 = vector.load %arg49[%c0_240, %c0_241] : memref<4x64xf32, #tpu.memory_space<vmem>>, vector<4x16xf32>
    tpu.vector_store %arg49[%c0_240, %c0_241], %363 {strides = array<i32>} : memref<4x64xf32, #tpu.memory_space<vmem>>, vector<4x16xf32>,
    %365 = vector.extract_strided_slice %344 {offsets = [0, 16], sizes = [4, 16], strides = [1, 1]} : vector<4x64xbf16> to vector<4x16xbf16>
    %366 = vector.extract_strided_slice %345 {offsets = [0, 16], sizes = [4, 16], strides = [1, 1]} : vector<4x64xbf16> to vector<4x16xbf16>
    %cst_242 = arith.constant dense<0.000000e+00> : vector<4x4xf32>
    %367 = tpu.matmul %365, %366, %cst_242 {dimension_numbers = #tpu.dot_dimension_numbers<[1], [1], [0], [0], [0, 0, 1, 0], [], []>} : vector<4x16xbf16>, vector<4x16xbf16>, vector<4x4xf32> -> vector<4x4xf32>
    %cst_243 = arith.constant 2.500000e-01 : f32
    %368 = vector.broadcast %cst_243 : f32 to vector<4x4xf32>
    %369 = arith.mulf %367, %368 : vector<4x4xf32>
    %cst_244 = arith.constant dense<0xFF800000> : vector<4xf32>
    %370 = vector.multi_reduction <maximumf>, %369, %cst_244 [1] : vector<4x4xf32> to vector<4xf32>
    %371 = vector.shape_cast %370 : vector<4xf32> to vector<4x1xf32>
    %372 = vector.broadcast %371 : vector<4x1xf32> to vector<4x4xf32>
    %373 = arith.subf %369, %372 : vector<4x4xf32>
    %374 = math.exp %373 : vector<4x4xf32>
    %cst_245 = arith.constant dense<0.000000e+00> : vector<4xf32>
    %375 = vector.multi_reduction <add>, %374, %cst_245 [1] : vector<4x4xf32> to vector<4xf32>
    %376 = vector.shape_cast %375 : vector<4xf32> to vector<4x1xf32>
    %377 = vector.broadcast %376 : vector<4x1xf32> to vector<4x4xf32>
    %378 = arith.divf %374, %377 : vector<4x4xf32>
    %379 = arith.truncf %378 : vector<4x4xf32> to vector<4x4xbf16>
    %380 = vector.extract_strided_slice %346 {offsets = [0, 16], sizes = [4, 16], strides = [1, 1]} : vector<4x64xbf16> to vector<4x16xbf16>
    %cst_246 = arith.constant dense<0.000000e+00> : vector<4x16xf32>
    %381 = tpu.matmul %379, %380, %cst_246 {dimension_numbers = #tpu.dot_dimension_numbers<[1], [0], [0], [1], [0, 0, 1, 1], [], []>} : vector<4x4xbf16>, vector<4x16xbf16>, vector<4x16xf32> -> vector<4x16xf32>
    %c0_247 = arith.constant 0 : index
    %c16 = arith.constant 16 : index
    %382 = vector.load %arg49[%c0_247, %c16] : memref<4x64xf32, #tpu.memory_space<vmem>>, vector<4x16xf32>
    tpu.vector_store %arg49[%c0_247, %c16], %381 {strides = array<i32>} : memref<4x64xf32, #tpu.memory_space<vmem>>, vector<4x16xf32>,
    %383 = vector.extract_strided_slice %344 {offsets = [0, 32], sizes = [4, 16], strides = [1, 1]} : vector<4x64xbf16> to vector<4x16xbf16>
    %384 = vector.extract_strided_slice %345 {offsets = [0, 32], sizes = [4, 16], strides = [1, 1]} : vector<4x64xbf16> to vector<4x16xbf16>
    %cst_248 = arith.constant dense<0.000000e+00> : vector<4x4xf32>
    %385 = tpu.matmul %383, %384, %cst_248 {dimension_numbers = #tpu.dot_dimension_numbers<[1], [1], [0], [0], [0, 0, 1, 0], [], []>} : vector<4x16xbf16>, vector<4x16xbf16>, vector<4x4xf32> -> vector<4x4xf32>
    %cst_249 = arith.constant 2.500000e-01 : f32
    %386 = vector.broadcast %cst_249 : f32 to vector<4x4xf32>
    %387 = arith.mulf %385, %386 : vector<4x4xf32>
    %cst_250 = arith.constant dense<0xFF800000> : vector<4xf32>
    %388 = vector.multi_reduction <maximumf>, %387, %cst_250 [1] : vector<4x4xf32> to vector<4xf32>
    %389 = vector.shape_cast %388 : vector<4xf32> to vector<4x1xf32>
    %390 = vector.broadcast %389 : vector<4x1xf32> to vector<4x4xf32>
    %391 = arith.subf %387, %390 : vector<4x4xf32>
    %392 = math.exp %391 : vector<4x4xf32>
    %cst_251 = arith.constant dense<0.000000e+00> : vector<4xf32>
    %393 = vector.multi_reduction <add>, %392, %cst_251 [1] : vector<4x4xf32> to vector<4xf32>
    %394 = vector.shape_cast %393 : vector<4xf32> to vector<4x1xf32>
    %395 = vector.broadcast %394 : vector<4x1xf32> to vector<4x4xf32>
    %396 = arith.divf %392, %395 : vector<4x4xf32>
    %397 = arith.truncf %396 : vector<4x4xf32> to vector<4x4xbf16>
    %398 = vector.extract_strided_slice %346 {offsets = [0, 32], sizes = [4, 16], strides = [1, 1]} : vector<4x64xbf16> to vector<4x16xbf16>
    %cst_252 = arith.constant dense<0.000000e+00> : vector<4x16xf32>
    %399 = tpu.matmul %397, %398, %cst_252 {dimension_numbers = #tpu.dot_dimension_numbers<[1], [0], [0], [1], [0, 0, 1, 1], [], []>} : vector<4x4xbf16>, vector<4x16xbf16>, vector<4x16xf32> -> vector<4x16xf32>
    %c0_253 = arith.constant 0 : index
    %c32 = arith.constant 32 : index
    %400 = vector.load %arg49[%c0_253, %c32] : memref<4x64xf32, #tpu.memory_space<vmem>>, vector<4x16xf32>
    tpu.vector_store %arg49[%c0_253, %c32], %399 {strides = array<i32>} : memref<4x64xf32, #tpu.memory_space<vmem>>, vector<4x16xf32>,
    %401 = vector.extract_strided_slice %344 {offsets = [0, 48], sizes = [4, 16], strides = [1, 1]} : vector<4x64xbf16> to vector<4x16xbf16>
    %402 = vector.extract_strided_slice %345 {offsets = [0, 48], sizes = [4, 16], strides = [1, 1]} : vector<4x64xbf16> to vector<4x16xbf16>
    %cst_254 = arith.constant dense<0.000000e+00> : vector<4x4xf32>
    %403 = tpu.matmul %401, %402, %cst_254 {dimension_numbers = #tpu.dot_dimension_numbers<[1], [1], [0], [0], [0, 0, 1, 0], [], []>} : vector<4x16xbf16>, vector<4x16xbf16>, vector<4x4xf32> -> vector<4x4xf32>
    %cst_255 = arith.constant 2.500000e-01 : f32
    %404 = vector.broadcast %cst_255 : f32 to vector<4x4xf32>
    %405 = arith.mulf %403, %404 : vector<4x4xf32>
    %cst_256 = arith.constant dense<0xFF800000> : vector<4xf32>
    %406 = vector.multi_reduction <maximumf>, %405, %cst_256 [1] : vector<4x4xf32> to vector<4xf32>
    %407 = vector.shape_cast %406 : vector<4xf32> to vector<4x1xf32>
    %408 = vector.broadcast %407 : vector<4x1xf32> to vector<4x4xf32>
    %409 = arith.subf %405, %408 : vector<4x4xf32>
    %410 = math.exp %409 : vector<4x4xf32>
    %cst_257 = arith.constant dense<0.000000e+00> : vector<4xf32>
    %411 = vector.multi_reduction <add>, %410, %cst_257 [1] : vector<4x4xf32> to vector<4xf32>
    %412 = vector.shape_cast %411 : vector<4xf32> to vector<4x1xf32>
    %413 = vector.broadcast %412 : vector<4x1xf32> to vector<4x4xf32>
    %414 = arith.divf %410, %413 : vector<4x4xf32>
    %415 = arith.truncf %414 : vector<4x4xf32> to vector<4x4xbf16>
    %416 = vector.extract_strided_slice %346 {offsets = [0, 48], sizes = [4, 16], strides = [1, 1]} : vector<4x64xbf16> to vector<4x16xbf16>
    %cst_258 = arith.constant dense<0.000000e+00> : vector<4x16xf32>
    %417 = tpu.matmul %415, %416, %cst_258 {dimension_numbers = #tpu.dot_dimension_numbers<[1], [0], [0], [1], [0, 0, 1, 1], [], []>} : vector<4x4xbf16>, vector<4x16xbf16>, vector<4x16xf32> -> vector<4x16xf32>
    %c0_259 = arith.constant 0 : index
    %c48 = arith.constant 48 : index
    %418 = vector.load %arg49[%c0_259, %c48] : memref<4x64xf32, #tpu.memory_space<vmem>>, vector<4x16xf32>
    tpu.vector_store %arg49[%c0_259, %c48], %417 {strides = array<i32>} : memref<4x64xf32, #tpu.memory_space<vmem>>, vector<4x16xf32>,
    %c0_260 = arith.constant 0 : index
    %c0_261 = arith.constant 0 : index
    %419 = vector.load %arg49[%c0_260, %c0_261] : memref<4x64xf32, #tpu.memory_space<vmem>>, vector<4x64xf32>
    %420 = arith.truncf %419 : vector<4x64xf32> to vector<4x64xbf16>
    %c0_262 = arith.constant 0 : index
    %c0_263 = arith.constant 0 : index
    %c0_264 = arith.constant 0 : index
    %421 = vector.load %arg29[%c0_262, %c0_263, %c0_264] : memref<2x64x64xbf16, #tpu.memory_space<vmem>>, vector<1x64x64xbf16>
    %422 = vector.shape_cast %421 : vector<1x64x64xbf16> to vector<64x64xbf16>
    %cst_265 = arith.constant dense<0.000000e+00> : vector<4x64xf32>
    %423 = tpu.matmul %420, %422, %cst_265 {dimension_numbers = #tpu.dot_dimension_numbers<[1], [0], [0], [1], [0, 0, 1, 1], [], []>} : vector<4x64xbf16>, vector<64x64xbf16>, vector<4x64xf32> -> vector<4x64xf32>
    %c0_266 = arith.constant 0 : index
    %c0_267 = arith.constant 0 : index
    %c0_268 = arith.constant 0 : index
    %424 = vector.load %arg30[%c0_266, %c0_267, %c0_268] : memref<2x1x64xf32, #tpu.memory_space<vmem>>, vector<1x1x64xf32>
    %425 = vector.shape_cast %424 : vector<1x1x64xf32> to vector<1x64xf32>
    %426 = vector.broadcast %425 : vector<1x64xf32> to vector<4x64xf32>
    %427 = arith.addf %423, %426 : vector<4x64xf32>
    %428 = arith.truncf %297 : vector<4x64xf32> to vector<4x64xbf16>
    %c0_269 = arith.constant 0 : index
    %c0_270 = arith.constant 0 : index
    %c0_271 = arith.constant 0 : index
    %429 = vector.load %arg31[%c0_269, %c0_270, %c0_271] : memref<2x64x64xbf16, #tpu.memory_space<vmem>>, vector<1x64x64xbf16>
    %430 = vector.shape_cast %429 : vector<1x64x64xbf16> to vector<64x64xbf16>
    %cst_272 = arith.constant dense<0.000000e+00> : vector<4x64xf32>
    %431 = tpu.matmul %428, %430, %cst_272 {dimension_numbers = #tpu.dot_dimension_numbers<[1], [0], [0], [1], [0, 0, 1, 1], [], []>} : vector<4x64xbf16>, vector<64x64xbf16>, vector<4x64xf32> -> vector<4x64xf32>
    %c0_273 = arith.constant 0 : index
    %c0_274 = arith.constant 0 : index
    %c0_275 = arith.constant 0 : index
    %432 = vector.load %arg32[%c0_273, %c0_274, %c0_275] : memref<2x1x64xf32, #tpu.memory_space<vmem>>, vector<1x1x64xf32>
    %433 = vector.shape_cast %432 : vector<1x1x64xf32> to vector<1x64xf32>
    %434 = vector.broadcast %433 : vector<1x64xf32> to vector<4x64xf32>
    %435 = arith.addf %431, %434 : vector<4x64xf32>
    %436 = arith.negf %435 : vector<4x64xf32>
    %437 = math.exp %436 : vector<4x64xf32>
    %cst_276 = arith.constant 1.000000e+00 : f32
    %438 = vector.broadcast %cst_276 : f32 to vector<4x64xf32>
    %439 = arith.addf %438, %437 : vector<4x64xf32>
    %440 = arith.divf %438, %439 : vector<4x64xf32>
    %441 = arith.mulf %427, %440 : vector<4x64xf32>
    %442 = arith.addf %297, %441 : vector<4x64xf32>
    %c0_277 = arith.constant 0 : index
    %c0_278 = arith.constant 0 : index
    %c0_279 = arith.constant 0 : index
    %443 = vector.load %arg33[%c0_277, %c0_278, %c0_279] : memref<2x1x64xf32, #tpu.memory_space<vmem>>, vector<1x1x64xf32>
    %444 = vector.shape_cast %443 : vector<1x1x64xf32> to vector<1x64xf32>
    %c0_280 = arith.constant 0 : index
    %c0_281 = arith.constant 0 : index
    %c0_282 = arith.constant 0 : index
    %445 = vector.load %arg34[%c0_280, %c0_281, %c0_282] : memref<2x1x64xf32, #tpu.memory_space<vmem>>, vector<1x1x64xf32>
    %446 = vector.shape_cast %445 : vector<1x1x64xf32> to vector<1x64xf32>
    %cst_283 = arith.constant dense<0.000000e+00> : vector<4xf32>
    %447 = vector.multi_reduction <add>, %442, %cst_283 [1] : vector<4x64xf32> to vector<4xf32>
    %448 = vector.shape_cast %447 : vector<4xf32> to vector<4x1xf32>
    %cst_284 = arith.constant 6.400000e+01 : f32
    %449 = vector.broadcast %cst_284 : f32 to vector<4x1xf32>
    %450 = arith.divf %448, %449 : vector<4x1xf32>
    %451 = vector.broadcast %450 : vector<4x1xf32> to vector<4x64xf32>
    %452 = arith.subf %442, %451 : vector<4x64xf32>
    %453 = arith.mulf %452, %452 : vector<4x64xf32>
    %cst_285 = arith.constant dense<0.000000e+00> : vector<4xf32>
    %454 = vector.multi_reduction <add>, %453, %cst_285 [1] : vector<4x64xf32> to vector<4xf32>
    %455 = vector.shape_cast %454 : vector<4xf32> to vector<4x1xf32>
    %cst_286 = arith.constant 6.400000e+01 : f32
    %456 = vector.broadcast %cst_286 : f32 to vector<4x1xf32>
    %457 = arith.divf %455, %456 : vector<4x1xf32>
    %cst_287 = arith.constant 9.99999974E-6 : f32
    %458 = vector.broadcast %cst_287 : f32 to vector<4x1xf32>
    %459 = arith.addf %457, %458 : vector<4x1xf32>
    %460 = math.rsqrt %459 : vector<4x1xf32>
    %461 = vector.broadcast %460 : vector<4x1xf32> to vector<4x64xf32>
    %462 = arith.mulf %452, %461 : vector<4x64xf32>
    %463 = vector.broadcast %444 : vector<1x64xf32> to vector<4x64xf32>
    %464 = arith.mulf %462, %463 : vector<4x64xf32>
    %465 = vector.broadcast %446 : vector<1x64xf32> to vector<4x64xf32>
    %466 = arith.addf %464, %465 : vector<4x64xf32>
    %467 = arith.truncf %466 : vector<4x64xf32> to vector<4x64xbf16>
    %c0_288 = arith.constant 0 : index
    %c0_289 = arith.constant 0 : index
    %c0_290 = arith.constant 0 : index
    %468 = vector.load %arg35[%c0_288, %c0_289, %c0_290] : memref<2x64x256xbf16, #tpu.memory_space<vmem>>, vector<1x64x256xbf16>
    %469 = vector.shape_cast %468 : vector<1x64x256xbf16> to vector<64x256xbf16>
    %cst_291 = arith.constant dense<0.000000e+00> : vector<4x256xf32>
    %470 = tpu.matmul %467, %469, %cst_291 {dimension_numbers = #tpu.dot_dimension_numbers<[1], [0], [0], [1], [0, 0, 1, 1], [], []>} : vector<4x64xbf16>, vector<64x256xbf16>, vector<4x256xf32> -> vector<4x256xf32>
    %c0_292 = arith.constant 0 : index
    %c0_293 = arith.constant 0 : index
    %c0_294 = arith.constant 0 : index
    %471 = vector.load %arg36[%c0_292, %c0_293, %c0_294] : memref<2x1x256xf32, #tpu.memory_space<vmem>>, vector<1x1x256xf32>
    %472 = vector.shape_cast %471 : vector<1x1x256xf32> to vector<1x256xf32>
    %473 = vector.broadcast %472 : vector<1x256xf32> to vector<4x256xf32>
    %474 = arith.addf %470, %473 : vector<4x256xf32>
    %cst_295 = arith.constant 5.000000e-01 : f32
    %475 = vector.broadcast %cst_295 : f32 to vector<4x256xf32>
    %476 = arith.mulf %475, %474 : vector<4x256xf32>
    %cst_296 = arith.constant 0.707106769 : f32
    %477 = vector.broadcast %cst_296 : f32 to vector<4x256xf32>
    %478 = arith.mulf %474, %477 : vector<4x256xf32>
    %479 = math.absf %478 : vector<4x256xf32>
    %cst_297 = arith.constant 0.327591091 : f32
    %480 = vector.broadcast %cst_297 : f32 to vector<4x256xf32>
    %481 = arith.mulf %480, %479 : vector<4x256xf32>
    %cst_298 = arith.constant 1.000000e+00 : f32
    %482 = vector.broadcast %cst_298 : f32 to vector<4x256xf32>
    %483 = arith.addf %482, %481 : vector<4x256xf32>
    %cst_299 = arith.constant 1.000000e+00 : f32
    %484 = vector.broadcast %cst_299 : f32 to vector<4x256xf32>
    %485 = arith.divf %484, %483 : vector<4x256xf32>
    %cst_300 = arith.constant 1.06140542 : f32
    %486 = vector.broadcast %cst_300 : f32 to vector<4x256xf32>
    %487 = arith.mulf %486, %485 : vector<4x256xf32>
    %cst_301 = arith.constant -1.45315206 : f32
    %488 = vector.broadcast %cst_301 : f32 to vector<4x256xf32>
    %489 = arith.addf %487, %488 : vector<4x256xf32>
    %490 = arith.mulf %489, %485 : vector<4x256xf32>
    %cst_302 = arith.constant 1.42141378 : f32
    %491 = vector.broadcast %cst_302 : f32 to vector<4x256xf32>
    %492 = arith.addf %490, %491 : vector<4x256xf32>
    %493 = arith.mulf %492, %485 : vector<4x256xf32>
    %cst_303 = arith.constant -0.284496725 : f32
    %494 = vector.broadcast %cst_303 : f32 to vector<4x256xf32>
    %495 = arith.addf %493, %494 : vector<4x256xf32>
    %496 = arith.mulf %495, %485 : vector<4x256xf32>
    %cst_304 = arith.constant 0.254829586 : f32
    %497 = vector.broadcast %cst_304 : f32 to vector<4x256xf32>
    %498 = arith.addf %496, %497 : vector<4x256xf32>
    %499 = arith.mulf %498, %485 : vector<4x256xf32>
    %cst_305 = arith.constant 0.000000e+00 : f32
    %500 = vector.broadcast %cst_305 : f32 to vector<4x256xf32>
    %501 = arith.subf %500, %479 : vector<4x256xf32>
    %502 = arith.mulf %501, %479 : vector<4x256xf32>
    %503 = math.exp %502 : vector<4x256xf32>
    %504 = arith.mulf %499, %503 : vector<4x256xf32>
    %cst_306 = arith.constant 1.000000e+00 : f32
    %505 = vector.broadcast %cst_306 : f32 to vector<4x256xf32>
    %506 = arith.subf %505, %504 : vector<4x256xf32>
    %cst_307 = arith.constant 0.000000e+00 : f32
    %507 = vector.broadcast %cst_307 : f32 to vector<4x256xf32>
    %508 = arith.cmpf oge, %478, %507 : vector<4x256xf32>
    %cst_308 = arith.constant 0.000000e+00 : f32
    %509 = vector.broadcast %cst_308 : f32 to vector<4x256xf32>
    %510 = arith.subf %509, %506 : vector<4x256xf32>
    %511 = arith.select %508, %506, %510 : vector<4x256xi1>, vector<4x256xf32>
    %cst_309 = arith.constant 1.000000e+00 : f32
    %512 = vector.broadcast %cst_309 : f32 to vector<4x256xf32>
    %513 = arith.addf %512, %511 : vector<4x256xf32>
    %514 = arith.mulf %476, %513 : vector<4x256xf32>
    %515 = arith.truncf %514 : vector<4x256xf32> to vector<4x256xbf16>
    %c0_310 = arith.constant 0 : index
    %c0_311 = arith.constant 0 : index
    %c0_312 = arith.constant 0 : index
    %516 = vector.load %arg37[%c0_310, %c0_311, %c0_312] : memref<2x256x64xbf16, #tpu.memory_space<vmem>>, vector<1x256x64xbf16>
    %517 = vector.shape_cast %516 : vector<1x256x64xbf16> to vector<256x64xbf16>
    %cst_313 = arith.constant dense<0.000000e+00> : vector<4x64xf32>
    %518 = tpu.matmul %515, %517, %cst_313 {dimension_numbers = #tpu.dot_dimension_numbers<[1], [0], [0], [1], [0, 0, 1, 1], [], []>} : vector<4x256xbf16>, vector<256x64xbf16>, vector<4x64xf32> -> vector<4x64xf32>
    %519 = arith.addf %442, %518 : vector<4x64xf32>
    %c0_314 = arith.constant 0 : index
    %c0_315 = arith.constant 0 : index
    %c0_316 = arith.constant 0 : index
    %520 = vector.load %arg38[%c0_314, %c0_315, %c0_316] : memref<2x1x64xf32, #tpu.memory_space<vmem>>, vector<1x1x64xf32>
    %521 = vector.shape_cast %520 : vector<1x1x64xf32> to vector<1x64xf32>
    %522 = vector.broadcast %521 : vector<1x64xf32> to vector<4x64xf32>
    %523 = arith.addf %519, %522 : vector<4x64xf32>
    %c1_317 = arith.constant 1 : index
    %c0_318 = arith.constant 0 : index
    %c0_319 = arith.constant 0 : index
    %524 = vector.load %arg21[%c1_317, %c0_318, %c0_319] : memref<2x1x64xf32, #tpu.memory_space<vmem>>, vector<1x1x64xf32>
    %525 = vector.shape_cast %524 : vector<1x1x64xf32> to vector<1x64xf32>
    %c1_320 = arith.constant 1 : index
    %c0_321 = arith.constant 0 : index
    %c0_322 = arith.constant 0 : index
    %526 = vector.load %arg22[%c1_320, %c0_321, %c0_322] : memref<2x1x64xf32, #tpu.memory_space<vmem>>, vector<1x1x64xf32>
    %527 = vector.shape_cast %526 : vector<1x1x64xf32> to vector<1x64xf32>
    %cst_323 = arith.constant dense<0.000000e+00> : vector<4xf32>
    %528 = vector.multi_reduction <add>, %523, %cst_323 [1] : vector<4x64xf32> to vector<4xf32>
    %529 = vector.shape_cast %528 : vector<4xf32> to vector<4x1xf32>
    %cst_324 = arith.constant 6.400000e+01 : f32
    %530 = vector.broadcast %cst_324 : f32 to vector<4x1xf32>
    %531 = arith.divf %529, %530 : vector<4x1xf32>
    %532 = vector.broadcast %531 : vector<4x1xf32> to vector<4x64xf32>
    %533 = arith.subf %523, %532 : vector<4x64xf32>
    %534 = arith.mulf %533, %533 : vector<4x64xf32>
    %cst_325 = arith.constant dense<0.000000e+00> : vector<4xf32>
    %535 = vector.multi_reduction <add>, %534, %cst_325 [1] : vector<4x64xf32> to vector<4xf32>
    %536 = vector.shape_cast %535 : vector<4xf32> to vector<4x1xf32>
    %cst_326 = arith.constant 6.400000e+01 : f32
    %537 = vector.broadcast %cst_326 : f32 to vector<4x1xf32>
    %538 = arith.divf %536, %537 : vector<4x1xf32>
    %cst_327 = arith.constant 9.99999974E-6 : f32
    %539 = vector.broadcast %cst_327 : f32 to vector<4x1xf32>
    %540 = arith.addf %538, %539 : vector<4x1xf32>
    %541 = math.rsqrt %540 : vector<4x1xf32>
    %542 = vector.broadcast %541 : vector<4x1xf32> to vector<4x64xf32>
    %543 = arith.mulf %533, %542 : vector<4x64xf32>
    %544 = vector.broadcast %525 : vector<1x64xf32> to vector<4x64xf32>
    %545 = arith.mulf %543, %544 : vector<4x64xf32>
    %546 = vector.broadcast %527 : vector<1x64xf32> to vector<4x64xf32>
    %547 = arith.addf %545, %546 : vector<4x64xf32>
    %548 = arith.truncf %547 : vector<4x64xf32> to vector<4x64xbf16>
    %c1_328 = arith.constant 1 : index
    %c0_329 = arith.constant 0 : index
    %c0_330 = arith.constant 0 : index
    %549 = vector.load %arg23[%c1_328, %c0_329, %c0_330] : memref<2x64x64xbf16, #tpu.memory_space<vmem>>, vector<1x64x64xbf16>
    %550 = vector.shape_cast %549 : vector<1x64x64xbf16> to vector<64x64xbf16>
    %cst_331 = arith.constant dense<0.000000e+00> : vector<4x64xf32>
    %551 = tpu.matmul %548, %550, %cst_331 {dimension_numbers = #tpu.dot_dimension_numbers<[1], [0], [0], [1], [0, 0, 1, 1], [], []>} : vector<4x64xbf16>, vector<64x64xbf16>, vector<4x64xf32> -> vector<4x64xf32>
    %c1_332 = arith.constant 1 : index
    %c0_333 = arith.constant 0 : index
    %c0_334 = arith.constant 0 : index
    %552 = vector.load %arg26[%c1_332, %c0_333, %c0_334] : memref<2x1x64xf32, #tpu.memory_space<vmem>>, vector<1x1x64xf32>
    %553 = vector.shape_cast %552 : vector<1x1x64xf32> to vector<1x64xf32>
    %554 = vector.broadcast %553 : vector<1x64xf32> to vector<4x64xf32>
    %555 = arith.addf %551, %554 : vector<4x64xf32>
    %c1_335 = arith.constant 1 : index
    %c0_336 = arith.constant 0 : index
    %c0_337 = arith.constant 0 : index
    %556 = vector.load %arg24[%c1_335, %c0_336, %c0_337] : memref<2x64x64xbf16, #tpu.memory_space<vmem>>, vector<1x64x64xbf16>
    %557 = vector.shape_cast %556 : vector<1x64x64xbf16> to vector<64x64xbf16>
    %cst_338 = arith.constant dense<0.000000e+00> : vector<4x64xf32>
    %558 = tpu.matmul %548, %557, %cst_338 {dimension_numbers = #tpu.dot_dimension_numbers<[1], [0], [0], [1], [0, 0, 1, 1], [], []>} : vector<4x64xbf16>, vector<64x64xbf16>, vector<4x64xf32> -> vector<4x64xf32>
    %c1_339 = arith.constant 1 : index
    %c0_340 = arith.constant 0 : index
    %c0_341 = arith.constant 0 : index
    %559 = vector.load %arg27[%c1_339, %c0_340, %c0_341] : memref<2x1x64xf32, #tpu.memory_space<vmem>>, vector<1x1x64xf32>
    %560 = vector.shape_cast %559 : vector<1x1x64xf32> to vector<1x64xf32>
    %561 = vector.broadcast %560 : vector<1x64xf32> to vector<4x64xf32>
    %562 = arith.addf %558, %561 : vector<4x64xf32>
    %c1_342 = arith.constant 1 : index
    %c0_343 = arith.constant 0 : index
    %c0_344 = arith.constant 0 : index
    %563 = vector.load %arg25[%c1_342, %c0_343, %c0_344] : memref<2x64x64xbf16, #tpu.memory_space<vmem>>, vector<1x64x64xbf16>
    %564 = vector.shape_cast %563 : vector<1x64x64xbf16> to vector<64x64xbf16>
    %cst_345 = arith.constant dense<0.000000e+00> : vector<4x64xf32>
    %565 = tpu.matmul %548, %564, %cst_345 {dimension_numbers = #tpu.dot_dimension_numbers<[1], [0], [0], [1], [0, 0, 1, 1], [], []>} : vector<4x64xbf16>, vector<64x64xbf16>, vector<4x64xf32> -> vector<4x64xf32>
    %c1_346 = arith.constant 1 : index
    %c0_347 = arith.constant 0 : index
    %c0_348 = arith.constant 0 : index
    %566 = vector.load %arg28[%c1_346, %c0_347, %c0_348] : memref<2x1x64xf32, #tpu.memory_space<vmem>>, vector<1x1x64xf32>
    %567 = vector.shape_cast %566 : vector<1x1x64xf32> to vector<1x64xf32>
    %568 = vector.broadcast %567 : vector<1x64xf32> to vector<4x64xf32>
    %569 = arith.addf %565, %568 : vector<4x64xf32>
    %570 = arith.truncf %555 : vector<4x64xf32> to vector<4x64xbf16>
    %571 = arith.truncf %562 : vector<4x64xf32> to vector<4x64xbf16>
    %572 = arith.truncf %569 : vector<4x64xf32> to vector<4x64xbf16>
    %573 = vector.extract_strided_slice %570 {offsets = [0, 0], sizes = [4, 16], strides = [1, 1]} : vector<4x64xbf16> to vector<4x16xbf16>
    %574 = vector.extract_strided_slice %571 {offsets = [0, 0], sizes = [4, 16], strides = [1, 1]} : vector<4x64xbf16> to vector<4x16xbf16>
    %cst_349 = arith.constant dense<0.000000e+00> : vector<4x4xf32>
    %575 = tpu.matmul %573, %574, %cst_349 {dimension_numbers = #tpu.dot_dimension_numbers<[1], [1], [0], [0], [0, 0, 1, 0], [], []>} : vector<4x16xbf16>, vector<4x16xbf16>, vector<4x4xf32> -> vector<4x4xf32>
    %cst_350 = arith.constant 2.500000e-01 : f32
    %576 = vector.broadcast %cst_350 : f32 to vector<4x4xf32>
    %577 = arith.mulf %575, %576 : vector<4x4xf32>
    %cst_351 = arith.constant dense<0xFF800000> : vector<4xf32>
    %578 = vector.multi_reduction <maximumf>, %577, %cst_351 [1] : vector<4x4xf32> to vector<4xf32>
    %579 = vector.shape_cast %578 : vector<4xf32> to vector<4x1xf32>
    %580 = vector.broadcast %579 : vector<4x1xf32> to vector<4x4xf32>
    %581 = arith.subf %577, %580 : vector<4x4xf32>
    %582 = math.exp %581 : vector<4x4xf32>
    %cst_352 = arith.constant dense<0.000000e+00> : vector<4xf32>
    %583 = vector.multi_reduction <add>, %582, %cst_352 [1] : vector<4x4xf32> to vector<4xf32>
    %584 = vector.shape_cast %583 : vector<4xf32> to vector<4x1xf32>
    %585 = vector.broadcast %584 : vector<4x1xf32> to vector<4x4xf32>
    %586 = arith.divf %582, %585 : vector<4x4xf32>
    %587 = arith.truncf %586 : vector<4x4xf32> to vector<4x4xbf16>
    %588 = vector.extract_strided_slice %572 {offsets = [0, 0], sizes = [4, 16], strides = [1, 1]} : vector<4x64xbf16> to vector<4x16xbf16>
    %cst_353 = arith.constant dense<0.000000e+00> : vector<4x16xf32>
    %589 = tpu.matmul %587, %588, %cst_353 {dimension_numbers = #tpu.dot_dimension_numbers<[1], [0], [0], [1], [0, 0, 1, 1], [], []>} : vector<4x4xbf16>, vector<4x16xbf16>, vector<4x16xf32> -> vector<4x16xf32>
    %c0_354 = arith.constant 0 : index
    %c0_355 = arith.constant 0 : index
    %590 = vector.load %arg49[%c0_354, %c0_355] : memref<4x64xf32, #tpu.memory_space<vmem>>, vector<4x16xf32>
    tpu.vector_store %arg49[%c0_354, %c0_355], %589 {strides = array<i32>} : memref<4x64xf32, #tpu.memory_space<vmem>>, vector<4x16xf32>,
    %591 = vector.extract_strided_slice %570 {offsets = [0, 16], sizes = [4, 16], strides = [1, 1]} : vector<4x64xbf16> to vector<4x16xbf16>
    %592 = vector.extract_strided_slice %571 {offsets = [0, 16], sizes = [4, 16], strides = [1, 1]} : vector<4x64xbf16> to vector<4x16xbf16>
    %cst_356 = arith.constant dense<0.000000e+00> : vector<4x4xf32>
    %593 = tpu.matmul %591, %592, %cst_356 {dimension_numbers = #tpu.dot_dimension_numbers<[1], [1], [0], [0], [0, 0, 1, 0], [], []>} : vector<4x16xbf16>, vector<4x16xbf16>, vector<4x4xf32> -> vector<4x4xf32>
    %cst_357 = arith.constant 2.500000e-01 : f32
    %594 = vector.broadcast %cst_357 : f32 to vector<4x4xf32>
    %595 = arith.mulf %593, %594 : vector<4x4xf32>
    %cst_358 = arith.constant dense<0xFF800000> : vector<4xf32>
    %596 = vector.multi_reduction <maximumf>, %595, %cst_358 [1] : vector<4x4xf32> to vector<4xf32>
    %597 = vector.shape_cast %596 : vector<4xf32> to vector<4x1xf32>
    %598 = vector.broadcast %597 : vector<4x1xf32> to vector<4x4xf32>
    %599 = arith.subf %595, %598 : vector<4x4xf32>
    %600 = math.exp %599 : vector<4x4xf32>
    %cst_359 = arith.constant dense<0.000000e+00> : vector<4xf32>
    %601 = vector.multi_reduction <add>, %600, %cst_359 [1] : vector<4x4xf32> to vector<4xf32>
    %602 = vector.shape_cast %601 : vector<4xf32> to vector<4x1xf32>
    %603 = vector.broadcast %602 : vector<4x1xf32> to vector<4x4xf32>
    %604 = arith.divf %600, %603 : vector<4x4xf32>
    %605 = arith.truncf %604 : vector<4x4xf32> to vector<4x4xbf16>
    %606 = vector.extract_strided_slice %572 {offsets = [0, 16], sizes = [4, 16], strides = [1, 1]} : vector<4x64xbf16> to vector<4x16xbf16>
    %cst_360 = arith.constant dense<0.000000e+00> : vector<4x16xf32>
    %607 = tpu.matmul %605, %606, %cst_360 {dimension_numbers = #tpu.dot_dimension_numbers<[1], [0], [0], [1], [0, 0, 1, 1], [], []>} : vector<4x4xbf16>, vector<4x16xbf16>, vector<4x16xf32> -> vector<4x16xf32>
    %c0_361 = arith.constant 0 : index
    %c16_362 = arith.constant 16 : index
    %608 = vector.load %arg49[%c0_361, %c16_362] : memref<4x64xf32, #tpu.memory_space<vmem>>, vector<4x16xf32>
    tpu.vector_store %arg49[%c0_361, %c16_362], %607 {strides = array<i32>} : memref<4x64xf32, #tpu.memory_space<vmem>>, vector<4x16xf32>,
    %609 = vector.extract_strided_slice %570 {offsets = [0, 32], sizes = [4, 16], strides = [1, 1]} : vector<4x64xbf16> to vector<4x16xbf16>
    %610 = vector.extract_strided_slice %571 {offsets = [0, 32], sizes = [4, 16], strides = [1, 1]} : vector<4x64xbf16> to vector<4x16xbf16>
    %cst_363 = arith.constant dense<0.000000e+00> : vector<4x4xf32>
    %611 = tpu.matmul %609, %610, %cst_363 {dimension_numbers = #tpu.dot_dimension_numbers<[1], [1], [0], [0], [0, 0, 1, 0], [], []>} : vector<4x16xbf16>, vector<4x16xbf16>, vector<4x4xf32> -> vector<4x4xf32>
    %cst_364 = arith.constant 2.500000e-01 : f32
    %612 = vector.broadcast %cst_364 : f32 to vector<4x4xf32>
    %613 = arith.mulf %611, %612 : vector<4x4xf32>
    %cst_365 = arith.constant dense<0xFF800000> : vector<4xf32>
    %614 = vector.multi_reduction <maximumf>, %613, %cst_365 [1] : vector<4x4xf32> to vector<4xf32>
    %615 = vector.shape_cast %614 : vector<4xf32> to vector<4x1xf32>
    %616 = vector.broadcast %615 : vector<4x1xf32> to vector<4x4xf32>
    %617 = arith.subf %613, %616 : vector<4x4xf32>
    %618 = math.exp %617 : vector<4x4xf32>
    %cst_366 = arith.constant dense<0.000000e+00> : vector<4xf32>
    %619 = vector.multi_reduction <add>, %618, %cst_366 [1] : vector<4x4xf32> to vector<4xf32>
    %620 = vector.shape_cast %619 : vector<4xf32> to vector<4x1xf32>
    %621 = vector.broadcast %620 : vector<4x1xf32> to vector<4x4xf32>
    %622 = arith.divf %618, %621 : vector<4x4xf32>
    %623 = arith.truncf %622 : vector<4x4xf32> to vector<4x4xbf16>
    %624 = vector.extract_strided_slice %572 {offsets = [0, 32], sizes = [4, 16], strides = [1, 1]} : vector<4x64xbf16> to vector<4x16xbf16>
    %cst_367 = arith.constant dense<0.000000e+00> : vector<4x16xf32>
    %625 = tpu.matmul %623, %624, %cst_367 {dimension_numbers = #tpu.dot_dimension_numbers<[1], [0], [0], [1], [0, 0, 1, 1], [], []>} : vector<4x4xbf16>, vector<4x16xbf16>, vector<4x16xf32> -> vector<4x16xf32>
    %c0_368 = arith.constant 0 : index
    %c32_369 = arith.constant 32 : index
    %626 = vector.load %arg49[%c0_368, %c32_369] : memref<4x64xf32, #tpu.memory_space<vmem>>, vector<4x16xf32>
    tpu.vector_store %arg49[%c0_368, %c32_369], %625 {strides = array<i32>} : memref<4x64xf32, #tpu.memory_space<vmem>>, vector<4x16xf32>,
    %627 = vector.extract_strided_slice %570 {offsets = [0, 48], sizes = [4, 16], strides = [1, 1]} : vector<4x64xbf16> to vector<4x16xbf16>
    %628 = vector.extract_strided_slice %571 {offsets = [0, 48], sizes = [4, 16], strides = [1, 1]} : vector<4x64xbf16> to vector<4x16xbf16>
    %cst_370 = arith.constant dense<0.000000e+00> : vector<4x4xf32>
    %629 = tpu.matmul %627, %628, %cst_370 {dimension_numbers = #tpu.dot_dimension_numbers<[1], [1], [0], [0], [0, 0, 1, 0], [], []>} : vector<4x16xbf16>, vector<4x16xbf16>, vector<4x4xf32> -> vector<4x4xf32>
    %cst_371 = arith.constant 2.500000e-01 : f32
    %630 = vector.broadcast %cst_371 : f32 to vector<4x4xf32>
    %631 = arith.mulf %629, %630 : vector<4x4xf32>
    %cst_372 = arith.constant dense<0xFF800000> : vector<4xf32>
    %632 = vector.multi_reduction <maximumf>, %631, %cst_372 [1] : vector<4x4xf32> to vector<4xf32>
    %633 = vector.shape_cast %632 : vector<4xf32> to vector<4x1xf32>
    %634 = vector.broadcast %633 : vector<4x1xf32> to vector<4x4xf32>
    %635 = arith.subf %631, %634 : vector<4x4xf32>
    %636 = math.exp %635 : vector<4x4xf32>
    %cst_373 = arith.constant dense<0.000000e+00> : vector<4xf32>
    %637 = vector.multi_reduction <add>, %636, %cst_373 [1] : vector<4x4xf32> to vector<4xf32>
    %638 = vector.shape_cast %637 : vector<4xf32> to vector<4x1xf32>
    %639 = vector.broadcast %638 : vector<4x1xf32> to vector<4x4xf32>
    %640 = arith.divf %636, %639 : vector<4x4xf32>
    %641 = arith.truncf %640 : vector<4x4xf32> to vector<4x4xbf16>
    %642 = vector.extract_strided_slice %572 {offsets = [0, 48], sizes = [4, 16], strides = [1, 1]} : vector<4x64xbf16> to vector<4x16xbf16>
    %cst_374 = arith.constant dense<0.000000e+00> : vector<4x16xf32>
    %643 = tpu.matmul %641, %642, %cst_374 {dimension_numbers = #tpu.dot_dimension_numbers<[1], [0], [0], [1], [0, 0, 1, 1], [], []>} : vector<4x4xbf16>, vector<4x16xbf16>, vector<4x16xf32> -> vector<4x16xf32>
    %c0_375 = arith.constant 0 : index
    %c48_376 = arith.constant 48 : index
    %644 = vector.load %arg49[%c0_375, %c48_376] : memref<4x64xf32, #tpu.memory_space<vmem>>, vector<4x16xf32>
    tpu.vector_store %arg49[%c0_375, %c48_376], %643 {strides = array<i32>} : memref<4x64xf32, #tpu.memory_space<vmem>>, vector<4x16xf32>,
    %c0_377 = arith.constant 0 : index
    %c0_378 = arith.constant 0 : index
    %645 = vector.load %arg49[%c0_377, %c0_378] : memref<4x64xf32, #tpu.memory_space<vmem>>, vector<4x64xf32>
    %646 = arith.truncf %645 : vector<4x64xf32> to vector<4x64xbf16>
    %c1_379 = arith.constant 1 : index
    %c0_380 = arith.constant 0 : index
    %c0_381 = arith.constant 0 : index
    %647 = vector.load %arg29[%c1_379, %c0_380, %c0_381] : memref<2x64x64xbf16, #tpu.memory_space<vmem>>, vector<1x64x64xbf16>
    %648 = vector.shape_cast %647 : vector<1x64x64xbf16> to vector<64x64xbf16>
    %cst_382 = arith.constant dense<0.000000e+00> : vector<4x64xf32>
    %649 = tpu.matmul %646, %648, %cst_382 {dimension_numbers = #tpu.dot_dimension_numbers<[1], [0], [0], [1], [0, 0, 1, 1], [], []>} : vector<4x64xbf16>, vector<64x64xbf16>, vector<4x64xf32> -> vector<4x64xf32>
    %c1_383 = arith.constant 1 : index
    %c0_384 = arith.constant 0 : index
    %c0_385 = arith.constant 0 : index
    %650 = vector.load %arg30[%c1_383, %c0_384, %c0_385] : memref<2x1x64xf32, #tpu.memory_space<vmem>>, vector<1x1x64xf32>
    %651 = vector.shape_cast %650 : vector<1x1x64xf32> to vector<1x64xf32>
    %652 = vector.broadcast %651 : vector<1x64xf32> to vector<4x64xf32>
    %653 = arith.addf %649, %652 : vector<4x64xf32>
    %654 = arith.truncf %523 : vector<4x64xf32> to vector<4x64xbf16>
    %c1_386 = arith.constant 1 : index
    %c0_387 = arith.constant 0 : index
    %c0_388 = arith.constant 0 : index
    %655 = vector.load %arg31[%c1_386, %c0_387, %c0_388] : memref<2x64x64xbf16, #tpu.memory_space<vmem>>, vector<1x64x64xbf16>
    %656 = vector.shape_cast %655 : vector<1x64x64xbf16> to vector<64x64xbf16>
    %cst_389 = arith.constant dense<0.000000e+00> : vector<4x64xf32>
    %657 = tpu.matmul %654, %656, %cst_389 {dimension_numbers = #tpu.dot_dimension_numbers<[1], [0], [0], [1], [0, 0, 1, 1], [], []>} : vector<4x64xbf16>, vector<64x64xbf16>, vector<4x64xf32> -> vector<4x64xf32>
    %c1_390 = arith.constant 1 : index
    %c0_391 = arith.constant 0 : index
    %c0_392 = arith.constant 0 : index
    %658 = vector.load %arg32[%c1_390, %c0_391, %c0_392] : memref<2x1x64xf32, #tpu.memory_space<vmem>>, vector<1x1x64xf32>
    %659 = vector.shape_cast %658 : vector<1x1x64xf32> to vector<1x64xf32>
    %660 = vector.broadcast %659 : vector<1x64xf32> to vector<4x64xf32>
    %661 = arith.addf %657, %660 : vector<4x64xf32>
    %662 = arith.negf %661 : vector<4x64xf32>
    %663 = math.exp %662 : vector<4x64xf32>
    %cst_393 = arith.constant 1.000000e+00 : f32
    %664 = vector.broadcast %cst_393 : f32 to vector<4x64xf32>
    %665 = arith.addf %664, %663 : vector<4x64xf32>
    %666 = arith.divf %664, %665 : vector<4x64xf32>
    %667 = arith.mulf %653, %666 : vector<4x64xf32>
    %668 = arith.addf %523, %667 : vector<4x64xf32>
    %c1_394 = arith.constant 1 : index
    %c0_395 = arith.constant 0 : index
    %c0_396 = arith.constant 0 : index
    %669 = vector.load %arg33[%c1_394, %c0_395, %c0_396] : memref<2x1x64xf32, #tpu.memory_space<vmem>>, vector<1x1x64xf32>
    %670 = vector.shape_cast %669 : vector<1x1x64xf32> to vector<1x64xf32>
    %c1_397 = arith.constant 1 : index
    %c0_398 = arith.constant 0 : index
    %c0_399 = arith.constant 0 : index
    %671 = vector.load %arg34[%c1_397, %c0_398, %c0_399] : memref<2x1x64xf32, #tpu.memory_space<vmem>>, vector<1x1x64xf32>
    %672 = vector.shape_cast %671 : vector<1x1x64xf32> to vector<1x64xf32>
    %cst_400 = arith.constant dense<0.000000e+00> : vector<4xf32>
    %673 = vector.multi_reduction <add>, %668, %cst_400 [1] : vector<4x64xf32> to vector<4xf32>
    %674 = vector.shape_cast %673 : vector<4xf32> to vector<4x1xf32>
    %cst_401 = arith.constant 6.400000e+01 : f32
    %675 = vector.broadcast %cst_401 : f32 to vector<4x1xf32>
    %676 = arith.divf %674, %675 : vector<4x1xf32>
    %677 = vector.broadcast %676 : vector<4x1xf32> to vector<4x64xf32>
    %678 = arith.subf %668, %677 : vector<4x64xf32>
    %679 = arith.mulf %678, %678 : vector<4x64xf32>
    %cst_402 = arith.constant dense<0.000000e+00> : vector<4xf32>
    %680 = vector.multi_reduction <add>, %679, %cst_402 [1] : vector<4x64xf32> to vector<4xf32>
    %681 = vector.shape_cast %680 : vector<4xf32> to vector<4x1xf32>
    %cst_403 = arith.constant 6.400000e+01 : f32
    %682 = vector.broadcast %cst_403 : f32 to vector<4x1xf32>
    %683 = arith.divf %681, %682 : vector<4x1xf32>
    %cst_404 = arith.constant 9.99999974E-6 : f32
    %684 = vector.broadcast %cst_404 : f32 to vector<4x1xf32>
    %685 = arith.addf %683, %684 : vector<4x1xf32>
    %686 = math.rsqrt %685 : vector<4x1xf32>
    %687 = vector.broadcast %686 : vector<4x1xf32> to vector<4x64xf32>
    %688 = arith.mulf %678, %687 : vector<4x64xf32>
    %689 = vector.broadcast %670 : vector<1x64xf32> to vector<4x64xf32>
    %690 = arith.mulf %688, %689 : vector<4x64xf32>
    %691 = vector.broadcast %672 : vector<1x64xf32> to vector<4x64xf32>
    %692 = arith.addf %690, %691 : vector<4x64xf32>
    %693 = arith.truncf %692 : vector<4x64xf32> to vector<4x64xbf16>
    %c1_405 = arith.constant 1 : index
    %c0_406 = arith.constant 0 : index
    %c0_407 = arith.constant 0 : index
    %694 = vector.load %arg35[%c1_405, %c0_406, %c0_407] : memref<2x64x256xbf16, #tpu.memory_space<vmem>>, vector<1x64x256xbf16>
    %695 = vector.shape_cast %694 : vector<1x64x256xbf16> to vector<64x256xbf16>
    %cst_408 = arith.constant dense<0.000000e+00> : vector<4x256xf32>
    %696 = tpu.matmul %693, %695, %cst_408 {dimension_numbers = #tpu.dot_dimension_numbers<[1], [0], [0], [1], [0, 0, 1, 1], [], []>} : vector<4x64xbf16>, vector<64x256xbf16>, vector<4x256xf32> -> vector<4x256xf32>
    %c1_409 = arith.constant 1 : index
    %c0_410 = arith.constant 0 : index
    %c0_411 = arith.constant 0 : index
    %697 = vector.load %arg36[%c1_409, %c0_410, %c0_411] : memref<2x1x256xf32, #tpu.memory_space<vmem>>, vector<1x1x256xf32>
    %698 = vector.shape_cast %697 : vector<1x1x256xf32> to vector<1x256xf32>
    %699 = vector.broadcast %698 : vector<1x256xf32> to vector<4x256xf32>
    %700 = arith.addf %696, %699 : vector<4x256xf32>
    %cst_412 = arith.constant 5.000000e-01 : f32
    %701 = vector.broadcast %cst_412 : f32 to vector<4x256xf32>
    %702 = arith.mulf %701, %700 : vector<4x256xf32>
    %cst_413 = arith.constant 0.707106769 : f32
    %703 = vector.broadcast %cst_413 : f32 to vector<4x256xf32>
    %704 = arith.mulf %700, %703 : vector<4x256xf32>
    %705 = math.absf %704 : vector<4x256xf32>
    %cst_414 = arith.constant 0.327591091 : f32
    %706 = vector.broadcast %cst_414 : f32 to vector<4x256xf32>
    %707 = arith.mulf %706, %705 : vector<4x256xf32>
    %cst_415 = arith.constant 1.000000e+00 : f32
    %708 = vector.broadcast %cst_415 : f32 to vector<4x256xf32>
    %709 = arith.addf %708, %707 : vector<4x256xf32>
    %cst_416 = arith.constant 1.000000e+00 : f32
    %710 = vector.broadcast %cst_416 : f32 to vector<4x256xf32>
    %711 = arith.divf %710, %709 : vector<4x256xf32>
    %cst_417 = arith.constant 1.06140542 : f32
    %712 = vector.broadcast %cst_417 : f32 to vector<4x256xf32>
    %713 = arith.mulf %712, %711 : vector<4x256xf32>
    %cst_418 = arith.constant -1.45315206 : f32
    %714 = vector.broadcast %cst_418 : f32 to vector<4x256xf32>
    %715 = arith.addf %713, %714 : vector<4x256xf32>
    %716 = arith.mulf %715, %711 : vector<4x256xf32>
    %cst_419 = arith.constant 1.42141378 : f32
    %717 = vector.broadcast %cst_419 : f32 to vector<4x256xf32>
    %718 = arith.addf %716, %717 : vector<4x256xf32>
    %719 = arith.mulf %718, %711 : vector<4x256xf32>
    %cst_420 = arith.constant -0.284496725 : f32
    %720 = vector.broadcast %cst_420 : f32 to vector<4x256xf32>
    %721 = arith.addf %719, %720 : vector<4x256xf32>
    %722 = arith.mulf %721, %711 : vector<4x256xf32>
    %cst_421 = arith.constant 0.254829586 : f32
    %723 = vector.broadcast %cst_421 : f32 to vector<4x256xf32>
    %724 = arith.addf %722, %723 : vector<4x256xf32>
    %725 = arith.mulf %724, %711 : vector<4x256xf32>
    %cst_422 = arith.constant 0.000000e+00 : f32
    %726 = vector.broadcast %cst_422 : f32 to vector<4x256xf32>
    %727 = arith.subf %726, %705 : vector<4x256xf32>
    %728 = arith.mulf %727, %705 : vector<4x256xf32>
    %729 = math.exp %728 : vector<4x256xf32>
    %730 = arith.mulf %725, %729 : vector<4x256xf32>
    %cst_423 = arith.constant 1.000000e+00 : f32
    %731 = vector.broadcast %cst_423 : f32 to vector<4x256xf32>
    %732 = arith.subf %731, %730 : vector<4x256xf32>
    %cst_424 = arith.constant 0.000000e+00 : f32
    %733 = vector.broadcast %cst_424 : f32 to vector<4x256xf32>
    %734 = arith.cmpf oge, %704, %733 : vector<4x256xf32>
    %cst_425 = arith.constant 0.000000e+00 : f32
    %735 = vector.broadcast %cst_425 : f32 to vector<4x256xf32>
    %736 = arith.subf %735, %732 : vector<4x256xf32>
    %737 = arith.select %734, %732, %736 : vector<4x256xi1>, vector<4x256xf32>
    %cst_426 = arith.constant 1.000000e+00 : f32
    %738 = vector.broadcast %cst_426 : f32 to vector<4x256xf32>
    %739 = arith.addf %738, %737 : vector<4x256xf32>
    %740 = arith.mulf %702, %739 : vector<4x256xf32>
    %741 = arith.truncf %740 : vector<4x256xf32> to vector<4x256xbf16>
    %c1_427 = arith.constant 1 : index
    %c0_428 = arith.constant 0 : index
    %c0_429 = arith.constant 0 : index
    %742 = vector.load %arg37[%c1_427, %c0_428, %c0_429] : memref<2x256x64xbf16, #tpu.memory_space<vmem>>, vector<1x256x64xbf16>
    %743 = vector.shape_cast %742 : vector<1x256x64xbf16> to vector<256x64xbf16>
    %cst_430 = arith.constant dense<0.000000e+00> : vector<4x64xf32>
    %744 = tpu.matmul %741, %743, %cst_430 {dimension_numbers = #tpu.dot_dimension_numbers<[1], [0], [0], [1], [0, 0, 1, 1], [], []>} : vector<4x256xbf16>, vector<256x64xbf16>, vector<4x64xf32> -> vector<4x64xf32>
    %745 = arith.addf %668, %744 : vector<4x64xf32>
    %c1_431 = arith.constant 1 : index
    %c0_432 = arith.constant 0 : index
    %c0_433 = arith.constant 0 : index
    %746 = vector.load %arg38[%c1_431, %c0_432, %c0_433] : memref<2x1x64xf32, #tpu.memory_space<vmem>>, vector<1x1x64xf32>
    %747 = vector.shape_cast %746 : vector<1x1x64xf32> to vector<1x64xf32>
    %748 = vector.broadcast %747 : vector<1x64xf32> to vector<4x64xf32>
    %749 = arith.addf %745, %748 : vector<4x64xf32>
    %750 = arith.addf %749, %297 : vector<4x64xf32>
    %751 = arith.truncf %750 : vector<4x64xf32> to vector<4x64xbf16>
    %cst_434 = arith.constant 0.000000e+00 : f32
    %752 = vector.broadcast %cst_434 : f32 to vector<8x32xf32>
    %c0_435 = arith.constant 0 : index
    %c0_436 = arith.constant 0 : index
    %c0_437 = arith.constant 0 : index
    %753 = vector.load %arg39[%c0_435, %c0_436, %c0_437] : memref<5x8x4xbf16, #tpu.memory_space<vmem>>, vector<1x8x4xbf16>
    %754 = vector.shape_cast %753 : vector<1x8x4xbf16> to vector<8x4xbf16>
    %cst_438 = arith.constant dense<0.000000e+00> : vector<8x64xf32>
    %755 = tpu.matmul %754, %751, %cst_438 {dimension_numbers = #tpu.dot_dimension_numbers<[1], [0], [0], [1], [0, 0, 1, 1], [], []>} : vector<8x4xbf16>, vector<4x64xbf16>, vector<8x64xf32> -> vector<8x64xf32>
    %756 = arith.truncf %755 : vector<8x64xf32> to vector<8x64xbf16>
    %c0_439 = arith.constant 0 : index
    %c0_440 = arith.constant 0 : index
    %c0_441 = arith.constant 0 : index
    %757 = vector.load %arg40[%c0_439, %c0_440, %c0_441] : memref<5x64x32xbf16, #tpu.memory_space<vmem>>, vector<1x64x32xbf16>
    %758 = vector.shape_cast %757 : vector<1x64x32xbf16> to vector<64x32xbf16>
    %cst_442 = arith.constant dense<0.000000e+00> : vector<8x32xf32>
    %759 = tpu.matmul %756, %758, %cst_442 {dimension_numbers = #tpu.dot_dimension_numbers<[1], [0], [0], [1], [0, 0, 1, 1], [], []>} : vector<8x64xbf16>, vector<64x32xbf16>, vector<8x32xf32> -> vector<8x32xf32>
    %760 = arith.addf %752, %759 : vector<8x32xf32>
    %c1_443 = arith.constant 1 : index
    %c0_444 = arith.constant 0 : index
    %c0_445 = arith.constant 0 : index
    %761 = vector.load %arg39[%c1_443, %c0_444, %c0_445] : memref<5x8x4xbf16, #tpu.memory_space<vmem>>, vector<1x8x4xbf16>
    %762 = vector.shape_cast %761 : vector<1x8x4xbf16> to vector<8x4xbf16>
    %cst_446 = arith.constant dense<0.000000e+00> : vector<8x64xf32>
    %763 = tpu.matmul %762, %751, %cst_446 {dimension_numbers = #tpu.dot_dimension_numbers<[1], [0], [0], [1], [0, 0, 1, 1], [], []>} : vector<8x4xbf16>, vector<4x64xbf16>, vector<8x64xf32> -> vector<8x64xf32>
    %764 = arith.truncf %763 : vector<8x64xf32> to vector<8x64xbf16>
    %c1_447 = arith.constant 1 : index
    %c0_448 = arith.constant 0 : index
    %c0_449 = arith.constant 0 : index
    %765 = vector.load %arg40[%c1_447, %c0_448, %c0_449] : memref<5x64x32xbf16, #tpu.memory_space<vmem>>, vector<1x64x32xbf16>
    %766 = vector.shape_cast %765 : vector<1x64x32xbf16> to vector<64x32xbf16>
    %cst_450 = arith.constant dense<0.000000e+00> : vector<8x32xf32>
    %767 = tpu.matmul %764, %766, %cst_450 {dimension_numbers = #tpu.dot_dimension_numbers<[1], [0], [0], [1], [0, 0, 1, 1], [], []>} : vector<8x64xbf16>, vector<64x32xbf16>, vector<8x32xf32> -> vector<8x32xf32>
    %768 = arith.addf %760, %767 : vector<8x32xf32>
    %c2_451 = arith.constant 2 : index
    %c0_452 = arith.constant 0 : index
    %c0_453 = arith.constant 0 : index
    %769 = vector.load %arg39[%c2_451, %c0_452, %c0_453] : memref<5x8x4xbf16, #tpu.memory_space<vmem>>, vector<1x8x4xbf16>
    %770 = vector.shape_cast %769 : vector<1x8x4xbf16> to vector<8x4xbf16>
    %cst_454 = arith.constant dense<0.000000e+00> : vector<8x64xf32>
    %771 = tpu.matmul %770, %751, %cst_454 {dimension_numbers = #tpu.dot_dimension_numbers<[1], [0], [0], [1], [0, 0, 1, 1], [], []>} : vector<8x4xbf16>, vector<4x64xbf16>, vector<8x64xf32> -> vector<8x64xf32>
    %772 = arith.truncf %771 : vector<8x64xf32> to vector<8x64xbf16>
    %c2_455 = arith.constant 2 : index
    %c0_456 = arith.constant 0 : index
    %c0_457 = arith.constant 0 : index
    %773 = vector.load %arg40[%c2_455, %c0_456, %c0_457] : memref<5x64x32xbf16, #tpu.memory_space<vmem>>, vector<1x64x32xbf16>
    %774 = vector.shape_cast %773 : vector<1x64x32xbf16> to vector<64x32xbf16>
    %cst_458 = arith.constant dense<0.000000e+00> : vector<8x32xf32>
    %775 = tpu.matmul %772, %774, %cst_458 {dimension_numbers = #tpu.dot_dimension_numbers<[1], [0], [0], [1], [0, 0, 1, 1], [], []>} : vector<8x64xbf16>, vector<64x32xbf16>, vector<8x32xf32> -> vector<8x32xf32>
    %776 = arith.addf %768, %775 : vector<8x32xf32>
    %c3_459 = arith.constant 3 : index
    %c0_460 = arith.constant 0 : index
    %c0_461 = arith.constant 0 : index
    %777 = vector.load %arg39[%c3_459, %c0_460, %c0_461] : memref<5x8x4xbf16, #tpu.memory_space<vmem>>, vector<1x8x4xbf16>
    %778 = vector.shape_cast %777 : vector<1x8x4xbf16> to vector<8x4xbf16>
    %cst_462 = arith.constant dense<0.000000e+00> : vector<8x64xf32>
    %779 = tpu.matmul %778, %751, %cst_462 {dimension_numbers = #tpu.dot_dimension_numbers<[1], [0], [0], [1], [0, 0, 1, 1], [], []>} : vector<8x4xbf16>, vector<4x64xbf16>, vector<8x64xf32> -> vector<8x64xf32>
    %780 = arith.truncf %779 : vector<8x64xf32> to vector<8x64xbf16>
    %c3_463 = arith.constant 3 : index
    %c0_464 = arith.constant 0 : index
    %c0_465 = arith.constant 0 : index
    %781 = vector.load %arg40[%c3_463, %c0_464, %c0_465] : memref<5x64x32xbf16, #tpu.memory_space<vmem>>, vector<1x64x32xbf16>
    %782 = vector.shape_cast %781 : vector<1x64x32xbf16> to vector<64x32xbf16>
    %cst_466 = arith.constant dense<0.000000e+00> : vector<8x32xf32>
    %783 = tpu.matmul %780, %782, %cst_466 {dimension_numbers = #tpu.dot_dimension_numbers<[1], [0], [0], [1], [0, 0, 1, 1], [], []>} : vector<8x64xbf16>, vector<64x32xbf16>, vector<8x32xf32> -> vector<8x32xf32>
    %784 = arith.addf %776, %783 : vector<8x32xf32>
    %c4_467 = arith.constant 4 : index
    %c0_468 = arith.constant 0 : index
    %c0_469 = arith.constant 0 : index
    %785 = vector.load %arg39[%c4_467, %c0_468, %c0_469] : memref<5x8x4xbf16, #tpu.memory_space<vmem>>, vector<1x8x4xbf16>
    %786 = vector.shape_cast %785 : vector<1x8x4xbf16> to vector<8x4xbf16>
    %cst_470 = arith.constant dense<0.000000e+00> : vector<8x64xf32>
    %787 = tpu.matmul %786, %751, %cst_470 {dimension_numbers = #tpu.dot_dimension_numbers<[1], [0], [0], [1], [0, 0, 1, 1], [], []>} : vector<8x4xbf16>, vector<4x64xbf16>, vector<8x64xf32> -> vector<8x64xf32>
    %788 = arith.truncf %787 : vector<8x64xf32> to vector<8x64xbf16>
    %c4_471 = arith.constant 4 : index
    %c0_472 = arith.constant 0 : index
    %c0_473 = arith.constant 0 : index
    %789 = vector.load %arg40[%c4_471, %c0_472, %c0_473] : memref<5x64x32xbf16, #tpu.memory_space<vmem>>, vector<1x64x32xbf16>
    %790 = vector.shape_cast %789 : vector<1x64x32xbf16> to vector<64x32xbf16>
    %cst_474 = arith.constant dense<0.000000e+00> : vector<8x32xf32>
    %791 = tpu.matmul %788, %790, %cst_474 {dimension_numbers = #tpu.dot_dimension_numbers<[1], [0], [0], [1], [0, 0, 1, 1], [], []>} : vector<8x64xbf16>, vector<64x32xbf16>, vector<8x32xf32> -> vector<8x32xf32>
    %792 = arith.addf %784, %791 : vector<8x32xf32>
    %c0_475 = arith.constant 0 : index
    %c0_476 = arith.constant 0 : index
    %793 = vector.load %arg41[%c0_475, %c0_476] : memref<1x32xf32, #tpu.memory_space<vmem>>, vector<1x32xf32>
    %794 = vector.broadcast %793 : vector<1x32xf32> to vector<8x32xf32>
    %795 = arith.addf %792, %794 : vector<8x32xf32>
    %cst_477 = arith.constant 5.000000e-01 : f32
    %796 = vector.broadcast %cst_477 : f32 to vector<8x32xf32>
    %797 = arith.mulf %796, %795 : vector<8x32xf32>
    %cst_478 = arith.constant 0.707106769 : f32
    %798 = vector.broadcast %cst_478 : f32 to vector<8x32xf32>
    %799 = arith.mulf %795, %798 : vector<8x32xf32>
    %800 = math.absf %799 : vector<8x32xf32>
    %cst_479 = arith.constant 0.327591091 : f32
    %801 = vector.broadcast %cst_479 : f32 to vector<8x32xf32>
    %802 = arith.mulf %801, %800 : vector<8x32xf32>
    %cst_480 = arith.constant 1.000000e+00 : f32
    %803 = vector.broadcast %cst_480 : f32 to vector<8x32xf32>
    %804 = arith.addf %803, %802 : vector<8x32xf32>
    %cst_481 = arith.constant 1.000000e+00 : f32
    %805 = vector.broadcast %cst_481 : f32 to vector<8x32xf32>
    %806 = arith.divf %805, %804 : vector<8x32xf32>
    %cst_482 = arith.constant 1.06140542 : f32
    %807 = vector.broadcast %cst_482 : f32 to vector<8x32xf32>
    %808 = arith.mulf %807, %806 : vector<8x32xf32>
    %cst_483 = arith.constant -1.45315206 : f32
    %809 = vector.broadcast %cst_483 : f32 to vector<8x32xf32>
    %810 = arith.addf %808, %809 : vector<8x32xf32>
    %811 = arith.mulf %810, %806 : vector<8x32xf32>
    %cst_484 = arith.constant 1.42141378 : f32
    %812 = vector.broadcast %cst_484 : f32 to vector<8x32xf32>
    %813 = arith.addf %811, %812 : vector<8x32xf32>
    %814 = arith.mulf %813, %806 : vector<8x32xf32>
    %cst_485 = arith.constant -0.284496725 : f32
    %815 = vector.broadcast %cst_485 : f32 to vector<8x32xf32>
    %816 = arith.addf %814, %815 : vector<8x32xf32>
    %817 = arith.mulf %816, %806 : vector<8x32xf32>
    %cst_486 = arith.constant 0.254829586 : f32
    %818 = vector.broadcast %cst_486 : f32 to vector<8x32xf32>
    %819 = arith.addf %817, %818 : vector<8x32xf32>
    %820 = arith.mulf %819, %806 : vector<8x32xf32>
    %cst_487 = arith.constant 0.000000e+00 : f32
    %821 = vector.broadcast %cst_487 : f32 to vector<8x32xf32>
    %822 = arith.subf %821, %800 : vector<8x32xf32>
    %823 = arith.mulf %822, %800 : vector<8x32xf32>
    %824 = math.exp %823 : vector<8x32xf32>
    %825 = arith.mulf %820, %824 : vector<8x32xf32>
    %cst_488 = arith.constant 1.000000e+00 : f32
    %826 = vector.broadcast %cst_488 : f32 to vector<8x32xf32>
    %827 = arith.subf %826, %825 : vector<8x32xf32>
    %cst_489 = arith.constant 0.000000e+00 : f32
    %828 = vector.broadcast %cst_489 : f32 to vector<8x32xf32>
    %829 = arith.cmpf oge, %799, %828 : vector<8x32xf32>
    %cst_490 = arith.constant 0.000000e+00 : f32
    %830 = vector.broadcast %cst_490 : f32 to vector<8x32xf32>
    %831 = arith.subf %830, %827 : vector<8x32xf32>
    %832 = arith.select %829, %827, %831 : vector<8x32xi1>, vector<8x32xf32>
    %cst_491 = arith.constant 1.000000e+00 : f32
    %833 = vector.broadcast %cst_491 : f32 to vector<8x32xf32>
    %834 = arith.addf %833, %832 : vector<8x32xf32>
    %835 = arith.mulf %797, %834 : vector<8x32xf32>
    %836 = arith.truncf %835 : vector<8x32xf32> to vector<8x32xbf16>
    %cst_492 = arith.constant 0.000000e+00 : f32
    %837 = vector.broadcast %cst_492 : f32 to vector<16x16xf32>
    %c0_493 = arith.constant 0 : index
    %c0_494 = arith.constant 0 : index
    %c0_495 = arith.constant 0 : index
    %838 = vector.load %arg42[%c0_493, %c0_494, %c0_495] : memref<5x16x8xbf16, #tpu.memory_space<vmem>>, vector<1x16x8xbf16>
    %839 = vector.shape_cast %838 : vector<1x16x8xbf16> to vector<16x8xbf16>
    %cst_496 = arith.constant dense<0.000000e+00> : vector<16x32xf32>
    %840 = tpu.matmul %839, %836, %cst_496 {dimension_numbers = #tpu.dot_dimension_numbers<[1], [0], [0], [1], [0, 0, 1, 1], [], []>} : vector<16x8xbf16>, vector<8x32xbf16>, vector<16x32xf32> -> vector<16x32xf32>
    %841 = arith.truncf %840 : vector<16x32xf32> to vector<16x32xbf16>
    %c0_497 = arith.constant 0 : index
    %c0_498 = arith.constant 0 : index
    %c0_499 = arith.constant 0 : index
    %842 = vector.load %arg43[%c0_497, %c0_498, %c0_499] : memref<5x32x16xbf16, #tpu.memory_space<vmem>>, vector<1x32x16xbf16>
    %843 = vector.shape_cast %842 : vector<1x32x16xbf16> to vector<32x16xbf16>
    %cst_500 = arith.constant dense<0.000000e+00> : vector<16x16xf32>
    %844 = tpu.matmul %841, %843, %cst_500 {dimension_numbers = #tpu.dot_dimension_numbers<[1], [0], [0], [1], [0, 0, 1, 1], [], []>} : vector<16x32xbf16>, vector<32x16xbf16>, vector<16x16xf32> -> vector<16x16xf32>
    %845 = arith.addf %837, %844 : vector<16x16xf32>
    %c1_501 = arith.constant 1 : index
    %c0_502 = arith.constant 0 : index
    %c0_503 = arith.constant 0 : index
    %846 = vector.load %arg42[%c1_501, %c0_502, %c0_503] : memref<5x16x8xbf16, #tpu.memory_space<vmem>>, vector<1x16x8xbf16>
    %847 = vector.shape_cast %846 : vector<1x16x8xbf16> to vector<16x8xbf16>
    %cst_504 = arith.constant dense<0.000000e+00> : vector<16x32xf32>
    %848 = tpu.matmul %847, %836, %cst_504 {dimension_numbers = #tpu.dot_dimension_numbers<[1], [0], [0], [1], [0, 0, 1, 1], [], []>} : vector<16x8xbf16>, vector<8x32xbf16>, vector<16x32xf32> -> vector<16x32xf32>
    %849 = arith.truncf %848 : vector<16x32xf32> to vector<16x32xbf16>
    %c1_505 = arith.constant 1 : index
    %c0_506 = arith.constant 0 : index
    %c0_507 = arith.constant 0 : index
    %850 = vector.load %arg43[%c1_505, %c0_506, %c0_507] : memref<5x32x16xbf16, #tpu.memory_space<vmem>>, vector<1x32x16xbf16>
    %851 = vector.shape_cast %850 : vector<1x32x16xbf16> to vector<32x16xbf16>
    %cst_508 = arith.constant dense<0.000000e+00> : vector<16x16xf32>
    %852 = tpu.matmul %849, %851, %cst_508 {dimension_numbers = #tpu.dot_dimension_numbers<[1], [0], [0], [1], [0, 0, 1, 1], [], []>} : vector<16x32xbf16>, vector<32x16xbf16>, vector<16x16xf32> -> vector<16x16xf32>
    %853 = arith.addf %845, %852 : vector<16x16xf32>
    %c2_509 = arith.constant 2 : index
    %c0_510 = arith.constant 0 : index
    %c0_511 = arith.constant 0 : index
    %854 = vector.load %arg42[%c2_509, %c0_510, %c0_511] : memref<5x16x8xbf16, #tpu.memory_space<vmem>>, vector<1x16x8xbf16>
    %855 = vector.shape_cast %854 : vector<1x16x8xbf16> to vector<16x8xbf16>
    %cst_512 = arith.constant dense<0.000000e+00> : vector<16x32xf32>
    %856 = tpu.matmul %855, %836, %cst_512 {dimension_numbers = #tpu.dot_dimension_numbers<[1], [0], [0], [1], [0, 0, 1, 1], [], []>} : vector<16x8xbf16>, vector<8x32xbf16>, vector<16x32xf32> -> vector<16x32xf32>
    %857 = arith.truncf %856 : vector<16x32xf32> to vector<16x32xbf16>
    %c2_513 = arith.constant 2 : index
    %c0_514 = arith.constant 0 : index
    %c0_515 = arith.constant 0 : index
    %858 = vector.load %arg43[%c2_513, %c0_514, %c0_515] : memref<5x32x16xbf16, #tpu.memory_space<vmem>>, vector<1x32x16xbf16>
    %859 = vector.shape_cast %858 : vector<1x32x16xbf16> to vector<32x16xbf16>
    %cst_516 = arith.constant dense<0.000000e+00> : vector<16x16xf32>
    %860 = tpu.matmul %857, %859, %cst_516 {dimension_numbers = #tpu.dot_dimension_numbers<[1], [0], [0], [1], [0, 0, 1, 1], [], []>} : vector<16x32xbf16>, vector<32x16xbf16>, vector<16x16xf32> -> vector<16x16xf32>
    %861 = arith.addf %853, %860 : vector<16x16xf32>
    %c3_517 = arith.constant 3 : index
    %c0_518 = arith.constant 0 : index
    %c0_519 = arith.constant 0 : index
    %862 = vector.load %arg42[%c3_517, %c0_518, %c0_519] : memref<5x16x8xbf16, #tpu.memory_space<vmem>>, vector<1x16x8xbf16>
    %863 = vector.shape_cast %862 : vector<1x16x8xbf16> to vector<16x8xbf16>
    %cst_520 = arith.constant dense<0.000000e+00> : vector<16x32xf32>
    %864 = tpu.matmul %863, %836, %cst_520 {dimension_numbers = #tpu.dot_dimension_numbers<[1], [0], [0], [1], [0, 0, 1, 1], [], []>} : vector<16x8xbf16>, vector<8x32xbf16>, vector<16x32xf32> -> vector<16x32xf32>
    %865 = arith.truncf %864 : vector<16x32xf32> to vector<16x32xbf16>
    %c3_521 = arith.constant 3 : index
    %c0_522 = arith.constant 0 : index
    %c0_523 = arith.constant 0 : index
    %866 = vector.load %arg43[%c3_521, %c0_522, %c0_523] : memref<5x32x16xbf16, #tpu.memory_space<vmem>>, vector<1x32x16xbf16>
    %867 = vector.shape_cast %866 : vector<1x32x16xbf16> to vector<32x16xbf16>
    %cst_524 = arith.constant dense<0.000000e+00> : vector<16x16xf32>
    %868 = tpu.matmul %865, %867, %cst_524 {dimension_numbers = #tpu.dot_dimension_numbers<[1], [0], [0], [1], [0, 0, 1, 1], [], []>} : vector<16x32xbf16>, vector<32x16xbf16>, vector<16x16xf32> -> vector<16x16xf32>
    %869 = arith.addf %861, %868 : vector<16x16xf32>
    %c4_525 = arith.constant 4 : index
    %c0_526 = arith.constant 0 : index
    %c0_527 = arith.constant 0 : index
    %870 = vector.load %arg42[%c4_525, %c0_526, %c0_527] : memref<5x16x8xbf16, #tpu.memory_space<vmem>>, vector<1x16x8xbf16>
    %871 = vector.shape_cast %870 : vector<1x16x8xbf16> to vector<16x8xbf16>
    %cst_528 = arith.constant dense<0.000000e+00> : vector<16x32xf32>
    %872 = tpu.matmul %871, %836, %cst_528 {dimension_numbers = #tpu.dot_dimension_numbers<[1], [0], [0], [1], [0, 0, 1, 1], [], []>} : vector<16x8xbf16>, vector<8x32xbf16>, vector<16x32xf32> -> vector<16x32xf32>
    %873 = arith.truncf %872 : vector<16x32xf32> to vector<16x32xbf16>
    %c4_529 = arith.constant 4 : index
    %c0_530 = arith.constant 0 : index
    %c0_531 = arith.constant 0 : index
    %874 = vector.load %arg43[%c4_529, %c0_530, %c0_531] : memref<5x32x16xbf16, #tpu.memory_space<vmem>>, vector<1x32x16xbf16>
    %875 = vector.shape_cast %874 : vector<1x32x16xbf16> to vector<32x16xbf16>
    %cst_532 = arith.constant dense<0.000000e+00> : vector<16x16xf32>
    %876 = tpu.matmul %873, %875, %cst_532 {dimension_numbers = #tpu.dot_dimension_numbers<[1], [0], [0], [1], [0, 0, 1, 1], [], []>} : vector<16x32xbf16>, vector<32x16xbf16>, vector<16x16xf32> -> vector<16x16xf32>
    %877 = arith.addf %869, %876 : vector<16x16xf32>
    %c0_533 = arith.constant 0 : index
    %c0_534 = arith.constant 0 : index
    %878 = vector.load %arg44[%c0_533, %c0_534] : memref<1x16xf32, #tpu.memory_space<vmem>>, vector<1x16xf32>
    %879 = vector.broadcast %878 : vector<1x16xf32> to vector<16x16xf32>
    %880 = arith.addf %877, %879 : vector<16x16xf32>
    %cst_535 = arith.constant 5.000000e-01 : f32
    %881 = vector.broadcast %cst_535 : f32 to vector<16x16xf32>
    %882 = arith.mulf %881, %880 : vector<16x16xf32>
    %cst_536 = arith.constant 0.707106769 : f32
    %883 = vector.broadcast %cst_536 : f32 to vector<16x16xf32>
    %884 = arith.mulf %880, %883 : vector<16x16xf32>
    %885 = math.absf %884 : vector<16x16xf32>
    %cst_537 = arith.constant 0.327591091 : f32
    %886 = vector.broadcast %cst_537 : f32 to vector<16x16xf32>
    %887 = arith.mulf %886, %885 : vector<16x16xf32>
    %cst_538 = arith.constant 1.000000e+00 : f32
    %888 = vector.broadcast %cst_538 : f32 to vector<16x16xf32>
    %889 = arith.addf %888, %887 : vector<16x16xf32>
    %cst_539 = arith.constant 1.000000e+00 : f32
    %890 = vector.broadcast %cst_539 : f32 to vector<16x16xf32>
    %891 = arith.divf %890, %889 : vector<16x16xf32>
    %cst_540 = arith.constant 1.06140542 : f32
    %892 = vector.broadcast %cst_540 : f32 to vector<16x16xf32>
    %893 = arith.mulf %892, %891 : vector<16x16xf32>
    %cst_541 = arith.constant -1.45315206 : f32
    %894 = vector.broadcast %cst_541 : f32 to vector<16x16xf32>
    %895 = arith.addf %893, %894 : vector<16x16xf32>
    %896 = arith.mulf %895, %891 : vector<16x16xf32>
    %cst_542 = arith.constant 1.42141378 : f32
    %897 = vector.broadcast %cst_542 : f32 to vector<16x16xf32>
    %898 = arith.addf %896, %897 : vector<16x16xf32>
    %899 = arith.mulf %898, %891 : vector<16x16xf32>
    %cst_543 = arith.constant -0.284496725 : f32
    %900 = vector.broadcast %cst_543 : f32 to vector<16x16xf32>
    %901 = arith.addf %899, %900 : vector<16x16xf32>
    %902 = arith.mulf %901, %891 : vector<16x16xf32>
    %cst_544 = arith.constant 0.254829586 : f32
    %903 = vector.broadcast %cst_544 : f32 to vector<16x16xf32>
    %904 = arith.addf %902, %903 : vector<16x16xf32>
    %905 = arith.mulf %904, %891 : vector<16x16xf32>
    %cst_545 = arith.constant 0.000000e+00 : f32
    %906 = vector.broadcast %cst_545 : f32 to vector<16x16xf32>
    %907 = arith.subf %906, %885 : vector<16x16xf32>
    %908 = arith.mulf %907, %885 : vector<16x16xf32>
    %909 = math.exp %908 : vector<16x16xf32>
    %910 = arith.mulf %905, %909 : vector<16x16xf32>
    %cst_546 = arith.constant 1.000000e+00 : f32
    %911 = vector.broadcast %cst_546 : f32 to vector<16x16xf32>
    %912 = arith.subf %911, %910 : vector<16x16xf32>
    %cst_547 = arith.constant 0.000000e+00 : f32
    %913 = vector.broadcast %cst_547 : f32 to vector<16x16xf32>
    %914 = arith.cmpf oge, %884, %913 : vector<16x16xf32>
    %cst_548 = arith.constant 0.000000e+00 : f32
    %915 = vector.broadcast %cst_548 : f32 to vector<16x16xf32>
    %916 = arith.subf %915, %912 : vector<16x16xf32>
    %917 = arith.select %914, %912, %916 : vector<16x16xi1>, vector<16x16xf32>
    %cst_549 = arith.constant 1.000000e+00 : f32
    %918 = vector.broadcast %cst_549 : f32 to vector<16x16xf32>
    %919 = arith.addf %918, %917 : vector<16x16xf32>
    %920 = arith.mulf %882, %919 : vector<16x16xf32>
    %921 = arith.truncf %920 : vector<16x16xf32> to vector<16x16xbf16>
    %cst_550 = arith.constant 0.000000e+00 : f32
    %922 = vector.broadcast %cst_550 : f32 to vector<32x4xf32>
    %c0_551 = arith.constant 0 : index
    %c0_552 = arith.constant 0 : index
    %c0_553 = arith.constant 0 : index
    %923 = vector.load %arg45[%c0_551, %c0_552, %c0_553] : memref<5x32x16xbf16, #tpu.memory_space<vmem>>, vector<1x32x16xbf16>
    %924 = vector.shape_cast %923 : vector<1x32x16xbf16> to vector<32x16xbf16>
    %cst_554 = arith.constant dense<0.000000e+00> : vector<32x16xf32>
    %925 = tpu.matmul %924, %921, %cst_554 {dimension_numbers = #tpu.dot_dimension_numbers<[1], [0], [0], [1], [0, 0, 1, 1], [], []>} : vector<32x16xbf16>, vector<16x16xbf16>, vector<32x16xf32> -> vector<32x16xf32>
    %926 = arith.truncf %925 : vector<32x16xf32> to vector<32x16xbf16>
    %c0_555 = arith.constant 0 : index
    %c0_556 = arith.constant 0 : index
    %c0_557 = arith.constant 0 : index
    %927 = vector.load %arg46[%c0_555, %c0_556, %c0_557] : memref<5x16x4xbf16, #tpu.memory_space<vmem>>, vector<1x16x4xbf16>
    %928 = vector.shape_cast %927 : vector<1x16x4xbf16> to vector<16x4xbf16>
    %cst_558 = arith.constant dense<0.000000e+00> : vector<32x4xf32>
    %929 = tpu.matmul %926, %928, %cst_558 {dimension_numbers = #tpu.dot_dimension_numbers<[1], [0], [0], [1], [0, 0, 1, 1], [], []>} : vector<32x16xbf16>, vector<16x4xbf16>, vector<32x4xf32> -> vector<32x4xf32>
    %930 = arith.addf %922, %929 : vector<32x4xf32>
    %c1_559 = arith.constant 1 : index
    %c0_560 = arith.constant 0 : index
    %c0_561 = arith.constant 0 : index
    %931 = vector.load %arg45[%c1_559, %c0_560, %c0_561] : memref<5x32x16xbf16, #tpu.memory_space<vmem>>, vector<1x32x16xbf16>
    %932 = vector.shape_cast %931 : vector<1x32x16xbf16> to vector<32x16xbf16>
    %cst_562 = arith.constant dense<0.000000e+00> : vector<32x16xf32>
    %933 = tpu.matmul %932, %921, %cst_562 {dimension_numbers = #tpu.dot_dimension_numbers<[1], [0], [0], [1], [0, 0, 1, 1], [], []>} : vector<32x16xbf16>, vector<16x16xbf16>, vector<32x16xf32> -> vector<32x16xf32>
    %934 = arith.truncf %933 : vector<32x16xf32> to vector<32x16xbf16>
    %c1_563 = arith.constant 1 : index
    %c0_564 = arith.constant 0 : index
    %c0_565 = arith.constant 0 : index
    %935 = vector.load %arg46[%c1_563, %c0_564, %c0_565] : memref<5x16x4xbf16, #tpu.memory_space<vmem>>, vector<1x16x4xbf16>
    %936 = vector.shape_cast %935 : vector<1x16x4xbf16> to vector<16x4xbf16>
    %cst_566 = arith.constant dense<0.000000e+00> : vector<32x4xf32>
    %937 = tpu.matmul %934, %936, %cst_566 {dimension_numbers = #tpu.dot_dimension_numbers<[1], [0], [0], [1], [0, 0, 1, 1], [], []>} : vector<32x16xbf16>, vector<16x4xbf16>, vector<32x4xf32> -> vector<32x4xf32>
    %938 = arith.addf %930, %937 : vector<32x4xf32>
    %c2_567 = arith.constant 2 : index
    %c0_568 = arith.constant 0 : index
    %c0_569 = arith.constant 0 : index
    %939 = vector.load %arg45[%c2_567, %c0_568, %c0_569] : memref<5x32x16xbf16, #tpu.memory_space<vmem>>, vector<1x32x16xbf16>
    %940 = vector.shape_cast %939 : vector<1x32x16xbf16> to vector<32x16xbf16>
    %cst_570 = arith.constant dense<0.000000e+00> : vector<32x16xf32>
    %941 = tpu.matmul %940, %921, %cst_570 {dimension_numbers = #tpu.dot_dimension_numbers<[1], [0], [0], [1], [0, 0, 1, 1], [], []>} : vector<32x16xbf16>, vector<16x16xbf16>, vector<32x16xf32> -> vector<32x16xf32>
    %942 = arith.truncf %941 : vector<32x16xf32> to vector<32x16xbf16>
    %c2_571 = arith.constant 2 : index
    %c0_572 = arith.constant 0 : index
    %c0_573 = arith.constant 0 : index
    %943 = vector.load %arg46[%c2_571, %c0_572, %c0_573] : memref<5x16x4xbf16, #tpu.memory_space<vmem>>, vector<1x16x4xbf16>
    %944 = vector.shape_cast %943 : vector<1x16x4xbf16> to vector<16x4xbf16>
    %cst_574 = arith.constant dense<0.000000e+00> : vector<32x4xf32>
    %945 = tpu.matmul %942, %944, %cst_574 {dimension_numbers = #tpu.dot_dimension_numbers<[1], [0], [0], [1], [0, 0, 1, 1], [], []>} : vector<32x16xbf16>, vector<16x4xbf16>, vector<32x4xf32> -> vector<32x4xf32>
    %946 = arith.addf %938, %945 : vector<32x4xf32>
    %c3_575 = arith.constant 3 : index
    %c0_576 = arith.constant 0 : index
    %c0_577 = arith.constant 0 : index
    %947 = vector.load %arg45[%c3_575, %c0_576, %c0_577] : memref<5x32x16xbf16, #tpu.memory_space<vmem>>, vector<1x32x16xbf16>
    %948 = vector.shape_cast %947 : vector<1x32x16xbf16> to vector<32x16xbf16>
    %cst_578 = arith.constant dense<0.000000e+00> : vector<32x16xf32>
    %949 = tpu.matmul %948, %921, %cst_578 {dimension_numbers = #tpu.dot_dimension_numbers<[1], [0], [0], [1], [0, 0, 1, 1], [], []>} : vector<32x16xbf16>, vector<16x16xbf16>, vector<32x16xf32> -> vector<32x16xf32>
    %950 = arith.truncf %949 : vector<32x16xf32> to vector<32x16xbf16>
    %c3_579 = arith.constant 3 : index
    %c0_580 = arith.constant 0 : index
    %c0_581 = arith.constant 0 : index
    %951 = vector.load %arg46[%c3_579, %c0_580, %c0_581] : memref<5x16x4xbf16, #tpu.memory_space<vmem>>, vector<1x16x4xbf16>
    %952 = vector.shape_cast %951 : vector<1x16x4xbf16> to vector<16x4xbf16>
    %cst_582 = arith.constant dense<0.000000e+00> : vector<32x4xf32>
    %953 = tpu.matmul %950, %952, %cst_582 {dimension_numbers = #tpu.dot_dimension_numbers<[1], [0], [0], [1], [0, 0, 1, 1], [], []>} : vector<32x16xbf16>, vector<16x4xbf16>, vector<32x4xf32> -> vector<32x4xf32>
    %954 = arith.addf %946, %953 : vector<32x4xf32>
    %c4_583 = arith.constant 4 : index
    %c0_584 = arith.constant 0 : index
    %c0_585 = arith.constant 0 : index
    %955 = vector.load %arg45[%c4_583, %c0_584, %c0_585] : memref<5x32x16xbf16, #tpu.memory_space<vmem>>, vector<1x32x16xbf16>
    %956 = vector.shape_cast %955 : vector<1x32x16xbf16> to vector<32x16xbf16>
    %cst_586 = arith.constant dense<0.000000e+00> : vector<32x16xf32>
    %957 = tpu.matmul %956, %921, %cst_586 {dimension_numbers = #tpu.dot_dimension_numbers<[1], [0], [0], [1], [0, 0, 1, 1], [], []>} : vector<32x16xbf16>, vector<16x16xbf16>, vector<32x16xf32> -> vector<32x16xf32>
    %958 = arith.truncf %957 : vector<32x16xf32> to vector<32x16xbf16>
    %c4_587 = arith.constant 4 : index
    %c0_588 = arith.constant 0 : index
    %c0_589 = arith.constant 0 : index
    %959 = vector.load %arg46[%c4_587, %c0_588, %c0_589] : memref<5x16x4xbf16, #tpu.memory_space<vmem>>, vector<1x16x4xbf16>
    %960 = vector.shape_cast %959 : vector<1x16x4xbf16> to vector<16x4xbf16>
    %cst_590 = arith.constant dense<0.000000e+00> : vector<32x4xf32>
    %961 = tpu.matmul %958, %960, %cst_590 {dimension_numbers = #tpu.dot_dimension_numbers<[1], [0], [0], [1], [0, 0, 1, 1], [], []>} : vector<32x16xbf16>, vector<16x4xbf16>, vector<32x4xf32> -> vector<32x4xf32>
    %962 = arith.addf %954, %961 : vector<32x4xf32>
    %c0_591 = arith.constant 0 : index
    %c0_592 = arith.constant 0 : index
    %963 = vector.load %arg47[%c0_591, %c0_592] : memref<1x4xf32, #tpu.memory_space<vmem>>, vector<1x4xf32>
    %964 = vector.broadcast %963 : vector<1x4xf32> to vector<32x4xf32>
    %965 = arith.addf %962, %964 : vector<32x4xf32>
    %966 = math.tanh %965 : vector<32x4xf32>
    %c0_593 = arith.constant 0 : index
    %c0_594 = arith.constant 0 : index
    %c0_595 = arith.constant 0 : index
    %967 = vector.load %arg48[%c0_593, %c0_594, %c0_595] : memref<1x32x4xf32, #tpu.memory_space<vmem>>, vector<1x32x4xf32>
    %968 = vector.shape_cast %967 : vector<1x32x4xf32> to vector<32x4xf32>
    %969 = vector.shape_cast %966 : vector<32x4xf32> to vector<1x32x4xf32>
    tpu.vector_store %arg48[%c0_593, %c0_594, %c0_595], %969 {strides = array<i32>} : memref<1x32x4xf32, #tpu.memory_space<vmem>>, vector<1x32x4xf32>,
    return
  }
  func.func @transform_0(%arg0: i32) -> (i32, i32, i32) {
    %c0_i32 = arith.constant 0 : i32
    %c0_i32_0 = arith.constant 0 : i32
    %c0_i32_1 = arith.constant 0 : i32
    return %arg0, %c0_i32, %c0_i32_0 : i32, i32, i32
  }
  func.func @transform_1(%arg0: i32) -> (i32, i32, i32) {
    %c0_i32 = arith.constant 0 : i32
    %c0_i32_0 = arith.constant 0 : i32
    %c0_i32_1 = arith.constant 0 : i32
    %c0_i32_2 = arith.constant 0 : i32
    return %c0_i32, %c0_i32_0, %c0_i32_1 : i32, i32, i32
  }
  func.func @transform_2(%arg0: i32) -> (i32, i32) {
    %c0_i32 = arith.constant 0 : i32
    %c0_i32_0 = arith.constant 0 : i32
    %c0_i32_1 = arith.constant 0 : i32
    return %c0_i32, %c0_i32_0 : i32, i32
  }
  func.func @transform_3(%arg0: i32) -> (i32, i32, i32) {
    %c0_i32 = arith.constant 0 : i32
    %c0_i32_0 = arith.constant 0 : i32
    %c0_i32_1 = arith.constant 0 : i32
    %c0_i32_2 = arith.constant 0 : i32
    return %c0_i32, %c0_i32_0, %c0_i32_1 : i32, i32, i32
  }
  func.func @transform_4(%arg0: i32) -> (i32, i32) {
    %c0_i32 = arith.constant 0 : i32
    %c0_i32_0 = arith.constant 0 : i32
    %c0_i32_1 = arith.constant 0 : i32
    return %c0_i32, %c0_i32_0 : i32, i32
  }
  func.func @transform_5(%arg0: i32) -> (i32, i32) {
    %c0_i32 = arith.constant 0 : i32
    %c0_i32_0 = arith.constant 0 : i32
    %c0_i32_1 = arith.constant 0 : i32
    return %c0_i32, %c0_i32_0 : i32, i32
  }
  func.func @transform_6(%arg0: i32) -> (i32, i32) {
    %c0_i32 = arith.constant 0 : i32
    %c0_i32_0 = arith.constant 0 : i32
    %c0_i32_1 = arith.constant 0 : i32
    return %c0_i32, %c0_i32_0 : i32, i32
  }
  func.func @transform_7(%arg0: i32) -> (i32, i32, i32) {
    %c0_i32 = arith.constant 0 : i32
    %c0_i32_0 = arith.constant 0 : i32
    %c0_i32_1 = arith.constant 0 : i32
    %c0_i32_2 = arith.constant 0 : i32
    return %c0_i32, %c0_i32_0, %c0_i32_1 : i32, i32, i32
  }
  func.func @transform_8(%arg0: i32) -> (i32, i32) {
    %c0_i32 = arith.constant 0 : i32
    %c0_i32_0 = arith.constant 0 : i32
    %c0_i32_1 = arith.constant 0 : i32
    return %c0_i32, %c0_i32_0 : i32, i32
  }
  func.func @transform_9(%arg0: i32) -> (i32, i32, i32) {
    %c0_i32 = arith.constant 0 : i32
    %c0_i32_0 = arith.constant 0 : i32
    %c0_i32_1 = arith.constant 0 : i32
    %c0_i32_2 = arith.constant 0 : i32
    return %c0_i32, %c0_i32_0, %c0_i32_1 : i32, i32, i32
  }
  func.func @transform_10(%arg0: i32) -> (i32, i32) {
    %c0_i32 = arith.constant 0 : i32
    %c0_i32_0 = arith.constant 0 : i32
    %c0_i32_1 = arith.constant 0 : i32
    return %c0_i32, %c0_i32_0 : i32, i32
  }
  func.func @transform_11(%arg0: i32) -> (i32, i32) {
    %c0_i32 = arith.constant 0 : i32
    %c0_i32_0 = arith.constant 0 : i32
    %c0_i32_1 = arith.constant 0 : i32
    return %c0_i32, %c0_i32_0 : i32, i32
  }
  func.func @transform_12(%arg0: i32) -> (i32, i32) {
    %c0_i32 = arith.constant 0 : i32
    %c0_i32_0 = arith.constant 0 : i32
    %c0_i32_1 = arith.constant 0 : i32
    return %c0_i32, %c0_i32_0 : i32, i32
  }
  func.func @transform_13(%arg0: i32) -> (i32, i32, i32) {
    %c0_i32 = arith.constant 0 : i32
    %c0_i32_0 = arith.constant 0 : i32
    %c0_i32_1 = arith.constant 0 : i32
    %c0_i32_2 = arith.constant 0 : i32
    return %c0_i32, %c0_i32_0, %c0_i32_1 : i32, i32, i32
  }
  func.func @transform_14(%arg0: i32) -> (i32, i32) {
    %c0_i32 = arith.constant 0 : i32
    %c0_i32_0 = arith.constant 0 : i32
    %c0_i32_1 = arith.constant 0 : i32
    return %c0_i32, %c0_i32_0 : i32, i32
  }
  func.func @transform_15(%arg0: i32) -> (i32, i32, i32) {
    %c0_i32 = arith.constant 0 : i32
    %c0_i32_0 = arith.constant 0 : i32
    %c0_i32_1 = arith.constant 0 : i32
    %c0_i32_2 = arith.constant 0 : i32
    return %c0_i32, %c0_i32_0, %c0_i32_1 : i32, i32, i32
  }
  func.func @transform_16(%arg0: i32) -> (i32, i32) {
    %c0_i32 = arith.constant 0 : i32
    %c0_i32_0 = arith.constant 0 : i32
    %c0_i32_1 = arith.constant 0 : i32
    return %c0_i32, %c0_i32_0 : i32, i32
  }
  func.func @transform_17(%arg0: i32) -> (i32, i32) {
    %c0_i32 = arith.constant 0 : i32
    %c0_i32_0 = arith.constant 0 : i32
    %c0_i32_1 = arith.constant 0 : i32
    return %c0_i32, %c0_i32_0 : i32, i32
  }
  func.func @transform_18(%arg0: i32) -> (i32, i32) {
    %c0_i32 = arith.constant 0 : i32
    %c0_i32_0 = arith.constant 0 : i32
    %c0_i32_1 = arith.constant 0 : i32
    return %c0_i32, %c0_i32_0 : i32, i32
  }
  func.func @transform_19(%arg0: i32) -> (i32, i32) {
    %c0_i32 = arith.constant 0 : i32
    %c0_i32_0 = arith.constant 0 : i32
    %c0_i32_1 = arith.constant 0 : i32
    return %c0_i32, %c0_i32_0 : i32, i32
  }
  func.func @transform_20(%arg0: i32) -> (i32, i32, i32) {
    %c0_i32 = arith.constant 0 : i32
    %c0_i32_0 = arith.constant 0 : i32
    %c0_i32_1 = arith.constant 0 : i32
    %c0_i32_2 = arith.constant 0 : i32
    return %c0_i32, %c0_i32_0, %c0_i32_1 : i32, i32, i32
  }
  func.func @transform_21(%arg0: i32) -> (i32, i32, i32) {
    %c0_i32 = arith.constant 0 : i32
    %c0_i32_0 = arith.constant 0 : i32
    %c0_i32_1 = arith.constant 0 : i32
    %c0_i32_2 = arith.constant 0 : i32
    return %c0_i32, %c0_i32_0, %c0_i32_1 : i32, i32, i32
  }
  func.func @transform_22(%arg0: i32) -> (i32, i32, i32) {
    %c0_i32 = arith.constant 0 : i32
    %c0_i32_0 = arith.constant 0 : i32
    %c0_i32_1 = arith.constant 0 : i32
    %c0_i32_2 = arith.constant 0 : i32
    return %c0_i32, %c0_i32_0, %c0_i32_1 : i32, i32, i32
  }
  func.func @transform_23(%arg0: i32) -> (i32, i32, i32) {
    %c0_i32 = arith.constant 0 : i32
    %c0_i32_0 = arith.constant 0 : i32
    %c0_i32_1 = arith.constant 0 : i32
    %c0_i32_2 = arith.constant 0 : i32
    return %c0_i32, %c0_i32_0, %c0_i32_1 : i32, i32, i32
  }
  func.func @transform_24(%arg0: i32) -> (i32, i32, i32) {
    %c0_i32 = arith.constant 0 : i32
    %c0_i32_0 = arith.constant 0 : i32
    %c0_i32_1 = arith.constant 0 : i32
    %c0_i32_2 = arith.constant 0 : i32
    return %c0_i32, %c0_i32_0, %c0_i32_1 : i32, i32, i32
  }
  func.func @transform_25(%arg0: i32) -> (i32, i32, i32) {
    %c0_i32 = arith.constant 0 : i32
    %c0_i32_0 = arith.constant 0 : i32
    %c0_i32_1 = arith.constant 0 : i32
    %c0_i32_2 = arith.constant 0 : i32
    return %c0_i32, %c0_i32_0, %c0_i32_1 : i32, i32, i32
  }
  func.func @transform_26(%arg0: i32) -> (i32, i32, i32) {
    %c0_i32 = arith.constant 0 : i32
    %c0_i32_0 = arith.constant 0 : i32
    %c0_i32_1 = arith.constant 0 : i32
    %c0_i32_2 = arith.constant 0 : i32
    return %c0_i32, %c0_i32_0, %c0_i32_1 : i32, i32, i32
  }
  func.func @transform_27(%arg0: i32) -> (i32, i32, i32) {
    %c0_i32 = arith.constant 0 : i32
    %c0_i32_0 = arith.constant 0 : i32
    %c0_i32_1 = arith.constant 0 : i32
    %c0_i32_2 = arith.constant 0 : i32
    return %c0_i32, %c0_i32_0, %c0_i32_1 : i32, i32, i32
  }
  func.func @transform_28(%arg0: i32) -> (i32, i32, i32) {
    %c0_i32 = arith.constant 0 : i32
    %c0_i32_0 = arith.constant 0 : i32
    %c0_i32_1 = arith.constant 0 : i32
    %c0_i32_2 = arith.constant 0 : i32
    return %c0_i32, %c0_i32_0, %c0_i32_1 : i32, i32, i32
  }
  func.func @transform_29(%arg0: i32) -> (i32, i32, i32) {
    %c0_i32 = arith.constant 0 : i32
    %c0_i32_0 = arith.constant 0 : i32
    %c0_i32_1 = arith.constant 0 : i32
    %c0_i32_2 = arith.constant 0 : i32
    return %c0_i32, %c0_i32_0, %c0_i32_1 : i32, i32, i32
  }
  func.func @transform_30(%arg0: i32) -> (i32, i32, i32) {
    %c0_i32 = arith.constant 0 : i32
    %c0_i32_0 = arith.constant 0 : i32
    %c0_i32_1 = arith.constant 0 : i32
    %c0_i32_2 = arith.constant 0 : i32
    return %c0_i32, %c0_i32_0, %c0_i32_1 : i32, i32, i32
  }
  func.func @transform_31(%arg0: i32) -> (i32, i32, i32) {
    %c0_i32 = arith.constant 0 : i32
    %c0_i32_0 = arith.constant 0 : i32
    %c0_i32_1 = arith.constant 0 : i32
    %c0_i32_2 = arith.constant 0 : i32
    return %c0_i32, %c0_i32_0, %c0_i32_1 : i32, i32, i32
  }
  func.func @transform_32(%arg0: i32) -> (i32, i32, i32) {
    %c0_i32 = arith.constant 0 : i32
    %c0_i32_0 = arith.constant 0 : i32
    %c0_i32_1 = arith.constant 0 : i32
    %c0_i32_2 = arith.constant 0 : i32
    return %c0_i32, %c0_i32_0, %c0_i32_1 : i32, i32, i32
  }
  func.func @transform_33(%arg0: i32) -> (i32, i32, i32) {
    %c0_i32 = arith.constant 0 : i32
    %c0_i32_0 = arith.constant 0 : i32
    %c0_i32_1 = arith.constant 0 : i32
    %c0_i32_2 = arith.constant 0 : i32
    return %c0_i32, %c0_i32_0, %c0_i32_1 : i32, i32, i32
  }
  func.func @transform_34(%arg0: i32) -> (i32, i32, i32) {
    %c0_i32 = arith.constant 0 : i32
    %c0_i32_0 = arith.constant 0 : i32
    %c0_i32_1 = arith.constant 0 : i32
    %c0_i32_2 = arith.constant 0 : i32
    return %c0_i32, %c0_i32_0, %c0_i32_1 : i32, i32, i32
  }
  func.func @transform_35(%arg0: i32) -> (i32, i32, i32) {
    %c0_i32 = arith.constant 0 : i32
    %c0_i32_0 = arith.constant 0 : i32
    %c0_i32_1 = arith.constant 0 : i32
    %c0_i32_2 = arith.constant 0 : i32
    return %c0_i32, %c0_i32_0, %c0_i32_1 : i32, i32, i32
  }
  func.func @transform_36(%arg0: i32) -> (i32, i32, i32) {
    %c0_i32 = arith.constant 0 : i32
    %c0_i32_0 = arith.constant 0 : i32
    %c0_i32_1 = arith.constant 0 : i32
    %c0_i32_2 = arith.constant 0 : i32
    return %c0_i32, %c0_i32_0, %c0_i32_1 : i32, i32, i32
  }
  func.func @transform_37(%arg0: i32) -> (i32, i32, i32) {
    %c0_i32 = arith.constant 0 : i32
    %c0_i32_0 = arith.constant 0 : i32
    %c0_i32_1 = arith.constant 0 : i32
    %c0_i32_2 = arith.constant 0 : i32
    return %c0_i32, %c0_i32_0, %c0_i32_1 : i32, i32, i32
  }
  func.func @transform_38(%arg0: i32) -> (i32, i32, i32) {
    %c0_i32 = arith.constant 0 : i32
    %c0_i32_0 = arith.constant 0 : i32
    %c0_i32_1 = arith.constant 0 : i32
    %c0_i32_2 = arith.constant 0 : i32
    return %c0_i32, %c0_i32_0, %c0_i32_1 : i32, i32, i32
  }
  func.func @transform_39(%arg0: i32) -> (i32, i32, i32) {
    %c0_i32 = arith.constant 0 : i32
    %c0_i32_0 = arith.constant 0 : i32
    %c0_i32_1 = arith.constant 0 : i32
    %c0_i32_2 = arith.constant 0 : i32
    return %c0_i32, %c0_i32_0, %c0_i32_1 : i32, i32, i32
  }
  func.func @transform_40(%arg0: i32) -> (i32, i32) {
    %c0_i32 = arith.constant 0 : i32
    %c0_i32_0 = arith.constant 0 : i32
    %c0_i32_1 = arith.constant 0 : i32
    return %c0_i32, %c0_i32_0 : i32, i32
  }
  func.func @transform_41(%arg0: i32) -> (i32, i32, i32) {
    %c0_i32 = arith.constant 0 : i32
    %c0_i32_0 = arith.constant 0 : i32
    %c0_i32_1 = arith.constant 0 : i32
    %c0_i32_2 = arith.constant 0 : i32
    return %c0_i32, %c0_i32_0, %c0_i32_1 : i32, i32, i32
  }
  func.func @transform_42(%arg0: i32) -> (i32, i32, i32) {
    %c0_i32 = arith.constant 0 : i32
    %c0_i32_0 = arith.constant 0 : i32
    %c0_i32_1 = arith.constant 0 : i32
    %c0_i32_2 = arith.constant 0 : i32
    return %c0_i32, %c0_i32_0, %c0_i32_1 : i32, i32, i32
  }
  func.func @transform_43(%arg0: i32) -> (i32, i32) {
    %c0_i32 = arith.constant 0 : i32
    %c0_i32_0 = arith.constant 0 : i32
    %c0_i32_1 = arith.constant 0 : i32
    return %c0_i32, %c0_i32_0 : i32, i32
  }
  func.func @transform_44(%arg0: i32) -> (i32, i32, i32) {
    %c0_i32 = arith.constant 0 : i32
    %c0_i32_0 = arith.constant 0 : i32
    %c0_i32_1 = arith.constant 0 : i32
    %c0_i32_2 = arith.constant 0 : i32
    return %c0_i32, %c0_i32_0, %c0_i32_1 : i32, i32, i32
  }
  func.func @transform_45(%arg0: i32) -> (i32, i32, i32) {
    %c0_i32 = arith.constant 0 : i32
    %c0_i32_0 = arith.constant 0 : i32
    %c0_i32_1 = arith.constant 0 : i32
    %c0_i32_2 = arith.constant 0 : i32
    return %c0_i32, %c0_i32_0, %c0_i32_1 : i32, i32, i32
  }
  func.func @transform_46(%arg0: i32) -> (i32, i32) {
    %c0_i32 = arith.constant 0 : i32
    %c0_i32_0 = arith.constant 0 : i32
    %c0_i32_1 = arith.constant 0 : i32
    return %c0_i32, %c0_i32_0 : i32, i32
  }
  func.func @transform_47(%arg0: i32) -> (i32, i32, i32) {
    %c0_i32 = arith.constant 0 : i32
    %c0_i32_0 = arith.constant 0 : i32
    %c0_i32_1 = arith.constant 0 : i32
    return %arg0, %c0_i32, %c0_i32_0 : i32, i32, i32
  }
}

</mosaic_0001>

<bundles_post_ra>
// kernel: enhanced_dae_forward.1
= control target key start
LH: loop header
LB: loop body
LE: loop exit
PB: predicated region body
PF: predicated region fallthrough
CT: control target
= control target key end

     0   :  { %s10359_s6 = smov 1   ;;  %s10360_s10 = smov 2   ;;  %s11585_s0 = inlined_call_operand.smem [shape: u32[48], index: -1, kind: input, shape index: {}] }
   0x1   :  { %s10429_s5 = sld [smem:[%s11585_s0]]   ;;  %s10361_s14 = smov 3  }
   0x2   :  { %s10434_s9 = sld [smem:[%s11585_s0 + %s10359_s6]]   ;;  %s10362_s18 = smov 4  }
   0x3   :  { %s10439_s13 = sld [smem:[%s11585_s0 + %s10360_s10]]   ;;  %s10363_s22 = smov 5  }
   0x4   :  { %s10444_s17 = sld [smem:[%s11585_s0 + %s10361_s14]]   ;;  %s10364_s26 = smov 6  }
   0x5   :  { %s10449_s21 = sld [smem:[%s11585_s0 + %s10362_s18]]   ;;  %s10365_s30 = smov 7  }
   0x6   :  { %s10454_s25 = sld [smem:[%s11585_s0 + %s10363_s22]]   ;;  %s10366_s4 = smov 8  }
   0x7   :  { %11637 = sst [smem:[#allocation17_spill]] %s10429_s5  ;;  %s10367_s10 = smov 9  }
   0x8   :  { %11638 = sst [smem:[#allocation18_spill]] %s10434_s9  ;;  %s10368_s15 = smov 10  }
   0x9   :  { %11639 = sst [smem:[#allocation19_spill]] %s10439_s13  ;;  %s10369_s20 = smov 11  }
   0xa   :  { %11640 = sst [smem:[#allocation20_spill]] %s10444_s17  ;;  %s10371_s1 = smov 13  }
   0xb   :  { %s10459_s29 = sld [smem:[%s11585_s0 + %s10364_s26]]   ;;  %s10370_s26 = smov 12  }
   0xc   :  { %s10464_s3 = sld [smem:[%s11585_s0 + %s10365_s30]]   ;;  %s10372_s7 = smov 14  }
   0xd   :  { %s10469_s8 = sld [smem:[%s11585_s0 + %s10366_s4]]   ;;  %s10374_s22 = smov 16  }
   0xe   :  { %s10474_s14 = sld [smem:[%s11585_s0 + %s10367_s10]]   ;;  %s10375_s28 = smov 17  }
   0xf   :  { %s10479_s19 = sld [smem:[%s11585_s0 + %s10368_s15]]   ;;  %s10373_s15 = smov 15  }
  0x10   :  { %s10484_s24 = sld [smem:[%s11585_s0 + %s10369_s20]]  }
  0x11   :  { %s10489_s30 = sld [smem:[%s11585_s0 + %s10370_s26]]  }
  0x12   :  { %11641 = sst [smem:[#allocation21_spill]] %s10464_s3 }
  0x13   :  { %11642 = sst [smem:[#allocation22_spill]] %s10469_s8 }
  0x14   :  { %11643 = sst [smem:[#allocation23_spill]] %s10474_s14 }
  0x15   :  { %11644 = sst [smem:[#allocation24_spill]] %s10479_s19 }
  0x16   :  { %11645 = sst [smem:[#allocation25_spill]] %s10484_s24 }
  0x17   :  { %s10494_s6 = sld [smem:[%s11585_s0 + %s10371_s1]]  }
  0x18   :  { %s10499_s12 = sld [smem:[%s11585_s0 + %s10372_s7]]   ;;  %s10376_s7 = smov 18  }
  0x19   :  { %s10504_s20 = sld [smem:[%s11585_s0 + %s10373_s15]]   ;;  %s10377_s15 = smov 19  }
  0x1a   :  { %s10509_s27 = sld [smem:[%s11585_s0 + %s10374_s22]]   ;;  %s10378_s22 = smov 20  }
  0x1b   :  { %s10514_s4 = sld [smem:[%s11585_s0 + %s10375_s28]]   ;;  %s10379_s28 = smov 21  }
  0x1d   :  { %11646 = sst [smem:[#allocation26_spill]] %s10494_s6 }
  0x1e   :  { %11647 = sst [smem:[#allocation27_spill]] %s10499_s12 }
  0x1f   :  { %11648 = sst [smem:[#allocation28_spill]] %s10504_s20 }
  0x20   :  { %s10519_s12 = sld [smem:[%s11585_s0 + %s10376_s7]]   ;;  %s10380_s7 = smov 22  }
  0x21   :  { %11649 = sst [smem:[#allocation29_spill]] %s10514_s4 }
  0x22   :  { %s10524_s20 = sld [smem:[%s11585_s0 + %s10377_s15]]   ;;  %s10381_s15 = smov 23  }
  0x23   :  { %s10529_s6 = sld [smem:[%s11585_s0 + %s10378_s22]]   ;;  %s10382_s22 = smov 24  }
  0x24   :  { %s10534_s4 = sld [smem:[%s11585_s0 + %s10379_s28]]   ;;  %s10383_s28 = smov 25  }
  0x25   :  { %s10539_s19 = sld [smem:[%s11585_s0 + %s10380_s7]]   ;;  %s10384_s7 = smov 26  }
  0x26   :  { %11650 = sst [smem:[#allocation30_spill]] %s10519_s12 }
  0x28   :  { %11651 = sst [smem:[#allocation31_spill]] %s10524_s20 }
  0x29   :  { %11652 = sst [smem:[#allocation32_spill]] %s10529_s6 }
  0x2a   :  { %11653 = sst [smem:[#allocation33_spill]] %s10534_s4 }
  0x2b   :  { %11654 = sst [smem:[#allocation34_spill]] %s10539_s19 }
  0x2c   :  { %s10544_s20 = sld [smem:[%s11585_s0 + %s10381_s15]]   ;;  %s10385_s15 = smov 27  }
  0x2d   :  { %s10549_s6 = sld [smem:[%s11585_s0 + %s10382_s22]]   ;;  %s10386_s22 = smov 28  }
  0x2e   :  { %s10554_s4 = sld [smem:[%s11585_s0 + %s10383_s28]]   ;;  %s10387_s28 = smov 29  }
  0x2f   :  { %s10559_s19 = sld [smem:[%s11585_s0 + %s10384_s7]]   ;;  %s10388_s7 = smov 30  }
  0x32   :  { %11655 = sst [smem:[#allocation35_spill]] %s10544_s20 }
  0x33   :  { %11656 = sst [smem:[#allocation36_spill]] %s10549_s6 }
  0x34   :  { %11657 = sst [smem:[#allocation37_spill]] %s10554_s4 }
  0x35   :  { %11658 = sst [smem:[#allocation38_spill]] %s10559_s19 }
  0x36   :  { %s10564_s20 = sld [smem:[%s11585_s0 + %s10385_s15]]   ;;  %s10389_s15 = smov 31  }
  0x37   :  { %s10569_s6 = sld [smem:[%s11585_s0 + %s10386_s22]]   ;;  %s10390_s22 = smov 32  }
  0x38   :  { %s10574_s4 = sld [smem:[%s11585_s0 + %s10387_s28]]   ;;  %s10391_s28 = smov 33  }
  0x39   :  { %s10579_s19 = sld [smem:[%s11585_s0 + %s10388_s7]]   ;;  %s10392_s7 = smov 34  }
  0x3c   :  { %11659 = sst [smem:[#allocation39_spill]] %s10564_s20 }
  0x3d   :  { %11660 = sst [smem:[#allocation40_spill]] %s10569_s6 }
  0x3e   :  { %11661 = sst [smem:[#allocation41_spill]] %s10574_s4 }
  0x3f   :  { %11662 = sst [smem:[#allocation42_spill]] %s10579_s19 }
  0x40   :  { %s10584_s20 = sld [smem:[%s11585_s0 + %s10389_s15]]   ;;  %s10393_s15 = smov 35  }
  0x41   :  { %s10589_s6 = sld [smem:[%s11585_s0 + %s10390_s22]]   ;;  %s10394_s22 = smov 36  }
  0x42   :  { %s10594_s4 = sld [smem:[%s11585_s0 + %s10391_s28]]   ;;  %s10395_s28 = smov 37  }
  0x43   :  { %s10599_s19 = sld [smem:[%s11585_s0 + %s10392_s7]]   ;;  %s10396_s7 = smov 38  }
  0x46   :  { %11663 = sst [smem:[#allocation43_spill]] %s10584_s20 }
  0x47   :  { %11664 = sst [smem:[#allocation44_spill]] %s10589_s6 }
  0x48   :  { %11665 = sst [smem:[#allocation45_spill]] %s10594_s4 }
  0x49   :  { %11666 = sst [smem:[#allocation46_spill]] %s10599_s19 }
  0x4a   :  { %s10604_s20 = sld [smem:[%s11585_s0 + %s10393_s15]]   ;;  %s10397_s15 = smov 39  }
  0x4b   :  { %s10609_s6 = sld [smem:[%s11585_s0 + %s10394_s22]]   ;;  %s10398_s22 = smov 40  }
  0x4c   :  { %s10614_s4 = sld [smem:[%s11585_s0 + %s10395_s28]]   ;;  %s10399_s28 = smov 41  }
  0x4d   :  { %s10619_s19 = sld [smem:[%s11585_s0 + %s10396_s7]]   ;;  %s10400_s7 = smov 42  }
  0x50   :  { %11667 = sst [smem:[#allocation47_spill]] %s10604_s20 }
  0x51   :  { %11668 = sst [smem:[#allocation48_spill]] %s10609_s6 }
  0x52   :  { %11669 = sst [smem:[#allocation49_spill]] %s10614_s4 }
  0x53   :  { %11670 = sst [smem:[#allocation50_spill]] %s10619_s19 }
  0x54   :  { %s10624_s20 = sld [smem:[%s11585_s0 + %s10397_s15]]   ;;  %s10401_s15 = smov 43  }
  0x55   :  { %s10629_s6 = sld [smem:[%s11585_s0 + %s10398_s22]]   ;;  %s10402_s22 = smov 44  }
  0x56   :  { %s10634_s4 = sld [smem:[%s11585_s0 + %s10399_s28]]   ;;  %s10403_s28 = smov 45  }
  0x57   :  { %s10639_s19 = sld [smem:[%s11585_s0 + %s10400_s7]]   ;;  %s10404_s7 = smov 46  }
  0x58   :  { %s10649_s24 = sld [smem:[%s11585_s0 + %s10402_s22]]  }
  0x5a   :  { %11671 = sst [smem:[#allocation51_spill]] %s10624_s20 }
  0x5b   :  { %11672 = sst [smem:[#allocation52_spill]] %s10629_s6 }
  0x5c   :  { %11673 = sst [smem:[#allocation53_spill]] %s10634_s4 }
  0x5d   :  { %11674 = sst [smem:[#allocation54_spill]] %s10639_s19 }
  0x5e   :  { %s10644_s20 = sld [smem:[%s11585_s0 + %s10401_s15]]   ;;  %s10405_s15 = smov 47  }
  0x5f   :  { %s10654_s4 = sld [smem:[%s11585_s0 + %s10403_s28]]  }
  0x60   :  { %s10659_s19 = sld [smem:[%s11585_s0 + %s10404_s7]]  }
  0x61   :  { %s10664_s8 = sld [smem:[%s11585_s0 + %s10405_s15]]  }
  0x62   :  { %100 = vsyncpa [#allocation4], 0 }
  0x63   :  { %101 = vsyncpa [#allocation6], 0 }
  0x64   :  { %102 = vsyncpa [#allocation9], 0 }
  0x65   :  { %103 = vsyncpa [#allocation12], 0  ;;  %s10666_s22 = smov 0  }
  0x66 LB: > { %s11675_s17 = sld [smem:[#allocation20_spill]]  ;;  %s11676_s14 = sld [smem:[#allocation23_spill]]  ;;  %s10357_s22 = sphi %s10666_s22, %s109_s22  }
  0x67   : > { %s11677_s12 = sld [smem:[#allocation30_spill]]  ;;  %s11678_s9 = sld [smem:[#allocation18_spill]] }
  0x68   : > { %s11679_s6 = sld [smem:[#allocation52_spill]]  ;;  %s11680_s3 = sld [smem:[#allocation21_spill]] }
  0x69   : > { %s10406_s23 = smov [#allocation5]   ;;  %s10672_s28 = sadd.s32 4294967295, %s10357_s22  }
  0x6a   : > { %s1198_s26 = sshll.u32 %s10406_s23, 4  ;;  %p8241_p0 = scmp.ge.s32.totalorder %s10357_s22, 1  ;;  %s10677_s26 = int_to_ptr.vmem [resolvable:$true] %s1198_s26 }
  0x6b   : > { %p1132_p1 = scmp.lt.s32.totalorder %s10357_s22, 3  ;;  %p11611_p2 = scmp.eq.s32.totalorder %s10672_s28, 0 }
  0x6c   : > { %s10407_s1 = smov [#allocation8]   ;;  %s10408_s7 = smov [#allocation3]  }
  0x6d   : > { %p10679_p3 = pnand %p8241_p0, %p1132_p1  ;;  %s1286_s2 = sshll.u32 %s10407_s1, 4  ;;  %s10685_s2 = int_to_ptr.vmem [resolvable:$true] %s1286_s2 }
  0x6e   : > { %s1178_s10 = sshll.u32 %s10408_s7, 4  ;;  %s10409_s15 = smov [#allocation7]   ;;  %s10693_s10 = int_to_ptr.vmem [resolvable:$true] %s1178_s10 }
  0x6f   : > { %s11681_s0 = scalar_select %p10679_p3, 1, 0 }
  0x70   : > { %p9796_p4 = pneg %p10679_p3  ;;  %s1212_s16 = sshll.u32 %s10409_s15, 4  ;;  %s10695_s16 = int_to_ptr.vmem [resolvable:$true] %s1212_s16 }
  0x71   : > { %s10167_s18 = scalar_lea.hbm %s10509_s27, 16 }
  0x72   : > { %p10689_p5 = pnand %p11611_p2, %p9796_p4  ;;  %p10168_p6 = scmp.ne.s32.totalorder %s10509_s27, %s10167_s18 }
  0x73   : > { %p10174_p10 = scmp.lt.u32.totalorder %s10167_s18, %s10509_s27 }
  0x74   : > { %p10701_p7 = pneg %p10689_p5 }
  0x76   : > { %p10170_p8 = pnand %p10701_p7, %p10168_p6 }
  0x78   : > { %p10171_p9 = pneg %p10170_p8 }
  0x7a   : > { %p10176_p11 = pnand %p10174_p10, %p10171_p9 }
  0x7c   : > { %10179 = shalt.err (!%p10176_p11)
}
  0x7d   : > { %s10180_s1 = scalar_lea.vmem %s10677_s26, 16  ;;  %s10187_s7 = scalar_lea.vmem %s10677_s26, 32 }
  0x7e   : > { %p10181_p12 = scmp.ne.s32.totalorder %s10677_s26, %s10180_s1  ;;  %p10188_p1 = scmp.lt.s32.totalorder %s10677_s26, %s10677_s26 }
  0x7f   : > { %p10189_p4 = scmp.lt.s32.totalorder %s10187_s7, %s10180_s1 }
  0x80   : > { %p10183_p13 = pnand %p10181_p12, %p10701_p7 }
  0x81   : > { %p10190_p2 = por %p10189_p4, %p10188_p1 }
  0x82   : > { %p10184_p0 = pneg %p10183_p13 }
  0x84   : > { %p10191_p6 = pnand %p10190_p2, %p10184_p0 }
  0x86   : > { %10194 = shalt.err (!%p10191_p6)
}
  0x87   : > { %9802 = dma.hbm_to_vmem [thread:$0]  (!%p10689_p5), %s10509_s27, 16, %s10677_s26, [#allocation6]  }
  0x88   : > { %s10195_s15 = scalar_lea.hbm %s11679_s6, 16 }
  0x89   : > { %p10196_p8 = scmp.ne.s32.totalorder %s11679_s6, %s10195_s15  ;;  %p10202_p11 = scmp.lt.u32.totalorder %s10195_s15, %s11679_s6 }
  0x8b   : > { %p10198_p9 = pnand %p10196_p8, %p10701_p7 }
  0x8d   : > { %p10199_p10 = pneg %p10198_p9 }
  0x8f   : > { %p10204_p12 = pnand %p10202_p11, %p10199_p10 }
  0x91   : > { %10207 = shalt.err (!%p10204_p12)
}
  0x92   : > { %s10208_s18 = scalar_lea.vmem %s10685_s2, 16  ;;  %s10215_s1 = scalar_lea.vmem %s10685_s2, 32 }
  0x93   : > { %p10209_p2 = scmp.ne.s32.totalorder %s10685_s2, %s10208_s18  ;;  %p10216_p1 = scmp.lt.s32.totalorder %s10685_s2, %s10685_s2 }
  0x94   : > { %p10217_p4 = scmp.lt.s32.totalorder %s10215_s1, %s10208_s18 }
  0x95   : > { %p10211_p13 = pnand %p10209_p2, %p10701_p7 }
  0x96   : > { %p10218_p6 = por %p10217_p4, %p10216_p1 }
  0x97   : > { %p10212_p0 = pneg %p10211_p13 }
  0x99   : > { %p10219_p8 = pnand %p10218_p6, %p10212_p0 }
  0x9b   : > { %10222 = shalt.err (!%p10219_p8)
}
  0x9c   : > { %9808 = dma.hbm_to_vmem [thread:$0]  (!%p10689_p5), %s11679_s6, 16, %s10685_s2, [#allocation9]  }
  0x9d   : > { %s10223_s26 = scalar_lea.hbm %s10489_s30, 16 }
  0x9e   : > { %p10224_p9 = scmp.ne.s32.totalorder %s10489_s30, %s10223_s26  ;;  %p10230_p12 = scmp.lt.u32.totalorder %s10223_s26, %s10489_s30 }
  0xa0   : > { %p10226_p10 = pnand %p10224_p9, %p10701_p7 }
  0xa2   : > { %p10227_p11 = pneg %p10226_p10 }
  0xa4   : > { %p10232_p2 = pnand %p10230_p12, %p10227_p11 }
  0xa6   : > { %10235 = shalt.err (!%p10232_p2)
}
  0xa7   : > { %s10236_s7 = scalar_lea.vmem %s10693_s10, 16  ;;  %s10243_s15 = scalar_lea.vmem %s10693_s10, 32 }
  0xa8   : > { %p10237_p13 = scmp.ne.s32.totalorder %s10693_s10, %s10236_s7  ;;  %p10244_p4 = scmp.lt.s32.totalorder %s10693_s10, %s10693_s10 }
  0xa9   : > { %p10245_p6 = scmp.lt.s32.totalorder %s10243_s15, %s10236_s7 }
  0xaa   : > { %p10239_p0 = pnand %p10237_p13, %p10701_p7 }
  0xab   : > { %p10246_p8 = por %p10245_p6, %p10244_p4 }
  0xac   : > { %p10240_p1 = pneg %p10239_p0 }
  0xae   : > { %p10247_p9 = pnand %p10246_p8, %p10240_p1 }
  0xb0   : > { %10250 = shalt.err (!%p10247_p9)
}
  0xb1   : > { %9799 = dma.hbm_to_vmem [thread:$0]  (!%p10689_p5), %s10489_s30, 16, %s10693_s10, [#allocation4]  }
  0xb2   : > { %s10251_s2 = scalar_lea.hbm %s11677_s12, 16 }
  0xb3   : > { %p10252_p10 = scmp.ne.s32.totalorder %s11677_s12, %s10251_s2  ;;  %p10258_p2 = scmp.lt.u32.totalorder %s10251_s2, %s11677_s12 }
  0xb5   : > { %p10254_p11 = pnand %p10252_p10, %p10701_p7 }
  0xb7   : > { %p10255_p12 = pneg %p10254_p11 }
  0xb9   : > { %p10260_p13 = pnand %p10258_p2, %p10255_p12 }
  0xbb   : > { %10263 = shalt.err (!%p10260_p13)
}
  0xbc   : > { %s10264_s18 = scalar_lea.vmem %s10695_s16, 16  ;;  %s10271_s1 = scalar_lea.vmem %s10695_s16, 32 }
  0xbd   : > { %p10265_p0 = scmp.ne.s32.totalorder %s10695_s16, %s10264_s18  ;;  %p10272_p6 = scmp.lt.s32.totalorder %s10695_s16, %s10695_s16 }
  0xbe   : > { %p10273_p8 = scmp.lt.s32.totalorder %s10271_s1, %s10264_s18 }
  0xbf   : > { %p10267_p1 = pnand %p10265_p0, %p10701_p7 }
  0xc0   : > { %p10274_p9 = por %p10273_p8, %p10272_p6 }
  0xc1   : > { %p10268_p4 = pneg %p10267_p1 }
  0xc3   : > { %p10275_p10 = pnand %p10274_p9, %p10268_p4 }
  0xc5   : > { %10278 = shalt.err (!%p10275_p10)
}
  0xc6   : > { %9805 = dma.hbm_to_vmem [thread:$0]  (!%p10689_p5), %s11677_s12, 16, %s10695_s16, [#allocation6]  }
  0xc7   : > { %s10410_s10 = smov [#allocation10]   ;;  %s10411_s7 = smov [#allocation11]  }
  0xc8   : > { %s1303_s26 = sshll.u32 %s10410_s10, 4  ;;  %s1320_s15 = sshll.u32 %s10411_s7, 4  ;;  %s1304_s26 = int_to_ptr.vmem [resolvable:$true] %s1303_s26  ;;  %s1321_s15 = int_to_ptr.vmem [resolvable:$true] %s1320_s15 }
  0xc9   : > { %s10279_s2 = scalar_lea.hbm %s10644_s20, 16 }
  0xca   : > { %p10280_p11 = scmp.ne.s32.totalorder %s10644_s20, %s10279_s2  ;;  %p10286_p13 = scmp.lt.u32.totalorder %s10279_s2, %s10644_s20 }
  0xcc   : > { %p10282_p12 = pnand %p10280_p11, %p10701_p7 }
  0xce   : > { %p10283_p2 = pneg %p10282_p12 }
  0xd0   : > { %p10288_p0 = pnand %p10286_p13, %p10283_p2 }
  0xd2   : > { %10291 = shalt.err (!%p10288_p0)
}
  0xd3   : > { %s10292_s18 = scalar_lea.vmem %s1304_s26, 16  ;;  %s10299_s16 = scalar_lea.vmem %s1304_s26, 32 }
  0xd4   : > { %p10293_p1 = scmp.ne.s32.totalorder %s1304_s26, %s10292_s18  ;;  %p10300_p8 = scmp.lt.s32.totalorder %s1304_s26, %s1304_s26 }
  0xd5   : > { %p10301_p9 = scmp.lt.s32.totalorder %s10299_s16, %s10292_s18 }
  0xd6   : > { %p10295_p4 = pnand %p10293_p1, %p10701_p7 }
  0xd7   : > { %p10302_p10 = por %p10301_p9, %p10300_p8 }
  0xd8   : > { %p10296_p6 = pneg %p10295_p4 }
  0xda   : > { %p10303_p3 = pnand %p10302_p10, %p10296_p6 }
  0xdc   : > { %10306 = shalt.err (!%p10303_p3)
}
  0xdd   : > { %9811 = dma.hbm_to_vmem [thread:$0]  (!%p10689_p5), %s10644_s20, 16, %s1304_s26, [#allocation9]  }
  0xde   : > { %s10307_s1 = scalar_lea.hbm %s10659_s19, 16 }
  0xdf   : > { %p10308_p11 = scmp.ne.s32.totalorder %s10659_s19, %s10307_s1  ;;  %p10314_p13 = scmp.lt.u32.totalorder %s10307_s1, %s10659_s19 }
  0xe1   : > { %p10310_p12 = pnand %p10308_p11, %p10701_p7 }
  0xe3   : > { %p10311_p2 = pneg %p10310_p12 }
  0xe5   : > { %p10316_p0 = pnand %p10314_p13, %p10311_p2 }
  0xe7   : > { %10319 = shalt.err (!%p10316_p0)
}
  0xe8   : > { %s10320_s10 = scalar_lea.vmem %s1321_s15, 16  ;;  %s10327_s7 = scalar_lea.vmem %s1321_s15, 32 }
  0xe9   : > { %p10321_p3 = scmp.ne.s32.totalorder %s1321_s15, %s10320_s10  ;;  %p10328_p6 = scmp.lt.s32.totalorder %s1321_s15, %s1321_s15 }
  0xea   : > { %p10329_p8 = scmp.lt.s32.totalorder %s10327_s7, %s10320_s10 }
  0xeb   : > { %p10323_p1 = pnand %p10321_p3, %p10701_p7 }
  0xec   : > { %p10330_p9 = por %p10329_p8, %p10328_p6 }
  0xed   : > { %p10324_p4 = pneg %p10323_p1 }
  0xef   : > { %p10331_p10 = pnand %p10330_p9, %p10324_p4 }
  0xf1   : > { %10334 = shalt.err (!%p10331_p10)
}
  0xf2   : > { %9814 = dma.hbm_to_vmem [thread:$0]  (!%p10689_p5), %s10659_s19, 16, %s1321_s15, [#allocation12]  }
  0xf3   : > { %p11684_p11 = scmp.ne.s32.totalorder %s11681_s0, 0 }
  0xf4   : > { %p11685_p12 = scmp.eq.s32.totalorder (!%p11684_p11), %s10672_s28, 0 }
  0xf5   : > { %1341 = sbr.rel (%p11684_p11) target bundleno = 9834 (0x266a), region = 208 }
  0xfc   : > { %10340 = dma.done.wait (%p11685_p12), [#allocation4], 16   ;;  %p11686_p2 = pmov %p11685_p12 }
  0xfe   : > { %10342 = vsyncadd (%p11686_p2), [#allocation4], 4294967280  ;;  %p11687_p7 = pmov %p11686_p2 }
  0xff   : > { %p11688_p13 = pmov %p11686_p2 }
 0x100   : > { %10344 = dma.done.wait (%p11687_p7), [#allocation6], 32  }
 0x101   : > { %10346 = vsyncadd (%p11688_p13), [#allocation6], 4294967264  ;;  %p11689_p0 = pmov %p11686_p2 }
 0x103   : > { %10348 = dma.done.wait (%p11689_p0), [#allocation9], 32   ;;  %p11690_p5 = pmov %p11689_p0 }
 0x104   : > { %p11691_p3 = pmov %p11689_p0 }
 0x105   : > { %10350 = vsyncadd (%p11690_p5), [#allocation9], 4294967264 }
 0x106   : > { %10352 = dma.done.wait (%p11691_p3), [#allocation12], 16   ;;  %p11692_p1 = pmov %p11689_p0 }
 0x107   : > { %s11693_s5 = sld [smem:[#allocation17_spill]]  ;;  %p1473_p4 = scmp.lt.s32.totalorder %s10672_s28, 1  ;;  %v10412_v0 = vmov 0.0   ;;  %vm10413_vm0 = vmmov 0   ;;  %vm1497_vm1 = vcmask 261120   ;;  %v9897_v7 = vld [vmem:[%s11678_s9] sm:$0xff]  }
 0x108   : > { %10354 = vsyncadd (%p11692_p1), [#allocation12], 4294967280  ;;  %9080 = vmatprep.subr.bf16.mxu0 %v10412_v0  ;;  %9088 = vmatprep.subr.bf16.mxu1 %v10412_v0  ;;  %v9898_v8 = vld [vmem:[%s11678_s9 + $0x8] sm:$0xff]   ;;  %v8266_v9 = vld [vmem:[%s11675_s17 + $0x2] sm:$0x3]  ;;  %vm1603_vm2 = vcmask 1041408  }
 0x109   : > { %s11733_s28 = smov (!%p1473_p4, %s10672_s28), 1  ;;  %9084 = vmatprep.mubr.msk.bf16.mxu0 %vm10413_vm0, %v10412_v0  ;;  %9092 = vmatprep.mubr.msk.bf16.mxu1 %vm10413_vm0, %v10412_v0  ;;  %v1543_v10 = vld [vmem:[%s11675_s17] sm:$0x3]  ;;  %v1605_v11 = vsel %vm1603_vm2, %v8266_v9, 0  ;;  %vm1599_vm3 = vcmask 31744   ;;  %v9899_v23 = vld [vmem:[%s11678_s9 + $0x10] sm:$0xff]  }
 0x10a   : > { %s11613_s0 = sshll.u32 %s11733_s28, 5  ;;  %v1652_v12 = vsel %vm1603_vm2, %v1543_v10, 0  ;;  %s11694_s13 = sld [smem:[#allocation19_spill]]  ;;  %v9900_v24 = vld [vmem:[%s11678_s9 + $0x18] sm:$0xff]   ;;  %v9901_v25 = vld [vmem:[%s11678_s9 + $0x20] sm:$0xff]   ;;  %vm2185_vm6 = vcmask 130048  }
 0x10b   : > { %v8273_v27 = vld [vmem:[%s11675_s17 + $0x4] sm:$0x3]  ;;  %v8279_v40 = vld [vmem:[%s11675_s17 + $0x6] sm:$0x3]  ;;  %v8285_v47 = vld [vmem:[%s11675_s17 + $0x8] sm:$0x3] }
 0x10c   : > { %v1754_v28 = vsel %vm1603_vm2, %v8273_v27, 0  ;;  %v1858_v45 = vsel %vm1603_vm2, %v8279_v40, 0  ;;  %v1962_v52 = vsel %vm1603_vm2, %v8285_v47, 0  ;;  %v2122_v54 = vld [vmem:[%s10454_s25] sm:$0x3]  ;;  %s11695_s23 = sld [smem:[#allocation22_spill]] }
 0x10d   : > { %s1477_s11 = scalar_lea.vmem %s11693_s5, %s11613_s0  ;;  %v2134_v59 = vsel %vm1603_vm2, %v2122_v54, 0  ;;  %s11696_s26 = sld [smem:[#allocation25_spill]]  ;;  %vm2823_vm8 = vcmask 1043456   ;;  %vm2819_vm9 = vcmask 64512   ;;  %vm3507_vm11 = vcmask 519168  }
 0x10e   : > { %v1484_v1 = vld [vmem:[%s1477_s11] sm:$0xff]  ;;  %v1485_v2 = vld [vmem:[%s1477_s11 + $0x8] sm:$0xff]  ;;  %v1486_v3 = vld [vmem:[%s1477_s11 + $0x10] sm:$0xff]  ;;  %s11697_s15 = sld [smem:[#allocation24_spill]]  ;;  %s11698_s2 = sld [smem:[#allocation26_spill]]  ;;  %vm3576_vm12 = vcmask 523264  }
 0x10f   : > { %v1488_v4 = vpack.c.bf16 %v1485_v2, %v1484_v1  ;;  %v1487_v5 = vld [vmem:[%s1477_s11 + $0x18] sm:$0xff]  ;;  %s11699_s18 = sld [smem:[#allocation28_spill]]  ;;  %s11700_s16 = sld [smem:[#allocation27_spill]]  ;;  %vm3828_vm13 = vcmask 27648   ;;  %vm3887_vm14 = vcmask 125952   ;;  %vm4007_vm15 = vcmask 257152  }
 0x110   : > { %v1489_v6 = vpack.c.bf16 %v1487_v5, %v1486_v3  ;;  %v9902_v26 = vld [vmem:[%s11694_s13] sm:$0xff]   ;;  %s11701_s1 = sld [smem:[#allocation29_spill]]  ;;  %s11702_s10 = sld [smem:[#allocation31_spill]] }
 0x111   : > { %9081 = vmatpush3.bf16.msra.mxu0 %v1488_v4  ;;  %9089 = vmatpush3.bf16.msra.mxu1 %v1488_v4  ;;  %s11703_s7 = sld [smem:[#allocation34_spill]]  ;;  %s11704_s11 = sld [smem:[#allocation35_spill]] }
 0x112   : > { %9082 = vmatprep.subr.bf16.mxu0 %v10412_v0  ;;  %9090 = vmatprep.subr.bf16.mxu1 %v10412_v0  ;;  %s11710_s0 = sld [smem:[#allocation39_spill]]  ;;  %s11625_s5 = smov 32  }
 0x113   : > { %s11713_s6 = sld [smem:[#allocation43_spill]]  ;;  %s11716_s9 = sld [smem:[#allocation44_spill]] }
 0x114   : > { %s11717_s12 = sld [smem:[#allocation45_spill]]  ;;  %s11718_s13 = sld [smem:[#allocation48_spill]] }
 0x115   : > { %9083 = vmatpush3.bf16.msra.mxu0 %v1489_v6  ;;  %9091 = vmatpush3.bf16.msra.mxu1 %v1489_v6  ;;  %s11720_s17 = sld [smem:[#allocation49_spill]] }
 0x116   : > { %9096 = vmatprep.subr.bf16.mxu0 %v10412_v0  ;;  %9102 = vmatprep.subr.bf16.mxu1 %v10412_v0 }
 0x118   : > { %9085 = vmatmul.mubr.msk.bf16.vlgmr.msra.gmra.mrb[0].mxu0 %vm1497_vm1, %v9897_v7  ;;  %9093 = vmatmul.mubr.msk.bf16.vlgmr.msra.gmra.mrb[0].mxu1 %vm1497_vm1, %v9898_v8 }
 0x119   : > { %9098 = vmatprep.mubr.msk.bf16.mxu0 %vm10413_vm0, %v10412_v0  ;;  %9104 = vmatprep.mubr.msk.bf16.mxu1 %vm10413_vm0, %v10412_v0 }
 0x11a   : > { %9097 = vmatpush3.bf16.msra.mxu0 %v1605_v11  ;;  %9103 = vmatpush3.bf16.msra.mxu1 %v1652_v12 }
 0x11b   : > { %9108 = vmatprep.subr.bf16.mxu0 %v10412_v0  ;;  %9116 = vmatprep.subr.bf16.mxu1 %v10412_v0 }
 0x1eb   : > { %v1535_v13 = vpop.f32.mrb[0].mxu0  ;;  %v1589_v14 = vpop.f32.mrb[0].mxu1 }
 0x1ec   : > { %v9086_v15 = vpop.f32.mrb[1].mxu0  ;;  %v9094_v16 = vpop.f32.mrb[1].mxu1 }
 0x1ed   : > { %v1538_v17 = vpop.f32.mrb[2].mxu0  ;;  %v1592_v18 = vpop.f32.mrb[2].mxu1  ;;  %v8287_v15 = vld [vmem:[%s10449_s21] ss:$0 sm:$0xff] }
 0x1ee   : > { %v1542_v19 = vpack.c.bf16 %v1538_v17, %v1535_v13  ;;  %v1596_v20 = vpack.c.bf16 %v1592_v18, %v1589_v14  ;;  %v9095_v21 = vpop.f32.mrb[3].mxu1  ;;  %v9087_v22 = vpop.f32.mrb[3].mxu0 }
 0x1f0   : > { %9099 = vmatmul.mubr.msk.bf16.vlgmr.msra.gmra.mrb[4].mxu0 %vm1599_vm3, %v1596_v20  ;;  %9105 = vmatmul.mubr.msk.bf16.vlgmr.msra.gmra.mrb[4].mxu1 %vm1599_vm3, %v1542_v19 }
 0x1f1   : > { %9109 = vmatpush3.bf16.msra.mxu0 %v1488_v4  ;;  %9112 = vmatprep.mubr.msk.bf16.mxu0 %vm10413_vm0, %v10412_v0 }
 0x1f2   : > { %9110 = vmatprep.subr.bf16.mxu0 %v10412_v0  ;;  %9118 = vmatprep.mubr.msk.bf16.mxu1 %vm10413_vm0, %v10412_v0 }
 0x1f3   : > { %9117 = vmatpush3.bf16.msra.mxu1 %v1754_v28 }
 0x1f4   : > { %9130 = vmatprep.subr.bf16.mxu1 %v10412_v0 }
 0x1f5   : > { %9111 = vmatpush3.bf16.msra.mxu0 %v1489_v6 }
 0x1f6   : > { %9122 = vmatprep.subr.bf16.mxu0 %v10412_v0 }
 0x1f8   : > { %9113 = vmatmul.mubr.msk.bf16.vlgmr.msra.gmra.mrb[8].mxu0 %vm1497_vm1, %v9899_v23 }
 0x1f9   : > { %9123 = vmatpush3.bf16.msra.mxu0 %v1488_v4  ;;  %9126 = vmatprep.mubr.msk.bf16.mxu0 %vm10413_vm0, %v10412_v0 }
 0x1fa   : > { %9124 = vmatprep.subr.bf16.mxu0 %v10412_v0 }
 0x1fd   : > { %9125 = vmatpush3.bf16.msra.mxu0 %v1489_v6 }
 0x1fe   : > { %9136 = vmatprep.subr.bf16.mxu0 %v10412_v0 }
 0x200   : > { %9127 = vmatmul.mubr.msk.bf16.vlgmr.msra.gmra.mrb[12].mxu0 %vm1497_vm1, %v9900_v24 }
 0x201   : > { %9137 = vmatpush3.bf16.msra.mxu0 %v1488_v4  ;;  %9140 = vmatprep.mubr.msk.bf16.mxu0 %vm10413_vm0, %v10412_v0 }
 0x202   : > { %9138 = vmatprep.subr.bf16.mxu0 %v10412_v0 }
 0x205   : > { %9139 = vmatpush3.bf16.msra.mxu0 %v1489_v6 }
 0x206   : > { %9150 = vmatprep.subr.bf16.mxu0 %v10412_v0 }
 0x208   : > { %9141 = vmatmul.mubr.msk.bf16.vlgmr.msra.gmra.mrb[16].mxu0 %vm1497_vm1, %v9901_v25 }
 0x209   : > { %9151 = vmatpush3.bf16.msra.mxu0 %v1488_v4  ;;  %9154 = vmatprep.mubr.msk.bf16.mxu0 %vm10413_vm0, %v10412_v0 }
 0x20a   : > { %9152 = vmatprep.subr.bf16.mxu0 %v10412_v0 }
 0x20d   : > { %9153 = vmatpush3.bf16.msra.mxu0 %v1489_v6 }
 0x20e   : > { %9164 = vmatprep.subr.bf16.mxu0 %v10412_v0 }
 0x210   : > { %9155 = vmatmul.mubr.msk.bf16.vlgmr.msra.gmra.mrb[20].mxu0 %vm1497_vm1, %v9902_v26 }
 0x211   : > { %9166 = vmatprep.mubr.msk.bf16.mxu0 %vm10413_vm0, %v10412_v0 }
 0x2c3   : > { %v1641_v29 = vpop.f32.mrb[4].mxu0  ;;  %v1688_v30 = vpop.f32.mrb[4].mxu1 }
 0x2c4   : > { %v1689_v31 = vadd.f32 %v1688_v30, %v1641_v29  ;;  %v9100_v32 = vpop.f32.mrb[5].mxu0  ;;  %v9106_v33 = vpop.f32.mrb[5].mxu1 }
 0x2c5   : > { %v1644_v34 = vpop.f32.mrb[6].mxu0  ;;  %v1691_v35 = vpop.f32.mrb[6].mxu1 }
 0x2c6   : > { %v1692_v36 = vadd.f32 %v1691_v35, %v1644_v34  ;;  %v9101_v37 = vpop.f32.mrb[7].mxu0  ;;  %v9107_v38 = vpop.f32.mrb[7].mxu1 }
 0x2cb   : > { %v1740_v39 = vpop.f32.mrb[8].mxu0 }
 0x2cc   : > { %v9114_v41 = vpop.f32.mrb[9].mxu0 }
 0x2cd   : > { %v1743_v42 = vpop.f32.mrb[10].mxu0 }
 0x2ce   : > { %v1747_v43 = vpack.c.bf16 %v1743_v42, %v1740_v39  ;;  %v9115_v44 = vpop.f32.mrb[11].mxu0 }
 0x2d0   : > { %9119 = vmatmul.mubr.msk.bf16.vlgmr.msra.gmra.mrb[8].mxu1 %vm1599_vm3, %v1747_v43 }
 0x2d1   : > { %9131 = vmatpush3.bf16.msra.mxu1 %v1858_v45  ;;  %9132 = vmatprep.mubr.msk.bf16.mxu1 %vm10413_vm0, %v10412_v0 }
 0x2d2   : > { %9144 = vmatprep.subr.bf16.mxu1 %v10412_v0 }
 0x2d3   : > { %v1844_v46 = vpop.f32.mrb[12].mxu0 }
 0x2d4   : > { %v9128_v48 = vpop.f32.mrb[13].mxu0 }
 0x2d5   : > { %v1847_v49 = vpop.f32.mrb[14].mxu0 }
 0x2d6   : > { %v1851_v50 = vpack.c.bf16 %v1847_v49, %v1844_v46  ;;  %v9129_v51 = vpop.f32.mrb[15].mxu0 }
 0x2d8   : > { %9133 = vmatmul.mubr.msk.bf16.vlgmr.msra.gmra.mrb[12].mxu1 %vm1599_vm3, %v1851_v50 }
 0x2d9   : > { %9145 = vmatpush3.bf16.msra.mxu1 %v1962_v52  ;;  %9146 = vmatprep.mubr.msk.bf16.mxu1 %vm10413_vm0, %v10412_v0 }
 0x2da   : > { %9158 = vmatprep.subr.bf16.mxu1 %v10412_v0 }
 0x2db   : > { %v1948_v53 = vpop.f32.mrb[16].mxu0 }
 0x2dc   : > { %v9142_v55 = vpop.f32.mrb[17].mxu0 }
 0x2dd   : > { %v1951_v56 = vpop.f32.mrb[18].mxu0 }
 0x2de   : > { %v1955_v57 = vpack.c.bf16 %v1951_v56, %v1948_v53  ;;  %v9143_v58 = vpop.f32.mrb[19].mxu0 }
 0x2e0   : > { %9147 = vmatmul.mubr.msk.bf16.vlgmr.msra.gmra.mrb[16].mxu1 %vm1599_vm3, %v1955_v57 }
 0x2e1   : > { %9159 = vmatpush3.bf16.msra.mxu1 %v2134_v59  ;;  %9160 = vmatprep.mubr.msk.bf16.mxu1 %vm10413_vm0, %v10412_v0 }
 0x2e2   : > { %9170 = vmatprep.subr.bf16.mxu1 %v10412_v0 }
 0x2e3   : > { %v2114_v60 = vpop.f32.mrb[20].mxu0 }
 0x2e4   : > { %v9156_v61 = vpop.f32.mrb[21].mxu0 }
 0x2e5   : > { %v2117_v62 = vpop.f32.mrb[22].mxu0 }
 0x2e6   : > { %v2121_v63 = vpack.c.bf16 %v2117_v62, %v2114_v60  ;;  %v9157_v1 = vpop.f32.mrb[23].mxu0 }
 0x2e8   : > { %9161 = vmatmul.mubr.msk.bf16.vlgmr.msra.gmra.mrb[20].mxu1 %vm1599_vm3, %v2121_v63 }
 0x2e9   : > { %9172 = vmatprep.mubr.msk.bf16.mxu1 %vm10413_vm0, %v10412_v0 }
 0x3a3   : > { %v1790_v2 = vpop.f32.mrb[8].mxu1 }
 0x3a4   : > { %v1797_v3 = vadd.f32 %v1790_v2, %v1689_v31  ;;  %v9120_v4 = vpop.f32.mrb[9].mxu1 }
 0x3a5   : > { %v1793_v5 = vpop.f32.mrb[10].mxu1  ;;  %v8290_v4 = vld [vmem:[%s10459_s29] ss:$0 sm:$0xff] }
 0x3a6   : > { %v1798_v6 = vadd.f32 %v1793_v5, %v1692_v36  ;;  %v9121_v7 = vpop.f32.mrb[11].mxu1 }
 0x3ab   : > { %v1894_v8 = vpop.f32.mrb[12].mxu1 }
 0x3ac   : > { %v1901_v9 = vadd.f32 %v1894_v8, %v1797_v3  ;;  %v9134_v10 = vpop.f32.mrb[13].mxu1 }
 0x3ad   : > { %v1897_v11 = vpop.f32.mrb[14].mxu1 }
 0x3ae   : > { %v1902_v12 = vadd.f32 %v1897_v11, %v1798_v6  ;;  %v9135_v13 = vpop.f32.mrb[15].mxu1 }
 0x3b3   : > { %v1998_v14 = vpop.f32.mrb[16].mxu1 }
 0x3b4   : > { %v2005_v16 = vadd.f32 %v1998_v14, %v1901_v9  ;;  %v9148_v17 = vpop.f32.mrb[17].mxu1 }
 0x3b5   : > { %v2001_v18 = vpop.f32.mrb[18].mxu1 }
 0x3b6   : > { %v2014_v19 = vadd.f32 %v8287_v15, %v2005_v16  ;;  %v2006_v20 = vadd.f32 %v2001_v18, %v1902_v12  ;;  %v9149_v21 = vpop.f32.mrb[19].mxu1 }
 0x3b8   : > { %v2018_v22 = vmul.f32 0.70710677, %v2014_v19  ;;  %v2015_v23 = vadd.f32 %v8287_v15, %v2006_v20  ;;  %v2016_v7 = vmul.f32 0.5, %v2014_v19 }
 0x3ba   : > { %v2020_v24 = vand.u32 2147483647, %v2018_v22  ;;  %v2019_v25 = vmul.f32 0.70710677, %v2015_v23  ;;  %vm2060_vm4 = vcmp.ge.f32.partialorder %v2018_v22, 0.0  ;;  %v2017_v13 = vmul.f32 0.5, %v2015_v23 }
 0x3bb   : > { %v2170_v26 = vpop.f32.mrb[20].mxu1  ;;  %v9904_v23 = vld [vmem:[%s11676_s14] sm:$0xff]  }
 0x3bc   : > { %v2022_v27 = vmul.f32 0.3275911, %v2020_v24  ;;  %v2021_v28 = vand.u32 2147483647, %v2019_v25  ;;  %v9162_v29 = vpop.f32.mrb[21].mxu1  ;;  %v2048_v35 = vsub.f32 0.0, %v2020_v24  ;;  %v2171_v9 = vadd.f32 %v8290_v4, %v2170_v26 }
 0x3bd   : > { %v2173_v32 = vpop.f32.mrb[22].mxu1  ;;  %vm2061_vm5 = vcmp.ge.f32.partialorder %v2019_v25, 0.0  ;;  %v2184_v25 = vld [vmem:[%s11680_s3] sm:$0xf]  ;;  %v8293_v26 = vld [vmem:[%s11680_s3 + $0x4] sm:$0xf] }
 0x3be   : > { %v2024_v30 = vadd.f32 1.0, %v2022_v27  ;;  %v2023_v31 = vmul.f32 0.3275911, %v2021_v28  ;;  %v9163_v33 = vpop.f32.mrb[23].mxu1  ;;  %v2049_v36 = vsub.f32 0.0, %v2021_v28  ;;  %v2050_v38 = vmul.f32 %v2048_v35, %v2020_v24  ;;  %v9903_v27 = vld [vmem:[%s11676_s14 + $0x8] sm:$0xff]  }
 0x3bf   : > { %v2174_v15 = vadd.f32 %v8290_v4, %v2173_v32  ;;  %v2179_v17 = vmul.f32 0.3, %v2171_v9 }
 0x3c0   : > { %10067 = vrcp.f32 %v2024_v30  ;;  %v2025_v34 = vadd.f32 1.0, %v2023_v31  ;;  %v2051_v41 = vmul.f32 %v2049_v36, %v2021_v28  ;;  %v2052_v43 = vmul.f32 1.442695, %v2050_v38  ;;  %v8301_v38 = vld [vmem:[%s11680_s3 + $0x8] sm:$0xf] }
 0x3c1   : > { %v2180_v22 = vmul.f32 0.3, %v2174_v15 }
 0x3c2   : > { %10069 = vrcp.f32 %v2025_v34  ;;  %v2054_v47 = vmul.f32 1.442695, %v2051_v41  ;;  %v2711_v41 = vld [vmem:[%s11695_s23] sm:$0xf]  ;;  %s11705_s23 = sld [smem:[#allocation32_spill]] }
 0x3c3   : > { %10071 = vpow2.f32 %v2052_v43 }
 0x3c4   : > { %10073 = vpow2.f32 %v2054_v47 }
 0x3ca   : > { %v10068_v37 = vpop.eup %10067 }
 0x3cb   : > { %v2030_v39 = vmul.f32 1.0614054, %v10068_v37 }
 0x3cc   : > { %v10070_v40 = vpop.eup %10069 }
 0x3cd   : > { %v2032_v42 = vadd.f32 -1.4531521, %v2030_v39  ;;  %v2031_v44 = vmul.f32 1.0614054, %v10070_v40  ;;  %v10072_v59 = vpop.eup %10071  ;;  %v8307_v39 = vld [vmem:[%s11680_s3 + $0xc] sm:$0xf] }
 0x3ce   : > { %v10074_v63 = vpop.eup %10073 }
 0x3cf   : > { %v2034_v45 = vmul.f32 %v10068_v37, %v2032_v42  ;;  %v2033_v46 = vadd.f32 -1.4531521, %v2031_v44  ;;  %v9905_v42 = vld [vmem:[%s11676_s14 + $0x10] sm:$0xff]  }
 0x3d1   : > { %v2036_v48 = vadd.f32 1.4214138, %v2034_v45  ;;  %v2035_v49 = vmul.f32 %v10070_v40, %v2033_v46 }
 0x3d3   : > { %v2038_v50 = vmul.f32 %v10068_v37, %v2036_v48  ;;  %v2037_v51 = vadd.f32 1.4214138, %v2035_v49 }
 0x3d5   : > { %v2040_v52 = vadd.f32 -0.28449672, %v2038_v50  ;;  %v2039_v53 = vmul.f32 %v10070_v40, %v2037_v51 }
 0x3d7   : > { %v2042_v54 = vmul.f32 %v10068_v37, %v2040_v52  ;;  %v2041_v55 = vadd.f32 -0.28449672, %v2039_v53  ;;  %v9906_v53 = vld [vmem:[%s11676_s14 + $0x18] sm:$0xff]  }
 0x3d9   : > { %v2044_v56 = vadd.f32 0.2548296, %v2042_v54  ;;  %v2043_v57 = vmul.f32 %v10070_v40, %v2041_v55 }
 0x3db   : > { %v2046_v58 = vmul.f32 %v10068_v37, %v2044_v56  ;;  %v2045_v60 = vadd.f32 0.2548296, %v2043_v57 }
 0x3dd   : > { %v2056_v61 = vmul.f32 %v10072_v59, %v2046_v58  ;;  %v2047_v62 = vmul.f32 %v10070_v40, %v2045_v60  ;;  %v8313_v40 = vld [vmem:[%s11680_s3 + $0x10] sm:$0xf]  ;;  %v9907_v59 = vld [vmem:[%s11676_s14 + $0x20] sm:$0xff]   ;;  %s11617_s3 = smov 80   ;;  %s11719_s14 = sld [smem:[#allocation47_spill]] }
 0x3df   : > { %v2058_v1 = vsub.f32 1.0, %v2056_v61  ;;  %v2057_v2 = vmul.f32 %v10074_v63, %v2047_v62 }
 0x3e1   : > { %v2062_v3 = vsub.f32 0.0, %v2058_v1  ;;  %v2059_v5 = vsub.f32 1.0, %v2057_v2  ;;  %v9908_v2 = vld [vmem:[%s11696_s26] sm:$0xff]   ;;  %s11706_s26 = sld [smem:[#allocation33_spill]] }
 0x3e3   : > { %v2064_v6 = vsel %vm2060_vm4, %v2058_v1, %v2062_v3  ;;  %v2063_v10 = vsub.f32 0.0, %v2059_v5  ;;  %vm4124_vm4 = vcmask 388352  }
 0x3e4   : > { %v2066_v8 = vadd.f32 1.0, %v2064_v6 }
 0x3e5   : > { %v2065_v12 = vsel %vm2061_vm5, %v2059_v5, %v2063_v10  ;;  %vm4241_vm5 = vcmask 519552  }
 0x3e6   : > { %v2068_v11 = vmul.f32 %v2066_v8, %v2016_v7  ;;  %v2067_v14 = vadd.f32 1.0, %v2065_v12 }
 0x3e8   : > { %v2177_v16 = vmul.f32 0.7, %v2068_v11  ;;  %v2069_v18 = vmul.f32 %v2067_v14, %v2017_v13 }
 0x3ea   : > { %v2181_v20 = vadd.f32 %v2179_v17, %v2177_v16  ;;  %v2178_v21 = vmul.f32 0.7, %v2069_v18 }
 0x3ec   : > { %v2182_v24 = vadd.f32 %v2180_v22, %v2178_v21 }
 0x3ee   : > { %v2183_v19 = vpack.c.bf16 %v2182_v24, %v2181_v20 }
 0x3f0   : > { %9165 = vmatpush3.bf16.msra.mxu0 %v2183_v19  ;;  %9171 = vmatpush3.bf16.msra.mxu1 %v2183_v19 }
 0x3f1   : > { %9176 = vmatprep.subr.bf16.mxu0 %v10412_v0  ;;  %9182 = vmatprep.subr.bf16.mxu1 %v10412_v0 }
 0x3f3   : > { %9167 = vmatmul.mubr.msk.bf16.vlgmr.msra.gmra.mrb[24].mxu0 %vm2185_vm6, %v2184_v25  ;;  %9173 = vmatmul.mubr.msk.bf16.vlgmr.msra.gmra.mrb[24].mxu1 %vm2185_vm6, %v8293_v26 }
 0x3f4   : > { %9177 = vmatpush3.bf16.msra.mxu0 %v9903_v27  ;;  %9178 = vmatprep.mubr.msk.bf16.mxu0 %vm10413_vm0, %v10412_v0 }
 0x3f5   : > { %9184 = vmatprep.mubr.msk.bf16.mxu1 %vm10413_vm0, %v10412_v0  ;;  %9188 = vmatprep.subr.bf16.mxu0 %v10412_v0 }
 0x3f6   : > { %9183 = vmatpush3.bf16.msra.mxu1 %v9904_v23 }
 0x3f7   : > { %9194 = vmatprep.subr.bf16.mxu1 %v10412_v0 }
 0x4c6   : > { %v2223_v28 = vpop.f32.mrb[24].mxu0  ;;  %v2271_v29 = vpop.f32.mrb[24].mxu1 }
 0x4c7   : > { %v2229_v30 = vpack.c.bf16 %v2223_v28, %v2223_v28  ;;  %v2277_v31 = vpack.c.bf16 %v2271_v29, %v2271_v29  ;;  %v9174_v32 = vpop.f32.mrb[25].mxu1  ;;  %v9168_v33 = vpop.f32.mrb[25].mxu0 }
 0x4c8   : > { %v2274_v34 = vpop.f32.mrb[26].mxu1  ;;  %v2226_v35 = vpop.f32.mrb[26].mxu0 }
 0x4c9   : > { %v9175_v36 = vpop.f32.mrb[27].mxu1  ;;  %9179 = vmatmul.mubr.msk.bf16.vlgmr.msra.gmra.mrb[28].mxu0 %vm2185_vm6, %v2277_v31  ;;  %9185 = vmatmul.mubr.msk.bf16.vlgmr.msra.gmra.mrb[28].mxu1 %vm2185_vm6, %v2229_v30  ;;  %v9169_v37 = vpop.f32.mrb[27].mxu0 }
 0x4ca   : > { %9189 = vmatpush3.bf16.msra.mxu0 %v2183_v19  ;;  %9190 = vmatprep.mubr.msk.bf16.mxu0 %vm10413_vm0, %v10412_v0 }
 0x4cb   : > { %9200 = vmatprep.subr.bf16.mxu0 %v10412_v0  ;;  %9196 = vmatprep.mubr.msk.bf16.mxu1 %vm10413_vm0, %v10412_v0 }
 0x4cc   : > { %9195 = vmatpush3.bf16.msra.mxu1 %v9905_v42 }
 0x4cd   : > { %9206 = vmatprep.subr.bf16.mxu1 %v10412_v0 }
 0x4d1   : > { %9191 = vmatmul.mubr.msk.bf16.vlgmr.msra.gmra.mrb[32].mxu0 %vm2185_vm6, %v8301_v38 }
 0x4d2   : > { %9201 = vmatpush3.bf16.msra.mxu0 %v2183_v19  ;;  %9202 = vmatprep.mubr.msk.bf16.mxu0 %vm10413_vm0, %v10412_v0 }
 0x4d3   : > { %9212 = vmatprep.subr.bf16.mxu0 %v10412_v0 }
 0x4d9   : > { %9203 = vmatmul.mubr.msk.bf16.vlgmr.msra.gmra.mrb[36].mxu0 %vm2185_vm6, %v8307_v39 }
 0x4da   : > { %9213 = vmatpush3.bf16.msra.mxu0 %v2183_v19  ;;  %9214 = vmatprep.mubr.msk.bf16.mxu0 %vm10413_vm0, %v10412_v0 }
 0x4db   : > { %9224 = vmatprep.subr.bf16.mxu0 %v10412_v0 }
 0x4e1   : > { %9215 = vmatmul.mubr.msk.bf16.vlgmr.msra.gmra.mrb[40].mxu0 %vm2185_vm6, %v8313_v40 }
 0x4e2   : > { %9225 = vmatpush3.bf16.msra.mxu0 %v2183_v19  ;;  %9226 = vmatprep.mubr.msk.bf16.mxu0 %vm10413_vm0, %v10412_v0  ;;  %v8319_v19 = vld [vmem:[%s11697_s15] ss:$0 sm:$0xff]  ;;  %s11707_s15 = sld [smem:[#allocation36_spill]] }
 0x4e3   : > { %9236 = vmatprep.subr.bf16.mxu0 %v10412_v0 }
 0x4e9   : > { %9227 = vmatmul.mubr.msk.bf16.vlgmr.msra.gmra.mrb[44].mxu0 %vm2185_vm6, %v2711_v41 }
 0x4ea   : > { %9238 = vmatprep.mubr.msk.bf16.mxu0 %vm10413_vm0, %v10412_v0 }
 0x59c   : > { %v2324_v43 = vpop.f32.mrb[28].mxu0  ;;  %v2373_v44 = vpop.f32.mrb[28].mxu1 }
 0x59d   : > { %v2374_v45 = vadd.f32 %v2373_v44, %v2324_v43  ;;  %v9180_v46 = vpop.f32.mrb[29].mxu0  ;;  %v9186_v47 = vpop.f32.mrb[29].mxu1 }
 0x59e   : > { %v2327_v48 = vpop.f32.mrb[30].mxu0  ;;  %v2376_v49 = vpop.f32.mrb[30].mxu1 }
 0x59f   : > { %v9181_v50 = vpop.f32.mrb[31].mxu0  ;;  %v9187_v51 = vpop.f32.mrb[31].mxu1 }
 0x5a4   : > { %v2418_v52 = vpop.f32.mrb[32].mxu0 }
 0x5a5   : > { %v2424_v54 = vpack.c.bf16 %v2418_v52, %v2418_v52  ;;  %v9192_v55 = vpop.f32.mrb[33].mxu0 }
 0x5a6   : > { %v2421_v56 = vpop.f32.mrb[34].mxu0 }
 0x5a7   : > { %v9193_v57 = vpop.f32.mrb[35].mxu0  ;;  %9197 = vmatmul.mubr.msk.bf16.vlgmr.msra.gmra.mrb[32].mxu1 %vm2185_vm6, %v2424_v54 }
 0x5a8   : > { %9207 = vmatpush3.bf16.msra.mxu1 %v9906_v53  ;;  %9208 = vmatprep.mubr.msk.bf16.mxu1 %vm10413_vm0, %v10412_v0  ;;  %v8321_v53 = vld [vmem:[#allocation3] ss:$0 sm:$0xff] }
 0x5a9   : > { %9218 = vmatprep.subr.bf16.mxu1 %v10412_v0 }
 0x5ac   : > { %v2517_v58 = vpop.f32.mrb[36].mxu0 }
 0x5ad   : > { %v2523_v60 = vpack.c.bf16 %v2517_v58, %v2517_v58  ;;  %v9204_v61 = vpop.f32.mrb[37].mxu0 }
 0x5ae   : > { %v2520_v62 = vpop.f32.mrb[38].mxu0 }
 0x5af   : > { %v9205_v63 = vpop.f32.mrb[39].mxu0  ;;  %9209 = vmatmul.mubr.msk.bf16.vlgmr.msra.gmra.mrb[36].mxu1 %vm2185_vm6, %v2523_v60 }
 0x5b0   : > { %9219 = vmatpush3.bf16.msra.mxu1 %v9907_v59  ;;  %9220 = vmatprep.mubr.msk.bf16.mxu1 %vm10413_vm0, %v10412_v0 }
 0x5b1   : > { %9230 = vmatprep.subr.bf16.mxu1 %v10412_v0 }
 0x5b4   : > { %v2616_v1 = vpop.f32.mrb[40].mxu0 }
 0x5b5   : > { %v2622_v3 = vpack.c.bf16 %v2616_v1, %v2616_v1  ;;  %v9216_v4 = vpop.f32.mrb[41].mxu0 }
 0x5b6   : > { %v2619_v5 = vpop.f32.mrb[42].mxu0  ;;  %v9909_v4 = vld [vmem:[%s11699_s18 + $0x10] sm:$0xff]  }
 0x5b7   : > { %v9217_v6 = vpop.f32.mrb[43].mxu0  ;;  %9221 = vmatmul.mubr.msk.bf16.vlgmr.msra.gmra.mrb[40].mxu1 %vm2185_vm6, %v2622_v3  ;;  %v8325_v3 = vld [vmem:[%s11698_s2 + $0x2] sm:$0x3] }
 0x5b8   : > { %9231 = vmatpush3.bf16.msra.mxu1 %v9908_v2  ;;  %9232 = vmatprep.mubr.msk.bf16.mxu1 %vm10413_vm0, %v10412_v0  ;;  %v2818_v2 = vld [vmem:[%s11698_s2] sm:$0x3]  ;;  %v9911_v6 = vld [vmem:[%s11699_s18 + $0x18] sm:$0xff]  }
 0x5b9   : > { %9242 = vmatprep.subr.bf16.mxu1 %v10412_v0  ;;  %v9910_v5 = vld [vmem:[%s11699_s18] sm:$0xff]  }
 0x5bc   : > { %v2749_v7 = vpop.f32.mrb[44].mxu0 }
 0x5bd   : > { %v2755_v8 = vpack.c.bf16 %v2749_v7, %v2749_v7  ;;  %v9228_v9 = vpop.f32.mrb[45].mxu0  ;;  %v9912_v7 = vld [vmem:[%s11699_s18 + $0x8] sm:$0xff]  }
 0x5be   : > { %v2752_v10 = vpop.f32.mrb[46].mxu0 }
 0x5bf   : > { %v9229_v11 = vpop.f32.mrb[47].mxu0  ;;  %9233 = vmatmul.mubr.msk.bf16.vlgmr.msra.gmra.mrb[44].mxu1 %vm2185_vm6, %v2755_v8 }
 0x5c0   : > { %9244 = vmatprep.mubr.msk.bf16.mxu1 %vm10413_vm0, %v10412_v0 }
 0x67a   : > { %v2471_v12 = vpop.f32.mrb[32].mxu1 }
 0x67b   : > { %v2477_v13 = vadd.f32 %v2471_v12, %v2374_v45  ;;  %v9198_v14 = vpop.f32.mrb[33].mxu1 }
 0x67c   : > { %v2474_v15 = vpop.f32.mrb[34].mxu1 }
 0x67d   : > { %v9199_v16 = vpop.f32.mrb[35].mxu1 }
 0x682   : > { %v2570_v17 = vpop.f32.mrb[36].mxu1 }
 0x683   : > { %v2576_v18 = vadd.f32 %v2570_v17, %v2477_v13  ;;  %v9210_v20 = vpop.f32.mrb[37].mxu1 }
 0x684   : > { %v2573_v21 = vpop.f32.mrb[38].mxu1  ;;  %v8346_v20 = vld [vmem:[%s11698_s2 + $0x6] sm:$0x3] }
 0x685   : > { %v9211_v22 = vpop.f32.mrb[39].mxu1  ;;  %v8355_v21 = vld [vmem:[%s11698_s2 + $0x8] sm:$0x3] }
 0x686   : > { %v3389_v22 = vld [vmem:[%s11700_s16] sm:$0x3]  ;;  %s11708_s16 = sld [smem:[#allocation38_spill]] }
 0x68a   : > { %v2669_v24 = vpop.f32.mrb[40].mxu1 }
 0x68b   : > { %v2675_v25 = vadd.f32 %v2669_v24, %v2576_v18  ;;  %v9222_v26 = vpop.f32.mrb[41].mxu1  ;;  %v8337_v18 = vld [vmem:[%s11698_s2 + $0x4] sm:$0x3]  ;;  %s11621_s2 = smov 112  }
 0x68c   : > { %v2672_v27 = vpop.f32.mrb[42].mxu1  ;;  %v9913_v24 = vld [vmem:[%s11699_s18 + $0x20] sm:$0xff]  }
 0x68d   : > { %v2683_v23 = vadd.f32 %v8319_v19, %v2675_v25  ;;  %v9223_v28 = vpop.f32.mrb[43].mxu1  ;;  %v9914_v19 = vld [vmem:[%s11699_s18 + $0x28] sm:$0xff]  }
 0x68f   : > { %v2685_v29 = vmul.f32 0.70710677, %v2683_v23  ;;  %v2684_v57 = vmul.f32 0.5, %v2683_v23 }
 0x691   : > { %v2686_v30 = vand.u32 2147483647, %v2685_v29  ;;  %vm2706_vm7 = vcmp.ge.f32.partialorder %v2685_v29, 0.0 }
 0x692   : > { %v2808_v31 = vpop.f32.mrb[44].mxu1 }
 0x693   : > { %v2687_v32 = vmul.f32 0.3275911, %v2686_v30  ;;  %v9234_v33 = vpop.f32.mrb[45].mxu1  ;;  %v2700_v37 = vsub.f32 0.0, %v2686_v30  ;;  %v2809_v55 = vadd.f32 %v8321_v53, %v2808_v31  ;;  %v9920_v53 = vld [vmem:[%s11701_s1 + $0x8] sm:$0xff]  }
 0x694   : > { %v2811_v34 = vpop.f32.mrb[46].mxu1 }
 0x695   : > { %v2688_v35 = vadd.f32 1.0, %v2687_v32  ;;  %v9235_v36 = vpop.f32.mrb[47].mxu1  ;;  %v2701_v39 = vmul.f32 %v2700_v37, %v2686_v30  ;;  %v2815_v60 = vmul.f32 0.3, %v2809_v55  ;;  %v9915_v34 = vld [vmem:[%s11699_s18 + $0x30] sm:$0xff]  }
 0x697   : > { %10075 = vrcp.f32 %v2688_v35  ;;  %v2702_v42 = vmul.f32 1.442695, %v2701_v39  ;;  %v9916_v39 = vld [vmem:[%s11699_s18 + $0x38] sm:$0xff]  }
 0x699   : > { %10077 = vpow2.f32 %v2702_v42 }
 0x6a1   : > { %v10076_v38 = vpop.eup %10075 }
 0x6a2   : > { %v2691_v40 = vmul.f32 1.0614054, %v10076_v38 }
 0x6a3   : > { %v10078_v50 = vpop.eup %10077 }
 0x6a4   : > { %v2692_v41 = vadd.f32 -1.4531521, %v2691_v40 }
 0x6a6   : > { %v2693_v43 = vmul.f32 %v10076_v38, %v2692_v41  ;;  %v9917_v41 = vld [vmem:[%s11699_s18 + $0x40] sm:$0xff]  }
 0x6a8   : > { %v2694_v44 = vadd.f32 1.4214138, %v2693_v43 }
 0x6aa   : > { %v2695_v45 = vmul.f32 %v10076_v38, %v2694_v44 }
 0x6ac   : > { %v2696_v46 = vadd.f32 -0.28449672, %v2695_v45 }
 0x6ae   : > { %v2697_v47 = vmul.f32 %v10076_v38, %v2696_v46  ;;  %v9918_v46 = vld [vmem:[%s11699_s18 + $0x48] sm:$0xff]  }
 0x6b0   : > { %v2698_v48 = vadd.f32 0.2548296, %v2697_v47 }
 0x6b2   : > { %v2699_v49 = vmul.f32 %v10076_v38, %v2698_v48  ;;  %v9919_v48 = vld [vmem:[%s11701_s1] sm:$0xff]   ;;  %s11619_s1 = smov 96  }
 0x6b4   : > { %v2704_v51 = vmul.f32 %v10078_v50, %v2699_v49 }
 0x6b6   : > { %v2705_v52 = vsub.f32 1.0, %v2704_v51 }
 0x6b8   : > { %v2707_v54 = vsub.f32 0.0, %v2705_v52 }
 0x6ba   : > { %v2708_v56 = vsel %vm2706_vm7, %v2705_v52, %v2707_v54 }
 0x6bb   : > { %v2709_v58 = vadd.f32 1.0, %v2708_v56 }
 0x6bd   : > { %v2710_v59 = vmul.f32 %v2709_v58, %v2684_v57 }
 0x6bf   : > { %v2814_v61 = vmul.f32 0.7, %v2710_v59 }
 0x6c1   : > { %v2816_v62 = vadd.f32 %v2815_v60, %v2814_v61 }
 0x6c3   : > { %v2817_v63 = vpack.c.bf16 %v2816_v62, %v2816_v62 }
 0x6c5   : > { %v2825_v1 = vsel %vm2823_vm8, %v2817_v63, 0 }
 0x6c6   : > { %9237 = vmatpush3.bf16.msra.mxu0 %v2825_v1  ;;  %9243 = vmatpush3.bf16.msra.mxu1 %v2825_v1 }
 0x6c7   : > { %9248 = vmatprep.subr.bf16.mxu0 %v10412_v0  ;;  %9256 = vmatprep.subr.bf16.mxu1 %v10412_v0 }
 0x6c9   : > { %9239 = vmatmul.mubr.msk.bf16.vlgmr.msra.gmra.mrb[48].mxu0 %vm2819_vm9, %v2818_v2  ;;  %9245 = vmatmul.mubr.msk.bf16.vlgmr.msra.gmra.mrb[48].mxu1 %vm2819_vm9, %v8325_v3 }
 0x6ca   : > { %9249 = vmatpush3.bf16.msra.mxu0 %v9909_v4  ;;  %9257 = vmatpush3.bf16.msra.mxu1 %v9910_v5 }
 0x6cb   : > { %9250 = vmatprep.subr.bf16.mxu0 %v10412_v0  ;;  %9258 = vmatprep.subr.bf16.mxu1 %v10412_v0 }
 0x6cc   : > { %9252 = vmatprep.mubr.msk.bf16.mxu0 %vm10413_vm0, %v10412_v0  ;;  %9260 = vmatprep.mubr.msk.bf16.mxu1 %vm10413_vm0, %v10412_v0 }
 0x6ce   : > { %9251 = vmatpush3.bf16.msra.mxu0 %v9911_v6  ;;  %9259 = vmatpush3.bf16.msra.mxu1 %v9912_v7  ;;  %v8364_v7 = vld [vmem:[#allocation5] ss:$0 sm:$0xff] }
 0x6cf   : > { %9264 = vmatprep.subr.bf16.mxu0 %v10412_v0  ;;  %9270 = vmatprep.subr.bf16.mxu1 %v10412_v0 }
 0x79c   : > { %v2861_v8 = vpop.f32.mrb[48].mxu0  ;;  %v2911_v9 = vpop.f32.mrb[48].mxu1 }
 0x79d   : > { %v2867_v10 = vpack.c.bf16 %v2861_v8, %v2861_v8  ;;  %v2917_v11 = vpack.c.bf16 %v2911_v9, %v2911_v9  ;;  %v9246_v12 = vpop.f32.mrb[49].mxu1  ;;  %v9240_v13 = vpop.f32.mrb[49].mxu0 }
 0x79e   : > { %v2914_v14 = vpop.f32.mrb[50].mxu1  ;;  %v2864_v15 = vpop.f32.mrb[50].mxu0 }
 0x79f   : > { %v9247_v16 = vpop.f32.mrb[51].mxu1  ;;  %9253 = vmatmul.mubr.msk.bf16.vlgmr.msra.gmra.mrb[52].mxu0 %vm1497_vm1, %v2917_v11  ;;  %9261 = vmatmul.mubr.msk.bf16.vlgmr.msra.gmra.mrb[52].mxu1 %vm1497_vm1, %v2867_v10  ;;  %v9241_v17 = vpop.f32.mrb[51].mxu0 }
 0x7a0   : > { %9265 = vmatpush3.bf16.msra.mxu0 %v2825_v1  ;;  %9266 = vmatprep.mubr.msk.bf16.mxu0 %vm10413_vm0, %v10412_v0 }
 0x7a1   : > { %9278 = vmatprep.subr.bf16.mxu0 %v10412_v0  ;;  %9274 = vmatprep.mubr.msk.bf16.mxu1 %vm10413_vm0, %v10412_v0 }
 0x7a2   : > { %9271 = vmatpush3.bf16.msra.mxu1 %v9913_v24 }
 0x7a3   : > { %9272 = vmatprep.subr.bf16.mxu1 %v10412_v0 }
 0x7a6   : > { %9273 = vmatpush3.bf16.msra.mxu1 %v9914_v19 }
 0x7a7   : > { %9267 = vmatmul.mubr.msk.bf16.vlgmr.msra.gmra.mrb[56].mxu0 %vm2819_vm9, %v8337_v18  ;;  %9284 = vmatprep.subr.bf16.mxu1 %v10412_v0 }
 0x7a8   : > { %9279 = vmatpush3.bf16.msra.mxu0 %v2825_v1  ;;  %9280 = vmatprep.mubr.msk.bf16.mxu0 %vm10413_vm0, %v10412_v0 }
 0x7a9   : > { %9292 = vmatprep.subr.bf16.mxu0 %v10412_v0 }
 0x7af   : > { %9281 = vmatmul.mubr.msk.bf16.vlgmr.msra.gmra.mrb[60].mxu0 %vm2819_vm9, %v8346_v20 }
 0x7b0   : > { %9293 = vmatpush3.bf16.msra.mxu0 %v2825_v1  ;;  %9294 = vmatprep.mubr.msk.bf16.mxu0 %vm10413_vm0, %v10412_v0 }
 0x7b1   : > { %9306 = vmatprep.subr.bf16.mxu0 %v10412_v0 }
 0x7b7   : > { %9295 = vmatmul.mubr.msk.bf16.vlgmr.msra.gmra.mrb[64].mxu0 %vm2819_vm9, %v8355_v21 }
 0x7b8   : > { %9307 = vmatpush3.bf16.msra.mxu0 %v2825_v1  ;;  %9308 = vmatprep.mubr.msk.bf16.mxu0 %vm10413_vm0, %v10412_v0 }
 0x7b9   : > { %9320 = vmatprep.subr.bf16.mxu0 %v10412_v0 }
 0x7bf   : > { %9309 = vmatmul.mubr.msk.bf16.vlgmr.msra.gmra.mrb[68].mxu0 %vm2819_vm9, %v3389_v22 }
 0x7c0   : > { %9328 = vmatprep.mubr.msk.bf16.mxu0 %vm10413_vm0, %v10412_v0 }
 0x872   : > { %v2972_v25 = vpop.f32.mrb[52].mxu0  ;;  %v3027_v26 = vpop.f32.mrb[52].mxu1 }
 0x873   : > { %v3028_v27 = vadd.f32 %v3027_v26, %v2972_v25  ;;  %v9254_v23 = vpop.f32.mrb[53].mxu0  ;;  %v9262_v28 = vpop.f32.mrb[53].mxu1 }
 0x874   : > { %v2975_v29 = vpop.f32.mrb[54].mxu0  ;;  %v3030_v30 = vpop.f32.mrb[54].mxu1 }
 0x875   : > { %v9255_v31 = vpop.f32.mrb[55].mxu0  ;;  %v9263_v32 = vpop.f32.mrb[55].mxu1 }
 0x87a   : > { %v3072_v33 = vpop.f32.mrb[56].mxu0 }
 0x87b   : > { %v3078_v35 = vpack.c.bf16 %v3072_v33, %v3072_v33  ;;  %v9268_v36 = vpop.f32.mrb[57].mxu0 }
 0x87c   : > { %v3075_v37 = vpop.f32.mrb[58].mxu0 }
 0x87d   : > { %v9269_v38 = vpop.f32.mrb[59].mxu0  ;;  %9275 = vmatmul.mubr.msk.bf16.vlgmr.msra.gmra.mrb[56].mxu1 %vm1497_vm1, %v3078_v35  ;;  %v8366_v37 = vld [vmem:[#allocation7] ss:$0 sm:$0xff] }
 0x87e   : > { %9285 = vmatpush3.bf16.msra.mxu1 %v9915_v34  ;;  %9288 = vmatprep.mubr.msk.bf16.mxu1 %vm10413_vm0, %v10412_v0 }
 0x87f   : > { %9286 = vmatprep.subr.bf16.mxu1 %v10412_v0 }
 0x882   : > { %v3179_v40 = vpop.f32.mrb[60].mxu0  ;;  %9287 = vmatpush3.bf16.msra.mxu1 %v9916_v39 }
 0x883   : > { %v3185_v42 = vpack.c.bf16 %v3179_v40, %v3179_v40  ;;  %v9282_v43 = vpop.f32.mrb[61].mxu0  ;;  %9298 = vmatprep.subr.bf16.mxu1 %v10412_v0 }
 0x884   : > { %v3182_v44 = vpop.f32.mrb[62].mxu0 }
 0x885   : > { %v9283_v45 = vpop.f32.mrb[63].mxu0  ;;  %9289 = vmatmul.mubr.msk.bf16.vlgmr.msra.gmra.mrb[60].mxu1 %vm1497_vm1, %v3185_v42 }
 0x886   : > { %9299 = vmatpush3.bf16.msra.mxu1 %v9917_v41  ;;  %9302 = vmatprep.mubr.msk.bf16.mxu1 %vm10413_vm0, %v10412_v0 }
 0x887   : > { %9300 = vmatprep.subr.bf16.mxu1 %v10412_v0 }
 0x88a   : > { %v3286_v47 = vpop.f32.mrb[64].mxu0  ;;  %9301 = vmatpush3.bf16.msra.mxu1 %v9918_v46  ;;  %v3503_v46 = vld [vmem:[%s11702_s10] sm:$0xf]  ;;  %s11709_s10 = sld [smem:[#allocation37_spill]] }
 0x88b   : > { %v3292_v49 = vpack.c.bf16 %v3286_v47, %v3286_v47  ;;  %v9296_v50 = vpop.f32.mrb[65].mxu0  ;;  %9312 = vmatprep.subr.bf16.mxu1 %v10412_v0 }
 0x88c   : > { %v3289_v51 = vpop.f32.mrb[66].mxu0 }
 0x88d   : > { %v9297_v52 = vpop.f32.mrb[67].mxu0  ;;  %9303 = vmatmul.mubr.msk.bf16.vlgmr.msra.gmra.mrb[64].mxu1 %vm1497_vm1, %v3292_v49 }
 0x88e   : > { %9313 = vmatpush3.bf16.msra.mxu1 %v9919_v48  ;;  %9316 = vmatprep.mubr.msk.bf16.mxu1 %vm10413_vm0, %v10412_v0 }
 0x88f   : > { %9314 = vmatprep.subr.bf16.mxu1 %v10412_v0 }
 0x892   : > { %v3427_v54 = vpop.f32.mrb[68].mxu0  ;;  %9315 = vmatpush3.bf16.msra.mxu1 %v9920_v53 }
 0x893   : > { %v3433_v55 = vpack.c.bf16 %v3427_v54, %v3427_v54  ;;  %v9310_v56 = vpop.f32.mrb[69].mxu0  ;;  %9332 = vmatprep.subr.bf16.mxu1 %v10412_v0 }
 0x894   : > { %v3430_v57 = vpop.f32.mrb[70].mxu0  ;;  %v9922_v56 = vld [vmem:[%s11704_s11] sm:$0xff]  }
 0x895   : > { %v9311_v58 = vpop.f32.mrb[71].mxu0  ;;  %9317 = vmatmul.mubr.msk.bf16.vlgmr.msra.gmra.mrb[68].mxu1 %vm1497_vm1, %v3433_v55  ;;  %v9921_v55 = vld [vmem:[%s11703_s7] sm:$0xff]   ;;  %v9923_v57 = vld [vmem:[%s11703_s7 + $0x8] sm:$0xff]  }
 0x896   : > { %9340 = vmatprep.mubr.msk.bf16.mxu1 %vm10413_vm0, %v10412_v0  ;;  %9321 = vmatpush3.bf16.msra.mxu0 %v9921_v55  ;;  %v9924_v58 = vld [vmem:[%s11704_s11 + $0x8] sm:$0xff]  }
 0x897   : > { %9333 = vmatpush3.bf16.msra.mxu1 %v9922_v56  ;;  %9322 = vmatprep.subr.bf16.mxu0 %v10412_v0 }
 0x898   : > { %9334 = vmatprep.subr.bf16.mxu1 %v10412_v0 }
 0x89a   : > { %9323 = vmatpush3.bf16.msra.mxu0 %v9923_v57 }
 0x89b   : > { %9335 = vmatpush3.bf16.msra.mxu1 %v9924_v58  ;;  %9324 = vmatprep.subr.bf16.mxu0 %v10412_v0 }
 0x89c   : > { %9336 = vmatprep.subr.bf16.mxu1 %v10412_v0 }
 0x950   : > { %v3133_v59 = vpop.f32.mrb[56].mxu1 }
 0x951   : > { %v3139_v60 = vadd.f32 %v3133_v59, %v3028_v27  ;;  %v9276_v61 = vpop.f32.mrb[57].mxu1  ;;  %v9925_v59 = vld [vmem:[%s11703_s7 + $0x10] sm:$0xff]  }
 0x952   : > { %v3136_v62 = vpop.f32.mrb[58].mxu1  ;;  %9325 = vmatpush3.bf16.msra.mxu0 %v9925_v59  ;;  %v9927_v61 = vld [vmem:[%s11703_s7 + $0x18] sm:$0xff]  }
 0x953   : > { %v9277_v63 = vpop.f32.mrb[59].mxu1  ;;  %9326 = vmatprep.subr.bf16.mxu0 %v10412_v0  ;;  %v9928_v62 = vld [vmem:[%s11704_s11 + $0x18] sm:$0xff]  }
 0x956   : > { %9327 = vmatpush3.bf16.msra.mxu0 %v9927_v61 }
 0x957   : > { %9344 = vmatprep.subr.bf16.mxu0 %v10412_v0 }
 0x958   : > { %v3240_v1 = vpop.f32.mrb[60].mxu1 }
 0x959   : > { %v3246_v2 = vadd.f32 %v3240_v1, %v3139_v60  ;;  %v9290_v3 = vpop.f32.mrb[61].mxu1  ;;  %v9926_v60 = vld [vmem:[%s11704_s11 + $0x10] sm:$0xff]  }
 0x95a   : > { %v3243_v4 = vpop.f32.mrb[62].mxu1  ;;  %9337 = vmatpush3.bf16.msra.mxu1 %v9926_v60 }
 0x95b   : > { %v9291_v5 = vpop.f32.mrb[63].mxu1  ;;  %9338 = vmatprep.subr.bf16.mxu1 %v10412_v0  ;;  %v8370_v4 = vld [vmem:[%s11705_s23] ss:$0 sm:$0xff] }
 0x95e   : > { %9339 = vmatpush3.bf16.msra.mxu1 %v9928_v62 }
 0x95f   : > { %9356 = vmatprep.subr.bf16.mxu1 %v10412_v0 }
 0x960   : > { %v3347_v6 = vpop.f32.mrb[64].mxu1 }
 0x961   : > { %v3353_v8 = vadd.f32 %v3347_v6, %v3246_v2  ;;  %v9304_v9 = vpop.f32.mrb[65].mxu1  ;;  %v8371_v6 = vld [vmem:[%s11706_s26] ss:$0 sm:$0xff] }
 0x962   : > { %v3350_v10 = vpop.f32.mrb[66].mxu1  ;;  %v9929_v9 = vld [vmem:[%s11707_s15] sm:$0xff]  }
 0x963   : > { %v3361_v11 = vadd.f32 %v8364_v7, %v3353_v8  ;;  %v9305_v12 = vpop.f32.mrb[67].mxu1 }
 0x964   : > { %v9931_v12 = vld [vmem:[%s11707_s15 + $0x10] sm:$0xff]  }
 0x965   : > { %v3363_v13 = vmul.f32 0.70710677, %v3361_v11  ;;  %v3362_v41 = vmul.f32 0.5, %v3361_v11  ;;  %v9930_v11 = vld [vmem:[%s11707_s15 + $0x8] sm:$0xff]  }
 0x967   : > { %v3364_v14 = vand.u32 2147483647, %v3363_v13  ;;  %vm3384_vm10 = vcmp.ge.f32.partialorder %v3363_v13, 0.0  ;;  %v9932_v13 = vld [vmem:[%s11707_s15 + $0x18] sm:$0xff]  }
 0x968   : > { %v3494_v15 = vpop.f32.mrb[68].mxu1 }
 0x969   : > { %v3365_v16 = vmul.f32 0.3275911, %v3364_v14  ;;  %v9318_v17 = vpop.f32.mrb[69].mxu1  ;;  %v3378_v22 = vsub.f32 0.0, %v3364_v14  ;;  %v3495_v39 = vadd.f32 %v8366_v37, %v3494_v15  ;;  %v8372_v15 = vld [vmem:[%s11709_s10] ss:$0 sm:$0xff] }
 0x96a   : > { %v3497_v18 = vpop.f32.mrb[70].mxu1 }
 0x96b   : > { %v3366_v20 = vadd.f32 1.0, %v3365_v16  ;;  %v9319_v21 = vpop.f32.mrb[71].mxu1  ;;  %v3379_v19 = vmul.f32 %v3378_v22, %v3364_v14  ;;  %v3501_v44 = vmul.f32 0.3, %v3495_v39  ;;  %v8378_v14 = vld [vmem:[%s11708_s16] ss:$0 sm:$0xff] }
 0x96d   : > { %10079 = vrcp.f32 %v3366_v20  ;;  %v3380_v27 = vmul.f32 1.442695, %v3379_v19 }
 0x96f   : > { %10081 = vpow2.f32 %v3380_v27 }
 0x977   : > { %v10080_v24 = vpop.eup %10079 }
 0x978   : > { %v3369_v25 = vmul.f32 1.0614054, %v10080_v24 }
 0x979   : > { %v10082_v34 = vpop.eup %10081 }
 0x97a   : > { %v3370_v26 = vadd.f32 -1.4531521, %v3369_v25 }
 0x97c   : > { %v3371_v23 = vmul.f32 %v10080_v24, %v3370_v26 }
 0x97e   : > { %v3372_v28 = vadd.f32 1.4214138, %v3371_v23 }
 0x980   : > { %v3373_v29 = vmul.f32 %v10080_v24, %v3372_v28 }
 0x982   : > { %v3374_v30 = vadd.f32 -0.28449672, %v3373_v29  ;;  %v8384_v29 = vld [vmem:[%s11710_s0] ss:$0 sm:$0xff] }
 0x984   : > { %v3375_v31 = vmul.f32 %v10080_v24, %v3374_v30 }
 0x986   : > { %v3376_v32 = vadd.f32 0.2548296, %v3375_v31 }
 0x988   : > { %v3377_v33 = vmul.f32 %v10080_v24, %v3376_v32 }
 0x98a   : > { %v3382_v35 = vmul.f32 %v10082_v34, %v3377_v33 }
 0x98c   : > { %v3383_v36 = vsub.f32 1.0, %v3382_v35 }
 0x98e   : > { %v3385_v38 = vsub.f32 0.0, %v3383_v36 }
 0x990   : > { %v3386_v40 = vsel %vm3384_vm10, %v3383_v36, %v3385_v38 }
 0x991   : > { %v3387_v42 = vadd.f32 1.0, %v3386_v40 }
 0x993   : > { %v3388_v43 = vmul.f32 %v3387_v42, %v3362_v41 }
 0x995   : > { %v3500_v45 = vmul.f32 0.7, %v3388_v43 }
 0x997   : > { %v3502_v47 = vadd.f32 %v3501_v44, %v3500_v45 }
 0x999   : > { %v11028_v48 = vadd.f32 %v3503_v46, %v3502_v47 }
 0x99b   : > { %v3508_v49 = vsel %vm3507_vm11, %v11028_v48, 0.0 }
 0x99c   : > { %3509 = vadd.xlane.f32.xlu0 %v3508_v49 }
 0xa29   : > { %v3510_v50 = vpop.xlane.xlu0 %3509 }
 0xa2a   : > { %v3512_v51 = vmul.f32 0.015625, %v3510_v50 }
 0xa2c   : > { %v3513_v52 = vsub.f32 %v11028_v48, %v3512_v51 }
 0xa2e   : > { %v3514_v53 = vmul.f32 %v3513_v52, %v3513_v52 }
 0xa30   : > { %v3515_v54 = vsel %vm3507_vm11, %v3514_v53, 0.0 }
 0xa31   : > { %3516 = vadd.xlane.f32.xlu0 %v3515_v54 }
 0xabe   : > { %v3517_v63 = vpop.xlane.xlu0 %3516 }
 0xabf   : > { %v3518_v1 = vmul.f32 0.015625, %v3517_v63 }
 0xac1   : > { %v3519_v2 = vadd.f32 1e-05, %v3518_v1 }
 0xac3   : > { %10083 = vrsqrt.f32 %v3519_v2 }
 0xacd   : > { %v10084_v3 = vpop.eup %10083 }
 0xace   : > { %v3521_v5 = vmul.f32 %v10084_v3, %v3513_v52 }
 0xad0   : > { %v3528_v7 = vmul.f32 %v8370_v4, %v3521_v5 }
 0xad2   : > { %v3535_v8 = vadd.f32 %v8371_v6, %v3528_v7 }
 0xad4   : > { %v3536_v10 = vpack.c.bf16 %v3535_v8, %v3535_v8 }
 0xad6   : > { %9329 = vmatmul.mubr.msk.bf16.vlgmr.msra.gmra.mrb[72].mxu0 %vm3576_vm12, %v3536_v10  ;;  %9341 = vmatmul.mubr.msk.bf16.vlgmr.msra.gmra.mrb[72].mxu1 %vm3576_vm12, %v3536_v10 }
 0xad7   : > { %9345 = vmatpush3.bf16.msra.mxu0 %v9929_v9  ;;  %9352 = vmatprep.mubr.msk.bf16.mxu0 %vm10413_vm0, %v10412_v0 }
 0xad8   : > { %9346 = vmatprep.subr.bf16.mxu0 %v10412_v0  ;;  %9358 = vmatprep.mubr.msk.bf16.mxu1 %vm10413_vm0, %v10412_v0 }
 0xadb   : > { %9347 = vmatpush3.bf16.msra.mxu0 %v9930_v11 }
 0xadc   : > { %9348 = vmatprep.subr.bf16.mxu0 %v10412_v0 }
 0xadf   : > { %9349 = vmatpush3.bf16.msra.mxu0 %v9931_v12 }
 0xae0   : > { %9350 = vmatprep.subr.bf16.mxu0 %v10412_v0 }
 0xae3   : > { %9351 = vmatpush3.bf16.msra.mxu0 %v9932_v13 }
 0xae4   : > { %9368 = vmatprep.subr.bf16.mxu0 %v10412_v0 }
 0xae6   : > { %9353 = vmatmul.mubr.msk.bf16.vlgmr.msra.gmra.mrb[76].mxu0 %vm3576_vm12, %v3536_v10 }
 0xae7   : > { %9370 = vmatprep.mubr.msk.bf16.mxu0 %vm10413_vm0, %v10412_v0 }
 0xba9   : > { %v3614_v16 = vpop.f32.mrb[72].mxu0  ;;  %v3693_v17 = vpop.f32.mrb[72].mxu1 }
 0xbaa   : > { %v3694_v18 = vadd.f32 %v8378_v14, %v3693_v17  ;;  %v9330_v20 = vpop.f32.mrb[73].mxu0  ;;  %v9342_v21 = vpop.f32.mrb[73].mxu1  ;;  %v3615_v19 = vadd.f32 %v8372_v15, %v3614_v16 }
 0xbab   : > { %v3617_v22 = vpop.f32.mrb[74].mxu0  ;;  %v3696_v24 = vpop.f32.mrb[74].mxu1 }
 0xbac   : > { %v3779_v25 = vpack.c.bf16 %v3694_v18, %v3694_v18  ;;  %v9331_v26 = vpop.f32.mrb[75].mxu0  ;;  %v9343_v27 = vpop.f32.mrb[75].mxu1  ;;  %v3778_v28 = vpack.c.bf16 %v3615_v19, %v3615_v19 }
 0xbae   : > { %4011 = vrot.lane.b32.xlu0 %v3779_v25, %s11619_s1  ;;  %3893 = vrot.lane.b32.xlu1 %v3779_v25, %s11621_s2  ;;  %v3785_v23 = vsel %vm2185_vm6, %v3779_v25, 0 }
 0xbaf   : > { %9357 = vmatpush3.bf16.xpose.msra.mxu1 %v3785_v23 }
 0xbb0   : > { %9362 = vmatprep.subr.bf16.mxu1 %v10412_v0 }
 0xbb2   : > { %3890 = vrot.lane.b32.xlu1 %v3778_v28, %s11621_s2 }
 0xbb6   : > { %4009 = vrot.lane.b32.xlu1 %v3778_v28, %s11619_s1  ;;  %9359 = vmatmul.mubr.msk.bf16.vlgmr.msra.gmra.mrb[76].mxu1 %vm2185_vm6, %v3778_v28 }
 0xbb7   : > { %9364 = vmatprep.mubr.msk.bf16.mxu1 %vm10413_vm0, %v10412_v0 }
 0xbb9   : > { %v3772_v30 = vpop.f32.mrb[76].mxu0 }
 0xbba   : > { %v3773_v31 = vadd.f32 %v8384_v29, %v3772_v30  ;;  %v9354_v32 = vpop.f32.mrb[77].mxu0  ;;  %4128 = vrot.lane.b32.xlu1 %v3779_v25, %s11617_s3 }
 0xbbb   : > { %v3775_v33 = vpop.f32.mrb[78].mxu0 }
 0xbbc   : > { %v11082_v34 = vpack.c.bf16 %v3773_v31, %v3773_v31  ;;  %v9355_v35 = vpop.f32.mrb[79].mxu0 }
 0xbbe   : > { %4126 = vrot.lane.b32.xlu1 %v3778_v28, %s11617_s3  ;;  %v3845_v36 = vsel %vm1603_vm2, %v11082_v34, 0 }
 0xbbf   : > { %9363 = vmatpush3.bf16.msra.mxu1 %v3845_v36 }
 0xbc0   : > { %9374 = vmatprep.subr.bf16.mxu1 %v10412_v0 }
 0xc20   : > { %v3894_v37 = vpop.permute.xlu1 %3893  ;;  %v4012_v40 = vpop.permute.xlu0 %4011 }
 0xc21   : > { %v3899_v38 = vsel %vm2185_vm6, %v3894_v37, 0  ;;  %v4017_v42 = vsel %vm2185_vm6, %v4012_v40, 0 }
 0xc22   : > { %9369 = vmatpush3.bf16.xpose.msra.mxu0 %v3899_v38 }
 0xc23   : > { %9380 = vmatprep.subr.bf16.mxu0 %v10412_v0 }
 0xc24   : > { %v3891_v39 = vpop.permute.xlu1 %3890 }
 0xc28   : > { %v4010_v41 = vpop.permute.xlu1 %4009 }
 0xc29   : > { %9371 = vmatmul.mubr.msk.bf16.vlgmr.msra.gmra.mrb[80].mxu0 %vm2185_vm6, %v3891_v39 }
 0xc2a   : > { %9381 = vmatpush3.bf16.xpose.msra.mxu0 %v4017_v42  ;;  %9382 = vmatprep.mubr.msk.bf16.mxu0 %vm10413_vm0, %v10412_v0 }
 0xc2b   : > { %9392 = vmatprep.subr.bf16.mxu0 %v10412_v0 }
 0xc2c   : > { %v4129_v43 = vpop.permute.xlu1 %4128 }
 0xc2d   : > { %v4134_v44 = vsel %vm2185_vm6, %v4129_v43, 0 }
 0xc30   : > { %v4127_v45 = vpop.permute.xlu1 %4126 }
 0xc31   : > { %9383 = vmatmul.mubr.msk.bf16.vlgmr.msra.gmra.mrb[84].mxu0 %vm2185_vm6, %v4010_v41 }
 0xc32   : > { %9393 = vmatpush3.bf16.xpose.msra.mxu0 %v4134_v44  ;;  %9394 = vmatprep.mubr.msk.bf16.mxu0 %vm10413_vm0, %v10412_v0 }
 0xc33   : > { %9404 = vmatprep.subr.bf16.mxu0 %v10412_v0 }
 0xc39   : > { %9395 = vmatmul.mubr.msk.bf16.vlgmr.msra.gmra.mrb[88].mxu0 %vm2185_vm6, %v4127_v45 }
 0xc3a   : > { %9412 = vmatprep.mubr.msk.bf16.mxu0 %vm10413_vm0, %v10412_v0 }
 0xc89   : > { %v3821_v46 = vpop.f32.mrb[76].mxu1 }
 0xc8a   : > { %v3827_v47 = vmul.f32 0.25, %v3821_v46  ;;  %v9360_v49 = vpop.f32.mrb[77].mxu1 }
 0xc8b   : > { %v3824_v50 = vpop.f32.mrb[78].mxu1 }
 0xc8c   : > { %v9361_v51 = vpop.f32.mrb[79].mxu1  ;;  %v3829_v52 = vsel %vm3828_vm13, %v3827_v47, -inf }
 0xc8d   : > { %3830 = vmax.xlane.f32.xlu1 %v3829_v52 }
 0xcfc   : > { %v3935_v53 = vpop.f32.mrb[80].mxu0 }
 0xcfd   : > { %v3941_v54 = vmul.f32 0.25, %v3935_v53  ;;  %v9372_v55 = vpop.f32.mrb[81].mxu0 }
 0xcfe   : > { %v3938_v56 = vpop.f32.mrb[82].mxu0  ;;  %v4327_v55 = vpack.c.bf16 %v11028_v48, %v11028_v48 }
 0xcff   : > { %v9373_v57 = vpop.f32.mrb[83].mxu0  ;;  %v3942_v58 = vsel %vm3828_vm13, %v3941_v54, -inf }
 0xd00   : > { %3943 = vmax.xlane.f32.xlu0 %v3942_v58 }
 0xd04   : > { %v4053_v59 = vpop.f32.mrb[84].mxu0 }
 0xd05   : > { %v4059_v60 = vmul.f32 0.25, %v4053_v59  ;;  %v9384_v61 = vpop.f32.mrb[85].mxu0 }
 0xd06   : > { %v4056_v62 = vpop.f32.mrb[86].mxu0 }
 0xd07   : > { %v9385_v63 = vpop.f32.mrb[87].mxu0  ;;  %v4060_v1 = vsel %vm3828_vm13, %v4059_v60, -inf }
 0xd08   : > { %4061 = vmax.xlane.f32.xlu1 %v4060_v1 }
 0xd0c   : > { %v4170_v2 = vpop.f32.mrb[88].mxu0 }
 0xd0d   : > { %v4176_v3 = vmul.f32 0.25, %v4170_v2  ;;  %v9396_v4 = vpop.f32.mrb[89].mxu0 }
 0xd0e   : > { %v4173_v5 = vpop.f32.mrb[90].mxu0 }
 0xd0f   : > { %v9397_v6 = vpop.f32.mrb[91].mxu0  ;;  %v4177_v7 = vsel %vm3828_vm13, %v4176_v3, -inf }
 0xd10   : > { %4178 = vmax.xlane.f32.xlu1 %v4177_v7 }
 0xd1a   : > { %v3831_v8 = vpop.xlane.xlu1 %3830 }
 0xd1b   : > { %v3832_v9 = vsub.f32 %v3827_v47, %v3831_v8 }
 0xd1d   : > { %v3833_v10 = vmul.f32 1.442695, %v3832_v9 }
 0xd1f   : > { %10085 = vpow2.f32 %v3833_v10 }
 0xd29   : > { %v10086_v11 = vpop.eup %10085 }
 0xd2a   : > { %v3835_v12 = vsel %vm3828_vm13, %v10086_v11, 0.0 }
 0xd2b   : > { %3836 = vadd.xlane.f32.xlu0 %v3835_v12 }
 0xd8d   : > { %v3944_v13 = vpop.xlane.xlu0 %3943 }
 0xd8e   : > { %v3945_v14 = vsub.f32 %v3941_v54, %v3944_v13 }
 0xd90   : > { %v3946_v15 = vmul.f32 1.442695, %v3945_v14 }
 0xd92   : > { %10087 = vpow2.f32 %v3946_v15 }
 0xd95   : > { %v4062_v16 = vpop.xlane.xlu1 %4061 }
 0xd96   : > { %v4063_v17 = vsub.f32 %v4059_v60, %v4062_v16 }
 0xd98   : > { %v4064_v18 = vmul.f32 1.442695, %v4063_v17 }
 0xd9a   : > { %10089 = vpow2.f32 %v4064_v18 }
 0xd9c   : > { %v10088_v20 = vpop.eup %10087 }
 0xd9d   : > { %v3948_v21 = vsel %vm3828_vm13, %v10088_v20, 0.0  ;;  %v4179_v25 = vpop.xlane.xlu1 %4178 }
 0xd9e   : > { %3949 = vadd.xlane.f32.xlu1 %v3948_v21  ;;  %v4180_v26 = vsub.f32 %v4176_v3, %v4179_v25 }
 0xda0   : > { %v4181_v27 = vmul.f32 1.442695, %v4180_v26 }
 0xda4   : > { %v10090_v22 = vpop.eup %10089 }
 0xda5   : > { %v4066_v24 = vsel %vm3828_vm13, %v10090_v22, 0.0 }
 0xda6   : > { %4067 = vadd.xlane.f32.xlu0 %v4066_v24  ;;  %v8404_v24 = vld [vmem:[%s11713_s6] ss:$0 sm:$0xff] }
 0xdaf   : > { %4072 = vrot.lane.b32.xlu1 %v11082_v34, %s11619_s1  ;;  %s11712_s1 = sld [smem:[#allocation40_spill]] }
 0xdb5   : > { %v9937_v60 = vld [vmem:[%s11712_s1] sm:$0xff]   ;;  %v9938_v61 = vld [vmem:[%s11712_s1 + $0x8] sm:$0xff]   ;;  %v9939_v7 = vld [vmem:[%s11712_s1 + $0x10] sm:$0xff]  }
 0xdb6   : > { %9405 = vmatpush3.bf16.msra.mxu0 %v9937_v60  ;;  %v9940_v8 = vld [vmem:[%s11712_s1 + $0x18] sm:$0xff]  }
 0xdb7   : > { %9406 = vmatprep.subr.bf16.mxu0 %v10412_v0 }
 0xdb8   : > { %v3837_v19 = vpop.xlane.xlu0 %3836 }
 0xdb9   : > { %10091 = vrcp.f32 %v3837_v19 }
 0xdba   : > { %10093 = vpow2.f32 %v4181_v27  ;;  %9407 = vmatpush3.bf16.msra.mxu0 %v9938_v61 }
 0xdbb   : > { %9408 = vmatprep.subr.bf16.mxu0 %v10412_v0 }
 0xdbc   : > { %3955 = vrot.lane.b32.xlu0 %v11082_v34, %s11621_s2  ;;  %s11623_s2 = smov 16  }
 0xdbe   : > { %9409 = vmatpush3.bf16.msra.mxu0 %v9939_v7  ;;  %v9961_v7 = vld [vmem:[%s11718_s13 + $0x60] sm:$0xff]  }
 0xdbf   : > { %9410 = vmatprep.subr.bf16.mxu0 %v10412_v0 }
 0xdc2   : > { %9411 = vmatpush3.bf16.msra.mxu0 %v9940_v8  ;;  %v9962_v8 = vld [vmem:[%s11718_s13 + $0x20] sm:$0xff]  }
 0xdc3   : > { %v10092_v23 = vpop.eup %10091 }
 0xdc4   : > { %v3839_v28 = vmul.f32 %v10092_v23, %v10086_v11  ;;  %v10094_v30 = vpop.eup %10093 }
 0xdc5   : > { %v4183_v31 = vsel %vm3828_vm13, %v10094_v30, 0.0 }
 0xdc6   : > { %v3840_v29 = vpack.c.bf16 %v3839_v28, %v3839_v28 }
 0xdc8   : > { %9365 = vmatmul.mubr.msk.bf16.vlgmr.msra.gmra.mrb[80].mxu1 %vm1599_vm3, %v3840_v29 }
 0xdc9   : > { %9376 = vmatprep.mubr.msk.bf16.mxu1 %vm10413_vm0, %v10412_v0 }
 0xdd3   : > { %4184 = vadd.xlane.f32.xlu1 %v4183_v31 }
 0xde4   : > { %4189 = vrot.lane.b32.xlu1 %v11082_v34, %s11617_s3  ;;  %s11711_s3 = sld [smem:[#allocation42_spill]] }
 0xdea   : > { %v9933_v50 = vld [vmem:[%s11711_s3] sm:$0xff]   ;;  %v9934_v52 = vld [vmem:[%s11711_s3 + $0x8] sm:$0xff]   ;;  %v9935_v53 = vld [vmem:[%s11711_s3 + $0x10] sm:$0xff]  }
 0xdeb   : > { %v9936_v54 = vld [vmem:[%s11711_s3 + $0x18] sm:$0xff]  }
 0xe2b   : > { %v3950_v32 = vpop.xlane.xlu1 %3949 }
 0xe2c   : > { %10095 = vrcp.f32 %v3950_v32 }
 0xe2f   : > { %v4073_v39 = vpop.permute.xlu1 %4072 }
 0xe30   : > { %v4078_v41 = vsel %vm1603_vm2, %v4073_v39, 0 }
 0xe33   : > { %v4068_v33 = vpop.xlane.xlu0 %4067 }
 0xe34   : > { %10097 = vrcp.f32 %v4068_v33 }
 0xe36   : > { %v10096_v35 = vpop.eup %10095 }
 0xe37   : > { %v3952_v36 = vmul.f32 %v10096_v35, %v10088_v20  ;;  %v3956_v37 = vpop.permute.xlu0 %3955 }
 0xe38   : > { %v3961_v38 = vsel %vm1603_vm2, %v3956_v37, 0 }
 0xe39   : > { %9375 = vmatpush3.bf16.msra.mxu1 %v3961_v38  ;;  %v3953_v40 = vpack.c.bf16 %v3952_v36, %v3952_v36 }
 0xe3a   : > { %9386 = vmatprep.subr.bf16.mxu1 %v10412_v0 }
 0xe3c   : > { %9377 = vmatmul.mubr.msk.bf16.vlgmr.msra.gmra.mrb[84].mxu1 %vm1599_vm3, %v3953_v40 }
 0xe3d   : > { %9387 = vmatpush3.bf16.msra.mxu1 %v4078_v41  ;;  %9388 = vmatprep.mubr.msk.bf16.mxu1 %vm10413_vm0, %v10412_v0 }
 0xe3e   : > { %v10098_v34 = vpop.eup %10097  ;;  %9398 = vmatprep.subr.bf16.mxu1 %v10412_v0 }
 0xe3f   : > { %v4070_v42 = vmul.f32 %v10098_v34, %v10090_v22 }
 0xe41   : > { %v4071_v43 = vpack.c.bf16 %v4070_v42, %v4070_v42 }
 0xe44   : > { %9389 = vmatmul.mubr.msk.bf16.vlgmr.msra.gmra.mrb[88].mxu1 %vm1599_vm3, %v4071_v43 }
 0xe45   : > { %9400 = vmatprep.mubr.msk.bf16.mxu1 %vm10413_vm0, %v10412_v0 }
 0xe60   : > { %v4185_v44 = vpop.xlane.xlu1 %4184 }
 0xe61   : > { %10099 = vrcp.f32 %v4185_v44 }
 0xe64   : > { %v4190_v45 = vpop.permute.xlu1 %4189 }
 0xe65   : > { %v4195_v46 = vsel %vm1603_vm2, %v4190_v45, 0 }
 0xe66   : > { %9399 = vmatpush3.bf16.msra.mxu1 %v4195_v46 }
 0xe67   : > { %9416 = vmatprep.subr.bf16.mxu1 %v10412_v0 }
 0xe6b   : > { %v10100_v47 = vpop.eup %10099 }
 0xe6c   : > { %v4187_v49 = vmul.f32 %v10100_v47, %v10094_v30 }
 0xe6e   : > { %v4188_v51 = vpack.c.bf16 %v4187_v49, %v4187_v49 }
 0xe70   : > { %9401 = vmatmul.mubr.msk.bf16.vlgmr.msra.gmra.mrb[92].mxu1 %vm1599_vm3, %v4188_v51  ;;  %v10420_v51 = vmov 0  }
 0xe71   : > { %9417 = vmatpush3.bf16.msra.mxu1 %v9933_v50  ;;  %9424 = vmatprep.mubr.msk.bf16.mxu1 %vm10413_vm0, %v10412_v0 }
 0xe72   : > { %9418 = vmatprep.subr.bf16.mxu1 %v10412_v0 }
 0xe75   : > { %9419 = vmatpush3.bf16.msra.mxu1 %v9934_v52 }
 0xe76   : > { %9420 = vmatprep.subr.bf16.mxu1 %v10412_v0 }
 0xe79   : > { %9421 = vmatpush3.bf16.msra.mxu1 %v9935_v53 }
 0xe7a   : > { %9422 = vmatprep.subr.bf16.mxu1 %v10412_v0 }
 0xe7d   : > { %9423 = vmatpush3.bf16.msra.mxu1 %v9936_v54 }
 0xe80   : > { %9425 = vmatmul.mubr.msk.bf16.vlgmr.msra.gmra.mrb[96].mxu1 %vm3576_vm12, %v4327_v55 }
 0xe9b   : > { %v3881_v56 = vpop.f32.mrb[80].mxu1 }
 0xe9c   : > { %3888 = vst.msk [vmem:[#allocation2] sm:$0xf] %vm3887_vm14, %v3881_v56  ;;  %v9366_v57 = vpop.f32.mrb[81].mxu1  ;;  %v8411_v56 = vld [vmem:[%s11716_s9] ss:$0 sm:$0xff] }
 0xe9d   : > { %v3884_v58 = vpop.f32.mrb[82].mxu1 }
 0xe9e   : > { %v9367_v59 = vpop.f32.mrb[83].mxu1  ;;  %v8412_v58 = vld [vmem:[%s11717_s12] ss:$0 sm:$0xff] }
 0xf0f   : > { %v3997_v62 = vpop.f32.mrb[84].mxu1 }
 0xf10   : > { %4004 = vrot.lane.b32.xlu0 %v3997_v62, %s11623_s2  ;;  %v9378_v63 = vpop.f32.mrb[85].mxu1  ;;  %s11626_s2 = smov 48   ;;  %v9953_v62 = vld [vmem:[%s11718_s13 + $0x40] sm:$0xff]  }
 0xf11   : > { %v4000_v1 = vpop.f32.mrb[86].mxu1  ;;  %v9954_v63 = vld [vmem:[%s11718_s13] sm:$0xff]   ;;  %8905 = vmatprep.subr.bf16.mxu1 %v9953_v62 }
 0xf12   : > { %v9379_v2 = vpop.f32.mrb[87].mxu1  ;;  %8906 = vmatpush3.bf16.msra.mxu1 %v9954_v63  ;;  %v9955_v1 = vld [vmem:[%s11718_s13 + $0x48] sm:$0xff]  }
 0xf13   : > { %v9956_v2 = vld [vmem:[%s11718_s13 + $0x8] sm:$0xff]   ;;  %8907 = vmatprep.subr.bf16.mxu1 %v9955_v1 }
 0xf16   : > { %8908 = vmatpush3.bf16.msra.mxu1 %v9956_v2 }
 0xf17   : > { %v4114_v3 = vpop.f32.mrb[88].mxu1 }
 0xf18   : > { %4121 = vrot.lane.b32.xlu1 %v4114_v3, %s11625_s5  ;;  %v9390_v4 = vpop.f32.mrb[89].mxu1  ;;  %s11714_s5 = sld [smem:[#allocation41_spill]]  ;;  %v9957_v3 = vld [vmem:[%s11718_s13 + $0x50] sm:$0xff]  }
 0xf19   : > { %v4117_v5 = vpop.f32.mrb[90].mxu1  ;;  %v9958_v4 = vld [vmem:[%s11718_s13 + $0x10] sm:$0xff]   ;;  %8909 = vmatprep.subr.bf16.mxu1 %v9957_v3 }
 0xf1a   : > { %v9391_v6 = vpop.f32.mrb[91].mxu1  ;;  %8910 = vmatpush3.bf16.msra.mxu1 %v9958_v4  ;;  %v9959_v5 = vld [vmem:[%s11718_s13 + $0x58] sm:$0xff]  }
 0xf1b   : > { %v9960_v6 = vld [vmem:[%s11718_s13 + $0x18] sm:$0xff]   ;;  %8911 = vmatprep.subr.bf16.mxu1 %v9959_v5 }
 0xf1e   : > { %v8398_v23 = vld [vmem:[%s11714_s5] ss:$0 sm:$0xff]  ;;  %8912 = vmatpush3.bf16.msra.mxu1 %v9960_v6 }
 0xf1f   : > { %8913 = vmatprep.subr.bf16.mxu1 %v9961_v7 }
 0xf22   : > { %8914 = vmatpush3.bf16.msra.mxu1 %v9962_v8 }
 0xf43   : > { %v4231_v9 = vpop.f32.mrb[92].mxu1 }
 0xf44   : > { %4238 = vrot.lane.b32.xlu0 %v4231_v9, %s11626_s2  ;;  %v9402_v10 = vpop.f32.mrb[93].mxu1  ;;  %s11715_s2 = sld [smem:[#allocation46_spill]]  ;;  %v9963_v9 = vld [vmem:[%s11718_s13 + $0x68] sm:$0xff]  }
 0xf45   : > { %v4234_v11 = vpop.f32.mrb[94].mxu1  ;;  %v9964_v10 = vld [vmem:[%s11718_s13 + $0x28] sm:$0xff]   ;;  %8915 = vmatprep.subr.bf16.mxu1 %v9963_v9 }
 0xf46   : > { %v9403_v12 = vpop.f32.mrb[95].mxu1  ;;  %8916 = vmatpush3.bf16.msra.mxu1 %v9964_v10  ;;  %v9965_v11 = vld [vmem:[%s11718_s13 + $0x70] sm:$0xff]  }
 0xf47   : > { %v9966_v12 = vld [vmem:[%s11718_s13 + $0x30] sm:$0xff]   ;;  %8917 = vmatprep.subr.bf16.mxu1 %v9965_v11 }
 0xf4a   : > { %v9943_v42 = vld [vmem:[%s11715_s2 + $0x4] ss:$8 sps:$4 sm:$0xff]   ;;  %v9941_v43 = vld [vmem:[%s11715_s2] ss:$8 sps:$4 sm:$0xff]   ;;  %v9946_v44 = vld [vmem:[%s11715_s2 + $0x14] ss:$8 sps:$4 sm:$0xff]   ;;  %8918 = vmatpush3.bf16.msra.mxu1 %v9966_v12 }
 0xf4b   : > { %4511 = vmatprep.subr.bf16.mxu0 %v9943_v42  ;;  %v9944_v45 = vld [vmem:[%s11715_s2 + $0x10] ss:$8 sps:$4 sm:$0xff]   ;;  %v9949_v46 = vld [vmem:[%s11715_s2 + $0x24] ss:$8 sps:$4 sm:$0xff]   ;;  %v9947_v47 = vld [vmem:[%s11715_s2 + $0x20] ss:$8 sps:$4 sm:$0xff]  }
 0xf4c   : > { %v9952_v49 = vld [vmem:[%s11715_s2 + $0x34] ss:$8 sps:$4 sm:$0xff]   ;;  %v9950_v50 = vld [vmem:[%s11715_s2 + $0x30] ss:$8 sps:$4 sm:$0xff]  }
 0xf53   : > { %v4404_v13 = vpop.f32.mrb[96].mxu1 }
 0xf54   : > { %v9426_v14 = vpop.f32.mrb[97].mxu1  ;;  %v4405_v19 = vadd.f32 %v8404_v24, %v4404_v13  ;;  %v9967_v13 = vld [vmem:[%s11718_s13 + $0x78] sm:$0xff]  }
 0xf55   : > { %v4407_v15 = vpop.f32.mrb[98].mxu1  ;;  %v9968_v14 = vld [vmem:[%s11718_s13 + $0x38] sm:$0xff]   ;;  %8919 = vmatprep.subr.bf16.mxu1 %v9967_v13 }
 0xf56   : > { %v9427_v16 = vpop.f32.mrb[99].mxu1  ;;  %v8410_v25 = vmul.f32 -1.442695, %v4405_v19  ;;  %8920 = vmatpush3.bf16.msra.mxu1 %v9968_v14  ;;  %v4458_v15 = vlaneseq }
 0xf57   : > { %9452 = vmatprep.subr.bf16.mxu1 %v10412_v0 }
 0xf58   : > { %10101 = vpow2.f32 %v8410_v25  ;;  %v11201_v16 = vshrl.u32 %v4458_v15, 7 }
 0xf62   : > { %v10102_v26 = vpop.eup %10101 }
 0xf63   : > { %v4413_v27 = vadd.f32 1.0, %v10102_v26 }
 0xf65   : > { %10103 = vrcp.f32 %v4413_v27 }
 0xf6f   : > { %v10104_v31 = vpop.eup %10103 }
 0xf82   : > { %v4005_v17 = vpop.permute.xlu0 %4004 }
 0xf83   : > { %4008 = vst.msk [vmem:[#allocation2] sm:$0xf] %vm4007_vm15, %v4005_v17  ;;  %v4460_v17 = vsub.s32 0, %v11201_v16 }
 0xf8a   : > { %v4122_v18 = vpop.permute.xlu1 %4121 }
 0xf8b   : > { %4125 = vst.msk [vmem:[#allocation2] sm:$0xf] %vm4124_vm4, %v4122_v18  ;;  %v4456_v18 = vld [vmem:[%s11719_s14] sm:$0x3] }
 0xfb6   : > { %v4239_v20 = vpop.permute.xlu0 %4238 }
 0xfb7   : > { %4242 = vst.msk [vmem:[#allocation2] sm:$0xf] %vm4241_vm5, %v4239_v20  ;;  %v4464_v20 = vsub.s32 1, %v11201_v16 }
 0xfbe   : > { %v4243_v21 = vld [vmem:[#allocation2] sm:$0xf] }
 0xfbf   : > { %v4244_v22 = vpack.c.bf16 %v4243_v21, %v4243_v21  ;;  %v4461_v21 = vrot.slane %v4456_v18, %v4460_v17 }
 0xfc1   : > { %9413 = vmatmul.mubr.msk.bf16.vlgmr.msra.gmra.mrb[92].mxu0 %vm3576_vm12, %v4244_v22  ;;  %v4465_v22 = vrot.slane %v4456_v18, %v4464_v20 }
 0xfc2   : > { %4512 = vmatpush1.bf16.msra.mxu0 %v9941_v43  ;;  %4543 = vmatprep.mubr.bf16.mxu0 %v10420_v51 }
 0xfc3   : > { %4513 = vmatprep.subr.bf16.mxu0 %v9946_v44 }
 0xfc6   : > { %4514 = vmatpush1.bf16.msra.mxu0 %v9944_v45 }
 0xfc7   : > { %4515 = vmatprep.subr.bf16.mxu0 %v9949_v46 }
 0xfca   : > { %4516 = vmatpush1.bf16.msra.mxu0 %v9947_v47 }
 0xfcb   : > { %4517 = vmatprep.subr.bf16.mxu0 %v9952_v49 }
 0xfce   : > { %4518 = vmatpush1.bf16.msra.mxu0 %v9950_v50 }
 0xfcf   : > { %9428 = vmatprep.subr.bf16.mxu0 %v10412_v0 }
0x1094   : > { %v4321_v28 = vpop.f32.mrb[92].mxu0 }
0x1095   : > { %v4322_v29 = vadd.f32 %v8398_v23, %v4321_v28  ;;  %v9414_v30 = vpop.f32.mrb[93].mxu0 }
0x1096   : > { %v4324_v32 = vpop.f32.mrb[94].mxu0 }
0x1097   : > { %v4416_v33 = vmul.f32 %v10104_v31, %v4322_v29  ;;  %v9415_v35 = vpop.f32.mrb[95].mxu0 }
0x1099   : > { %v11163_v36 = vadd.f32 %v4416_v33, %v11028_v48 }
0x109b   : > { %v4420_v37 = vsel %vm3507_vm11, %v11163_v36, 0.0 }
0x109c   : > { %4421 = vadd.xlane.f32.xlu1 %v4420_v37 }
0x1129   : > { %v4422_v38 = vpop.xlane.xlu1 %4421 }
0x112a   : > { %v4423_v39 = vmul.f32 0.015625, %v4422_v38 }
0x112c   : > { %v4424_v40 = vsub.f32 %v11163_v36, %v4423_v39 }
0x112e   : > { %v4425_v41 = vmul.f32 %v4424_v40, %v4424_v40 }
0x1130   : > { %v4426_v34 = vsel %vm3507_vm11, %v4425_v41, 0.0 }
0x1131   : > { %4427 = vadd.xlane.f32.xlu0 %v4426_v34 }
0x11be   : > { %v4428_v52 = vpop.xlane.xlu0 %4427 }
0x11bf   : > { %v4429_v53 = vmul.f32 0.015625, %v4428_v52 }
0x11c1   : > { %v4430_v54 = vadd.f32 1e-05, %v4429_v53 }
0x11c3   : > { %10105 = vrsqrt.f32 %v4430_v54 }
0x11cd   : > { %v10106_v55 = vpop.eup %10105 }
0x11ce   : > { %v4432_v57 = vmul.f32 %v10106_v55, %v4424_v40 }
0x11d0   : > { %v4439_v59 = vmul.f32 %v8411_v56, %v4432_v57 }
0x11d2   : > { %v4446_v60 = vadd.f32 %v8412_v58, %v4439_v59 }
0x11d4   : > { %v4447_v61 = vpack.c.bf16 %v4446_v60, %v4446_v60 }
0x11d6   : > { %8421 = vmatmul.mubr.msk.bf16.vlgmr.msra.gmra.mrb[96].mxu0 %vm3576_vm12, %v4447_v61 }
0x11d7   : > { %9436 = vmatprep.mubr.msk.bf16.mxu0 %vm10413_vm0, %v10412_v0 }
0x12a9   : > { %v4545_v24 = vpop.f32.mrb[96].mxu0 }
0x12aa   : > { %v4546_v19 = vadd.f32 %v4545_v24, %v4461_v21  ;;  %v4547_v25 = vpop.f32.mrb[97].mxu0 }
0x12ab   : > { %v4548_v26 = vadd.f32 %v4547_v25, %v4465_v22  ;;  %v4549_v27 = vpop.f32.mrb[98].mxu0 }
0x12ac   : > { %v4554_v23 = vmul.f32 0.70710677, %v4546_v19  ;;  %v4550_v28 = vpop.f32.mrb[99].mxu0  ;;  %v4552_v11 = vmul.f32 0.5, %v4546_v19 }
0x12ad   : > { %v4555_v29 = vmul.f32 0.70710677, %v4548_v26  ;;  %v4553_v14 = vmul.f32 0.5, %v4548_v26  ;;  %v8438_v28 = vld [vmem:[%s11720_s17] ss:$0 sm:$0xff] }
0x12ae   : > { %v4556_v30 = vand.u32 2147483647, %v4554_v23  ;;  %vm4596_vm7 = vcmp.ge.f32.partialorder %v4554_v23, 0.0 }
0x12af   : > { %v4557_v31 = vand.u32 2147483647, %v4555_v29  ;;  %vm4597_vm10 = vcmp.ge.f32.partialorder %v4555_v29, 0.0 }
0x12b0   : > { %v4558_v32 = vmul.f32 0.3275911, %v4556_v30  ;;  %v4584_v38 = vsub.f32 0.0, %v4556_v30 }
0x12b1   : > { %v4559_v33 = vmul.f32 0.3275911, %v4557_v31  ;;  %v4585_v39 = vsub.f32 0.0, %v4557_v31 }
0x12b2   : > { %v4560_v35 = vadd.f32 1.0, %v4558_v32  ;;  %v4586_v41 = vmul.f32 %v4584_v38, %v4556_v30 }
0x12b3   : > { %v4561_v37 = vadd.f32 1.0, %v4559_v33  ;;  %v4587_v43 = vmul.f32 %v4585_v39, %v4557_v31  ;;  %v9969_v39 = vld [vmem:[%s11703_s7 + $0x20] sm:$0xff]  }
0x12b4   : > { %10107 = vrcp.f32 %v4560_v35  ;;  %v4588_v46 = vmul.f32 1.442695, %v4586_v41  ;;  %9429 = vmatpush3.bf16.msra.mxu0 %v9969_v39  ;;  %v9972_v41 = vld [vmem:[%s11707_s15 + $0x28] sm:$0xff]  }
0x12b5   : > { %10109 = vrcp.f32 %v4561_v37  ;;  %v4590_v50 = vmul.f32 1.442695, %v4587_v43  ;;  %9430 = vmatprep.subr.bf16.mxu0 %v10412_v0  ;;  %v9975_v43 = vld [vmem:[%s11703_s7 + $0x38] sm:$0xff]  }
0x12b6   : > { %10111 = vpow2.f32 %v4588_v46 }
0x12b7   : > { %10113 = vpow2.f32 %v4590_v50  ;;  %v8441_v50 = vld [vmem:[%s11705_s23 + $0x1] ss:$0 sm:$0xff] }
0x12be   : > { %v10108_v40 = vpop.eup %10107 }
0x12bf   : > { %v10110_v34 = vpop.eup %10109  ;;  %v4566_v42 = vmul.f32 1.0614054, %v10108_v40 }
0x12c0   : > { %v4567_v44 = vmul.f32 1.0614054, %v10110_v34  ;;  %v10112_v1 = vpop.eup %10111 }
0x12c1   : > { %v4568_v45 = vadd.f32 -1.4531521, %v4566_v42  ;;  %v10114_v3 = vpop.eup %10113  ;;  %v9974_v42 = vld [vmem:[%s11707_s15 + $0x30] sm:$0xff]  }
0x12c2   : > { %v4569_v47 = vadd.f32 -1.4531521, %v4567_v44  ;;  %v9976_v44 = vld [vmem:[%s11707_s15 + $0x38] sm:$0xff]  }
0x12c3   : > { %v4570_v49 = vmul.f32 %v10108_v40, %v4568_v45 }
0x12c4   : > { %v4571_v52 = vmul.f32 %v10110_v34, %v4569_v47 }
0x12c5   : > { %v4572_v53 = vadd.f32 1.4214138, %v4570_v49 }
0x12c6   : > { %v4573_v54 = vadd.f32 1.4214138, %v4571_v52 }
0x12c7   : > { %v4574_v55 = vmul.f32 %v10108_v40, %v4572_v53  ;;  %v8442_v53 = vld [vmem:[%s11706_s26 + $0x1] ss:$0 sm:$0xff] }
0x12c8   : > { %v4575_v56 = vmul.f32 %v10110_v34, %v4573_v54 }
0x12c9   : > { %v4576_v57 = vadd.f32 -0.28449672, %v4574_v55 }
0x12ca   : > { %v4577_v58 = vadd.f32 -0.28449672, %v4575_v56  ;;  %v9977_v56 = vld [vmem:[%s11704_s11 + $0x20] sm:$0xff]  }
0x12cb   : > { %v4578_v59 = vmul.f32 %v10108_v40, %v4576_v57 }
0x12cc   : > { %v4579_v60 = vmul.f32 %v10110_v34, %v4577_v58  ;;  %v9978_v58 = vld [vmem:[%s11704_s11 + $0x28] sm:$0xff]  }
0x12cd   : > { %v4580_v61 = vadd.f32 0.2548296, %v4578_v59  ;;  %v9979_v59 = vld [vmem:[%s11704_s11 + $0x30] sm:$0xff]  }
0x12ce   : > { %v4581_v62 = vadd.f32 0.2548296, %v4579_v60  ;;  %v9980_v60 = vld [vmem:[%s11704_s11 + $0x38] sm:$0xff]  }
0x12cf   : > { %v4582_v63 = vmul.f32 %v10108_v40, %v4580_v61  ;;  %v9971_v40 = vld [vmem:[%s11703_s7 + $0x28] sm:$0xff]   ;;  %v8452_v61 = vld [vmem:[%s11709_s10 + $0x1] ss:$0 sm:$0xff]  ;;  %s11723_s10 = smov 80  }
0x12d0   : > { %v4583_v2 = vmul.f32 %v10110_v34, %v4581_v62  ;;  %9431 = vmatpush3.bf16.msra.mxu0 %v9971_v40  ;;  %v9973_v34 = vld [vmem:[%s11703_s7 + $0x30] sm:$0xff]   ;;  %v8482_v62 = vld [vmem:[%s11710_s0 + $0x1] ss:$0 sm:$0xff]  ;;  %s11721_s7 = smov 112   ;;  %s11722_s0 = smov 96  }
0x12d1   : > { %v4592_v4 = vmul.f32 %v10112_v1, %v4582_v63  ;;  %9432 = vmatprep.subr.bf16.mxu0 %v10412_v0 }
0x12d2   : > { %v4593_v5 = vmul.f32 %v10114_v3, %v4583_v2 }
0x12d3   : > { %v4594_v6 = vsub.f32 1.0, %v4592_v4 }
0x12d4   : > { %v4595_v7 = vsub.f32 1.0, %v4593_v5  ;;  %9433 = vmatpush3.bf16.msra.mxu0 %v9973_v34 }
0x12d5   : > { %v4598_v8 = vsub.f32 0.0, %v4594_v6  ;;  %9434 = vmatprep.subr.bf16.mxu0 %v10412_v0 }
0x12d6   : > { %v4599_v9 = vsub.f32 0.0, %v4595_v7 }
0x12d7   : > { %v4600_v10 = vsel %vm4596_vm7, %v4594_v6, %v4598_v8 }
0x12d8   : > { %v4602_v12 = vadd.f32 1.0, %v4600_v10  ;;  %v4601_v13 = vsel %vm4597_vm10, %v4595_v7, %v4599_v9  ;;  %9435 = vmatpush3.bf16.msra.mxu0 %v9975_v43 }
0x12d9   : > { %v4603_v15 = vadd.f32 1.0, %v4601_v13  ;;  %9440 = vmatprep.subr.bf16.mxu0 %v10412_v0  ;;  %v8467_v13 = vld [vmem:[%s11708_s16 + $0x1] ss:$0 sm:$0xff] }
0x12da   : > { %v4604_v18 = vmul.f32 %v4602_v12, %v4552_v11 }
0x12db   : > { %v4605_v21 = vmul.f32 %v4603_v15, %v4553_v14 }
0x12dc   : > { %v4606_v24 = vpack.c.bf16 %v4604_v18, %v4604_v18 }
0x12dd   : > { %v4607_v22 = vpack.c.bf16 %v4605_v21, %v4605_v21 }
0x12df   : > { %4768 = vmatprep.mubr.bf16.mxu1 %v4607_v22 }
0x12e0   : > { %4769 = vmatmul.mubr.bf16.vlgmr.msra.gmra.mrb[100].mxu1 %v4606_v24 }
0x12e1   : > { %9460 = vmatprep.mubr.msk.bf16.mxu1 %vm10413_vm0, %v10412_v0 }
0x13b3   : > { %v8921_v25 = vpop.f32.mrb[100].mxu1 }
0x13b4   : > { %v8922_v27 = vpop.f32.mrb[101].mxu1 }
0x13b5   : > { %v8923_v23 = vadd.f32 %v8922_v27, %v8921_v25  ;;  %v8924_v19 = vpop.f32.mrb[102].mxu1 }
0x13b6   : > { %v8925_v29 = vpop.f32.mrb[103].mxu1 }
0x13b7   : > { %v4776_v26 = vadd.f32 %v8923_v23, %v11163_v36  ;;  %v9970_v36 = vld [vmem:[%s11707_s15 + $0x20] sm:$0xff]  }
0x13b8   : > { %9453 = vmatpush3.bf16.msra.mxu1 %v9970_v36 }
0x13b9   : > { %v11214_v30 = vadd.f32 %v8438_v28, %v4776_v26  ;;  %9454 = vmatprep.subr.bf16.mxu1 %v10412_v0 }
0x13bb   : > { %v4789_v31 = vsel %vm3507_vm11, %v11214_v30, 0.0 }
0x13bc   : > { %4790 = vadd.xlane.f32.xlu0 %v4789_v31  ;;  %9455 = vmatpush3.bf16.msra.mxu1 %v9972_v41 }
0x13bd   : > { %9456 = vmatprep.subr.bf16.mxu1 %v10412_v0 }
0x13c0   : > { %9457 = vmatpush3.bf16.msra.mxu1 %v9974_v42 }
0x13c1   : > { %9458 = vmatprep.subr.bf16.mxu1 %v10412_v0 }
0x13c4   : > { %9459 = vmatpush3.bf16.msra.mxu1 %v9976_v44 }
0x13c5   : > { %9470 = vmatprep.subr.bf16.mxu1 %v10412_v0 }
0x1449   : > { %v4791_v32 = vpop.xlane.xlu0 %4790 }
0x144a   : > { %v4792_v33 = vmul.f32 0.015625, %v4791_v32 }
0x144c   : > { %v4793_v35 = vsub.f32 %v11214_v30, %v4792_v33 }
0x144e   : > { %v4794_v37 = vmul.f32 %v4793_v35, %v4793_v35 }
0x1450   : > { %v4795_v38 = vsel %vm3507_vm11, %v4794_v37, 0.0 }
0x1451   : > { %4796 = vadd.xlane.f32.xlu1 %v4795_v38 }
0x14de   : > { %v4797_v45 = vpop.xlane.xlu1 %4796 }
0x14df   : > { %v4798_v46 = vmul.f32 0.015625, %v4797_v45 }
0x14e1   : > { %v4799_v47 = vadd.f32 1e-05, %v4798_v46 }
0x14e3   : > { %10115 = vrsqrt.f32 %v4799_v47 }
0x14ed   : > { %v10116_v49 = vpop.eup %10115 }
0x14ee   : > { %v4801_v52 = vmul.f32 %v10116_v49, %v4793_v35 }
0x14f0   : > { %v4808_v54 = vmul.f32 %v8441_v50, %v4801_v52 }
0x14f2   : > { %v4815_v55 = vadd.f32 %v8442_v53, %v4808_v54 }
0x14f4   : > { %v4816_v57 = vpack.c.bf16 %v4815_v55, %v4815_v55 }
0x14f6   : > { %9437 = vmatmul.mubr.msk.bf16.vlgmr.msra.gmra.mrb[100].mxu0 %vm3576_vm12, %v4816_v57  ;;  %9461 = vmatmul.mubr.msk.bf16.vlgmr.msra.gmra.mrb[104].mxu1 %vm3576_vm12, %v4816_v57 }
0x14f7   : > { %9441 = vmatpush3.bf16.msra.mxu0 %v9977_v56  ;;  %9448 = vmatprep.mubr.msk.bf16.mxu0 %vm10413_vm0, %v10412_v0 }
0x14f8   : > { %9442 = vmatprep.subr.bf16.mxu0 %v10412_v0  ;;  %9472 = vmatprep.mubr.msk.bf16.mxu1 %vm10413_vm0, %v10412_v0 }
0x14fb   : > { %9443 = vmatpush3.bf16.msra.mxu0 %v9978_v58 }
0x14fc   : > { %9444 = vmatprep.subr.bf16.mxu0 %v10412_v0 }
0x14ff   : > { %9445 = vmatpush3.bf16.msra.mxu0 %v9979_v59 }
0x1500   : > { %9446 = vmatprep.subr.bf16.mxu0 %v10412_v0 }
0x1503   : > { %9447 = vmatpush3.bf16.msra.mxu0 %v9980_v60 }
0x1504   : > { %9464 = vmatprep.subr.bf16.mxu0 %v10412_v0 }
0x1506   : > { %9449 = vmatmul.mubr.msk.bf16.vlgmr.msra.gmra.mrb[104].mxu0 %vm3576_vm12, %v4816_v57 }
0x1507   : > { %9466 = vmatprep.mubr.msk.bf16.mxu0 %vm10413_vm0, %v10412_v0 }
0x15c9   : > { %v4895_v63 = vpop.f32.mrb[100].mxu0  ;;  %v5057_v1 = vpop.f32.mrb[104].mxu1 }
0x15ca   : > { %v4896_v2 = vadd.f32 %v8452_v61, %v4895_v63  ;;  %v5058_v3 = vadd.f32 %v8482_v62, %v5057_v1  ;;  %v9438_v4 = vpop.f32.mrb[101].mxu0  ;;  %v9462_v5 = vpop.f32.mrb[105].mxu1 }
0x15cb   : > { %v4898_v6 = vpop.f32.mrb[102].mxu0  ;;  %v5060_v7 = vpop.f32.mrb[106].mxu1 }
0x15cc   : > { %v5063_v8 = vpack.c.bf16 %v4896_v2, %v4896_v2  ;;  %v11257_v9 = vpack.c.bf16 %v5058_v3, %v5058_v3  ;;  %v9439_v10 = vpop.f32.mrb[103].mxu0  ;;  %v9463_v11 = vpop.f32.mrb[107].mxu1 }
0x15ce   : > { %5173 = vrot.lane.b32.xlu1 %v5063_v8, %s11721_s7  ;;  %v5129_v12 = vsel %vm1603_vm2, %v11257_v9, 0 }
0x15cf   : > { %9471 = vmatpush3.bf16.msra.mxu1 %v5129_v12 }
0x15d0   : > { %9482 = vmatprep.subr.bf16.mxu1 %v10412_v0 }
0x15d9   : > { %v4976_v14 = vpop.f32.mrb[104].mxu0 }
0x15da   : > { %v4977_v15 = vadd.f32 %v8467_v13, %v4976_v14  ;;  %v9450_v18 = vpop.f32.mrb[105].mxu0 }
0x15db   : > { %v4979_v21 = vpop.f32.mrb[106].mxu0 }
0x15dc   : > { %v5064_v22 = vpack.c.bf16 %v4977_v15, %v4977_v15  ;;  %v9451_v24 = vpop.f32.mrb[107].mxu0 }
0x15de   : > { %5293 = vrot.lane.b32.xlu1 %v5064_v22, %s11722_s0  ;;  %5176 = vrot.lane.b32.xlu0 %v5064_v22, %s11721_s7  ;;  %v5070_v25 = vsel %vm2185_vm6, %v5064_v22, 0 }
0x15df   : > { %9465 = vmatpush3.bf16.xpose.msra.mxu0 %v5070_v25 }
0x15e0   : > { %9476 = vmatprep.subr.bf16.mxu0 %v10412_v0 }
0x15e2   : > { %5409 = vrot.lane.b32.xlu1 %v5064_v22, %s11723_s10  ;;  %5291 = vrot.lane.b32.xlu0 %v5063_v8, %s11722_s0 }
0x15e6   : > { %5407 = vrot.lane.b32.xlu0 %v5063_v8, %s11723_s10  ;;  %9467 = vmatmul.mubr.msk.bf16.vlgmr.msra.gmra.mrb[108].mxu0 %vm2185_vm6, %v5063_v8 }
0x15e7   : > { %9478 = vmatprep.mubr.msk.bf16.mxu0 %vm10413_vm0, %v10412_v0 }
0x1640   : > { %v5174_v19 = vpop.permute.xlu1 %5173 }
0x1650   : > { %v5177_v27 = vpop.permute.xlu0 %5176  ;;  %v5294_v28 = vpop.permute.xlu1 %5293 }
0x1651   : > { %v5182_v23 = vsel %vm2185_vm6, %v5177_v27, 0  ;;  %v5299_v29 = vsel %vm2185_vm6, %v5294_v28, 0 }
0x1652   : > { %9477 = vmatpush3.bf16.xpose.msra.mxu0 %v5182_v23 }
0x1653   : > { %9488 = vmatprep.subr.bf16.mxu0 %v10412_v0 }
0x1654   : > { %v5410_v26 = vpop.permute.xlu1 %5409  ;;  %v5292_v31 = vpop.permute.xlu0 %5291 }
0x1655   : > { %v5415_v32 = vsel %vm2185_vm6, %v5410_v26, 0 }
0x1658   : > { %v5408_v33 = vpop.permute.xlu0 %5407 }
0x1659   : > { %9479 = vmatmul.mubr.msk.bf16.vlgmr.msra.gmra.mrb[112].mxu0 %vm2185_vm6, %v5174_v19 }
0x165a   : > { %9489 = vmatpush3.bf16.xpose.msra.mxu0 %v5299_v29  ;;  %9490 = vmatprep.mubr.msk.bf16.mxu0 %vm10413_vm0, %v10412_v0 }
0x165b   : > { %9500 = vmatprep.subr.bf16.mxu0 %v10412_v0 }
0x1661   : > { %9491 = vmatmul.mubr.msk.bf16.vlgmr.msra.gmra.mrb[116].mxu0 %vm2185_vm6, %v5292_v31 }
0x1662   : > { %9501 = vmatpush3.bf16.xpose.msra.mxu0 %v5415_v32  ;;  %9502 = vmatprep.mubr.msk.bf16.mxu0 %vm10413_vm0, %v10412_v0 }
0x1663   : > { %9512 = vmatprep.subr.bf16.mxu0 %v10412_v0 }
0x1669   : > { %9503 = vmatmul.mubr.msk.bf16.vlgmr.msra.gmra.mrb[120].mxu0 %vm2185_vm6, %v5408_v33 }
0x166a   : > { %9520 = vmatprep.mubr.msk.bf16.mxu0 %vm10413_vm0, %v10412_v0 }
0x16b9   : > { %v5106_v35 = vpop.f32.mrb[108].mxu0 }
0x16ba   : > { %v5112_v37 = vmul.f32 0.25, %v5106_v35  ;;  %v9468_v38 = vpop.f32.mrb[109].mxu0 }
0x16bb   : > { %v5109_v39 = vpop.f32.mrb[110].mxu0 }
0x16bc   : > { %v9469_v36 = vpop.f32.mrb[111].mxu0  ;;  %v5113_v40 = vsel %vm3828_vm13, %v5112_v37, -inf }
0x16bd   : > { %5114 = vmax.xlane.f32.xlu1 %v5113_v40 }
0x172c   : > { %v5218_v41 = vpop.f32.mrb[112].mxu0 }
0x172d   : > { %v5224_v34 = vmul.f32 0.25, %v5218_v41  ;;  %v9480_v42 = vpop.f32.mrb[113].mxu0 }
0x172e   : > { %v5221_v43 = vpop.f32.mrb[114].mxu0  ;;  %v9981_v42 = vld [vmem:[%s11711_s3 + $0x20] sm:$0xff]  }
0x172f   : > { %v9481_v44 = vpop.f32.mrb[115].mxu0  ;;  %v5225_v45 = vsel %vm3828_vm13, %v5224_v34, -inf }
0x1730   : > { %5226 = vmax.xlane.f32.xlu0 %v5225_v45  ;;  %v9982_v44 = vld [vmem:[%s11711_s3 + $0x28] sm:$0xff]   ;;  %v9983_v45 = vld [vmem:[%s11711_s3 + $0x30] sm:$0xff]  }
0x1734   : > { %v5335_v46 = vpop.f32.mrb[116].mxu0 }
0x1735   : > { %v5341_v47 = vmul.f32 0.25, %v5335_v46  ;;  %v9492_v49 = vpop.f32.mrb[117].mxu0  ;;  %v9984_v46 = vld [vmem:[%s11711_s3 + $0x38] sm:$0xff]  }
0x1736   : > { %v5338_v50 = vpop.f32.mrb[118].mxu0 }
0x1737   : > { %v9493_v52 = vpop.f32.mrb[119].mxu0  ;;  %v5342_v53 = vsel %vm3828_vm13, %v5341_v47, -inf }
0x1738   : > { %5343 = vmax.xlane.f32.xlu0 %v5342_v53 }
0x173c   : > { %v5451_v54 = vpop.f32.mrb[120].mxu0 }
0x173d   : > { %v5457_v55 = vmul.f32 0.25, %v5451_v54  ;;  %v9504_v56 = vpop.f32.mrb[121].mxu0  ;;  %v9985_v54 = vld [vmem:[%s11712_s1 + $0x20] sm:$0xff]  }
0x173e   : > { %v5454_v57 = vpop.f32.mrb[122].mxu0  ;;  %9513 = vmatpush3.bf16.msra.mxu0 %v9985_v54  ;;  %v8530_v54 = vld [vmem:[%s11717_s12 + $0x1] ss:$0 sm:$0xff] }
0x173f   : > { %v9505_v58 = vpop.f32.mrb[123].mxu0  ;;  %v5458_v59 = vsel %vm3828_vm13, %v5457_v55, -inf  ;;  %9514 = vmatprep.subr.bf16.mxu0 %v10412_v0 }
0x1740   : > { %5459 = vmax.xlane.f32.xlu1 %v5458_v59 }
0x174a   : > { %v5115_v60 = vpop.xlane.xlu1 %5114 }
0x174b   : > { %v5116_v61 = vsub.f32 %v5112_v37, %v5115_v60 }
0x174d   : > { %v5117_v62 = vmul.f32 1.442695, %v5116_v61 }
0x174f   : > { %10117 = vpow2.f32 %v5117_v62 }
0x1759   : > { %v10118_v63 = vpop.eup %10117 }
0x175a   : > { %v5119_v1 = vsel %vm3828_vm13, %v10118_v63, 0.0 }
0x175b   : > { %5120 = vadd.xlane.f32.xlu0 %v5119_v1  ;;  %v9987_v1 = vld [vmem:[%s11712_s1 + $0x30] sm:$0xff]  }
0x17bd   : > { %v5227_v2 = vpop.xlane.xlu0 %5226 }
0x17be   : > { %v5228_v3 = vsub.f32 %v5224_v34, %v5227_v2  ;;  %v9988_v2 = vld [vmem:[%s11712_s1 + $0x38] sm:$0xff]  }
0x17c0   : > { %v5229_v4 = vmul.f32 1.442695, %v5228_v3 }
0x17c2   : > { %10119 = vpow2.f32 %v5229_v4 }
0x17c5   : > { %v5344_v5 = vpop.xlane.xlu0 %5343 }
0x17c6   : > { %v5345_v6 = vsub.f32 %v5341_v47, %v5344_v5  ;;  %v5609_v47 = vpack.c.bf16 %v11214_v30, %v11214_v30 }
0x17c8   : > { %v5346_v7 = vmul.f32 1.442695, %v5345_v6 }
0x17ca   : > { %10121 = vpow2.f32 %v5346_v7 }
0x17cc   : > { %v10120_v8 = vpop.eup %10119 }
0x17cd   : > { %v5231_v10 = vsel %vm3828_vm13, %v10120_v8, 0.0  ;;  %v5460_v14 = vpop.xlane.xlu1 %5459 }
0x17ce   : > { %5232 = vadd.xlane.f32.xlu1 %v5231_v10  ;;  %v5461_v15 = vsub.f32 %v5457_v55, %v5460_v14  ;;  %v9986_v55 = vld [vmem:[%s11712_s1 + $0x28] sm:$0xff]  }
0x17cf   : > { %9515 = vmatpush3.bf16.msra.mxu0 %v9986_v55 }
0x17d0   : > { %v5462_v18 = vmul.f32 1.442695, %v5461_v15  ;;  %9516 = vmatprep.subr.bf16.mxu0 %v10412_v0 }
0x17d3   : > { %9517 = vmatpush3.bf16.msra.mxu0 %v9987_v1  ;;  %v10007_v1 = vld [vmem:[%s11718_s13 + $0xd8] sm:$0xff]  }
0x17d4   : > { %v10122_v11 = vpop.eup %10121  ;;  %9518 = vmatprep.subr.bf16.mxu0 %v10412_v0 }
0x17d5   : > { %v5348_v12 = vsel %vm3828_vm13, %v10122_v11, 0.0 }
0x17d6   : > { %5349 = vadd.xlane.f32.xlu0 %v5348_v12 }
0x17d7   : > { %9519 = vmatpush3.bf16.msra.mxu0 %v9988_v2  ;;  %v10008_v2 = vld [vmem:[%s11718_s13 + $0x98] sm:$0xff]  }
0x17df   : > { %5354 = vrot.lane.b32.xlu1 %v11257_v9, %s11722_s0  ;;  %s11724_s0 = smov 16  }
0x17e8   : > { %v5121_v13 = vpop.xlane.xlu0 %5120 }
0x17e9   : > { %10123 = vrcp.f32 %v5121_v13 }
0x17ea   : > { %10125 = vpow2.f32 %v5462_v18 }
0x17ec   : > { %5238 = vrot.lane.b32.xlu0 %v11257_v9, %s11721_s7  ;;  %s11725_s7 = smov 32  }
0x17f3   : > { %v10124_v21 = vpop.eup %10123 }
0x17f4   : > { %v5123_v22 = vmul.f32 %v10124_v21, %v10118_v63  ;;  %v10126_v25 = vpop.eup %10125  ;;  %v8520_v21 = vld [vmem:[%s11713_s6 + $0x1] ss:$0 sm:$0xff] }
0x17f5   : > { %v5464_v27 = vsel %vm3828_vm13, %v10126_v25, 0.0 }
0x17f6   : > { %v5124_v24 = vpack.c.bf16 %v5123_v22, %v5123_v22 }
0x17f8   : > { %9473 = vmatmul.mubr.msk.bf16.vlgmr.msra.gmra.mrb[108].mxu1 %vm1599_vm3, %v5124_v24 }
0x17f9   : > { %9484 = vmatprep.mubr.msk.bf16.mxu1 %vm10413_vm0, %v10412_v0 }
0x1803   : > { %5465 = vadd.xlane.f32.xlu1 %v5464_v27 }
0x1814   : > { %5470 = vrot.lane.b32.xlu1 %v11257_v9, %s11723_s10  ;;  %s11726_s10 = smov 48  }
0x185b   : > { %v5233_v23 = vpop.xlane.xlu1 %5232 }
0x185c   : > { %10127 = vrcp.f32 %v5233_v23  ;;  %v8505_v23 = vld [vmem:[%s11714_s5 + $0x1] ss:$0 sm:$0xff] }
0x185f   : > { %v5355_v32 = vpop.permute.xlu1 %5354 }
0x1860   : > { %v5360_v35 = vsel %vm1603_vm2, %v5355_v32, 0 }
0x1863   : > { %v5350_v19 = vpop.xlane.xlu0 %5349 }
0x1864   : > { %10129 = vrcp.f32 %v5350_v19 }
0x1866   : > { %v10128_v28 = vpop.eup %10127 }
0x1867   : > { %v5235_v29 = vmul.f32 %v10128_v28, %v10120_v8  ;;  %v5239_v26 = vpop.permute.xlu0 %5238 }
0x1868   : > { %v5244_v31 = vsel %vm1603_vm2, %v5239_v26, 0 }
0x1869   : > { %9483 = vmatpush3.bf16.msra.mxu1 %v5244_v31  ;;  %v5236_v33 = vpack.c.bf16 %v5235_v29, %v5235_v29 }
0x186a   : > { %9494 = vmatprep.subr.bf16.mxu1 %v10412_v0 }
0x186c   : > { %9485 = vmatmul.mubr.msk.bf16.vlgmr.msra.gmra.mrb[112].mxu1 %vm1599_vm3, %v5236_v33 }
0x186d   : > { %9495 = vmatpush3.bf16.msra.mxu1 %v5360_v35  ;;  %9496 = vmatprep.mubr.msk.bf16.mxu1 %vm10413_vm0, %v10412_v0 }
0x186e   : > { %v10130_v9 = vpop.eup %10129  ;;  %9506 = vmatprep.subr.bf16.mxu1 %v10412_v0 }
0x186f   : > { %v5352_v37 = vmul.f32 %v10130_v9, %v10122_v11 }
0x1871   : > { %v5353_v38 = vpack.c.bf16 %v5352_v37, %v5352_v37 }
0x1874   : > { %9497 = vmatmul.mubr.msk.bf16.vlgmr.msra.gmra.mrb[116].mxu1 %vm1599_vm3, %v5353_v38 }
0x1875   : > { %9508 = vmatprep.mubr.msk.bf16.mxu1 %vm10413_vm0, %v10412_v0 }
0x1890   : > { %v5466_v39 = vpop.xlane.xlu1 %5465 }
0x1891   : > { %10131 = vrcp.f32 %v5466_v39 }
0x1894   : > { %v5471_v36 = vpop.permute.xlu1 %5470 }
0x1895   : > { %v5476_v40 = vsel %vm1603_vm2, %v5471_v36, 0 }
0x1896   : > { %9507 = vmatpush3.bf16.msra.mxu1 %v5476_v40  ;;  %v9991_v40 = vld [vmem:[%s11715_s2 + $0x44] ss:$8 sps:$4 sm:$0xff]  }
0x1897   : > { %9524 = vmatprep.subr.bf16.mxu1 %v10412_v0  ;;  %5799 = vmatprep.subr.bf16.mxu0 %v9991_v40 }
0x189b   : > { %v10132_v41 = vpop.eup %10131 }
0x189c   : > { %v5468_v34 = vmul.f32 %v10132_v41, %v10126_v25  ;;  %v9989_v41 = vld [vmem:[%s11715_s2 + $0x40] ss:$8 sps:$4 sm:$0xff]  }
0x189e   : > { %v5469_v43 = vpack.c.bf16 %v5468_v34, %v5468_v34  ;;  %v9992_v34 = vld [vmem:[%s11715_s2 + $0x50] ss:$8 sps:$4 sm:$0xff]  }
0x18a0   : > { %9509 = vmatmul.mubr.msk.bf16.vlgmr.msra.gmra.mrb[120].mxu1 %vm1599_vm3, %v5469_v43  ;;  %v9995_v43 = vld [vmem:[%s11715_s2 + $0x60] ss:$8 sps:$4 sm:$0xff]  }
0x18a1   : > { %9525 = vmatpush3.bf16.msra.mxu1 %v9981_v42  ;;  %9532 = vmatprep.mubr.msk.bf16.mxu1 %vm10413_vm0, %v10412_v0  ;;  %v9997_v42 = vld [vmem:[%s11715_s2 + $0x64] ss:$8 sps:$4 sm:$0xff]  }
0x18a2   : > { %9526 = vmatprep.subr.bf16.mxu1 %v10412_v0 }
0x18a5   : > { %9527 = vmatpush3.bf16.msra.mxu1 %v9982_v44  ;;  %v9998_v44 = vld [vmem:[%s11715_s2 + $0x70] ss:$8 sps:$4 sm:$0xff]  }
0x18a6   : > { %9528 = vmatprep.subr.bf16.mxu1 %v10412_v0 }
0x18a9   : > { %9529 = vmatpush3.bf16.msra.mxu1 %v9983_v45  ;;  %v10000_v45 = vld [vmem:[%s11715_s2 + $0x74] ss:$8 sps:$4 sm:$0xff]  }
0x18aa   : > { %9530 = vmatprep.subr.bf16.mxu1 %v10412_v0 }
0x18ad   : > { %9531 = vmatpush3.bf16.msra.mxu1 %v9984_v46 }
0x18b0   : > { %9533 = vmatmul.mubr.msk.bf16.vlgmr.msra.gmra.mrb[124].mxu1 %vm3576_vm12, %v5609_v47 }
0x18cb   : > { %v5165_v49 = vpop.f32.mrb[108].mxu1 }
0x18cc   : > { %5171 = vst.msk [vmem:[#allocation2] sm:$0xf] %vm3887_vm14, %v5165_v49  ;;  %v9474_v50 = vpop.f32.mrb[109].mxu1 }
0x18cd   : > { %v5168_v52 = vpop.f32.mrb[110].mxu1 }
0x18ce   : > { %v9475_v53 = vpop.f32.mrb[111].mxu1  ;;  %v8529_v52 = vld [vmem:[%s11716_s9 + $0x1] ss:$0 sm:$0xff] }
0x193f   : > { %v5280_v56 = vpop.f32.mrb[112].mxu1 }
0x1940   : > { %5287 = vrot.lane.b32.xlu0 %v5280_v56, %s11724_s0  ;;  %v9486_v57 = vpop.f32.mrb[113].mxu1  ;;  %s11727_s0 = sld [smem:[#allocation51_spill]] }
0x1941   : > { %v5283_v58 = vpop.f32.mrb[114].mxu1 }
0x1942   : > { %v9487_v59 = vpop.f32.mrb[115].mxu1  ;;  %v10001_v58 = vld [vmem:[%s11718_s13 + $0xc0] sm:$0xff]  }
0x1943   : > { %v10002_v59 = vld [vmem:[%s11718_s13 + $0x80] sm:$0xff]   ;;  %8968 = vmatprep.subr.bf16.mxu1 %v10001_v58 }
0x1944   : > { %8969 = vmatpush3.bf16.msra.mxu1 %v10002_v59 }
0x1947   : > { %v5396_v60 = vpop.f32.mrb[116].mxu1 }
0x1948   : > { %5403 = vrot.lane.b32.xlu1 %v5396_v60, %s11725_s7  ;;  %v9498_v61 = vpop.f32.mrb[117].mxu1  ;;  %v10003_v60 = vld [vmem:[%s11718_s13 + $0xc8] sm:$0xff]   ;;  %s11728_s7 = sld [smem:[#allocation50_spill]] }
0x1949   : > { %v5399_v62 = vpop.f32.mrb[118].mxu1  ;;  %v10004_v61 = vld [vmem:[%s11718_s13 + $0x88] sm:$0xff]   ;;  %8970 = vmatprep.subr.bf16.mxu1 %v10003_v60 }
0x194a   : > { %v9499_v63 = vpop.f32.mrb[119].mxu1  ;;  %8971 = vmatpush3.bf16.msra.mxu1 %v10004_v61  ;;  %v10005_v62 = vld [vmem:[%s11718_s13 + $0xd0] sm:$0xff]  }
0x194b   : > { %v10006_v63 = vld [vmem:[%s11718_s13 + $0x90] sm:$0xff]   ;;  %8972 = vmatprep.subr.bf16.mxu1 %v10005_v62 }
0x194e   : > { %8973 = vmatpush3.bf16.msra.mxu1 %v10006_v63 }
0x194f   : > { %8974 = vmatprep.subr.bf16.mxu1 %v10007_v1 }
0x1952   : > { %8975 = vmatpush3.bf16.msra.mxu1 %v10008_v2 }
0x1973   : > { %v5512_v3 = vpop.f32.mrb[120].mxu1 }
0x1974   : > { %5519 = vrot.lane.b32.xlu0 %v5512_v3, %s11726_s10  ;;  %v9510_v4 = vpop.f32.mrb[121].mxu1  ;;  %v10009_v3 = vld [vmem:[%s11718_s13 + $0xe0] sm:$0xff]   ;;  %s11729_s10 = sld [smem:[#allocation53_spill]] }
0x1975   : > { %v5515_v5 = vpop.f32.mrb[122].mxu1  ;;  %v10010_v4 = vld [vmem:[%s11718_s13 + $0xa0] sm:$0xff]   ;;  %8976 = vmatprep.subr.bf16.mxu1 %v10009_v3 }
0x1976   : > { %v9511_v6 = vpop.f32.mrb[123].mxu1  ;;  %8977 = vmatpush3.bf16.msra.mxu1 %v10010_v4  ;;  %v10011_v5 = vld [vmem:[%s11718_s13 + $0xe8] sm:$0xff]  }
0x1977   : > { %v10012_v6 = vld [vmem:[%s11718_s13 + $0xa8] sm:$0xff]   ;;  %8978 = vmatprep.subr.bf16.mxu1 %v10011_v5 }
0x197a   : > { %8979 = vmatpush3.bf16.msra.mxu1 %v10012_v6 }
0x1983   : > { %v5688_v7 = vpop.f32.mrb[124].mxu1 }
0x1984   : > { %v9534_v8 = vpop.f32.mrb[125].mxu1  ;;  %v5689_v22 = vadd.f32 %v8520_v21, %v5688_v7  ;;  %v10013_v7 = vld [vmem:[%s11718_s13 + $0xf0] sm:$0xff]  }
0x1985   : > { %v5691_v10 = vpop.f32.mrb[126].mxu1  ;;  %v10014_v8 = vld [vmem:[%s11718_s13 + $0xb0] sm:$0xff]   ;;  %8980 = vmatprep.subr.bf16.mxu1 %v10013_v7 }
0x1986   : > { %v9535_v11 = vpop.f32.mrb[127].mxu1  ;;  %v8526_v24 = vmul.f32 -1.442695, %v5689_v22  ;;  %8981 = vmatpush3.bf16.msra.mxu1 %v10014_v8  ;;  %v10015_v10 = vld [vmem:[%s11718_s13 + $0xf8] sm:$0xff]  }
0x1987   : > { %v10016_v11 = vld [vmem:[%s11718_s13 + $0xb8] sm:$0xff]   ;;  %8982 = vmatprep.subr.bf16.mxu1 %v10015_v10 }
0x1988   : > { %10133 = vpow2.f32 %v8526_v24 }
0x198a   : > { %8983 = vmatpush3.bf16.msra.mxu1 %v10016_v11 }
0x198b   : > { %9560 = vmatprep.subr.bf16.mxu1 %v10412_v0 }
0x1992   : > { %v10134_v25 = vpop.eup %10133 }
0x1993   : > { %v5697_v27 = vadd.f32 1.0, %v10134_v25 }
0x1995   : > { %10135 = vrcp.f32 %v5697_v27 }
0x199f   : > { %v10136_v26 = vpop.eup %10135 }
0x19b2   : > { %v5288_v12 = vpop.permute.xlu0 %5287 }
0x19b3   : > { %5290 = vst.msk [vmem:[#allocation2] sm:$0xf] %vm4007_vm15, %v5288_v12  ;;  %v8539_v12 = vld [vmem:[%s11719_s14 + $0x2] sm:$0x3] }
0x19ba   : > { %v5404_v13 = vpop.permute.xlu1 %5403 }
0x19bb   : > { %5406 = vst.msk [vmem:[#allocation2] sm:$0xf] %vm4124_vm4, %v5404_v13  ;;  %v5749_v13 = vrot.slane %v8539_v12, %v4460_v17 }
0x19e6   : > { %v5520_v14 = vpop.permute.xlu0 %5519 }
0x19e7   : > { %5522 = vst.msk [vmem:[#allocation2] sm:$0xf] %vm4241_vm5, %v5520_v14  ;;  %v5753_v14 = vrot.slane %v8539_v12, %v4464_v20  ;;  %v10017_v12 = vld [vmem:[%s11727_s0] sm:$0xff]  }
0x19ee   : > { %v5523_v15 = vld [vmem:[#allocation2] sm:$0xf] }
0x19ef   : > { %v5524_v18 = vpack.c.bf16 %v5523_v15, %v5523_v15 }
0x19f1   : > { %9521 = vmatmul.mubr.msk.bf16.vlgmr.msra.gmra.mrb[124].mxu0 %vm3576_vm12, %v5524_v18 }
0x19f2   : > { %5831 = vmatprep.mubr.bf16.mxu0 %v10420_v51  ;;  %5800 = vmatpush1.bf16.msra.mxu0 %v9989_v41 }
0x1ac4   : > { %v5603_v19 = vpop.f32.mrb[124].mxu0 }
0x1ac5   : > { %v5604_v28 = vadd.f32 %v8505_v23, %v5603_v19  ;;  %v9522_v29 = vpop.f32.mrb[125].mxu0 }
0x1ac6   : > { %v5606_v31 = vpop.f32.mrb[126].mxu0 }
0x1ac7   : > { %v5700_v32 = vmul.f32 %v10136_v26, %v5604_v28  ;;  %v9523_v33 = vpop.f32.mrb[127].mxu0 }
0x1ac9   : > { %v11350_v51 = vadd.f32 %v5700_v32, %v11214_v30  ;;  %v9994_v30 = vld [vmem:[%s11715_s2 + $0x54] ss:$8 sps:$4 sm:$0xff]  }
0x1aca   : > { %5801 = vmatprep.subr.bf16.mxu0 %v9994_v30 }
0x1acb   : > { %v5706_v35 = vsel %vm3507_vm11, %v11350_v51, 0.0  ;;  %5802 = vmatpush1.bf16.msra.mxu0 %v9992_v34 }
0x1acc   : > { %5707 = vadd.xlane.f32.xlu1 %v5706_v35  ;;  %5803 = vmatprep.subr.bf16.mxu0 %v9997_v42 }
0x1acf   : > { %5804 = vmatpush1.bf16.msra.mxu0 %v9995_v43 }
0x1ad0   : > { %5805 = vmatprep.subr.bf16.mxu0 %v10000_v45 }
0x1ad3   : > { %5806 = vmatpush1.bf16.msra.mxu0 %v9998_v44 }
0x1ad4   : > { %9536 = vmatprep.subr.bf16.mxu0 %v10412_v0 }
0x1b59   : > { %v5708_v9 = vpop.xlane.xlu1 %5707 }
0x1b5a   : > { %v5709_v37 = vmul.f32 0.015625, %v5708_v9 }
0x1b5c   : > { %v5710_v38 = vsub.f32 %v11350_v51, %v5709_v37 }
0x1b5e   : > { %v5711_v39 = vmul.f32 %v5710_v38, %v5710_v38 }
0x1b60   : > { %v5712_v36 = vsel %vm3507_vm11, %v5711_v39, 0.0 }
0x1b61   : > { %5713 = vadd.xlane.f32.xlu0 %v5712_v36 }
0x1bee   : > { %v5714_v46 = vpop.xlane.xlu0 %5713 }
0x1bef   : > { %v5715_v47 = vmul.f32 0.015625, %v5714_v46 }
0x1bf1   : > { %v5716_v49 = vadd.f32 1e-05, %v5715_v47 }
0x1bf3   : > { %10137 = vrsqrt.f32 %v5716_v49 }
0x1bfd   : > { %v10138_v50 = vpop.eup %10137 }
0x1bfe   : > { %v5718_v53 = vmul.f32 %v10138_v50, %v5710_v38 }
0x1c00   : > { %v5725_v55 = vmul.f32 %v8529_v52, %v5718_v53 }
0x1c02   : > { %v5732_v56 = vadd.f32 %v8530_v54, %v5725_v55 }
0x1c04   : > { %v5733_v57 = vpack.c.bf16 %v5732_v56, %v5732_v56 }
0x1c06   : > { %8548 = vmatmul.mubr.msk.bf16.vlgmr.msra.gmra.mrb[128].mxu0 %vm3576_vm12, %v5733_v57 }
0x1c07   : > { %9538 = vmatprep.mubr.msk.bf16.mxu0 %vm10413_vm0, %v10412_v0 }
0x1cd9   : > { %v5833_v15 = vpop.f32.mrb[128].mxu0 }
0x1cda   : > { %v5834_v18 = vadd.f32 %v5833_v15, %v5749_v13  ;;  %v5835_v21 = vpop.f32.mrb[129].mxu0  ;;  %v10018_v13 = vld [vmem:[%s11727_s0 + $0x8] sm:$0xff]  }
0x1cdb   : > { %v5836_v22 = vadd.f32 %v5835_v21, %v5753_v14  ;;  %v5837_v24 = vpop.f32.mrb[130].mxu0  ;;  %v10020_v14 = vld [vmem:[%s11727_s0 + $0x10] sm:$0xff]  }
0x1cdc   : > { %v5842_v25 = vmul.f32 0.70710677, %v5834_v18  ;;  %v5838_v27 = vpop.f32.mrb[131].mxu0  ;;  %v5840_v2 = vmul.f32 0.5, %v5834_v18  ;;  %v8598_v24 = vld [vmem:[%s11720_s17 + $0x1] ss:$0 sm:$0xff] }
0x1cdd   : > { %v5843_v23 = vmul.f32 0.70710677, %v5836_v22  ;;  %v5841_v5 = vmul.f32 0.5, %v5836_v22 }
0x1cde   : > { %v5844_v19 = vand.u32 2147483647, %v5842_v25  ;;  %vm5884_vm11 = vcmp.ge.f32.partialorder %v5842_v25, 0.0 }
0x1cdf   : > { %v5845_v28 = vand.u32 2147483647, %v5843_v23  ;;  %vm5885_vm13 = vcmp.ge.f32.partialorder %v5843_v23, 0.0 }
0x1ce0   : > { %v5846_v29 = vmul.f32 0.3275911, %v5844_v19  ;;  %v5872_v17 = vsub.f32 0.0, %v5844_v19 }
0x1ce1   : > { %v5847_v26 = vmul.f32 0.3275911, %v5845_v28  ;;  %v5873_v33 = vsub.f32 0.0, %v5845_v28 }
0x1ce2   : > { %v5848_v31 = vadd.f32 1.0, %v5846_v29  ;;  %v5874_v20 = vmul.f32 %v5872_v17, %v5844_v19  ;;  %v10023_v17 = vld [vmem:[%s11727_s0 + $0x30] sm:$0xff]  }
0x1ce3   : > { %v5849_v32 = vadd.f32 1.0, %v5847_v26  ;;  %v5875_v37 = vmul.f32 %v5873_v33, %v5845_v28  ;;  %v6077_v26 = vld [vmem:[%s11728_s7] sm:$0xf]  ;;  %v10024_v33 = vld [vmem:[%s11727_s0 + $0x38] sm:$0xff]  }
0x1ce4   : > { %10139 = vrcp.f32 %v5848_v31  ;;  %v5876_v36 = vmul.f32 1.442695, %v5874_v20  ;;  %v10021_v31 = vld [vmem:[%s11727_s0 + $0x28] sm:$0xff]  }
0x1ce5   : > { %10141 = vrcp.f32 %v5849_v32  ;;  %v5878_v30 = vmul.f32 1.442695, %v5875_v37  ;;  %v10022_v32 = vld [vmem:[%s11727_s0 + $0x18] sm:$0xff]  }
0x1ce6   : > { %10143 = vpow2.f32 %v5876_v36 }
0x1ce7   : > { %10145 = vpow2.f32 %v5878_v30  ;;  %v8620_v30 = vld [vmem:[%s11728_s7 + $0x8] sm:$0xf] }
0x1cee   : > { %v10140_v16 = vpop.eup %10139 }
0x1cef   : > { %v10142_v35 = vpop.eup %10141  ;;  %v5854_v9 = vmul.f32 1.0614054, %v10140_v16 }
0x1cf0   : > { %v5855_v38 = vmul.f32 1.0614054, %v10142_v35  ;;  %v10144_v55 = vpop.eup %10143 }
0x1cf1   : > { %v5856_v39 = vadd.f32 -1.4531521, %v5854_v9  ;;  %v10146_v57 = vpop.eup %10145 }
0x1cf2   : > { %v5857_v40 = vadd.f32 -1.4531521, %v5855_v38 }
0x1cf3   : > { %v5858_v41 = vmul.f32 %v10140_v16, %v5856_v39 }
0x1cf4   : > { %v5859_v34 = vmul.f32 %v10142_v35, %v5857_v40 }
0x1cf5   : > { %v5860_v42 = vadd.f32 1.4214138, %v5858_v41 }
0x1cf6   : > { %v5861_v43 = vadd.f32 1.4214138, %v5859_v34  ;;  %v8635_v34 = vld [vmem:[%s11728_s7 + $0xc] sm:$0xf] }
0x1cf7   : > { %v5862_v44 = vmul.f32 %v10140_v16, %v5860_v42  ;;  %v10025_v42 = vld [vmem:[%s11727_s0 + $0x40] sm:$0xff]  }
0x1cf8   : > { %v5863_v45 = vmul.f32 %v10142_v35, %v5861_v43  ;;  %v10026_v43 = vld [vmem:[%s11727_s0 + $0x48] sm:$0xff]  }
0x1cf9   : > { %v5864_v46 = vadd.f32 -0.28449672, %v5862_v44  ;;  %v10027_v44 = vld [vmem:[%s11727_s0 + $0x50] sm:$0xff]  }
0x1cfa   : > { %v5865_v47 = vadd.f32 -0.28449672, %v5863_v45  ;;  %v10028_v45 = vld [vmem:[%s11727_s0 + $0x60] sm:$0xff]  }
0x1cfb   : > { %v5866_v49 = vmul.f32 %v10140_v16, %v5864_v46  ;;  %v10029_v46 = vld [vmem:[%s11727_s0 + $0x58] sm:$0xff]  }
0x1cfc   : > { %v5867_v50 = vmul.f32 %v10142_v35, %v5865_v47  ;;  %v10030_v47 = vld [vmem:[%s11727_s0 + $0x68] sm:$0xff]  }
0x1cfd   : > { %v5868_v52 = vadd.f32 0.2548296, %v5866_v49  ;;  %v10031_v49 = vld [vmem:[%s11727_s0 + $0x70] sm:$0xff]  }
0x1cfe   : > { %v5869_v53 = vadd.f32 0.2548296, %v5867_v50  ;;  %v10032_v50 = vld [vmem:[%s11727_s0 + $0x78] sm:$0xff]  }
0x1cff   : > { %v5870_v54 = vmul.f32 %v10140_v16, %v5868_v52 }
0x1d00   : > { %v5871_v56 = vmul.f32 %v10142_v35, %v5869_v53 }
0x1d01   : > { %v5880_v58 = vmul.f32 %v10144_v55, %v5870_v54 }
0x1d02   : > { %v5881_v59 = vmul.f32 %v10146_v57, %v5871_v56 }
0x1d03   : > { %v5882_v60 = vsub.f32 1.0, %v5880_v58 }
0x1d04   : > { %v5883_v61 = vsub.f32 1.0, %v5881_v59 }
0x1d05   : > { %v5886_v62 = vsub.f32 0.0, %v5882_v60 }
0x1d06   : > { %v5887_v63 = vsub.f32 0.0, %v5883_v61 }
0x1d07   : > { %v5888_v1 = vsel %vm5884_vm11, %v5882_v60, %v5886_v62 }
0x1d08   : > { %v5890_v3 = vadd.f32 1.0, %v5888_v1  ;;  %v5889_v4 = vsel %vm5885_vm13, %v5883_v61, %v5887_v63 }
0x1d09   : > { %v5891_v6 = vadd.f32 1.0, %v5889_v4  ;;  %v8650_v4 = vld [vmem:[%s11728_s7 + $0x10] sm:$0xf] }
0x1d0a   : > { %v5892_v7 = vmul.f32 %v5890_v3, %v5840_v2 }
0x1d0b   : > { %v5893_v8 = vmul.f32 %v5891_v6, %v5841_v5  ;;  %v10033_v5 = vld [vmem:[%s11727_s0 + $0x80] sm:$0xff]  }
0x1d0c   : > { %v5894_v11 = vpack.c.bf16 %v5892_v7, %v5892_v7 }
0x1d0d   : > { %v5895_v10 = vpack.c.bf16 %v5893_v8, %v5893_v8 }
0x1d0f   : > { %6057 = vmatprep.mubr.bf16.mxu1 %v5895_v10 }
0x1d10   : > { %6058 = vmatmul.mubr.bf16.vlgmr.msra.gmra.mrb[128].mxu1 %v5894_v11  ;;  %v10034_v11 = vld [vmem:[%s11727_s0 + $0x88] sm:$0xff]  }
0x1d11   : > { %9568 = vmatprep.mubr.msk.bf16.mxu1 %vm10413_vm0, %v10412_v0  ;;  %9561 = vmatpush3.bf16.msra.mxu1 %v10017_v12  ;;  %v10035_v12 = vld [vmem:[%s11727_s0 + $0x90] sm:$0xff]  }
0x1d12   : > { %9562 = vmatprep.subr.bf16.mxu1 %v10412_v0 }
0x1d15   : > { %9563 = vmatpush3.bf16.msra.mxu1 %v10018_v13  ;;  %v10036_v13 = vld [vmem:[%s11727_s0 + $0x98] sm:$0xff]  }
0x1d16   : > { %9564 = vmatprep.subr.bf16.mxu1 %v10412_v0 }
0x1d19   : > { %9565 = vmatpush3.bf16.msra.mxu1 %v10020_v14 }
0x1d1a   : > { %9566 = vmatprep.subr.bf16.mxu1 %v10412_v0 }
0x1d1d   : > { %9567 = vmatpush3.bf16.msra.mxu1 %v10022_v32  ;;  %v8665_v32 = vld [vmem:[#allocation8] ss:$0 sm:$0xff] }
0x1d1e   : > { %9578 = vmatprep.subr.bf16.mxu1 %v10412_v0 }
0x1de3   : > { %v8984_v15 = vpop.f32.mrb[128].mxu1 }
0x1de4   : > { %v8985_v18 = vpop.f32.mrb[129].mxu1 }
0x1de5   : > { %v8986_v21 = vadd.f32 %v8985_v18, %v8984_v15  ;;  %v8987_v22 = vpop.f32.mrb[130].mxu1 }
0x1de6   : > { %v8988_v25 = vpop.f32.mrb[131].mxu1 }
0x1de7   : > { %v6065_v27 = vadd.f32 %v8986_v21, %v11350_v51  ;;  %v10019_v51 = vld [vmem:[%s11727_s0 + $0x20] sm:$0xff]   ;;  %s11730_s0 = sld [smem:[#allocation54_spill]] }
0x1de9   : > { %v6074_v23 = vadd.f32 %v8598_v24, %v6065_v27 }
0x1deb   : > { %v6075_v19 = vadd.f32 %v6074_v23, %v11028_v48  ;;  %v8600_v48 = vld [vmem:[%s11728_s7 + $0x4] sm:$0xf] }
0x1ded   : > { %v6076_v28 = vpack.c.bf16 %v6075_v19, %v6075_v19 }
0x1def   : > { %v11404_v29 = vsel %vm1603_vm2, %v6076_v28, 0 }
0x1df0   : > { %9537 = vmatpush3.bf16.msra.mxu0 %v11404_v29 }
0x1df1   : > { %9542 = vmatprep.subr.bf16.mxu0 %v10412_v0 }
0x1df3   : > { %9539 = vmatmul.mubr.msk.bf16.vlgmr.msra.gmra.mrb[132].mxu0 %vm1599_vm3, %v6077_v26 }
0x1df4   : > { %9543 = vmatpush3.bf16.msra.mxu0 %v11404_v29  ;;  %9544 = vmatprep.mubr.msk.bf16.mxu0 %vm10413_vm0, %v10412_v0 }
0x1df5   : > { %9548 = vmatprep.subr.bf16.mxu0 %v10412_v0 }
0x1dfb   : > { %9545 = vmatmul.mubr.msk.bf16.vlgmr.msra.gmra.mrb[136].mxu0 %vm1599_vm3, %v8600_v48 }
0x1dfc   : > { %9549 = vmatpush3.bf16.msra.mxu0 %v10019_v51  ;;  %9556 = vmatprep.mubr.msk.bf16.mxu0 %vm10413_vm0, %v10412_v0 }
0x1dfd   : > { %9550 = vmatprep.subr.bf16.mxu0 %v10412_v0 }
0x1e00   : > { %9551 = vmatpush3.bf16.msra.mxu0 %v10021_v31 }
0x1e01   : > { %9552 = vmatprep.subr.bf16.mxu0 %v10412_v0 }
0x1e04   : > { %9553 = vmatpush3.bf16.msra.mxu0 %v10023_v17 }
0x1e05   : > { %9554 = vmatprep.subr.bf16.mxu0 %v10412_v0 }
0x1e08   : > { %9555 = vmatpush3.bf16.msra.mxu0 %v10024_v33 }
0x1e09   : > { %9572 = vmatprep.subr.bf16.mxu0 %v10412_v0 }
0x1ec6   : > { %v6118_v16 = vpop.f32.mrb[132].mxu0 }
0x1ec7   : > { %v6124_v20 = vpack.c.bf16 %v6118_v16, %v6118_v16  ;;  %v9540_v35 = vpop.f32.mrb[133].mxu0 }
0x1ec8   : > { %v6121_v9 = vpop.f32.mrb[134].mxu0 }
0x1ec9   : > { %v9541_v37 = vpop.f32.mrb[135].mxu0  ;;  %9569 = vmatmul.mubr.msk.bf16.vlgmr.msra.gmra.mrb[132].mxu1 %vm3576_vm12, %v6124_v20 }
0x1eca   : > { %9586 = vmatprep.mubr.msk.bf16.mxu1 %vm10413_vm0, %v10412_v0  ;;  %9579 = vmatpush3.bf16.msra.mxu1 %v10025_v42 }
0x1ecb   : > { %9580 = vmatprep.subr.bf16.mxu1 %v10412_v0 }
0x1ece   : > { %v6172_v38 = vpop.f32.mrb[136].mxu0  ;;  %9581 = vmatpush3.bf16.msra.mxu1 %v10026_v43 }
0x1ecf   : > { %v6178_v39 = vpack.c.bf16 %v6172_v38, %v6172_v38  ;;  %v9546_v36 = vpop.f32.mrb[137].mxu0  ;;  %9582 = vmatprep.subr.bf16.mxu1 %v10412_v0 }
0x1ed0   : > { %v6175_v40 = vpop.f32.mrb[138].mxu0 }
0x1ed1   : > { %v9547_v41 = vpop.f32.mrb[139].mxu0  ;;  %9557 = vmatmul.mubr.msk.bf16.vlgmr.msra.gmra.mrb[140].mxu0 %vm3576_vm12, %v6178_v39 }
0x1ed2   : > { %9573 = vmatpush3.bf16.msra.mxu0 %v11404_v29  ;;  %9574 = vmatprep.mubr.msk.bf16.mxu0 %vm10413_vm0, %v10412_v0 }
0x1ed3   : > { %9590 = vmatprep.subr.bf16.mxu0 %v10412_v0  ;;  %9583 = vmatpush3.bf16.msra.mxu1 %v10027_v44 }
0x1ed4   : > { %9584 = vmatprep.subr.bf16.mxu1 %v10412_v0 }
0x1ed7   : > { %9585 = vmatpush3.bf16.msra.mxu1 %v10029_v46 }
0x1ed8   : > { %9608 = vmatprep.subr.bf16.mxu1 %v10412_v0 }
0x1ed9   : > { %9575 = vmatmul.mubr.msk.bf16.vlgmr.msra.gmra.mrb[144].mxu0 %vm1599_vm3, %v8620_v30 }
0x1eda   : > { %9591 = vmatpush3.bf16.msra.mxu0 %v11404_v29  ;;  %9592 = vmatprep.mubr.msk.bf16.mxu0 %vm10413_vm0, %v10412_v0 }
0x1edb   : > { %9596 = vmatprep.subr.bf16.mxu0 %v10412_v0 }
0x1ee1   : > { %9593 = vmatmul.mubr.msk.bf16.vlgmr.msra.gmra.mrb[148].mxu0 %vm1599_vm3, %v8635_v34 }
0x1ee2   : > { %9604 = vmatprep.mubr.msk.bf16.mxu0 %vm10413_vm0, %v10412_v0  ;;  %9597 = vmatpush3.bf16.msra.mxu0 %v10028_v45 }
0x1ee3   : > { %9598 = vmatprep.subr.bf16.mxu0 %v10412_v0 }
0x1ee6   : > { %9599 = vmatpush3.bf16.msra.mxu0 %v10030_v47 }
0x1ee7   : > { %9600 = vmatprep.subr.bf16.mxu0 %v10412_v0 }
0x1eea   : > { %9601 = vmatpush3.bf16.msra.mxu0 %v10031_v49 }
0x1eeb   : > { %9602 = vmatprep.subr.bf16.mxu0 %v10412_v0 }
0x1eee   : > { %9603 = vmatpush3.bf16.msra.mxu0 %v10032_v50 }
0x1eef   : > { %9626 = vmatprep.subr.bf16.mxu0 %v10412_v0 }
0x1f9c   : > { %v6316_v52 = vpop.f32.mrb[132].mxu1 }
0x1f9d   : > { %v9570_v53 = vpop.f32.mrb[133].mxu1 }
0x1f9e   : > { %v6319_v54 = vpop.f32.mrb[134].mxu1 }
0x1f9f   : > { %v9571_v55 = vpop.f32.mrb[135].mxu1 }
0x1fa4   : > { %v6249_v56 = vpop.f32.mrb[140].mxu0 }
0x1fa5   : > { %v6317_v57 = vadd.f32 %v6316_v52, %v6249_v56  ;;  %v9558_v58 = vpop.f32.mrb[141].mxu0 }
0x1fa6   : > { %v6252_v59 = vpop.f32.mrb[142].mxu0 }
0x1fa7   : > { %v9559_v60 = vpop.f32.mrb[143].mxu0 }
0x1fac   : > { %v6361_v61 = vpop.f32.mrb[144].mxu0 }
0x1fad   : > { %v6367_v62 = vpack.c.bf16 %v6361_v61, %v6361_v61  ;;  %v9576_v63 = vpop.f32.mrb[145].mxu0 }
0x1fae   : > { %v6364_v1 = vpop.f32.mrb[146].mxu0  ;;  %v10038_v63 = vld [vmem:[%s11729_s10 + $0x8] sm:$0xff]  }
0x1faf   : > { %v9577_v2 = vpop.f32.mrb[147].mxu0  ;;  %9587 = vmatmul.mubr.msk.bf16.vlgmr.msra.gmra.mrb[136].mxu1 %vm3576_vm12, %v6367_v62  ;;  %v10037_v62 = vld [vmem:[%s11729_s10] sm:$0xff]  }
0x1fb0   : > { %9609 = vmatpush3.bf16.msra.mxu1 %v11404_v29  ;;  %9610 = vmatprep.mubr.msk.bf16.mxu1 %vm10413_vm0, %v10412_v0  ;;  %v10039_v1 = vld [vmem:[%s11730_s0] sm:$0xff]   ;;  %v10040_v2 = vld [vmem:[%s11730_s0 + $0x8] sm:$0xff]  }
0x1fb1   : > { %9614 = vmatprep.subr.bf16.mxu1 %v10412_v0 }
0x1fb4   : > { %v6484_v3 = vpop.f32.mrb[148].mxu0 }
0x1fb5   : > { %v6490_v6 = vpack.c.bf16 %v6484_v3, %v6484_v3  ;;  %v9594_v7 = vpop.f32.mrb[149].mxu0  ;;  %v10041_v3 = vld [vmem:[%s11730_s0 + $0x10] sm:$0xff]  }
0x1fb6   : > { %v6487_v8 = vpop.f32.mrb[150].mxu0 }
0x1fb7   : > { %9605 = vmatmul.mubr.msk.bf16.vlgmr.msra.gmra.mrb[152].mxu0 %vm3576_vm12, %v6490_v6  ;;  %9611 = vmatmul.mubr.msk.bf16.vlgmr.msra.gmra.mrb[140].mxu1 %vm1599_vm3, %v8650_v4  ;;  %v9595_v10 = vpop.f32.mrb[151].mxu0  ;;  %v10042_v4 = vld [vmem:[%s11730_s0 + $0x18] sm:$0xff]  }
0x1fb8   : > { %9615 = vmatpush3.bf16.msra.mxu1 %v10033_v5  ;;  %9622 = vmatprep.mubr.msk.bf16.mxu1 %vm10413_vm0, %v10412_v0 }
0x1fb9   : > { %9616 = vmatprep.subr.bf16.mxu1 %v10412_v0  ;;  %9628 = vmatprep.mubr.msk.bf16.mxu0 %vm10413_vm0, %v10412_v0 }
0x1fbc   : > { %9617 = vmatpush3.bf16.msra.mxu1 %v10034_v11 }
0x1fbd   : > { %9618 = vmatprep.subr.bf16.mxu1 %v10412_v0 }
0x1fc0   : > { %9619 = vmatpush3.bf16.msra.mxu1 %v10035_v12 }
0x1fc1   : > { %9620 = vmatprep.subr.bf16.mxu1 %v10412_v0 }
0x1fc4   : > { %9621 = vmatpush3.bf16.msra.mxu1 %v10036_v13 }
0x1fc5   : > { %9638 = vmatprep.subr.bf16.mxu1 %v10412_v0 }
0x2082   : > { %v6438_v14 = vpop.f32.mrb[136].mxu1 }
0x2083   : > { %v6444_v15 = vadd.f32 %v6438_v14, %v6317_v57  ;;  %v9588_v18 = vpop.f32.mrb[137].mxu1 }
0x2084   : > { %v6441_v21 = vpop.f32.mrb[138].mxu1  ;;  %v10043_v18 = vld [vmem:[%s11729_s10 + $0x10] sm:$0xff]  }
0x2085   : > { %v9589_v22 = vpop.f32.mrb[139].mxu1  ;;  %v10044_v21 = vld [vmem:[%s11729_s10 + $0x18] sm:$0xff]  }
0x2086   : > { %v10045_v22 = vld [vmem:[%s11729_s10 + $0x20] sm:$0xff]  }
0x208a   : > { %v6561_v24 = vpop.f32.mrb[152].mxu0  ;;  %v6607_v25 = vpop.f32.mrb[140].mxu1 }
0x208b   : > { %v6567_v27 = vadd.f32 %v6561_v24, %v6444_v15  ;;  %v6613_v23 = vpack.c.bf16 %v6607_v25, %v6607_v25  ;;  %v9612_v19 = vpop.f32.mrb[141].mxu1  ;;  %v9606_v28 = vpop.f32.mrb[153].mxu0  ;;  %v10046_v24 = vld [vmem:[%s11730_s0 + $0x20] sm:$0xff]   ;;  %v10047_v25 = vld [vmem:[%s11730_s0 + $0x28] sm:$0xff]  }
0x208c   : > { %v6610_v29 = vpop.f32.mrb[142].mxu1  ;;  %v6564_v26 = vpop.f32.mrb[154].mxu0 }
0x208d   : > { %v9613_v48 = vpop.f32.mrb[143].mxu1  ;;  %9623 = vmatmul.mubr.msk.bf16.vlgmr.msra.gmra.mrb[144].mxu1 %vm3576_vm12, %v6613_v23  ;;  %v9607_v51 = vpop.f32.mrb[155].mxu0 }
0x208e   : > { %9642 = vmatprep.mubr.msk.bf16.mxu1 %vm10413_vm0, %v10412_v0  ;;  %9639 = vmatpush3.bf16.msra.mxu1 %v10041_v3 }
0x208f   : > { %9640 = vmatprep.subr.bf16.mxu1 %v10412_v0 }
0x2092   : > { %9641 = vmatpush3.bf16.msra.mxu1 %v10042_v4 }
0x2093   : > { %9654 = vmatprep.subr.bf16.mxu1 %v10412_v0 }
0x2160   : > { %v6684_v31 = vpop.f32.mrb[144].mxu1 }
0x2161   : > { %v6690_v17 = vadd.f32 %v6684_v31, %v6567_v27  ;;  %v9624_v33 = vpop.f32.mrb[145].mxu1 }
0x2162   : > { %v6687_v16 = vpop.f32.mrb[146].mxu1 }
0x2163   : > { %v6698_v20 = vadd.f32 %v8665_v32, %v6690_v17  ;;  %v9625_v35 = vpop.f32.mrb[147].mxu1 }
0x2165   : > { %v6700_v9 = vmul.f32 0.70710677, %v6698_v20  ;;  %v6699_v57 = vmul.f32 0.5, %v6698_v20  ;;  %v10048_v20 = vld [vmem:[%s11730_s0 + $0x30] sm:$0xff]  }
0x2167   : > { %v6701_v37 = vand.u32 2147483647, %v6700_v9  ;;  %vm6721_vm2 = vcmp.ge.f32.partialorder %v6700_v9, 0.0 }
0x2169   : > { %v6702_v38 = vmul.f32 0.3275911, %v6701_v37  ;;  %v6715_v36 = vsub.f32 0.0, %v6701_v37 }
0x216b   : > { %v6703_v39 = vadd.f32 1.0, %v6702_v38  ;;  %v6716_v41 = vmul.f32 %v6715_v36, %v6701_v37  ;;  %v10049_v37 = vld [vmem:[%s11730_s0 + $0x38] sm:$0xff]  }
0x216d   : > { %10147 = vrcp.f32 %v6703_v39  ;;  %v6717_v42 = vmul.f32 1.442695, %v6716_v41 }
0x216f   : > { %10149 = vpow2.f32 %v6717_v42 }
0x2177   : > { %v10148_v40 = vpop.eup %10147 }
0x2178   : > { %v6706_v30 = vmul.f32 1.0614054, %v10148_v40 }
0x2179   : > { %v10150_v52 = vpop.eup %10149 }
0x217a   : > { %v6707_v34 = vadd.f32 -1.4531521, %v6706_v30 }
0x217c   : > { %v6708_v43 = vmul.f32 %v10148_v40, %v6707_v34  ;;  %v10051_v34 = vld [vmem:[%s11730_s0 + $0x48] sm:$0xff]  }
0x217e   : > { %v6709_v44 = vadd.f32 1.4214138, %v6708_v43 }
0x2180   : > { %v6710_v45 = vmul.f32 %v10148_v40, %v6709_v44 }
0x2182   : > { %v6711_v46 = vadd.f32 -0.28449672, %v6710_v45 }
0x2184   : > { %v6712_v47 = vmul.f32 %v10148_v40, %v6711_v46 }
0x2186   : > { %v6713_v49 = vadd.f32 0.2548296, %v6712_v47  ;;  %v10052_v47 = vld [vmem:[%s10649_s24 + $0x10] sm:$0xff]  }
0x2188   : > { %v6714_v50 = vmul.f32 %v10148_v40, %v6713_v49  ;;  %v10050_v40 = vld [vmem:[%s11730_s0 + $0x40] sm:$0xff]   ;;  %s11731_s0 = sshll.u32 %s11733_s28, 5 }
0x2189   : > { %v10056_v49 = vld [vmem:[%s10649_s24] sm:$0xff]   ;;  %s1482_s1 = scalar_lea.vmem %s10664_s8, %s11731_s0 }
0x218a   : > { %v6719_v53 = vmul.f32 %v10150_v52, %v6714_v50 }
0x218c   : > { %v6720_v54 = vsub.f32 1.0, %v6719_v53 }
0x218e   : > { %v6722_v55 = vsub.f32 0.0, %v6720_v54 }
0x2190   : > { %v6723_v56 = vsel %vm6721_vm2, %v6720_v54, %v6722_v55 }
0x2191   : > { %v6724_v58 = vadd.f32 1.0, %v6723_v56 }
0x2193   : > { %v6725_v59 = vmul.f32 %v6724_v58, %v6699_v57 }
0x2195   : > { %v6726_v60 = vpack.c.bf16 %v6725_v59, %v6725_v59 }
0x2197   : > { %v6738_v61 = vsel %vm2823_vm8, %v6726_v60, 0 }
0x2198   : > { %9627 = vmatpush3.bf16.msra.mxu0 %v6738_v61 }
0x2199   : > { %9632 = vmatprep.subr.bf16.mxu0 %v10412_v0 }
0x219b   : > { %9629 = vmatmul.mubr.msk.bf16.vlgmr.msra.gmra.mrb[156].mxu0 %vm2819_vm9, %v10037_v62 }
0x219c   : > { %9633 = vmatpush3.bf16.msra.mxu0 %v6738_v61  ;;  %9634 = vmatprep.mubr.msk.bf16.mxu0 %vm10413_vm0, %v10412_v0 }
0x219d   : > { %9646 = vmatprep.subr.bf16.mxu0 %v10412_v0 }
0x21a3   : > { %9635 = vmatmul.mubr.msk.bf16.vlgmr.msra.gmra.mrb[160].mxu0 %vm2819_vm9, %v10038_v63  ;;  %v8715_v63 = vld [vmem:[#allocation10] ss:$0 sm:$0xff] }
0x21a4   : > { %9647 = vmatpush3.bf16.msra.mxu0 %v10039_v1  ;;  %9650 = vmatprep.mubr.msk.bf16.mxu0 %vm10413_vm0, %v10412_v0 }
0x21a5   : > { %9648 = vmatprep.subr.bf16.mxu0 %v10412_v0 }
0x21a8   : > { %9649 = vmatpush3.bf16.msra.mxu0 %v10040_v2 }
0x21a9   : > { %9660 = vmatprep.subr.bf16.mxu0 %v10412_v0 }
0x226e   : > { %v6774_v5 = vpop.f32.mrb[156].mxu0 }
0x226f   : > { %v9630_v6 = vpop.f32.mrb[157].mxu0 }
0x2270   : > { %v6777_v7 = vpop.f32.mrb[158].mxu0 }
0x2271   : > { %v6781_v8 = vpack.c.bf16 %v6777_v7, %v6774_v5  ;;  %v9631_v10 = vpop.f32.mrb[159].mxu0 }
0x2273   : > { %9651 = vmatmul.mubr.msk.bf16.vlgmr.msra.gmra.mrb[164].mxu0 %vm1497_vm1, %v6781_v8 }
0x2274   : > { %9664 = vmatprep.mubr.msk.bf16.mxu0 %vm10413_vm0, %v10412_v0  ;;  %9661 = vmatpush3.bf16.msra.mxu0 %v10046_v24 }
0x2275   : > { %9662 = vmatprep.subr.bf16.mxu0 %v10412_v0 }
0x2276   : > { %v6831_v11 = vpop.f32.mrb[160].mxu0 }
0x2277   : > { %v9636_v12 = vpop.f32.mrb[161].mxu0 }
0x2278   : > { %v6834_v13 = vpop.f32.mrb[162].mxu0  ;;  %9663 = vmatpush3.bf16.msra.mxu0 %v10047_v25 }
0x2279   : > { %v6838_v14 = vpack.c.bf16 %v6834_v13, %v6831_v11  ;;  %v9637_v15 = vpop.f32.mrb[163].mxu0  ;;  %9674 = vmatprep.subr.bf16.mxu0 %v10412_v0 }
0x227b   : > { %9643 = vmatmul.mubr.msk.bf16.vlgmr.msra.gmra.mrb[148].mxu1 %vm1497_vm1, %v6838_v14 }
0x227c   : > { %9655 = vmatpush3.bf16.msra.mxu1 %v6738_v61  ;;  %9656 = vmatprep.mubr.msk.bf16.mxu1 %vm10413_vm0, %v10412_v0 }
0x227d   : > { %9668 = vmatprep.subr.bf16.mxu1 %v10412_v0 }
0x2283   : > { %9657 = vmatmul.mubr.msk.bf16.vlgmr.msra.gmra.mrb[152].mxu1 %vm2819_vm9, %v10043_v18 }
0x2284   : > { %9669 = vmatpush3.bf16.msra.mxu1 %v6738_v61  ;;  %9670 = vmatprep.mubr.msk.bf16.mxu1 %vm10413_vm0, %v10412_v0 }
0x2285   : > { %9682 = vmatprep.subr.bf16.mxu1 %v10412_v0 }
0x228b   : > { %9671 = vmatmul.mubr.msk.bf16.vlgmr.msra.gmra.mrb[156].mxu1 %vm2819_vm9, %v10044_v21 }
0x228c   : > { %9683 = vmatpush3.bf16.msra.mxu1 %v6738_v61  ;;  %9684 = vmatprep.mubr.msk.bf16.mxu1 %vm10413_vm0, %v10412_v0 }
0x2293   : > { %9685 = vmatmul.mubr.msk.bf16.vlgmr.msra.gmra.mrb[160].mxu1 %vm2819_vm9, %v10045_v22 }
0x2294   : > { %9698 = vmatprep.mubr.msk.bf16.mxu1 %vm2185_vm6, %v10056_v49 }
0x2346   : > { %v6949_v27 = vpop.f32.mrb[164].mxu0 }
0x2347   : > { %v9652_v23 = vpop.f32.mrb[165].mxu0 }
0x2348   : > { %v6952_v19 = vpop.f32.mrb[166].mxu0 }
0x2349   : > { %v9653_v28 = vpop.f32.mrb[167].mxu0 }
0x234e   : > { %v6893_v29 = vpop.f32.mrb[148].mxu1 }
0x234f   : > { %v6950_v26 = vadd.f32 %v6949_v27, %v6893_v29  ;;  %v9644_v48 = vpop.f32.mrb[149].mxu1 }
0x2350   : > { %v6896_v51 = vpop.f32.mrb[150].mxu1 }
0x2351   : > { %v6953_v31 = vadd.f32 %v6952_v19, %v6896_v51  ;;  %v9645_v32 = vpop.f32.mrb[151].mxu1 }
0x2356   : > { %v7001_v17 = vpop.f32.mrb[152].mxu1 }
0x2357   : > { %v9658_v33 = vpop.f32.mrb[153].mxu1 }
0x2358   : > { %v7004_v16 = vpop.f32.mrb[154].mxu1 }
0x2359   : > { %v7008_v35 = vpack.c.bf16 %v7004_v16, %v7001_v17  ;;  %v9659_v9 = vpop.f32.mrb[155].mxu1 }
0x235b   : > { %9665 = vmatmul.mubr.msk.bf16.vlgmr.msra.gmra.mrb[168].mxu0 %vm1497_vm1, %v7008_v35 }
0x235c   : > { %9675 = vmatpush3.bf16.msra.mxu0 %v10048_v20  ;;  %9678 = vmatprep.mubr.msk.bf16.mxu0 %vm10413_vm0, %v10412_v0 }
0x235d   : > { %9676 = vmatprep.subr.bf16.mxu0 %v10412_v0 }
0x235e   : > { %v7117_v38 = vpop.f32.mrb[156].mxu1 }
0x235f   : > { %v9672_v39 = vpop.f32.mrb[157].mxu1 }
0x2360   : > { %v7120_v36 = vpop.f32.mrb[158].mxu1  ;;  %9677 = vmatpush3.bf16.msra.mxu0 %v10049_v37 }
0x2361   : > { %v7124_v41 = vpack.c.bf16 %v7120_v36, %v7117_v38  ;;  %v9673_v30 = vpop.f32.mrb[159].mxu1  ;;  %9688 = vmatprep.subr.bf16.mxu0 %v10412_v0 }
0x2363   : > { %9679 = vmatmul.mubr.msk.bf16.vlgmr.msra.gmra.mrb[172].mxu0 %vm1497_vm1, %v7124_v41 }
0x2364   : > { %9689 = vmatpush3.bf16.msra.mxu0 %v10050_v40  ;;  %9692 = vmatprep.mubr.msk.bf16.mxu0 %vm10413_vm0, %v10412_v0 }
0x2365   : > { %9690 = vmatprep.subr.bf16.mxu0 %v10412_v0 }
0x2366   : > { %v7233_v42 = vpop.f32.mrb[160].mxu1 }
0x2367   : > { %v9686_v43 = vpop.f32.mrb[161].mxu1 }
0x2368   : > { %v7236_v44 = vpop.f32.mrb[162].mxu1  ;;  %9691 = vmatpush3.bf16.msra.mxu0 %v10051_v34 }
0x2369   : > { %v7240_v45 = vpack.c.bf16 %v7236_v44, %v7233_v42  ;;  %v9687_v46 = vpop.f32.mrb[163].mxu1 }
0x236b   : > { %9693 = vmatmul.mubr.msk.bf16.vlgmr.msra.gmra.mrb[176].mxu0 %vm1497_vm1, %v7240_v45 }
0x236c   : > { %9704 = vmatprep.mubr.msk.bf16.mxu0 %vm2185_vm6, %v10052_v47 }
0x242e   : > { %v7063_v50 = vpop.f32.mrb[168].mxu0 }
0x242f   : > { %v7070_v52 = vadd.f32 %v7063_v50, %v6950_v26  ;;  %v9666_v53 = vpop.f32.mrb[169].mxu0 }
0x2430   : > { %v7066_v54 = vpop.f32.mrb[170].mxu0 }
0x2431   : > { %v7071_v55 = vadd.f32 %v7066_v54, %v6953_v31  ;;  %v9667_v0 = vpop.f32.mrb[171].mxu0 }
0x2436   : > { %v7179_v56 = vpop.f32.mrb[172].mxu0 }
0x2437   : > { %v7186_v57 = vadd.f32 %v7179_v56, %v7070_v52  ;;  %v9680_v58 = vpop.f32.mrb[173].mxu0 }
0x2438   : > { %v7182_v59 = vpop.f32.mrb[174].mxu0  ;;  %v10053_v58 = vld [vmem:[%s10649_s24 + $0x18] sm:$0xff]  }
0x2439   : > { %v7187_v60 = vadd.f32 %v7182_v59, %v7071_v55  ;;  %v9681_v61 = vpop.f32.mrb[175].mxu0  ;;  %v10057_v59 = vld [vmem:[%s10649_s24 + $0x8] sm:$0xff]  }
0x243a   : > { %v10055_v61 = vld [vmem:[%s10649_s24 + $0x28] sm:$0xff]  }
0x243e   : > { %v7295_v62 = vpop.f32.mrb[176].mxu0 }
0x243f   : > { %v7302_v1 = vadd.f32 %v7295_v62, %v7186_v57  ;;  %v9694_v2 = vpop.f32.mrb[177].mxu0  ;;  %v10058_v62 = vld [vmem:[%s10649_s24 + $0x30] sm:$0xff]  }
0x2440   : > { %v7298_v3 = vpop.f32.mrb[178].mxu0  ;;  %v10061_v2 = vld [vmem:[%s10649_s24 + $0x48] sm:$0xff]  }
0x2441   : > { %v7311_v4 = vadd.f32 %v8715_v63, %v7302_v1  ;;  %v7303_v5 = vadd.f32 %v7298_v3, %v7187_v60  ;;  %v9695_v6 = vpop.f32.mrb[179].mxu0  ;;  %v10054_v60 = vld [vmem:[%s10649_s24 + $0x20] sm:$0xff]   ;;  %v10062_v3 = vld [vmem:[%s10654_s4 + $0x8] sm:$0xff]  }
0x2442   : > { %v10060_v1 = vld [vmem:[%s10649_s24 + $0x40] sm:$0xff]  }
0x2443   : > { %v7315_v7 = vmul.f32 0.70710677, %v7311_v4  ;;  %v7312_v8 = vadd.f32 %v8715_v63, %v7303_v5  ;;  %v7313_v53 = vmul.f32 0.5, %v7311_v4  ;;  %v10059_v63 = vld [vmem:[%s10649_s24 + $0x38] sm:$0xff]   ;;  %v10063_v4 = vld [vmem:[%s10654_s4] sm:$0xff]  }
0x2445   : > { %v7317_v10 = vand.u32 2147483647, %v7315_v7  ;;  %v7316_v11 = vmul.f32 0.70710677, %v7312_v8  ;;  %vm7357_vm0 = vcmp.ge.f32.partialorder %v7315_v7, 0.0  ;;  %v7314_v54 = vmul.f32 0.5, %v7312_v8 }
0x2447   : > { %v7319_v12 = vmul.f32 0.3275911, %v7317_v10  ;;  %v7318_v13 = vand.u32 2147483647, %v7316_v11  ;;  %v7345_v21 = vsub.f32 0.0, %v7317_v10  ;;  %vm7358_vm1 = vcmp.ge.f32.partialorder %v7316_v11, 0.0 }
0x2449   : > { %v7321_v14 = vadd.f32 1.0, %v7319_v12  ;;  %v7320_v15 = vmul.f32 0.3275911, %v7318_v13  ;;  %v7346_v22 = vsub.f32 0.0, %v7318_v13  ;;  %v7347_v25 = vmul.f32 %v7345_v21, %v7317_v10 }
0x244b   : > { %10151 = vrcp.f32 %v7321_v14  ;;  %v7322_v18 = vadd.f32 1.0, %v7320_v15  ;;  %v7348_v28 = vmul.f32 %v7346_v22, %v7318_v13  ;;  %v7349_v29 = vmul.f32 1.442695, %v7347_v25  ;;  %v10064_v22 = vld [vmem:[%s10654_s4 + $0x10] sm:$0xff]  }
0x244d   : > { %10153 = vrcp.f32 %v7322_v18  ;;  %v7351_v32 = vmul.f32 1.442695, %v7348_v28 }
0x244e   : > { %10155 = vpow2.f32 %v7349_v29 }
0x244f   : > { %10157 = vpow2.f32 %v7351_v32 }
0x2455   : > { %v10152_v24 = vpop.eup %10151 }
0x2456   : > { %v7327_v27 = vmul.f32 1.0614054, %v10152_v24 }
0x2457   : > { %v10154_v23 = vpop.eup %10153 }
0x2458   : > { %v7329_v19 = vadd.f32 -1.4531521, %v7327_v27  ;;  %v7328_v26 = vmul.f32 1.0614054, %v10154_v23  ;;  %v10156_v40 = vpop.eup %10155 }
0x2459   : > { %v10158_v42 = vpop.eup %10157 }
0x245a   : > { %v7331_v48 = vmul.f32 %v10152_v24, %v7329_v19  ;;  %v7330_v51 = vadd.f32 -1.4531521, %v7328_v26  ;;  %v10065_v26 = vld [vmem:[%s10654_s4 + $0x18] sm:$0xff]  }
0x245c   : > { %v7333_v31 = vadd.f32 1.4214138, %v7331_v48  ;;  %v7332_v17 = vmul.f32 %v10154_v23, %v7330_v51 }
0x245e   : > { %v7335_v33 = vmul.f32 %v10152_v24, %v7333_v31  ;;  %v7334_v16 = vadd.f32 1.4214138, %v7332_v17 }
0x2460   : > { %v7337_v20 = vadd.f32 -0.28449672, %v7335_v33  ;;  %v7336_v35 = vmul.f32 %v10154_v23, %v7334_v16 }
0x2462   : > { %v7339_v9 = vmul.f32 %v10152_v24, %v7337_v20  ;;  %v7338_v37 = vadd.f32 -0.28449672, %v7336_v35 }
0x2464   : > { %v7341_v38 = vadd.f32 0.2548296, %v7339_v9  ;;  %v7340_v39 = vmul.f32 %v10154_v23, %v7338_v37 }
0x2466   : > { %v7343_v36 = vmul.f32 %v10152_v24, %v7341_v38  ;;  %v7342_v41 = vadd.f32 0.2548296, %v7340_v39  ;;  %v10066_v38 = vld [vmem:[%s10654_s4 + $0x20] sm:$0xff]   ;;  %v8775_v39 = vld [vmem:[#allocation11] ss:$0 sm:$0xff] }
0x2468   : > { %v7353_v30 = vmul.f32 %v10156_v40, %v7343_v36  ;;  %v7344_v34 = vmul.f32 %v10154_v23, %v7342_v41 }
0x246a   : > { %v7355_v43 = vsub.f32 1.0, %v7353_v30  ;;  %v7354_v44 = vmul.f32 %v10158_v42, %v7344_v34 }
0x246c   : > { %v7359_v45 = vsub.f32 0.0, %v7355_v43  ;;  %v7356_v46 = vsub.f32 1.0, %v7354_v44 }
0x246e   : > { %v7361_v47 = vsel %vm7357_vm0, %v7355_v43, %v7359_v45  ;;  %v7360_v49 = vsub.f32 0.0, %v7356_v46 }
0x246f   : > { %v7363_v50 = vadd.f32 1.0, %v7361_v47 }
0x2470   : > { %v7362_v52 = vsel %vm7358_vm1, %v7356_v46, %v7360_v49 }
0x2471   : > { %v7364_v55 = vadd.f32 1.0, %v7362_v52  ;;  %v7365_v0 = vmul.f32 %v7363_v50, %v7313_v53 }
0x2473   : > { %v7366_v56 = vmul.f32 %v7364_v55, %v7314_v54 }
0x2475   : > { %v7367_v57 = vpack.c.bf16 %v7366_v56, %v7365_v0 }
0x2477   : > { %9696 = vmatprep.subr.bf16.mxu1 %v7367_v57  ;;  %9702 = vmatprep.subr.bf16.mxu0 %v7367_v57 }
0x2478   : > { %9697 = vmatpush3.bf16.msra.mxu1 %v7367_v57  ;;  %9703 = vmatpush3.bf16.msra.mxu0 %v7367_v57 }
0x2479   : > { %9720 = vmatprep.subr.bf16.mxu0 %v7367_v57  ;;  %9708 = vmatprep.subr.bf16.mxu1 %v10062_v3 }
0x247b   : > { %9705 = vmatmul.mubr.msk.bf16.vlgmr.msra.gmra.mrb[180].mxu0 %vm2185_vm6, %v10053_v58  ;;  %9699 = vmatmul.mubr.msk.bf16.vlgmr.msra.gmra.mrb[164].mxu1 %vm2185_vm6, %v10057_v59 }
0x247c   : > { %9721 = vmatpush3.bf16.msra.mxu0 %v7367_v57  ;;  %9722 = vmatprep.mubr.msk.bf16.mxu0 %vm2185_vm6, %v10054_v60 }
0x247d   : > { %9732 = vmatprep.subr.bf16.mxu0 %v7367_v57  ;;  %9709 = vmatpush3.bf16.msra.mxu1 %v10062_v3 }
0x247e   : > { %9714 = vmatprep.subr.bf16.mxu1 %v10063_v4 }
0x2483   : > { %9723 = vmatmul.mubr.msk.bf16.vlgmr.msra.gmra.mrb[184].mxu0 %vm2185_vm6, %v10055_v61 }
0x2484   : > { %9733 = vmatpush3.bf16.msra.mxu0 %v7367_v57  ;;  %9734 = vmatprep.mubr.msk.bf16.mxu0 %vm2185_vm6, %v10058_v62 }
0x2485   : > { %9744 = vmatprep.subr.bf16.mxu0 %v7367_v57 }
0x248b   : > { %9735 = vmatmul.mubr.msk.bf16.vlgmr.msra.gmra.mrb[188].mxu0 %vm2185_vm6, %v10059_v63 }
0x248c   : > { %9745 = vmatpush3.bf16.msra.mxu0 %v7367_v57  ;;  %9746 = vmatprep.mubr.msk.bf16.mxu0 %vm2185_vm6, %v10060_v1 }
0x2493   : > { %9747 = vmatmul.mubr.msk.bf16.vlgmr.msra.gmra.mrb[192].mxu0 %vm2185_vm6, %v10061_v2 }
0x254e   : > { %v9706_v5 = vpop.f32.mrb[180].mxu0  ;;  %v9700_v6 = vpop.f32.mrb[164].mxu1 }
0x254f   : > { %v7496_v7 = vpop.f32.mrb[181].mxu0  ;;  %v7422_v8 = vpop.f32.mrb[165].mxu1 }
0x2550   : > { %v9707_v10 = vpop.f32.mrb[182].mxu0  ;;  %v9701_v11 = vpop.f32.mrb[166].mxu1 }
0x2551   : > { %v7512_v12 = vpack.c.bf16 %v9707_v10, %v9706_v5  ;;  %v7499_v13 = vpop.f32.mrb[183].mxu0  ;;  %v7438_v14 = vpack.c.bf16 %v9701_v11, %v9700_v6  ;;  %v7425_v15 = vpop.f32.mrb[167].mxu1 }
0x2552   : > { %v7511_v18 = vpack.c.bf16 %v7499_v13, %v7496_v7  ;;  %v7437_v21 = vpack.c.bf16 %v7425_v15, %v7422_v8 }
0x2554   : > { %9710 = vmatprep.mubr.msk.bf16.mxu1 %vm2185_vm6, %v7511_v18 }
0x2555   : > { %9711 = vmatmul.mubr.msk.bf16.vlgmr.msra.gmra.mrb[168].mxu1 %vm2185_vm6, %v7512_v12 }
0x2556   : > { %9715 = vmatpush3.bf16.msra.mxu1 %v10063_v4  ;;  %9716 = vmatprep.mubr.msk.bf16.mxu1 %vm2185_vm6, %v7437_v21  ;;  %v9724_v24 = vpop.f32.mrb[184].mxu0 }
0x2557   : > { %9726 = vmatprep.subr.bf16.mxu1 %v10064_v22  ;;  %v7693_v25 = vpop.f32.mrb[185].mxu0 }
0x2558   : > { %v9725_v27 = vpop.f32.mrb[186].mxu0 }
0x2559   : > { %v7709_v23 = vpack.c.bf16 %v9725_v27, %v9724_v24  ;;  %v7696_v19 = vpop.f32.mrb[187].mxu0 }
0x255a   : > { %v7708_v28 = vpack.c.bf16 %v7696_v19, %v7693_v25 }
0x255e   : > { %v9736_v29 = vpop.f32.mrb[188].mxu0 }
0x255f   : > { %v7833_v48 = vpop.f32.mrb[189].mxu0 }
0x2560   : > { %v9737_v51 = vpop.f32.mrb[190].mxu0 }
0x2561   : > { %9717 = vmatmul.mubr.msk.bf16.vlgmr.msra.gmra.mrb[168].mxu1 %vm2185_vm6, %v7438_v14  ;;  %v7849_v31 = vpack.c.bf16 %v9737_v51, %v9736_v29  ;;  %v7836_v32 = vpop.f32.mrb[191].mxu0 }
0x2562   : > { %9727 = vmatpush3.bf16.msra.mxu1 %v10064_v22  ;;  %9728 = vmatprep.mubr.msk.bf16.mxu1 %vm2185_vm6, %v7708_v28  ;;  %v7848_v17 = vpack.c.bf16 %v7836_v32, %v7833_v48 }
0x2563   : > { %9738 = vmatprep.subr.bf16.mxu1 %v10065_v26 }
0x2566   : > { %v9748_v33 = vpop.f32.mrb[192].mxu0 }
0x2567   : > { %v7973_v16 = vpop.f32.mrb[193].mxu0 }
0x2568   : > { %v9749_v20 = vpop.f32.mrb[194].mxu0 }
0x2569   : > { %v7989_v35 = vpack.c.bf16 %v9749_v20, %v9748_v33  ;;  %v7976_v9 = vpop.f32.mrb[195].mxu0 }
0x256a   : > { %v7988_v37 = vpack.c.bf16 %v7976_v9, %v7973_v16 }
0x256d   : > { %9729 = vmatmul.mubr.msk.bf16.vlgmr.msra.gmra.mrb[168].mxu1 %vm2185_vm6, %v7709_v23 }
0x256e   : > { %9739 = vmatpush3.bf16.msra.mxu1 %v10065_v26  ;;  %9740 = vmatprep.mubr.msk.bf16.mxu1 %vm2185_vm6, %v7848_v17 }
0x256f   : > { %9750 = vmatprep.subr.bf16.mxu1 %v10066_v38 }
0x2579   : > { %9741 = vmatmul.mubr.msk.bf16.vlgmr.msra.gmra.mrb[168].mxu1 %vm2185_vm6, %v7849_v31 }
0x257a   : > { %9751 = vmatpush3.bf16.msra.mxu1 %v10066_v38  ;;  %9752 = vmatprep.mubr.msk.bf16.mxu1 %vm2185_vm6, %v7988_v37 }
0x2585   : > { %9753 = vmatmul.mubr.msk.bf16.vlgmr.msra.gmra.mrb[168].mxu1 %vm2185_vm6, %v7989_v35 }
0x2658   : > { %v9754_v36 = vpop.f32.mrb[168].mxu1 }
0x2659   : > { %v8067_v40 = vadd.f32 %v9754_v36, %v8775_v39  ;;  %v8039_v41 = vpop.f32.mrb[169].mxu1 }
0x265a   : > { %v8065_v30 = vadd.f32 %v8775_v39, %v8039_v41  ;;  %v9755_v34 = vpop.f32.mrb[170].mxu1 }
0x265b   : > { %10159 = vtanh.f32 %v8067_v40  ;;  %v8068_v42 = vadd.f32 %v9755_v34, %v8775_v39  ;;  %v8042_v43 = vpop.f32.mrb[171].mxu1 }
0x265c   : > { %10161 = vtanh.f32 %v8065_v30  ;;  %v8066_v44 = vadd.f32 %v8775_v39, %v8042_v43 }
0x265d   : > { %10163 = vtanh.f32 %v8068_v42 }
0x265e   : > { %10165 = vtanh.f32 %v8066_v44 }
0x2665   : > { %v10160_v45 = vpop.eup %10159 }
0x2666   : > { %v10162_v46 = vpop.eup %10161  ;;  %8075 = vst.msk [vmem:[%s1482_s1 + $0x10] sm:$0xff] %vm1599_vm3, %v10160_v45 }
0x2667   : > { %v10164_v47 = vpop.eup %10163  ;;  %8073 = vst.msk [vmem:[%s1482_s1] sm:$0xff] %vm1599_vm3, %v10162_v46 }
0x2668   : > { %v10166_v49 = vpop.eup %10165  ;;  %8076 = vst.msk [vmem:[%s1482_s1 + $0x18] sm:$0xff] %vm1599_vm3, %v10164_v47 }
0x2669   : > { %8074 = vst.msk [vmem:[%s1482_s1 + $0x8] sm:$0xff] %vm1599_vm3, %v10166_v49 }
0x266a PF: > { %s109_s22 = sadd.s32 1, %s10357_s22  }
0x266b   : > { %p106_p6 = scmp.ge.s32.totalorder %s109_s22, 4  }
0x266d   :  { %108 = sbr.rel (!%p106_p6) target bundleno = 102 (0x66), region = 376 }
0x2674   :  { %8098 = vsyncpa [#allocation4], 1 }
0x2675   :  { %8100 = vsyncpa [#allocation4 + $0x1], 1 }
0x2676   :  { %8101 = vsyncpa [#allocation6], 1 }
0x2677   :  { %8102 = vsyncpa [#allocation9], 1 }
0x2678   :  { %8103 = vsyncpa [#allocation12], 1 }

</bundles_post_ra>
